<compile_context>
chip_gen: v7x
topology: tpu7x:2x2x1
jax: 0.10.0
libtpu: 0.0.40
codegen_flags: <defaults>
</compile_context>

<pallas_src>
import functools

import jax
import jax.numpy as jnp
from jax.experimental import pallas as pl
from jax.experimental.pallas import tpu as pltpu

HIDDEN = 32          # node-feature width (lane group size); 4*HIDDEN = 128 lanes
EDGE_BLOCK = 512     # edges per grid step (512 on v5e/v6e; 256-512 on v7x)


def _round_up(x, m):
    return ((x + m - 1) // m) * m


# --------------------------------------------------------------------------
# Fused message passing:
#   lin0+ReLU (init)  ->  3 x ( edge-MLP + NNConv(add) + ReLU + GRU )
# grid = (mp_iteration, edge_block); node state + aggregator + replicated
# state live in VMEM scratch; per-edge NNConv weights never hit HBM.
# --------------------------------------------------------------------------
def _mp_fused_kernel(x_ref, l0w_ref, l0b_ref,
                     gsrc_ref, scat_ref, ea_ref,
                     nn1w_ref, nn1b_ref, nn2w_ref, nn2b_ref, rep_ref,
                     wroot_ref, bconv_ref,
                     gwi_ref, gwh_ref, gbi_ref, gbh_ref,
                     out_ref,
                     out_s, h_s, agg_s, outrep_s, *, hidden):
    H = hidden
    it = pl.program_id(0)
    eb = pl.program_id(1)
    n_eb = pl.num_programs(1)

    # lin0 + ReLU fused into the very first grid step
    @pl.when(jnp.logical_and(it == 0, eb == 0))
    def _init_state():
        x0 = jnp.maximum(
            jnp.dot(x_ref[...], l0w_ref[...], preferred_element_type=jnp.float32)
            + l0b_ref[...], 0.0)
        out_s[...] = x0
        h_s[...] = x0

    # per-MP-iteration init: zero the aggregator and replicate node state
    # across the H output groups:  outrep[n, i*H + o] = out[n, i]
    @pl.when(eb == 0)
    def _start_iteration():
        agg_s[...] = jnp.zeros_like(agg_s)
        outrep_s[...] = jnp.dot(out_s[...], rep_ref[...],
                                preferred_element_type=jnp.float32)

    # ---- edge block -------------------------------------------------------
    # edge MLP recomputed in-kernel: (TE,num_nn)->(TE,16)->(TE,H*H)
    h1 = jnp.maximum(
        jnp.dot(ea_ref[...], nn1w_ref[...], preferred_element_type=jnp.float32)
        + nn1b_ref[...], 0.0)
    we = (jnp.dot(h1, nn2w_ref[...], preferred_element_type=jnp.float32)
          + nn2b_ref[...])                                               # (TE, H*H)

    # gather replicated source features: (TE,N)@(N,H*H) on the MXU.
    # (padded edges have all-zero one-hot rows -> xs_rep row == 0 -> msg == 0,
    #  which neutralizes their nonzero bias-path edge-MLP output)
    gsrc = gsrc_ref[...].astype(jnp.float32)
    xs_rep = jnp.dot(gsrc, outrep_s[...], preferred_element_type=jnp.float32)

    # per-edge weight contraction: one lane-dense multiply + log-tree fold
    # msgs[e, o] = sum_i xs[e, i] * we[e, i*H + o]
    s = xs_rep * we                                                      # (TE, H*H)
    width = H * H
    while width > 128:                      # 1024 -> 512 -> 256 -> 128 (lane-aligned)
        half = width // 2
        s = s[:, :half] + s[:, half:width]
        width = half
    shift = width // 2
    while shift >= H:                       # fold remaining H-groups via XLU rolls
        s = s + pltpu.roll(s, shift=shift, axis=1)
        shift //= 2
    msgs = s[:, 0:H]                                                     # (TE, H)

    # scatter-add onto destination nodes via one-hot matmul (N,TE)@(TE,H)
    scat = scat_ref[...].astype(jnp.float32)
    agg_s[...] = agg_s[...] + jnp.dot(scat, msgs,
                                      preferred_element_type=jnp.float32)

    # ---- after the last edge block: NNConv combine + ReLU, then GRU update ----
    @pl.when(eb == n_eb - 1)
    def _update():
        out_prev = out_s[...]
        h_prev = h_s[...]
        m = jnp.maximum(
            agg_s[...]
            + jnp.dot(out_prev, wroot_ref[...], preferred_element_type=jnp.float32)
            + bconv_ref[...], 0.0)
        # GRU with gates concatenated [r|z|n|pad] into one 128-wide matmul per side
        gi = jnp.dot(m, gwi_ref[...], preferred_element_type=jnp.float32) + gbi_ref[...]
        gh = jnp.dot(h_prev, gwh_ref[...], preferred_element_type=jnp.float32) + gbh_ref[...]
        r = jax.nn.sigmoid(gi[:, 0:H] + gh[:, 0:H])
        z = jax.nn.sigmoid(gi[:, H:2 * H] + gh[:, H:2 * H])
        n = jnp.tanh(gi[:, 2 * H:3 * H] + r * gh[:, 2 * H:3 * H])
        h_new = (1.0 - z) * n + z * h_prev
        h_s[...] = h_new
        out_s[...] = h_new
        out_ref[...] = h_new


def mp_fused(x, lin0_w, lin0_b, gsrc, scat, ea,
             nn1_w, nn1_b, nn2_w, nn2_b, rep,
             conv_root_w, conv_b, gru_wi, gru_wh, gru_bi, gru_bh,
             n_mp_steps=3, block_e=EDGE_BLOCK):
    n, cin = x.shape
    h = lin0_w.shape[1]
    ep = gsrc.shape[0]
    nnf = ea.shape[1]
    h16 = nn1_w.shape[1]
    n_eb = ep // block_e
    return pl.pallas_call(
        functools.partial(_mp_fused_kernel, hidden=h),
        out_shape=jax.ShapeDtypeStruct((n, h), jnp.float32),
        grid_spec=pltpu.PrefetchScalarGridSpec(
            num_scalar_prefetch=0,
            grid=(n_mp_steps, n_eb),
            in_specs=[
                pl.BlockSpec((n, cin), lambda it, eb: (0, 0)),          # raw node feats
                pl.BlockSpec((cin, h), lambda it, eb: (0, 0)),          # lin0 W
                pl.BlockSpec((1, h), lambda it, eb: (0, 0)),            # lin0 b
                pl.BlockSpec((block_e, n), lambda it, eb: (eb, 0)),     # one-hot src (bf16)
                pl.BlockSpec((n, block_e), lambda it, eb: (0, eb)),     # one-hot dst (bf16)
                pl.BlockSpec((block_e, nnf), lambda it, eb: (eb, 0)),   # edge attrs
                pl.BlockSpec((nnf, h16), lambda it, eb: (0, 0)),        # edge-MLP W1
                pl.BlockSpec((1, h16), lambda it, eb: (0, 0)),          # edge-MLP b1
                pl.BlockSpec((h16, h * h), lambda it, eb: (0, 0)),      # edge-MLP W2
                pl.BlockSpec((1, h * h), lambda it, eb: (0, 0)),        # edge-MLP b2
                pl.BlockSpec((h, h * h), lambda it, eb: (0, 0)),        # replication matrix
                pl.BlockSpec((h, h), lambda it, eb: (0, 0)),            # NNConv root W
                pl.BlockSpec((1, h), lambda it, eb: (0, 0)),            # NNConv bias
                pl.BlockSpec((h, 4 * h), lambda it, eb: (0, 0)),        # GRU W_ih (r|z|n|pad)
                pl.BlockSpec((h, 4 * h), lambda it, eb: (0, 0)),        # GRU W_hh
                pl.BlockSpec((1, 4 * h), lambda it, eb: (0, 0)),        # GRU b_ih
                pl.BlockSpec((1, 4 * h), lambda it, eb: (0, 0)),        # GRU b_hh
            ],
            out_specs=pl.BlockSpec((n, h), lambda it, eb: (0, 0)),
            scratch_shapes=[pltpu.VMEM((n, h), jnp.float32),       # out_s
                            pltpu.VMEM((n, h), jnp.float32),       # h_s
                            pltpu.VMEM((n, h), jnp.float32),       # agg_s
                            pltpu.VMEM((n, h * h), jnp.float32)],  # outrep_s
        ),
        compiler_params=pltpu.CompilerParams(
            dimension_semantics=("arbitrary", "arbitrary"),
            vmem_limit_bytes=48 * 1024 * 1024),   # fits v7x's 64 MiB physical VMEM
    )(x, lin0_w, lin0_b, gsrc, scat, ea,
      nn1_w, nn1_b, nn2_w, nn2_b, rep,
      conv_root_w, conv_b, gru_wi, gru_wh, gru_bi, gru_bh)


# --------------------------------------------------------------------------
# Fused Set2Set (processing_steps=3, 3-layer LSTM) + lin1 + ReLU + lin2.
# x^T is passed in (transpose hoisted out of the 3-step loop); graph one-hot
# membership is bf16; softmax divide runs on the EUP.
# --------------------------------------------------------------------------
def _set2set_head_kernel(x_ref, xt_ref, g_ref,
                         wi0_ref, wh0_ref, b0_ref,
                         wi1_ref, wh1_ref, b1_ref,
                         wi2_ref, wh2_ref, b2_ref,
                         l1w_ref, l1b_ref, l2w_ref, l2b_ref,
                         o_ref, *, hidden, steps):
    H = hidden
    x = x_ref[...]                                   # (N, H)
    x_t = xt_ref[...]                                # (H, N), hoisted transpose
    gmask = g_ref[...].astype(jnp.float32) > 0.5     # (B, N) bool, f32 math below
    B = gmask.shape[0]

    layers = ((wi0_ref, wh0_ref, b0_ref),
              (wi1_ref, wh1_ref, b1_ref),
              (wi2_ref, wh2_ref, b2_ref))

    q_star = jnp.zeros((B, 2 * H), jnp.float32)
    hs = [jnp.zeros((B, H), jnp.float32) for _ in range(3)]
    cs = [jnp.zeros((B, H), jnp.float32) for _ in range(3)]

    for _ in range(steps):
        inp = q_star
        for l, (wi, wh, bb) in enumerate(layers):
            # 128-wide lane-dense gate matmul, gates [i|f|g|o]
            gates = (jnp.dot(inp, wi[...], preferred_element_type=jnp.float32)
                     + jnp.dot(hs[l], wh[...], preferred_element_type=jnp.float32)
                     + bb[...])
            i_g = jax.nn.sigmoid(gates[:, 0:H])
            f_g = jax.nn.sigmoid(gates[:, H:2 * H])
            g_g = jnp.tanh(gates[:, 2 * H:3 * H])
            o_g = jax.nn.sigmoid(gates[:, 3 * H:4 * H])
            cs[l] = f_g * cs[l] + i_g * g_g
            hs[l] = o_g * jnp.tanh(cs[l])
            inp = hs[l]
        q = hs[2]                                                          # (B, H)
        # per-graph masked softmax attention over nodes (f32 throughout)
        scores = jnp.dot(q, x_t, preferred_element_type=jnp.float32)       # (B, N)
        scores = jnp.where(gmask, scores, -1e30)
        mx = jnp.max(scores, axis=1, keepdims=True)
        ex = jnp.where(gmask, jnp.exp(scores - mx), 0.0)
        denom = jnp.maximum(jnp.sum(ex, axis=1, keepdims=True), 1e-16)
        attn = ex * pl.reciprocal(denom, approx=True)                      # EUP divide
        r = jnp.dot(attn, x, preferred_element_type=jnp.float32)           # (B, H)
        q_star = jnp.concatenate([q, r], axis=-1)                          # (B, 2H)

    y = jnp.maximum(
        jnp.dot(q_star, l1w_ref[...], preferred_element_type=jnp.float32) + l1b_ref[...],
        0.0)
    o_ref[...] = jnp.dot(y, l2w_ref[...], preferred_element_type=jnp.float32) + l2b_ref[...]


def set2set_head(x_nodes, x_nodes_t, g, params):
    # TODO(synk): for large N, tile the attention over node blocks instead of
    # holding x/g fully resident (v7x 64 MiB VMEM).
    n, h = x_nodes.shape
    b = g.shape[0]
    c = params["lin2_w"].shape[1]

    def full(shape):
        return pl.BlockSpec(shape, lambda i: tuple(0 for _ in shape))

    ins = (x_nodes, x_nodes_t, g,
           params["lstm0_wi"], params["lstm0_wh"], params["lstm0_b"],
           params["lstm1_wi"], params["lstm1_wh"], params["lstm1_b"],
           params["lstm2_wi"], params["lstm2_wh"], params["lstm2_b"],
           params["lin1_w"], params["lin1_b"], params["lin2_w"], params["lin2_b"])
    return pl.pallas_call(
        functools.partial(_set2set_head_kernel, hidden=h, steps=3),
        out_shape=jax.ShapeDtypeStruct((b, c), jnp.float32),
        grid=(1,),
        in_specs=[full(a.shape) for a in ins],
        out_specs=full((b, c)),
    )(*ins)


# --------------------------------------------------------------------------
# Parameter init (deterministic, synthetic) — gate-concatenated layout
# --------------------------------------------------------------------------
def init_params(key, in_channels, out_channels, num_nn, hidden):
    H = hidden
    cnt = [0]

    def w(shape, scale=0.1):
        cnt[0] += 1
        k = jax.random.fold_in(key, cnt[0])
        return (scale * jax.random.normal(k, shape)).astype(jnp.float32)

    def pad_cols(a, total):
        return jnp.pad(a, ((0, 0), (0, total - a.shape[1])))

    p = {}
    p["lin0_w"], p["lin0_b"] = w((in_channels, H)), w((1, H))
    # edge network: Linear(num_nn,16) -> ReLU -> Linear(16, H*H)
    # (H*H flattening is in-channel major / out-channel minor, matching
    #  PyTorch NNConv's weight.view(-1, in_channels, out_channels))
    p["nn1_w"], p["nn1_b"] = w((num_nn, 16)), w((1, 16))
    p["nn2_w"], p["nn2_b"] = w((16, H * H), 0.02), w((1, H * H), 0.02)
    # NNConv root + bias
    p["conv_root_w"], p["conv_b"] = w((H, H)), w((1, H))
    # GRU: gates [r|z|n] concatenated and zero-padded to 4H=128 (lane-dense matmul)
    p["gru_wi"] = pad_cols(w((H, 3 * H)), 4 * H)
    p["gru_wh"] = pad_cols(w((H, 3 * H)), 4 * H)
    p["gru_bi"] = pad_cols(w((1, 3 * H)), 4 * H)
    p["gru_bh"] = pad_cols(w((1, 3 * H)), 4 * H)
    # Set2Set: 3-layer LSTM, gates [i|f|g|o] concatenated (4H = 128 lane-dense)
    for l in range(3):
        din = 2 * H if l == 0 else H
        p[f"lstm{l}_wi"] = w((din, 4 * H))
        p[f"lstm{l}_wh"] = w((H, 4 * H))
        p[f"lstm{l}_b"] = w((1, 4 * H))
    p["lin1_w"], p["lin1_b"] = w((2 * H, H)), w((1, H))
    p["lin2_w"], p["lin2_b"] = w((H, out_channels)), w((1, out_channels))
    return p


# --------------------------------------------------------------------------
# Forward pass (2 pallas_call launches total)
# --------------------------------------------------------------------------
def mpnn_forward(params, x, src, dst, edge_attr, batch, num_graphs,
                 block_e=EDGE_BLOCK):
    H = HIDDEN
    n_nodes = x.shape[0]
    n_edges = src.shape[0]

    # pad edges to a multiple of the edge block; padded edges are inert because
    # src=dst=-1 produces all-zero one-hot gather rows / scatter columns, which
    # also neutralizes the nonzero bias-path output of the in-kernel edge MLP.
    ep = _round_up(max(n_edges, 1), block_e)
    pe = ep - n_edges
    ea_p = jnp.pad(edge_attr.astype(jnp.float32), ((0, pe), (0, 0)))
    src_p = jnp.pad(src, (0, pe), constant_values=-1)
    dst_p = jnp.pad(dst, (0, pe), constant_values=-1)

    # dense one-hot gather/scatter matrices, stored bf16 (0/1 exact in bf16)
    node_ids = jnp.arange(n_nodes, dtype=jnp.int32)
    gsrc = (src_p[:, None] == node_ids[None, :]).astype(jnp.bfloat16)      # (Ep, N)
    scat = (dst_p[None, :] == node_ids[:, None]).astype(jnp.bfloat16)      # (N, Ep)

    # constant 0/1 replication matrix: rep[i, i*H:(i+1)*H] = 1
    rep = jnp.repeat(jnp.eye(H, dtype=jnp.float32), H, axis=1)             # (H, H*H)

    # fused lin0 + 3x (edge-MLP + NNConv + ReLU + GRU)
    out = mp_fused(x.astype(jnp.float32), params["lin0_w"], params["lin0_b"],
                   gsrc, scat, ea_p,
                   params["nn1_w"], params["nn1_b"],
                   params["nn2_w"], params["nn2_b"], rep,
                   params["conv_root_w"], params["conv_b"],
                   params["gru_wi"], params["gru_wh"],
                   params["gru_bi"], params["gru_bh"],
                   n_mp_steps=3, block_e=block_e)                          # (N, H)

    # fused Set2Set + lin1 + lin2 (graph membership one-hot in bf16)
    g = (batch[None, :] == jnp.arange(num_graphs, dtype=batch.dtype)[:, None]
         ).astype(jnp.bfloat16)                                            # (B, N)
    return set2set_head(out, out.T, g, params)                             # (B, out)


if __name__ == "__main__":
    in_channels, out_channels, num_nn = 8, 3, 4
    n_nodes, n_edges, n_graphs = 12, 24, 2

    key = jax.random.PRNGKey(0)
    kx, ke, ks, kd = jax.random.split(key, 4)
    x = jax.random.normal(kx, (n_nodes, in_channels), dtype=jnp.float32)
    edge_attr = jax.random.normal(ke, (n_edges, num_nn), dtype=jnp.float32)
    src = jax.random.randint(ks, (n_edges,), 0, n_nodes, dtype=jnp.int32)
    dst = jax.random.randint(kd, (n_edges,), 0, n_nodes, dtype=jnp.int32)
    batch = jnp.concatenate([jnp.zeros((n_nodes // 2,), jnp.int32),
                             jnp.ones((n_nodes - n_nodes // 2,), jnp.int32)])

    params = init_params(jax.random.PRNGKey(42), in_channels, out_channels,
                         num_nn, HIDDEN)

    y = mpnn_forward(params, x, src, dst, edge_attr, batch, n_graphs)
    jax.block_until_ready(y)
    assert y.shape == (n_graphs, out_channels), y.shape
    # TODO(synk): torch's gru.flatten_parameters() is a memory-layout no-op; nothing to translate.
    print("KERNEL_OK")
</pallas_src>

<mosaic_0001>
module attributes {stable_mosaic.version = 11 : i64} {
  func.func @_mp_fused_kernel(%arg0: i32, %arg1: i32, %arg2: memref<12x8xf32, #tpu.memory_space<vmem>>, %arg3: memref<8x32xf32, #tpu.memory_space<vmem>>, %arg4: memref<1x32xf32, #tpu.memory_space<vmem>>, %arg5: memref<512x12xbf16, #tpu.memory_space<vmem>>, %arg6: memref<12x512xbf16, #tpu.memory_space<vmem>>, %arg7: memref<512x4xf32, #tpu.memory_space<vmem>>, %arg8: memref<4x16xf32, #tpu.memory_space<vmem>>, %arg9: memref<1x16xf32, #tpu.memory_space<vmem>>, %arg10: memref<16x1024xf32, #tpu.memory_space<vmem>>, %arg11: memref<1x1024xf32, #tpu.memory_space<vmem>>, %arg12: memref<32x1024xf32, #tpu.memory_space<vmem>>, %arg13: memref<32x32xf32, #tpu.memory_space<vmem>>, %arg14: memref<1x32xf32, #tpu.memory_space<vmem>>, %arg15: memref<32x128xf32, #tpu.memory_space<vmem>>, %arg16: memref<32x128xf32, #tpu.memory_space<vmem>>, %arg17: memref<1x128xf32, #tpu.memory_space<vmem>>, %arg18: memref<1x128xf32, #tpu.memory_space<vmem>>, %arg19: memref<12x32xf32, #tpu.memory_space<vmem>>, %arg20: memref<12x32xf32, #tpu.memory_space<vmem>>, %arg21: memref<12x32xf32, #tpu.memory_space<vmem>>, %arg22: memref<12x32xf32, #tpu.memory_space<vmem>>, %arg23: memref<12x1024xf32, #tpu.memory_space<vmem>>) attributes {dimension_semantics = [#tpu.dimension_semantics<arbitrary>, #tpu.dimension_semantics<arbitrary>], iteration_bounds = array<i64: 3, 1>, scalar_prefetch = 0 : i64, scratch_operands = 4 : i64, tpu.core_type = #tpu.core_type<tc>, window_params = [{pipeline_mode = #tpu.pipeline_mode<synchronous>, transform_indices = @transform_0, window_bounds = array<i64: 12, 8>}, {pipeline_mode = #tpu.pipeline_mode<synchronous>, transform_indices = @transform_1, window_bounds = array<i64: 8, 32>}, {pipeline_mode = #tpu.pipeline_mode<synchronous>, transform_indices = @transform_2, window_bounds = array<i64: 1, 32>}, {transform_indices = @transform_3, window_bounds = array<i64: 512, 12>}, {transform_indices = @transform_4, window_bounds = array<i64: 12, 512>}, {transform_indices = @transform_5, window_bounds = array<i64: 512, 4>}, {pipeline_mode = #tpu.pipeline_mode<synchronous>, transform_indices = @transform_6, window_bounds = array<i64: 4, 16>}, {pipeline_mode = #tpu.pipeline_mode<synchronous>, transform_indices = @transform_7, window_bounds = array<i64: 1, 16>}, {pipeline_mode = #tpu.pipeline_mode<synchronous>, transform_indices = @transform_8, window_bounds = array<i64: 16, 1024>}, {pipeline_mode = #tpu.pipeline_mode<synchronous>, transform_indices = @transform_9, window_bounds = array<i64: 1, 1024>}, {pipeline_mode = #tpu.pipeline_mode<synchronous>, transform_indices = @transform_10, window_bounds = array<i64: 32, 1024>}, {pipeline_mode = #tpu.pipeline_mode<synchronous>, transform_indices = @transform_11, window_bounds = array<i64: 32, 32>}, {pipeline_mode = #tpu.pipeline_mode<synchronous>, transform_indices = @transform_12, window_bounds = array<i64: 1, 32>}, {pipeline_mode = #tpu.pipeline_mode<synchronous>, transform_indices = @transform_13, window_bounds = array<i64: 32, 128>}, {pipeline_mode = #tpu.pipeline_mode<synchronous>, transform_indices = @transform_14, window_bounds = array<i64: 32, 128>}, {pipeline_mode = #tpu.pipeline_mode<synchronous>, transform_indices = @transform_15, window_bounds = array<i64: 1, 128>}, {pipeline_mode = #tpu.pipeline_mode<synchronous>, transform_indices = @transform_16, window_bounds = array<i64: 1, 128>}, {pipeline_mode = #tpu.pipeline_mode<synchronous>, transform_indices = @transform_17, window_bounds = array<i64: 12, 32>}]} {
    %c0_i32 = arith.constant 0 : i32
    %0 = arith.cmpi eq, %arg0, %c0_i32 : i32
    %c0_i32_0 = arith.constant 0 : i32
    %1 = arith.cmpi eq, %arg1, %c0_i32_0 : i32
    %2 = arith.andi %0, %1 : i1
    %3 = arith.extui %2 : i1 to i32
    %c0_i32_1 = arith.constant 0 : i32
    %4 = arith.cmpi ne, %3, %c0_i32_1 : i32
    scf.if %4 {
      %c0_29 = arith.constant 0 : index
      %c0_30 = arith.constant 0 : index
      %49 = vector.load %arg2[%c0_29, %c0_30] : memref<12x8xf32, #tpu.memory_space<vmem>>, vector<12x8xf32>
      %c0_31 = arith.constant 0 : index
      %c0_32 = arith.constant 0 : index
      %50 = vector.load %arg3[%c0_31, %c0_32] : memref<8x32xf32, #tpu.memory_space<vmem>>, vector<8x32xf32>
      %cst_33 = arith.constant dense<0.000000e+00> : vector<12x32xf32>
      %51 = tpu.matmul %49, %50, %cst_33 {dimension_numbers = #tpu.dot_dimension_numbers<[1], [0], [0], [1], [0, 0, 1, 1], [], []>} : vector<12x8xf32>, vector<8x32xf32>, vector<12x32xf32> -> vector<12x32xf32>
      %c0_34 = arith.constant 0 : index
      %c0_35 = arith.constant 0 : index
      %52 = vector.load %arg4[%c0_34, %c0_35] : memref<1x32xf32, #tpu.memory_space<vmem>>, vector<1x32xf32>
      %53 = vector.broadcast %52 : vector<1x32xf32> to vector<12x32xf32>
      %54 = arith.addf %51, %53 : vector<12x32xf32>
      %cst_36 = arith.constant 0.000000e+00 : f32
      %55 = vector.broadcast %cst_36 : f32 to vector<12x32xf32>
      %56 = arith.maximumf %54, %55 : vector<12x32xf32>
      %c0_37 = arith.constant 0 : index
      %c0_38 = arith.constant 0 : index
      %57 = vector.load %arg20[%c0_37, %c0_38] : memref<12x32xf32, #tpu.memory_space<vmem>>, vector<12x32xf32>
      tpu.vector_store %arg20[%c0_37, %c0_38], %56 {strides = array<i32>} : memref<12x32xf32, #tpu.memory_space<vmem>>, vector<12x32xf32>,
      %c0_39 = arith.constant 0 : index
      %c0_40 = arith.constant 0 : index
      %58 = vector.load %arg21[%c0_39, %c0_40] : memref<12x32xf32, #tpu.memory_space<vmem>>, vector<12x32xf32>
      tpu.vector_store %arg21[%c0_39, %c0_40], %56 {strides = array<i32>} : memref<12x32xf32, #tpu.memory_space<vmem>>, vector<12x32xf32>,
    } else {
    }
    %c0_i32_2 = arith.constant 0 : i32
    %5 = arith.cmpi eq, %arg1, %c0_i32_2 : i32
    %6 = arith.extui %5 : i1 to i32
    %c0_i32_3 = arith.constant 0 : i32
    %7 = arith.cmpi ne, %6, %c0_i32_3 : i32
    scf.if %7 {
      %cst_29 = arith.constant 0.000000e+00 : f32
      %49 = vector.broadcast %cst_29 : f32 to vector<12x32xf32>
      %c0_30 = arith.constant 0 : index
      %c0_31 = arith.constant 0 : index
      %50 = vector.load %arg22[%c0_30, %c0_31] : memref<12x32xf32, #tpu.memory_space<vmem>>, vector<12x32xf32>
      tpu.vector_store %arg22[%c0_30, %c0_31], %49 {strides = array<i32>} : memref<12x32xf32, #tpu.memory_space<vmem>>, vector<12x32xf32>,
      %c0_32 = arith.constant 0 : index
      %c0_33 = arith.constant 0 : index
      %51 = vector.load %arg20[%c0_32, %c0_33] : memref<12x32xf32, #tpu.memory_space<vmem>>, vector<12x32xf32>
      %c0_34 = arith.constant 0 : index
      %c0_35 = arith.constant 0 : index
      %52 = vector.load %arg12[%c0_34, %c0_35] : memref<32x1024xf32, #tpu.memory_space<vmem>>, vector<32x1024xf32>
      %cst_36 = arith.constant dense<0.000000e+00> : vector<12x1024xf32>
      %53 = tpu.matmul %51, %52, %cst_36 {dimension_numbers = #tpu.dot_dimension_numbers<[1], [0], [0], [1], [0, 0, 1, 1], [], []>} : vector<12x32xf32>, vector<32x1024xf32>, vector<12x1024xf32> -> vector<12x1024xf32>
      %c0_37 = arith.constant 0 : index
      %c0_38 = arith.constant 0 : index
      %54 = vector.load %arg23[%c0_37, %c0_38] : memref<12x1024xf32, #tpu.memory_space<vmem>>, vector<12x1024xf32>
      tpu.vector_store %arg23[%c0_37, %c0_38], %53 {strides = array<i32>} : memref<12x1024xf32, #tpu.memory_space<vmem>>, vector<12x1024xf32>,
    } else {
    }
    %c0 = arith.constant 0 : index
    %c0_4 = arith.constant 0 : index
    %8 = vector.load %arg7[%c0, %c0_4] : memref<512x4xf32, #tpu.memory_space<vmem>>, vector<512x4xf32>
    %c0_5 = arith.constant 0 : index
    %c0_6 = arith.constant 0 : index
    %9 = vector.load %arg8[%c0_5, %c0_6] : memref<4x16xf32, #tpu.memory_space<vmem>>, vector<4x16xf32>
    %cst = arith.constant dense<0.000000e+00> : vector<512x16xf32>
    %10 = tpu.matmul %8, %9, %cst {dimension_numbers = #tpu.dot_dimension_numbers<[1], [0], [0], [1], [0, 0, 1, 1], [], []>} : vector<512x4xf32>, vector<4x16xf32>, vector<512x16xf32> -> vector<512x16xf32>
    %c0_7 = arith.constant 0 : index
    %c0_8 = arith.constant 0 : index
    %11 = vector.load %arg9[%c0_7, %c0_8] : memref<1x16xf32, #tpu.memory_space<vmem>>, vector<1x16xf32>
    %12 = vector.broadcast %11 : vector<1x16xf32> to vector<512x16xf32>
    %13 = arith.addf %10, %12 : vector<512x16xf32>
    %cst_9 = arith.constant 0.000000e+00 : f32
    %14 = vector.broadcast %cst_9 : f32 to vector<512x16xf32>
    %15 = arith.maximumf %13, %14 : vector<512x16xf32>
    %c0_10 = arith.constant 0 : index
    %c0_11 = arith.constant 0 : index
    %16 = vector.load %arg10[%c0_10, %c0_11] : memref<16x1024xf32, #tpu.memory_space<vmem>>, vector<16x1024xf32>
    %cst_12 = arith.constant dense<0.000000e+00> : vector<512x1024xf32>
    %17 = tpu.matmul %15, %16, %cst_12 {dimension_numbers = #tpu.dot_dimension_numbers<[1], [0], [0], [1], [0, 0, 1, 1], [], []>} : vector<512x16xf32>, vector<16x1024xf32>, vector<512x1024xf32> -> vector<512x1024xf32>
    %c0_13 = arith.constant 0 : index
    %c0_14 = arith.constant 0 : index
    %18 = vector.load %arg11[%c0_13, %c0_14] : memref<1x1024xf32, #tpu.memory_space<vmem>>, vector<1x1024xf32>
    %19 = vector.broadcast %18 : vector<1x1024xf32> to vector<512x1024xf32>
    %20 = arith.addf %17, %19 : vector<512x1024xf32>
    %c0_15 = arith.constant 0 : index
    %c0_16 = arith.constant 0 : index
    %21 = vector.load %arg5[%c0_15, %c0_16] : memref<512x12xbf16, #tpu.memory_space<vmem>>, vector<512x12xbf16>
    %22 = arith.extf %21 : vector<512x12xbf16> to vector<512x12xf32>
    %c0_17 = arith.constant 0 : index
    %c0_18 = arith.constant 0 : index
    %23 = vector.load %arg23[%c0_17, %c0_18] : memref<12x1024xf32, #tpu.memory_space<vmem>>, vector<12x1024xf32>
    %cst_19 = arith.constant dense<0.000000e+00> : vector<512x1024xf32>
    %24 = tpu.matmul %22, %23, %cst_19 {dimension_numbers = #tpu.dot_dimension_numbers<[1], [0], [0], [1], [0, 0, 1, 1], [], []>} : vector<512x12xf32>, vector<12x1024xf32>, vector<512x1024xf32> -> vector<512x1024xf32>
    %25 = arith.mulf %24, %20 : vector<512x1024xf32>
    %26 = vector.extract_strided_slice %25 {offsets = [0, 0], sizes = [512, 512], strides = [1, 1]} : vector<512x1024xf32> to vector<512x512xf32>
    %27 = vector.extract_strided_slice %25 {offsets = [0, 512], sizes = [512, 512], strides = [1, 1]} : vector<512x1024xf32> to vector<512x512xf32>
    %28 = arith.addf %26, %27 : vector<512x512xf32>
    %29 = vector.extract_strided_slice %28 {offsets = [0, 0], sizes = [512, 256], strides = [1, 1]} : vector<512x512xf32> to vector<512x256xf32>
    %30 = vector.extract_strided_slice %28 {offsets = [0, 256], sizes = [512, 256], strides = [1, 1]} : vector<512x512xf32> to vector<512x256xf32>
    %31 = arith.addf %29, %30 : vector<512x256xf32>
    %32 = vector.extract_strided_slice %31 {offsets = [0, 0], sizes = [512, 128], strides = [1, 1]} : vector<512x256xf32> to vector<512x128xf32>
    %33 = vector.extract_strided_slice %31 {offsets = [0, 128], sizes = [512, 128], strides = [1, 1]} : vector<512x256xf32> to vector<512x128xf32>
    %34 = arith.addf %32, %33 : vector<512x128xf32>
    %c64_i32 = arith.constant 64 : i32
    %35 = tpu.dynamic_rotate %34 by %c64_i32 dim 1 : vector<512x128xf32>, i32 -> vector<512x128xf32>
    %36 = arith.addf %34, %35 : vector<512x128xf32>
    %c32_i32 = arith.constant 32 : i32
    %37 = tpu.dynamic_rotate %36 by %c32_i32 dim 1 : vector<512x128xf32>, i32 -> vector<512x128xf32>
    %38 = arith.addf %36, %37 : vector<512x128xf32>
    %39 = vector.extract_strided_slice %38 {offsets = [0, 0], sizes = [512, 32], strides = [1, 1]} : vector<512x128xf32> to vector<512x32xf32>
    %c0_20 = arith.constant 0 : index
    %c0_21 = arith.constant 0 : index
    %40 = vector.load %arg6[%c0_20, %c0_21] : memref<12x512xbf16, #tpu.memory_space<vmem>>, vector<12x512xbf16>
    %41 = arith.extf %40 : vector<12x512xbf16> to vector<12x512xf32>
    %c0_22 = arith.constant 0 : index
    %c0_23 = arith.constant 0 : index
    %42 = vector.load %arg22[%c0_22, %c0_23] : memref<12x32xf32, #tpu.memory_space<vmem>>, vector<12x32xf32>
    %cst_24 = arith.constant dense<0.000000e+00> : vector<12x32xf32>
    %43 = tpu.matmul %41, %39, %cst_24 {dimension_numbers = #tpu.dot_dimension_numbers<[1], [0], [0], [1], [0, 0, 1, 1], [], []>} : vector<12x512xf32>, vector<512x32xf32>, vector<12x32xf32> -> vector<12x32xf32>
    %44 = arith.addf %42, %43 : vector<12x32xf32>
    %c0_25 = arith.constant 0 : index
    %c0_26 = arith.constant 0 : index
    %45 = vector.load %arg22[%c0_25, %c0_26] : memref<12x32xf32, #tpu.memory_space<vmem>>, vector<12x32xf32>
    tpu.vector_store %arg22[%c0_25, %c0_26], %44 {strides = array<i32>} : memref<12x32xf32, #tpu.memory_space<vmem>>, vector<12x32xf32>,
    %c0_i32_27 = arith.constant 0 : i32
    %46 = arith.cmpi eq, %arg1, %c0_i32_27 : i32
    %47 = arith.extui %46 : i1 to i32
    %c0_i32_28 = arith.constant 0 : i32
    %48 = arith.cmpi ne, %47, %c0_i32_28 : i32
    scf.if %48 {
      %c0_29 = arith.constant 0 : index
      %c0_30 = arith.constant 0 : index
      %49 = vector.load %arg20[%c0_29, %c0_30] : memref<12x32xf32, #tpu.memory_space<vmem>>, vector<12x32xf32>
      %c0_31 = arith.constant 0 : index
      %c0_32 = arith.constant 0 : index
      %50 = vector.load %arg21[%c0_31, %c0_32] : memref<12x32xf32, #tpu.memory_space<vmem>>, vector<12x32xf32>
      %c0_33 = arith.constant 0 : index
      %c0_34 = arith.constant 0 : index
      %51 = vector.load %arg22[%c0_33, %c0_34] : memref<12x32xf32, #tpu.memory_space<vmem>>, vector<12x32xf32>
      %c0_35 = arith.constant 0 : index
      %c0_36 = arith.constant 0 : index
      %52 = vector.load %arg13[%c0_35, %c0_36] : memref<32x32xf32, #tpu.memory_space<vmem>>, vector<32x32xf32>
      %cst_37 = arith.constant dense<0.000000e+00> : vector<12x32xf32>
      %53 = tpu.matmul %49, %52, %cst_37 {dimension_numbers = #tpu.dot_dimension_numbers<[1], [0], [0], [1], [0, 0, 1, 1], [], []>} : vector<12x32xf32>, vector<32x32xf32>, vector<12x32xf32> -> vector<12x32xf32>
      %54 = arith.addf %51, %53 : vector<12x32xf32>
      %c0_38 = arith.constant 0 : index
      %c0_39 = arith.constant 0 : index
      %55 = vector.load %arg14[%c0_38, %c0_39] : memref<1x32xf32, #tpu.memory_space<vmem>>, vector<1x32xf32>
      %56 = vector.broadcast %55 : vector<1x32xf32> to vector<12x32xf32>
      %57 = arith.addf %54, %56 : vector<12x32xf32>
      %cst_40 = arith.constant 0.000000e+00 : f32
      %58 = vector.broadcast %cst_40 : f32 to vector<12x32xf32>
      %59 = arith.maximumf %57, %58 : vector<12x32xf32>
      %c0_41 = arith.constant 0 : index
      %c0_42 = arith.constant 0 : index
      %60 = vector.load %arg15[%c0_41, %c0_42] : memref<32x128xf32, #tpu.memory_space<vmem>>, vector<32x128xf32>
      %cst_43 = arith.constant dense<0.000000e+00> : vector<12x128xf32>
      %61 = tpu.matmul %59, %60, %cst_43 {dimension_numbers = #tpu.dot_dimension_numbers<[1], [0], [0], [1], [0, 0, 1, 1], [], []>} : vector<12x32xf32>, vector<32x128xf32>, vector<12x128xf32> -> vector<12x128xf32>
      %c0_44 = arith.constant 0 : index
      %c0_45 = arith.constant 0 : index
      %62 = vector.load %arg17[%c0_44, %c0_45] : memref<1x128xf32, #tpu.memory_space<vmem>>, vector<1x128xf32>
      %63 = vector.broadcast %62 : vector<1x128xf32> to vector<12x128xf32>
      %64 = arith.addf %61, %63 : vector<12x128xf32>
      %c0_46 = arith.constant 0 : index
      %c0_47 = arith.constant 0 : index
      %65 = vector.load %arg16[%c0_46, %c0_47] : memref<32x128xf32, #tpu.memory_space<vmem>>, vector<32x128xf32>
      %cst_48 = arith.constant dense<0.000000e+00> : vector<12x128xf32>
      %66 = tpu.matmul %50, %65, %cst_48 {dimension_numbers = #tpu.dot_dimension_numbers<[1], [0], [0], [1], [0, 0, 1, 1], [], []>} : vector<12x32xf32>, vector<32x128xf32>, vector<12x128xf32> -> vector<12x128xf32>
      %c0_49 = arith.constant 0 : index
      %c0_50 = arith.constant 0 : index
      %67 = vector.load %arg18[%c0_49, %c0_50] : memref<1x128xf32, #tpu.memory_space<vmem>>, vector<1x128xf32>
      %68 = vector.broadcast %67 : vector<1x128xf32> to vector<12x128xf32>
      %69 = arith.addf %66, %68 : vector<12x128xf32>
      %70 = vector.extract_strided_slice %64 {offsets = [0, 0], sizes = [12, 32], strides = [1, 1]} : vector<12x128xf32> to vector<12x32xf32>
      %71 = vector.extract_strided_slice %69 {offsets = [0, 0], sizes = [12, 32], strides = [1, 1]} : vector<12x128xf32> to vector<12x32xf32>
      %72 = arith.addf %70, %71 : vector<12x32xf32>
      %73 = arith.negf %72 : vector<12x32xf32>
      %74 = math.exp %73 : vector<12x32xf32>
      %cst_51 = arith.constant 1.000000e+00 : f32
      %75 = vector.broadcast %cst_51 : f32 to vector<12x32xf32>
      %76 = arith.addf %75, %74 : vector<12x32xf32>
      %77 = arith.divf %75, %76 : vector<12x32xf32>
      %78 = vector.extract_strided_slice %64 {offsets = [0, 32], sizes = [12, 32], strides = [1, 1]} : vector<12x128xf32> to vector<12x32xf32>
      %79 = vector.extract_strided_slice %69 {offsets = [0, 32], sizes = [12, 32], strides = [1, 1]} : vector<12x128xf32> to vector<12x32xf32>
      %80 = arith.addf %78, %79 : vector<12x32xf32>
      %81 = arith.negf %80 : vector<12x32xf32>
      %82 = math.exp %81 : vector<12x32xf32>
      %cst_52 = arith.constant 1.000000e+00 : f32
      %83 = vector.broadcast %cst_52 : f32 to vector<12x32xf32>
      %84 = arith.addf %83, %82 : vector<12x32xf32>
      %85 = arith.divf %83, %84 : vector<12x32xf32>
      %86 = vector.extract_strided_slice %64 {offsets = [0, 64], sizes = [12, 32], strides = [1, 1]} : vector<12x128xf32> to vector<12x32xf32>
      %87 = vector.extract_strided_slice %69 {offsets = [0, 64], sizes = [12, 32], strides = [1, 1]} : vector<12x128xf32> to vector<12x32xf32>
      %88 = arith.mulf %77, %87 : vector<12x32xf32>
      %89 = arith.addf %86, %88 : vector<12x32xf32>
      %90 = math.tanh %89 : vector<12x32xf32>
      %cst_53 = arith.constant 1.000000e+00 : f32
      %91 = vector.broadcast %cst_53 : f32 to vector<12x32xf32>
      %92 = arith.subf %91, %85 : vector<12x32xf32>
      %93 = arith.mulf %92, %90 : vector<12x32xf32>
      %94 = arith.mulf %85, %50 : vector<12x32xf32>
      %95 = arith.addf %93, %94 : vector<12x32xf32>
      %c0_54 = arith.constant 0 : index
      %c0_55 = arith.constant 0 : index
      %96 = vector.load %arg21[%c0_54, %c0_55] : memref<12x32xf32, #tpu.memory_space<vmem>>, vector<12x32xf32>
      tpu.vector_store %arg21[%c0_54, %c0_55], %95 {strides = array<i32>} : memref<12x32xf32, #tpu.memory_space<vmem>>, vector<12x32xf32>,
      %c0_56 = arith.constant 0 : index
      %c0_57 = arith.constant 0 : index
      %97 = vector.load %arg20[%c0_56, %c0_57] : memref<12x32xf32, #tpu.memory_space<vmem>>, vector<12x32xf32>
      tpu.vector_store %arg20[%c0_56, %c0_57], %95 {strides = array<i32>} : memref<12x32xf32, #tpu.memory_space<vmem>>, vector<12x32xf32>,
      %c0_58 = arith.constant 0 : index
      %c0_59 = arith.constant 0 : index
      %98 = vector.load %arg19[%c0_58, %c0_59] : memref<12x32xf32, #tpu.memory_space<vmem>>, vector<12x32xf32>
      tpu.vector_store %arg19[%c0_58, %c0_59], %95 {strides = array<i32>} : memref<12x32xf32, #tpu.memory_space<vmem>>, vector<12x32xf32>,
    } else {
    }
    return
  }
  func.func @transform_0(%arg0: i32, %arg1: i32) -> (i32, i32) {
    %c0_i32 = arith.constant 0 : i32
    %c0_i32_0 = arith.constant 0 : i32
    %c0_i32_1 = arith.constant 0 : i32
    return %c0_i32, %c0_i32_0 : i32, i32
  }
  func.func @transform_1(%arg0: i32, %arg1: i32) -> (i32, i32) {
    %c0_i32 = arith.constant 0 : i32
    %c0_i32_0 = arith.constant 0 : i32
    %c0_i32_1 = arith.constant 0 : i32
    return %c0_i32, %c0_i32_0 : i32, i32
  }
  func.func @transform_2(%arg0: i32, %arg1: i32) -> (i32, i32) {
    %c0_i32 = arith.constant 0 : i32
    %c0_i32_0 = arith.constant 0 : i32
    %c0_i32_1 = arith.constant 0 : i32
    return %c0_i32, %c0_i32_0 : i32, i32
  }
  func.func @transform_3(%arg0: i32, %arg1: i32) -> (i32, i32) {
    %c0_i32 = arith.constant 0 : i32
    %c0_i32_0 = arith.constant 0 : i32
    return %arg1, %c0_i32 : i32, i32
  }
  func.func @transform_4(%arg0: i32, %arg1: i32) -> (i32, i32) {
    %c0_i32 = arith.constant 0 : i32
    %c0_i32_0 = arith.constant 0 : i32
    return %c0_i32, %arg1 : i32, i32
  }
  func.func @transform_5(%arg0: i32, %arg1: i32) -> (i32, i32) {
    %c0_i32 = arith.constant 0 : i32
    %c0_i32_0 = arith.constant 0 : i32
    return %arg1, %c0_i32 : i32, i32
  }
  func.func @transform_6(%arg0: i32, %arg1: i32) -> (i32, i32) {
    %c0_i32 = arith.constant 0 : i32
    %c0_i32_0 = arith.constant 0 : i32
    %c0_i32_1 = arith.constant 0 : i32
    return %c0_i32, %c0_i32_0 : i32, i32
  }
  func.func @transform_7(%arg0: i32, %arg1: i32) -> (i32, i32) {
    %c0_i32 = arith.constant 0 : i32
    %c0_i32_0 = arith.constant 0 : i32
    %c0_i32_1 = arith.constant 0 : i32
    return %c0_i32, %c0_i32_0 : i32, i32
  }
  func.func @transform_8(%arg0: i32, %arg1: i32) -> (i32, i32) {
    %c0_i32 = arith.constant 0 : i32
    %c0_i32_0 = arith.constant 0 : i32
    %c0_i32_1 = arith.constant 0 : i32
    return %c0_i32, %c0_i32_0 : i32, i32
  }
  func.func @transform_9(%arg0: i32, %arg1: i32) -> (i32, i32) {
    %c0_i32 = arith.constant 0 : i32
    %c0_i32_0 = arith.constant 0 : i32
    %c0_i32_1 = arith.constant 0 : i32
    return %c0_i32, %c0_i32_0 : i32, i32
  }
  func.func @transform_10(%arg0: i32, %arg1: i32) -> (i32, i32) {
    %c0_i32 = arith.constant 0 : i32
    %c0_i32_0 = arith.constant 0 : i32
    %c0_i32_1 = arith.constant 0 : i32
    return %c0_i32, %c0_i32_0 : i32, i32
  }
  func.func @transform_11(%arg0: i32, %arg1: i32) -> (i32, i32) {
    %c0_i32 = arith.constant 0 : i32
    %c0_i32_0 = arith.constant 0 : i32
    %c0_i32_1 = arith.constant 0 : i32
    return %c0_i32, %c0_i32_0 : i32, i32
  }
  func.func @transform_12(%arg0: i32, %arg1: i32) -> (i32, i32) {
    %c0_i32 = arith.constant 0 : i32
    %c0_i32_0 = arith.constant 0 : i32
    %c0_i32_1 = arith.constant 0 : i32
    return %c0_i32, %c0_i32_0 : i32, i32
  }
  func.func @transform_13(%arg0: i32, %arg1: i32) -> (i32, i32) {
    %c0_i32 = arith.constant 0 : i32
    %c0_i32_0 = arith.constant 0 : i32
    %c0_i32_1 = arith.constant 0 : i32
    return %c0_i32, %c0_i32_0 : i32, i32
  }
  func.func @transform_14(%arg0: i32, %arg1: i32) -> (i32, i32) {
    %c0_i32 = arith.constant 0 : i32
    %c0_i32_0 = arith.constant 0 : i32
    %c0_i32_1 = arith.constant 0 : i32
    return %c0_i32, %c0_i32_0 : i32, i32
  }
  func.func @transform_15(%arg0: i32, %arg1: i32) -> (i32, i32) {
    %c0_i32 = arith.constant 0 : i32
    %c0_i32_0 = arith.constant 0 : i32
    %c0_i32_1 = arith.constant 0 : i32
    return %c0_i32, %c0_i32_0 : i32, i32
  }
  func.func @transform_16(%arg0: i32, %arg1: i32) -> (i32, i32) {
    %c0_i32 = arith.constant 0 : i32
    %c0_i32_0 = arith.constant 0 : i32
    %c0_i32_1 = arith.constant 0 : i32
    return %c0_i32, %c0_i32_0 : i32, i32
  }
  func.func @transform_17(%arg0: i32, %arg1: i32) -> (i32, i32) {
    %c0_i32 = arith.constant 0 : i32
    %c0_i32_0 = arith.constant 0 : i32
    %c0_i32_1 = arith.constant 0 : i32
    return %c0_i32, %c0_i32_0 : i32, i32
  }
}

</mosaic_0001>

<bundles_post_ra>
// kernel: tpu_custom_call.1
= control target key start
LH: loop header
LB: loop body
LE: loop exit
PB: predicated region body
PF: predicated region fallthrough
CT: control target
= control target key end

     0   :  { %s16219_s0 = inlined_call_operand.vmem [shape: f32[12,8], index: 0, kind: input, shape index: {}]   ;;  %s16220_s1 = inlined_call_operand.vmem [shape: f32[8,32], index: 1, kind: input, shape index: {}]   ;;  %s16221_s2 = inlined_call_operand.vmem [shape: f32[1,32], index: 2, kind: input, shape index: {}]   ;;  %s16222_s3 = inlined_call_operand.vmem [shape: bf16[512,12], index: 3, kind: input, shape index: {}]   ;;  %s16223_s4 = inlined_call_operand.vmem [shape: bf16[12,512], index: 4, kind: input, shape index: {}]   ;;  %s16224_s5 = inlined_call_operand.vmem [shape: f32[512,4], index: 5, kind: input, shape index: {}]   ;;  %s16225_s6 = inlined_call_operand.vmem [shape: f32[4,16], index: 6, kind: input, shape index: {}]   ;;  %s16226_s7 = inlined_call_operand.vmem [shape: f32[1,16], index: 7, kind: input, shape index: {}]   ;;  %s16227_s8 = inlined_call_operand.vmem [shape: f32[16,1024], index: 8, kind: input, shape index: {}]   ;;  %s16228_s9 = inlined_call_operand.vmem [shape: f32[1,1024], index: 9, kind: input, shape index: {}]   ;;  %s16229_s10 = inlined_call_operand.vmem [shape: f32[32,1024], index: 10, kind: input, shape index: {}]   ;;  %s16230_s11 = inlined_call_operand.vmem [shape: f32[32,32], index: 11, kind: input, shape index: {}]   ;;  %s16231_s12 = inlined_call_operand.vmem [shape: f32[1,32], index: 12, kind: input, shape index: {}]   ;;  %s16232_s13 = inlined_call_operand.vmem [shape: f32[32,128], index: 13, kind: input, shape index: {}]   ;;  %s16233_s14 = inlined_call_operand.vmem [shape: f32[32,128], index: 14, kind: input, shape index: {}]   ;;  %s16234_s15 = inlined_call_operand.vmem [shape: f32[1,128], index: 15, kind: input, shape index: {}]   ;;  %s16235_s16 = inlined_call_operand.vmem [shape: f32[1,128], index: 16, kind: input, shape index: {}]   ;;  %s16236_s17 = inlined_call_operand.hbm [shape: f32[12,32], index: 17, kind: output, shape index: {}]  }
   0x1   :  { %16412 = sst [smem:[#allocation545_spill]] %s16219_s0 }
   0x2   :  { %16413 = sst [smem:[#allocation546_spill]] %s16220_s1 }
   0x3   :  { %22 = vsyncpa [#allocation7], 0  ;;  %s9401_s24 = smov 0   ;;  %s9403_s25 = smov 0  }
   0x4   :  { %s9405_s26 = smov 0  }
   0x5 LB: > { %s40_s28 = sadd.s32 1, %s9297_s25  ;;  %p7964_p1 = scmp.ge.s32.totalorder %s9301_s26, 1  ;;  %s9301_s26 = sphi %s9405_s26, %s28_s26   ;;  %s9297_s25 = sphi %s9403_s25, %s18096_s25   ;;  %s9293_s24 = sphi %s9401_s24, %s18095_s24  }
   0x6   : > { %p42_p0 = scmp.ge.s32.totalorder %s40_s28, 3  ;;  %p518_p2 = scmp.lt.s32.totalorder %s9301_s26, 4 }
   0x8   : > { %s18098_s28 = smov (%p42_p0, %s40_s28), 0  ;;  %p519_p3 = pnand %p7964_p1, %p518_p2 }
   0xa   : > { %522 = sbr.rel (%p519_p3) target bundleno = 2939 (0xb7b), region = 88 }
  0x11   : > { %p593_p4 = scmp.eq.s32.totalorder %s9293_s24, 0 }
  0x12   : > { %s16414_s30 = sld [smem:[#allocation546_spill]] (%p593_p4)  ;;  %s16415_s1 = sld [smem:[#allocation545_spill]] (%p593_p4)  ;;  %vm609_vm0 = vcmask (%p593_p4), 64512   ;;  %v7966_v3 = vld [vmem:[%s16221_s2] ss:$0 sm:$0xff] (%p593_p4)  ;;  %vm695_vm1 = vcmask (%p593_p4), 257024  }
  0x13   : > { %598 = sbr.rel (!%p593_p4) target bundleno = 245 (0xf5), region = 92  ;;  %vm693_vm2 = vcmask (%p593_p4), 261120  }
  0x18   : > { %v601_v0 = vld [vmem:[%s16414_s30] sm:$0xff] (%p593_p4)  ;;  %v600_v2 = vld [vmem:[%s16415_s1 + $0x8] sm:$0xf] (%p593_p4) }
  0x19   : > { %v599_v1 = vld [vmem:[%s16415_s1] sm:$0xff] (%p593_p4)  ;;  %8900 = vmatprep.subr.mxu0 (%p593_p4), %v601_v0 }
  0x1a   : > { %8902 = vmatprep.mubr.msk.f32.mxu0 %vm609_vm0, %v599_v1  ;;  %8901 = vmatpush3.msra.mxu0 %v601_v0 }
  0x1b   : > { %8903 = vmatmul.mubr.msk.f32.vlgmr.msra.gmra.mrb[0].mxu0 %vm609_vm0, %v600_v2 }
  0xee   : > { %v8904_v4 = vpop.f32.mrb[0].mxu0 }
  0xef   : > { %v688_v5 = vadd.f32 %v8904_v4, %v7966_v3  ;;  %v682_v6 = vpop.f32.mrb[1].mxu0 }
  0xf0   : > { %v683_v7 = vadd.f32 %v7966_v3, %v682_v6 }
  0xf1   : > { %v692_v8 = vmax.f32 %v688_v5, 0.0 }
  0xf2   : > { %v691_v9 = vmax.f32 %v683_v7, 0.0 }
  0xf3   : > { %696 = vst.msk [vmem:[#allocation2 + $0x8] sm:$0xf] %vm695_vm1, %v692_v8  ;;  %698 = vst.msk [vmem:[#allocation3 + $0x8] sm:$0xf] %vm695_vm1, %v692_v8 }
  0xf4   : > { %694 = vst.msk [vmem:[#allocation2] sm:$0xff] %vm693_vm2, %v691_v9  ;;  %697 = vst.msk [vmem:[#allocation3] sm:$0xff] %vm693_vm2, %v691_v9 }
  0xf5 PF: > { %v709_v10 = vld [vmem:[%s16229_s10 + $0x8] sm:$0xff]  ;;  %v708_v12 = vld [vmem:[%s16229_s10] sm:$0xff]  ;;  %vm702_vm3 = vcmask 261120   ;;  %v16242_v17 = vmov 0.0   ;;  %vm1335_vm4 = vcmask 1043456   ;;  %v711_v38 = vld [vmem:[%s16229_s10 + $0x18] sm:$0xff] }
  0xf6   : > { %v717_v11 = vld [vmem:[%s16229_s10 + $0x48] sm:$0xff]  ;;  %v716_v14 = vld [vmem:[%s16229_s10 + $0x40] sm:$0xff]  ;;  %810 = vmatprep.mubr.f32.mxu0 %v16242_v17  ;;  %703 = vst.msk [vmem:[#allocation4] sm:$0xff] %vm702_vm3, %v16242_v17  ;;  %887 = vmatprep.mubr.f32.mxu1 %v16242_v17  ;;  %v719_v39 = vld [vmem:[%s16229_s10 + $0x58] sm:$0xff]  ;;  %vm1142_vm5 = vcmask 31744   ;;  %vm1846_vm6 = vcmask 130048  }
  0xf7   : > { %v9036_v13 = vpack.c.bf16 %v717_v11, %v709_v10  ;;  %v725_v15 = vld [vmem:[%s16229_s10 + $0x88] sm:$0xff]  ;;  %v9038_v18 = vpack.c.bf16 %v716_v14, %v708_v12  ;;  %v724_v20 = vld [vmem:[%s16229_s10 + $0x80] sm:$0xff]  ;;  %v710_v40 = vld [vmem:[%s16229_s10 + $0x10] sm:$0xff]  ;;  %v9044_v42 = vpack.c.bf16 %v719_v39, %v711_v38  ;;  %vm9304_vm7 = vmmov 1   ;;  %s9305_s20 = smov 64   ;;  %s9306_s21 = smov 32  }
  0xf8   : > { %v733_v16 = vld [vmem:[%s16229_s10 + $0xc8] sm:$0xff]  ;;  %v732_v21 = vld [vmem:[%s16229_s10 + $0xc0] sm:$0xff]  ;;  %v718_v43 = vld [vmem:[%s16229_s10 + $0x50] sm:$0xff]  ;;  %vm3979_vm9 = vcmask 97280   ;;  %vm704_vm10 = vcmask 257024   ;;  %s9307_s23 = smov 96  }
  0xf9   : > { %v9040_v19 = vpack.c.bf16 %v733_v16, %v725_v15  ;;  %9037 = vmatprep.subr.bf16.mxu0 %v9036_v13  ;;  %v713_v22 = vld [vmem:[%s16229_s10 + $0x28] sm:$0xff]  ;;  %v9042_v24 = vpack.c.bf16 %v732_v21, %v724_v20  ;;  %v712_v26 = vld [vmem:[%s16229_s10 + $0x20] sm:$0xff]  ;;  %v9046_v44 = vpack.c.bf16 %v718_v43, %v710_v40  ;;  %v727_v45 = vld [vmem:[%s16229_s10 + $0x98] sm:$0xff]  ;;  %9045 = vmatprep.subr.bf16.mxu1 %v9044_v42  ;;  %s18093_s29 = sadd.s32 4294967295, %s9301_s26  }
  0xfa   : > { %v721_v23 = vld [vmem:[%s16229_s10 + $0x68] sm:$0xff]  ;;  %9039 = vmatpush1.bf16.msra.mxu0 %v9038_v18  ;;  %v720_v27 = vld [vmem:[%s16229_s10 + $0x60] sm:$0xff]  ;;  %v9489_v35 = vld [vmem:[#allocation2 + $0x8] sm:$0xf]  ;;  %p16171_p5 = scmp.eq.s32.totalorder %s18093_s29, 2 }
  0xfb   : > { %9041 = vmatprep.subr.bf16.mxu0 %v9040_v19  ;;  %v9052_v25 = vpack.c.bf16 %v721_v23, %v713_v22  ;;  %v729_v28 = vld [vmem:[%s16229_s10 + $0xa8] sm:$0xff]  ;;  %v9478_v30 = vld [vmem:[#allocation2] sm:$0xff]  ;;  %v9054_v31 = vpack.c.bf16 %v720_v27, %v712_v26  ;;  %v728_v33 = vld [vmem:[%s16229_s10 + $0xa0] sm:$0xff]  ;;  %9047 = vmatpush1.bf16.msra.mxu1 %v9046_v44 }
  0xfc   : > { %v737_v29 = vld [vmem:[%s16229_s10 + $0xe8] sm:$0xff]  ;;  %v736_v34 = vld [vmem:[%s16229_s10 + $0xe0] sm:$0xff]  ;;  %v735_v46 = vld [vmem:[%s16229_s10 + $0xd8] sm:$0xff] }
  0xfd   : > { %v9056_v32 = vpack.c.bf16 %v737_v29, %v729_v28  ;;  %v9058_v36 = vpack.c.bf16 %v736_v34, %v728_v33  ;;  %v9494_v37 = vld [vmem:[%s16225_s6] sm:$0xf]  ;;  %v726_v47 = vld [vmem:[%s16229_s10 + $0x90] sm:$0xff]  ;;  %v9048_v48 = vpack.c.bf16 %v735_v46, %v727_v45  ;;  %v715_v50 = vld [vmem:[%s16229_s10 + $0x38] sm:$0xff] }
  0xfe   : > { %9043 = vmatpush1.bf16.msra.mxu0 %v9042_v24  ;;  %v1070_v41 = vld [vmem:[%s16224_s5] sm:$0xff]  ;;  %v734_v49 = vld [vmem:[%s16229_s10 + $0xd0] sm:$0xff]  ;;  %v723_v51 = vld [vmem:[%s16229_s10 + $0x78] sm:$0xff] }
  0xff   : > { %9053 = vmatprep.subr.bf16.mxu0 %v9052_v25  ;;  %v1071_v52 = vld [vmem:[%s16224_s5 + $0x8] sm:$0xff]  ;;  %v9050_v53 = vpack.c.bf16 %v734_v49, %v726_v47  ;;  %v1072_v54 = vld [vmem:[%s16224_s5 + $0x10] sm:$0xff]  ;;  %9049 = vmatprep.subr.bf16.mxu1 %v9048_v48  ;;  %v9060_v55 = vpack.c.bf16 %v723_v51, %v715_v50  ;;  %v731_v58 = vld [vmem:[%s16229_s10 + $0xb8] sm:$0xff] }
 0x100   : > { %v714_v56 = vld [vmem:[%s16229_s10 + $0x30] sm:$0xff]  ;;  %v739_v59 = vld [vmem:[%s16229_s10 + $0xf8] sm:$0xff]  ;;  %v1074_v62 = vld [vmem:[%s16224_s5 + $0x20] sm:$0xff] }
 0x101   : > { %7969 = vmatmul.mubr.msk.f32.vlgmr.msra.gmra.mrb[0].mxu0 %vm702_vm3, %v9478_v30  ;;  %v722_v57 = vld [vmem:[%s16229_s10 + $0x70] sm:$0xff]  ;;  %v1073_v60 = vld [vmem:[%s16224_s5 + $0x18] sm:$0xff]  ;;  %9051 = vmatpush1.bf16.msra.mxu1 %v9050_v53  ;;  %v9064_v63 = vpack.c.bf16 %v739_v59, %v731_v58  ;;  %v1075_v2 = vld [vmem:[%s16224_s5 + $0x28] sm:$0xff] }
 0x102   : > { %9055 = vmatpush1.bf16.msra.mxu0 %v9054_v31  ;;  %816 = vmatprep.mubr.f32.mxu0 %v16242_v17  ;;  %v9062_v61 = vpack.c.bf16 %v722_v57, %v714_v56  ;;  %v730_v0 = vld [vmem:[%s16229_s10 + $0xb0] sm:$0xff]  ;;  %v1077_v5 = vld [vmem:[%s16224_s5 + $0x38] sm:$0xff]  ;;  %v1078_v6 = vld [vmem:[%s16224_s5 + $0x40] sm:$0xff] }
 0x103   : > { %9057 = vmatprep.subr.bf16.mxu0 %v9056_v32  ;;  %9061 = vmatprep.subr.bf16.mxu1 %v9060_v55  ;;  %v738_v1 = vld [vmem:[%s16229_s10 + $0xf0] sm:$0xff]  ;;  %v1079_v7 = vld [vmem:[%s16224_s5 + $0x48] sm:$0xff]  ;;  %v1118_v9 = vld [vmem:[%s16224_s5 + $0x180] sm:$0xff] }
 0x104   : > { %7971 = vmatmul.mubr.msk.f32.vlgmr.msra.gmra.mrb[0].mxu1 %vm702_vm3, %v9478_v30  ;;  %v9066_v3 = vpack.c.bf16 %v738_v1, %v730_v0  ;;  %v1076_v4 = vld [vmem:[%s16224_s5 + $0x30] sm:$0xff]  ;;  %v1081_v10 = vld [vmem:[%s16224_s5 + $0x58] sm:$0xff]  ;;  %v1119_v11 = vld [vmem:[%s16224_s5 + $0x188] sm:$0xff] }
 0x105   : > { %7970 = vmatmul.mubr.msk.f32.gmra.mrb[2].mxu0 %vm702_vm3, %v9489_v35  ;;  %9063 = vmatpush1.bf16.msra.mxu1 %v9062_v61  ;;  %v1080_v8 = vld [vmem:[%s16224_s5 + $0x50] sm:$0xff]  ;;  %v1082_v12 = vld [vmem:[%s16224_s5 + $0x60] sm:$0xff]  ;;  %v1083_v14 = vld [vmem:[%s16224_s5 + $0x68] sm:$0xff] }
 0x106   : > { %9059 = vmatpush1.bf16.msra.mxu0 %v9058_v36  ;;  %964 = vmatprep.mubr.f32.mxu0 %v16242_v17  ;;  %v1120_v13 = vld [vmem:[%s16224_s5 + $0x190] sm:$0xff]  ;;  %v1121_v15 = vld [vmem:[%s16224_s5 + $0x198] sm:$0xff]  ;;  %v1122_v18 = vld [vmem:[%s16224_s5 + $0x1a0] sm:$0xff] }
 0x107   : > { %8905 = vmatprep.subr.msk.mxu0 %vm1335_vm4, %v9494_v37  ;;  %893 = vmatprep.mubr.f32.mxu1 %v16242_v17  ;;  %v1084_v16 = vld [vmem:[%s16224_s5 + $0x70] sm:$0xff]  ;;  %v1085_v19 = vld [vmem:[%s16224_s5 + $0x78] sm:$0xff]  ;;  %v1123_v20 = vld [vmem:[%s16224_s5 + $0x1a8] sm:$0xff] }
 0x108   : > { %9065 = vmatprep.subr.bf16.mxu1 %v9064_v63  ;;  %7972 = vmatmul.mubr.msk.f32.gmra.mrb[2].mxu1 %vm702_vm3, %v9489_v35  ;;  %v1086_v21 = vld [vmem:[%s16224_s5 + $0x80] sm:$0xff]  ;;  %v1087_v22 = vld [vmem:[%s16224_s5 + $0x88] sm:$0xff]  ;;  %v1088_v23 = vld [vmem:[%s16224_s5 + $0x90] sm:$0xff] }
 0x109   : > { %7973 = vmatmul.mubr.msk.f32.vlgmr.msra.gmra.mrb[4].mxu0 %vm702_vm3, %v9478_v30  ;;  %9067 = vmatpush1.bf16.msra.mxu1 %v9066_v3  ;;  %v1089_v24 = vld [vmem:[%s16224_s5 + $0x98] sm:$0xff]  ;;  %v1090_v25 = vld [vmem:[%s16224_s5 + $0xa0] sm:$0xff]  ;;  %v1091_v26 = vld [vmem:[%s16224_s5 + $0xa8] sm:$0xff] }
 0x10a   : > { %970 = vmatprep.mubr.f32.mxu0 %v16242_v17  ;;  %8906 = vmatpush3.msk.msra.mxu0 %vm1335_vm4, %v9494_v37  ;;  %v1092_v27 = vld [vmem:[%s16224_s5 + $0xb0] sm:$0xff]  ;;  %v1093_v28 = vld [vmem:[%s16224_s5 + $0xb8] sm:$0xff]  ;;  %v1094_v29 = vld [vmem:[%s16224_s5 + $0xc0] sm:$0xff] }
 0x10b   : > { %1041 = vmatprep.mubr.f32.mxu1 %v16242_v17  ;;  %9196 = vmatprep.subr.msk.mxu1 %vm1335_vm4, %v9494_v37  ;;  %v1096_v31 = vld [vmem:[%s16224_s5 + $0xd0] sm:$0xff]  ;;  %v1097_v32 = vld [vmem:[%s16224_s5 + $0xd8] sm:$0xff]  ;;  %v1098_v33 = vld [vmem:[%s16224_s5 + $0xe0] sm:$0xff] }
 0x10c   : > { %7975 = vmatmul.mubr.msk.f32.vlgmr.msra.gmra.mrb[4].mxu1 %vm702_vm3, %v9478_v30  ;;  %v1095_v30 = vld [vmem:[%s16224_s5 + $0xc8] sm:$0xff]  ;;  %v1101_v36 = vld [vmem:[%s16224_s5 + $0xf8] sm:$0xff]  ;;  %v1104_v39 = vld [vmem:[%s16224_s5 + $0x110] sm:$0xff] }
 0x10d   : > { %7974 = vmatmul.mubr.msk.f32.gmra.mrb[6].mxu0 %vm702_vm3, %v9489_v35  ;;  %1047 = vmatprep.mubr.f32.mxu1 %v16242_v17  ;;  %v1099_v34 = vld [vmem:[%s16224_s5 + $0xe8] sm:$0xff]  ;;  %v1105_v40 = vld [vmem:[%s16224_s5 + $0x118] sm:$0xff]  ;;  %v1124_v42 = vld [vmem:[%s16224_s5 + $0x1b0] sm:$0xff] }
 0x10e   : > { %8907 = vmatprep.mubr.msk.f32.mxu0 %vm1142_vm5, %v1070_v41  ;;  %9197 = vmatpush3.msk.msra.mxu1 %vm1335_vm4, %v9494_v37  ;;  %v1102_v37 = vld [vmem:[%s16224_s5 + $0x100] sm:$0xff]  ;;  %v1103_v38 = vld [vmem:[%s16224_s5 + $0x108] sm:$0xff]  ;;  %v1125_v43 = vld [vmem:[%s16224_s5 + $0x1b8] sm:$0xff] }
 0x10f   : > { %v1106_v41 = vld [vmem:[%s16224_s5 + $0x120] sm:$0xff]  ;;  %v1107_v44 = vld [vmem:[%s16224_s5 + $0x128] sm:$0xff]  ;;  %v1108_v45 = vld [vmem:[%s16224_s5 + $0x130] sm:$0xff] }
 0x110   : > { %7976 = vmatmul.mubr.msk.f32.gmra.mrb[6].mxu1 %vm702_vm3, %v9489_v35  ;;  %v1100_v35 = vld [vmem:[%s16224_s5 + $0xf0] sm:$0xff]  ;;  %v1126_v46 = vld [vmem:[%s16224_s5 + $0x1c0] sm:$0xff]  ;;  %v1127_v47 = vld [vmem:[%s16224_s5 + $0x1c8] sm:$0xff] }
 0x111   : > { %8908 = vmatmul.mubr.msk.f32.vlgmr.msra.gmra.mrb[8].mxu0 %vm1142_vm5, %v1071_v52  ;;  %8979 = vmatprep.mubr.msk.f32.mxu1 %vm1142_vm5, %v1118_v9  ;;  %v1109_v48 = vld [vmem:[%s16224_s5 + $0x138] sm:$0xff]  ;;  %v1110_v49 = vld [vmem:[%s16224_s5 + $0x140] sm:$0xff]  ;;  %v1128_v50 = vld [vmem:[%s16224_s5 + $0x1d0] sm:$0xff] }
 0x112   : > { %8910 = vmatprep.mubr.msk.f32.mxu0 %vm1142_vm5, %v1072_v54  ;;  %v1129_v51 = vld [vmem:[%s16224_s5 + $0x1d8] sm:$0xff]  ;;  %v1111_v52 = vld [vmem:[%s16224_s5 + $0x148] sm:$0xff]  ;;  %v1112_v53 = vld [vmem:[%s16224_s5 + $0x150] sm:$0xff] }
 0x113   : > { %v1130_v54 = vld [vmem:[%s16224_s5 + $0x1e0] sm:$0xff]  ;;  %v1131_v55 = vld [vmem:[%s16224_s5 + $0x1e8] sm:$0xff]  ;;  %v1113_v56 = vld [vmem:[%s16224_s5 + $0x158] sm:$0xff] }
 0x114   : > { %8980 = vmatmul.mubr.msk.f32.vlgmr.msra.gmra.mrb[8].mxu1 %vm1142_vm5, %v1119_v11  ;;  %v1114_v57 = vld [vmem:[%s16224_s5 + $0x160] sm:$0xff]  ;;  %v1789_v58 = vld [vmem:[%s16227_s8 + $0x8] sm:$0xff]  ;;  %v1133_v0 = vld [vmem:[%s16224_s5 + $0x1f8] sm:$0xff] }
 0x115   : > { %8911 = vmatmul.mubr.msk.f32.gmra.mrb[10].mxu0 %vm1142_vm5, %v1073_v60  ;;  %8982 = vmatprep.mubr.msk.f32.mxu1 %vm1142_vm5, %v1120_v13  ;;  %v1797_v59 = vld [vmem:[%s16227_s8 + $0x48] sm:$0xff]  ;;  %v1132_v60 = vld [vmem:[%s16224_s5 + $0x1f0] sm:$0xff]  ;;  %v1796_v63 = vld [vmem:[%s16227_s8 + $0x40] sm:$0xff] }
 0x116   : > { %8913 = vmatprep.mubr.msk.f32.mxu0 %vm1142_vm5, %v1074_v62  ;;  %v9068_v61 = vpack.c.bf16 %v1797_v59, %v1789_v58  ;;  %v1788_v62 = vld [vmem:[%s16227_s8] sm:$0xff]  ;;  %v1799_v3 = vld [vmem:[%s16227_s8 + $0x58] sm:$0xff]  ;;  %v1793_v9 = vld [vmem:[%s16227_s8 + $0x28] sm:$0xff] }
 0x117   : > { %v9070_v1 = vpack.c.bf16 %v1796_v63, %v1788_v62  ;;  %v1116_v11 = vld [vmem:[%s16224_s5 + $0x170] sm:$0xff]  ;;  %v1117_v13 = vld [vmem:[%s16224_s5 + $0x178] sm:$0xff]  ;;  %vm9887_vm8 = vmpackc.low %vm1335_vm4, %vm9304_vm7 }
 0x118   : > { %8983 = vmatmul.mubr.msk.f32.gmra.mrb[10].mxu1 %vm1142_vm5, %v1121_v15  ;;  %9069 = vmatprep.subr.bf16.mxu1 %v9068_v61  ;;  %v1803_v15 = vld [vmem:[%s16227_s8 + $0x78] sm:$0xff] }
 0x119   : > { %8914 = vmatmul.mubr.msk.f32.gmra.mrb[12].mxu0 %vm1142_vm5, %v1075_v2  ;;  %8985 = vmatprep.mubr.msk.f32.mxu1 %vm1142_vm5, %v1122_v18  ;;  %v1791_v2 = vld [vmem:[%s16227_s8 + $0x18] sm:$0xff] }
 0x11a   : > { %8916 = vmatprep.mubr.msk.f32.mxu0 %vm1142_vm5, %v1076_v4  ;;  %v1790_v4 = vld [vmem:[%s16227_s8 + $0x10] sm:$0xff]  ;;  %9071 = vmatpush1.bf16.msra.mxu1 %v9070_v1 }
 0x11c   : > { %8986 = vmatmul.mubr.msk.f32.gmra.mrb[12].mxu1 %vm1142_vm5, %v1123_v20 }
 0x11d   : > { %8917 = vmatmul.mubr.msk.f32.gmra.mrb[14].mxu0 %vm1142_vm5, %v1077_v5  ;;  %8988 = vmatprep.mubr.msk.f32.mxu1 %vm1142_vm5, %v1124_v42  ;;  %v1798_v5 = vld [vmem:[%s16227_s8 + $0x50] sm:$0xff] }
 0x11e   : > { %8919 = vmatprep.mubr.msk.f32.mxu0 %vm1142_vm5, %v1078_v6  ;;  %v1115_v6 = vld [vmem:[%s16224_s5 + $0x168] sm:$0xff] }
 0x120   : > { %8989 = vmatmul.mubr.msk.f32.gmra.mrb[14].mxu1 %vm1142_vm5, %v1125_v43 }
 0x121   : > { %8920 = vmatmul.mubr.msk.f32.gmra.mrb[16].mxu0 %vm1142_vm5, %v1079_v7  ;;  %8991 = vmatprep.mubr.msk.f32.mxu1 %vm1142_vm5, %v1126_v46  ;;  %v9072_v7 = vpack.c.bf16 %v1799_v3, %v1791_v2 }
 0x122   : > { %8922 = vmatprep.mubr.msk.f32.mxu0 %vm1142_vm5, %v1080_v8  ;;  %v9074_v8 = vpack.c.bf16 %v1798_v5, %v1790_v4 }
 0x123   : > { %9073 = vmatprep.subr.bf16.mxu0 %v9072_v7 }
 0x124   : > { %8992 = vmatmul.mubr.msk.f32.gmra.mrb[16].mxu1 %vm1142_vm5, %v1127_v47  ;;  %9075 = vmatpush1.bf16.msra.mxu0 %v9074_v8 }
 0x125   : > { %8923 = vmatmul.mubr.msk.f32.gmra.mrb[18].mxu0 %vm1142_vm5, %v1081_v10  ;;  %8994 = vmatprep.mubr.msk.f32.mxu1 %vm1142_vm5, %v1128_v50  ;;  %v1801_v10 = vld [vmem:[%s16227_s8 + $0x68] sm:$0xff] }
 0x126   : > { %8925 = vmatprep.mubr.msk.f32.mxu0 %vm1142_vm5, %v1082_v12  ;;  %v9076_v12 = vpack.c.bf16 %v1801_v10, %v1793_v9 }
 0x128   : > { %8995 = vmatmul.mubr.msk.f32.gmra.mrb[18].mxu1 %vm1142_vm5, %v1129_v51  ;;  %9077 = vmatprep.subr.bf16.mxu1 %v9076_v12 }
 0x129   : > { %8926 = vmatmul.mubr.msk.f32.gmra.mrb[20].mxu0 %vm1142_vm5, %v1083_v14  ;;  %8997 = vmatprep.mubr.msk.f32.mxu1 %vm1142_vm5, %v1130_v54  ;;  %v1795_v14 = vld [vmem:[%s16227_s8 + $0x38] sm:$0xff] }
 0x12a   : > { %8928 = vmatprep.mubr.msk.f32.mxu0 %vm1142_vm5, %v1084_v16  ;;  %v9080_v16 = vpack.c.bf16 %v1803_v15, %v1795_v14 }
 0x12c   : > { %8998 = vmatmul.mubr.msk.f32.gmra.mrb[20].mxu1 %vm1142_vm5, %v1131_v55  ;;  %9081 = vmatprep.subr.bf16.mxu0 %v9080_v16 }
 0x12d   : > { %8929 = vmatmul.mubr.msk.f32.gmra.mrb[22].mxu0 %vm1142_vm5, %v1085_v19  ;;  %9000 = vmatprep.mubr.msk.f32.mxu1 %vm1142_vm5, %v1132_v60 }
 0x12e   : > { %8931 = vmatprep.mubr.msk.f32.mxu0 %vm1142_vm5, %v1086_v21 }
 0x130   : > { %9001 = vmatmul.mubr.msk.f32.gmra.mrb[22].mxu1 %vm1142_vm5, %v1133_v0 }
 0x131   : > { %8932 = vmatmul.mubr.msk.f32.gmra.mrb[24].mxu0 %vm1142_vm5, %v1087_v22  ;;  %2103 = vmatprep.mubr.f32.mxu1 %v16242_v17 }
 0x132   : > { %8934 = vmatprep.mubr.msk.f32.mxu0 %vm1142_vm5, %v1088_v23 }
 0x135   : > { %8935 = vmatmul.mubr.msk.f32.gmra.mrb[26].mxu0 %vm1142_vm5, %v1089_v24 }
 0x136   : > { %8937 = vmatprep.mubr.msk.f32.mxu0 %vm1142_vm5, %v1090_v25 }
 0x139   : > { %8938 = vmatmul.mubr.msk.f32.gmra.mrb[28].mxu0 %vm1142_vm5, %v1091_v26  ;;  %v9868_v26 = vld [vmem:[%s16226_s7] ss:$0 sm:$0xff] }
 0x13a   : > { %8940 = vmatprep.mubr.msk.f32.mxu0 %vm1142_vm5, %v1092_v27 }
 0x13d   : > { %8941 = vmatmul.mubr.msk.f32.gmra.mrb[30].mxu0 %vm1142_vm5, %v1093_v28  ;;  %v1792_v28 = vld [vmem:[%s16227_s8 + $0x20] sm:$0xff] }
 0x13e   : > { %8943 = vmatprep.mubr.msk.f32.mxu0 %vm1142_vm5, %v1094_v29  ;;  %v1800_v29 = vld [vmem:[%s16227_s8 + $0x60] sm:$0xff] }
 0x141   : > { %8944 = vmatmul.mubr.msk.f32.gmra.mrb[32].mxu0 %vm1142_vm5, %v1095_v30 }
 0x142   : > { %8946 = vmatprep.mubr.msk.f32.mxu0 %vm1142_vm5, %v1096_v31 }
 0x145   : > { %8947 = vmatmul.mubr.msk.f32.gmra.mrb[34].mxu0 %vm1142_vm5, %v1097_v32  ;;  %v1794_v32 = vld [vmem:[%s16227_s8 + $0x30] sm:$0xff] }
 0x146   : > { %8949 = vmatprep.mubr.msk.f32.mxu0 %vm1142_vm5, %v1098_v33  ;;  %v1802_v33 = vld [vmem:[%s16227_s8 + $0x70] sm:$0xff] }
 0x149   : > { %8950 = vmatmul.mubr.msk.f32.gmra.mrb[36].mxu0 %vm1142_vm5, %v1099_v34  ;;  %v9078_v34 = vpack.c.bf16 %v1800_v29, %v1792_v28 }
 0x14a   : > { %8952 = vmatprep.mubr.msk.f32.mxu0 %vm1142_vm5, %v1100_v35 }
 0x14d   : > { %8953 = vmatmul.mubr.msk.f32.gmra.mrb[38].mxu0 %vm1142_vm5, %v1101_v36 }
 0x14e   : > { %8955 = vmatprep.mubr.msk.f32.mxu0 %vm1142_vm5, %v1102_v37 }
 0x151   : > { %8956 = vmatmul.mubr.msk.f32.gmra.mrb[40].mxu0 %vm1142_vm5, %v1103_v38 }
 0x152   : > { %8958 = vmatprep.mubr.msk.f32.mxu0 %vm1142_vm5, %v1104_v39 }
 0x155   : > { %8959 = vmatmul.mubr.msk.f32.gmra.mrb[42].mxu0 %vm1142_vm5, %v1105_v40 }
 0x156   : > { %8961 = vmatprep.mubr.msk.f32.mxu0 %vm1142_vm5, %v1106_v41  ;;  %v9082_v41 = vpack.c.bf16 %v1802_v33, %v1794_v32 }
 0x159   : > { %8962 = vmatmul.mubr.msk.f32.gmra.mrb[44].mxu0 %vm1142_vm5, %v1107_v44 }
 0x15a   : > { %8964 = vmatprep.mubr.msk.f32.mxu0 %vm1142_vm5, %v1108_v45 }
 0x15d   : > { %8965 = vmatmul.mubr.msk.f32.gmra.mrb[46].mxu0 %vm1142_vm5, %v1109_v48 }
 0x15e   : > { %8967 = vmatprep.mubr.msk.f32.mxu0 %vm1142_vm5, %v1110_v49 }
 0x161   : > { %8968 = vmatmul.mubr.msk.f32.gmra.mrb[48].mxu0 %vm1142_vm5, %v1111_v52 }
 0x162   : > { %8970 = vmatprep.mubr.msk.f32.mxu0 %vm1142_vm5, %v1112_v53 }
 0x165   : > { %8971 = vmatmul.mubr.msk.f32.gmra.mrb[50].mxu0 %vm1142_vm5, %v1113_v56 }
 0x166   : > { %8973 = vmatprep.mubr.msk.f32.mxu0 %vm1142_vm5, %v1114_v57 }
 0x169   : > { %8974 = vmatmul.mubr.msk.f32.gmra.mrb[52].mxu0 %vm1142_vm5, %v1115_v6 }
 0x16a   : > { %8976 = vmatprep.mubr.msk.f32.mxu0 %vm1142_vm5, %v1116_v11 }
 0x16d   : > { %8977 = vmatmul.mubr.msk.f32.gmra.mrb[54].mxu0 %vm1142_vm5, %v1117_v13 }
 0x16e   : > { %2552 = vmatprep.mubr.f32.mxu0 %v16242_v17 }
 0x1d4   : > { %v812_v18 = vpop.f32.mrb[0].mxu0 }
 0x1d5   : > { %1054 = vst [vmem:[#allocation5] sm:$0xff] %v812_v18  ;;  %v814_v19 = vpop.f32.mrb[1].mxu0 }
 0x1d7   : > { %v9960_v4 = vpop.f32.mrb[0].mxu1 }
 0x1d8   : > { %v818_v20 = vpop.f32.mrb[2].mxu0  ;;  %v891_v7 = vpop.f32.mrb[1].mxu1 }
 0x1d9   : > { %1062 = vst [vmem:[#allocation5 + $0x40] sm:$0xf] %v818_v20  ;;  %v820_v21 = vpop.f32.mrb[3].mxu0 }
 0x1da   : > { %1063 = vst [vmem:[#allocation5 + $0x48] sm:$0xf] %v820_v21 }
 0x1db   : > { %v895_v9 = vpop.f32.mrb[2].mxu1 }
 0x1dc   : > { %v966_v22 = vpop.f32.mrb[4].mxu0  ;;  %1064 = vst [vmem:[#allocation5 + $0x50] sm:$0xf] %v895_v9  ;;  %v897_v11 = vpop.f32.mrb[3].mxu1 }
 0x1dd   : > { %1058 = vst [vmem:[#allocation5 + $0x20] sm:$0xff] %v966_v22  ;;  %v968_v23 = vpop.f32.mrb[5].mxu0  ;;  %1065 = vst [vmem:[#allocation5 + $0x58] sm:$0xf] %v897_v11 }
 0x1de   : > { %1059 = vst [vmem:[#allocation5 + $0x28] sm:$0xff] %v968_v23 }
 0x1df   : > { %v1043_v16 = vpop.f32.mrb[4].mxu1 }
 0x1e0   : > { %v972_v24 = vpop.f32.mrb[6].mxu0  ;;  %1060 = vst [vmem:[#allocation5 + $0x30] sm:$0xff] %v1043_v16  ;;  %v9992_v20 = vpop.f32.mrb[5].mxu1 }
 0x1e1   : > { %1066 = vst [vmem:[#allocation5 + $0x60] sm:$0xf] %v972_v24  ;;  %v974_v25 = vpop.f32.mrb[7].mxu0  ;;  %v3972_v35 = vld [vmem:[#allocation5 + $0x48] sm:$0xf] }
 0x1e2   : > { %1067 = vst [vmem:[#allocation5 + $0x68] sm:$0xf] %v974_v25  ;;  %v9084_v42 = vpack.c.bf16 %v3972_v35, %v814_v19 }
 0x1e3   : > { %v1049_v22 = vpop.f32.mrb[6].mxu1 }
 0x1e4   : > { %v8909_v27 = vpop.f32.mrb[8].mxu0  ;;  %1068 = vst [vmem:[#allocation5 + $0x70] sm:$0xf] %v1049_v22  ;;  %v1051_v24 = vpop.f32.mrb[7].mxu1  ;;  %v3974_v25 = vld [vmem:[#allocation5 + $0x58] sm:$0xf] }
 0x1e5   : > { %v1405_v30 = vpop.f32.mrb[9].mxu0  ;;  %v1411_v36 = vadd.f32 %v8909_v27, %v9868_v26  ;;  %1069 = vst [vmem:[#allocation5 + $0x78] sm:$0xf] %v1051_v24  ;;  %v9090_v27 = vpack.c.bf16 %v3974_v25, %v891_v7 }
 0x1e6   : > { %v1406_v31 = vadd.f32 %v9868_v26, %v1405_v30 }
 0x1e7   : > { %v9897_v44 = vmax.f32 %v1411_v36, 0.0 }
 0x1e8   : > { %v9884_v37 = vmax.f32 %v1406_v31, 0.0  ;;  %v8912_v38 = vpop.f32.mrb[10].mxu0 }
 0x1e9   : > { %v1415_v40 = vpop.f32.mrb[11].mxu0  ;;  %v1421_v48 = vadd.f32 %v8912_v38, %v9868_v26 }
 0x1ea   : > { %8043 = vmatmul.mubr.msk.f32.vlgmr.msra.gmra.mrb[24].mxu1 %vm1846_vm6, %v9884_v37  ;;  %8107 = vmatmul.mubr.msk.f32.vlgmr.msra.gmra.mrb[56].mxu0 %vm1846_vm6, %v9884_v37  ;;  %v1416_v43 = vadd.f32 %v9868_v26, %v1415_v40 }
 0x1eb   : > { %9079 = vmatpush1.bf16.msra.mxu1 %v9078_v34  ;;  %2109 = vmatprep.mubr.f32.mxu1 %v16242_v17  ;;  %v9918_v52 = vmax.f32 %v1421_v48, 0.0 }
 0x1ec   : > { %9086 = vmatprep.subr.msk.bf16.mxu1 %vm9887_vm8, %v9084_v42  ;;  %2558 = vmatprep.mubr.f32.mxu0 %v16242_v17  ;;  %v8915_v45 = vpop.f32.mrb[12].mxu0  ;;  %v9902_v47 = vmax.f32 %v1416_v43, 0.0  ;;  %v10044_v42 = vpop.f32.mrb[8].mxu1 }
 0x1ed   : > { %v1425_v46 = vpop.f32.mrb[13].mxu0  ;;  %9083 = vmatpush1.bf16.msra.mxu0 %v9082_v41  ;;  %v1431_v56 = vadd.f32 %v8915_v45, %v9868_v26  ;;  %v10048_v43 = vpop.f32.mrb[9].mxu1 }
 0x1ee   : > { %8044 = vmatmul.mubr.msk.f32.gmra.mrb[26].mxu1 %vm1846_vm6, %v9897_v44  ;;  %8108 = vmatmul.mubr.msk.f32.gmra.mrb[58].mxu0 %vm1846_vm6, %v9897_v44  ;;  %v1426_v51 = vadd.f32 %v9868_v26, %v1425_v46 }
 0x1ef   : > { %2115 = vmatprep.mubr.f32.mxu1 %v16242_v17  ;;  %2564 = vmatprep.mubr.f32.mxu0 %v16242_v17  ;;  %v9936_v60 = vmax.f32 %v1431_v56, 0.0 }
 0x1f0   : > { %v8918_v49 = vpop.f32.mrb[14].mxu0  ;;  %v9920_v55 = vmax.f32 %v1426_v51, 0.0  ;;  %9092 = vmatprep.subr.msk.bf16.mxu0 %vm9887_vm8, %v9090_v27 }
 0x1f1   : > { %v1435_v50 = vpop.f32.mrb[15].mxu0  ;;  %v1441_v0 = vadd.f32 %v8918_v49, %v9868_v26 }
 0x1f2   : > { %8045 = vmatmul.mubr.msk.f32.gmra.mrb[28].mxu1 %vm1846_vm6, %v9902_v47  ;;  %8109 = vmatmul.mubr.msk.f32.gmra.mrb[60].mxu0 %vm1846_vm6, %v9902_v47  ;;  %v1436_v59 = vadd.f32 %v9868_v26, %v1435_v50  ;;  %v10062_v50 = vpop.f32.mrb[10].mxu1 }
 0x1f3   : > { %2121 = vmatprep.mubr.f32.mxu1 %v16242_v17  ;;  %2570 = vmatprep.mubr.f32.mxu0 %v16242_v17  ;;  %v9962_v5 = vmax.f32 %v1441_v0, 0.0  ;;  %v10066_v51 = vpop.f32.mrb[11].mxu1 }
 0x1f4   : > { %v8921_v53 = vpop.f32.mrb[16].mxu0  ;;  %v9940_v63 = vmax.f32 %v1436_v59, 0.0 }
 0x1f5   : > { %v1445_v54 = vpop.f32.mrb[17].mxu0  ;;  %v1451_v12 = vadd.f32 %v8921_v53, %v9868_v26 }
 0x1f6   : > { %8046 = vmatmul.mubr.msk.f32.gmra.mrb[30].mxu1 %vm1846_vm6, %v9918_v52  ;;  %8110 = vmatmul.mubr.msk.f32.gmra.mrb[62].mxu0 %vm1846_vm6, %v9918_v52  ;;  %v1446_v3 = vadd.f32 %v9868_v26, %v1445_v54 }
 0x1f7   : > { %2127 = vmatprep.mubr.f32.mxu1 %v16242_v17  ;;  %2576 = vmatprep.mubr.f32.mxu0 %v16242_v17  ;;  %v9988_v18 = vmax.f32 %v1451_v12, 0.0 }
 0x1f8   : > { %v8924_v57 = vpop.f32.mrb[18].mxu0  ;;  %v9968_v10 = vmax.f32 %v1446_v3, 0.0 }
 0x1f9   : > { %v1455_v58 = vpop.f32.mrb[19].mxu0  ;;  %v1461_v28 = vadd.f32 %v8924_v57, %v9868_v26 }
 0x1fa   : > { %8047 = vmatmul.mubr.msk.f32.gmra.mrb[32].mxu1 %vm1846_vm6, %v9920_v55  ;;  %8111 = vmatmul.mubr.msk.f32.gmra.mrb[64].mxu0 %vm1846_vm6, %v9920_v55  ;;  %v1456_v15 = vadd.f32 %v9868_v26, %v1455_v58  ;;  %v10080_v58 = vpop.f32.mrb[12].mxu1 }
 0x1fb   : > { %2133 = vmatprep.mubr.f32.mxu1 %v16242_v17  ;;  %2582 = vmatprep.mubr.f32.mxu0 %v16242_v17  ;;  %v10018_v32 = vmax.f32 %v1461_v28, 0.0  ;;  %v10084_v59 = vpop.f32.mrb[13].mxu1 }
 0x1fc   : > { %v9938_v61 = vpop.f32.mrb[20].mxu0  ;;  %v9996_v23 = vmax.f32 %v1456_v15, 0.0  ;;  %v10104_v7 = vpop.f32.mrb[14].mxu1 }
 0x1fd   : > { %v1465_v62 = vpop.f32.mrb[21].mxu0  ;;  %v1471_v36 = vadd.f32 %v9938_v61, %v9868_v26  ;;  %v10108_v9 = vpop.f32.mrb[15].mxu1 }
 0x1fe   : > { %8048 = vmatmul.mubr.msk.f32.gmra.mrb[34].mxu1 %vm1846_vm6, %v9936_v60  ;;  %8112 = vmatmul.mubr.msk.f32.gmra.mrb[66].mxu0 %vm1846_vm6, %v9936_v60  ;;  %v1466_v31 = vadd.f32 %v9868_v26, %v1465_v62  ;;  %v10122_v15 = vpop.f32.mrb[16].mxu1 }
 0x1ff   : > { %2139 = vmatprep.mubr.f32.mxu1 %v16242_v17  ;;  %2588 = vmatprep.mubr.f32.mxu0 %v16242_v17  ;;  %v10050_v45 = vmax.f32 %v1471_v36, 0.0  ;;  %v10126_v22 = vpop.f32.mrb[17].mxu1 }
 0x200   : > { %v9949_v1 = vpop.f32.mrb[22].mxu0  ;;  %v10024_v35 = vmax.f32 %v1466_v31, 0.0  ;;  %v10140_v27 = vpop.f32.mrb[18].mxu1 }
 0x201   : > { %v9951_v2 = vpop.f32.mrb[23].mxu0  ;;  %v1481_v53 = vadd.f32 %v9949_v1, %v9868_v26  ;;  %v10144_v31 = vpop.f32.mrb[19].mxu1 }
 0x202   : > { %8049 = vmatmul.mubr.msk.f32.gmra.mrb[36].mxu1 %vm1846_vm6, %v9940_v63  ;;  %8113 = vmatmul.mubr.msk.f32.gmra.mrb[68].mxu0 %vm1846_vm6, %v9940_v63  ;;  %v1476_v41 = vadd.f32 %v9868_v26, %v9951_v2 }
 0x203   : > { %2145 = vmatprep.mubr.f32.mxu1 %v16242_v17  ;;  %2594 = vmatprep.mubr.f32.mxu0 %v16242_v17  ;;  %v10086_v61 = vmax.f32 %v1481_v53, 0.0  ;;  %v10158_v53 = vpop.f32.mrb[20].mxu1 }
 0x204   : > { %v9964_v6 = vpop.f32.mrb[24].mxu0  ;;  %v10056_v49 = vmax.f32 %v1476_v41, 0.0 }
 0x205   : > { %v9966_v8 = vpop.f32.mrb[25].mxu0  ;;  %16419 = vst [vmem:[#allocation10_spill] sm:$0xff] %v10086_v61  ;;  %v1491_v2 = vadd.f32 %v9964_v6, %v9868_v26 }
 0x206   : > { %8050 = vmatmul.mubr.msk.f32.gmra.mrb[38].mxu1 %vm1846_vm6, %v9962_v5  ;;  %8114 = vmatmul.mubr.msk.f32.gmra.mrb[70].mxu0 %vm1846_vm6, %v9962_v5  ;;  %16418 = vst [vmem:[#allocation9_spill] sm:$0xff] %v10056_v49  ;;  %v1486_v57 = vadd.f32 %v9868_v26, %v9966_v8 }
 0x207   : > { %2151 = vmatprep.mubr.f32.mxu1 %v16242_v17  ;;  %2600 = vmatprep.mubr.f32.mxu0 %v16242_v17  ;;  %v10118_v6 = vmax.f32 %v1491_v2, 0.0  ;;  %v10162_v2 = vpop.f32.mrb[21].mxu1 }
 0x208   : > { %v9977_v13 = vpop.f32.mrb[26].mxu0  ;;  %v10092_v1 = vmax.f32 %v1486_v57, 0.0 }
 0x209   : > { %v9979_v14 = vpop.f32.mrb[27].mxu0  ;;  %16421 = vst [vmem:[#allocation12_spill] sm:$0xff] %v10118_v6 }
 0x20a   : > { %8051 = vmatmul.mubr.msk.f32.gmra.mrb[40].mxu1 %vm1846_vm6, %v9968_v10  ;;  %8115 = vmatmul.mubr.msk.f32.gmra.mrb[72].mxu0 %vm1846_vm6, %v9968_v10  ;;  %16420 = vst [vmem:[#allocation11_spill] sm:$0xff] %v10092_v1  ;;  %v1496_v11 = vadd.f32 %v9868_v26, %v9979_v14  ;;  %v1501_v14 = vadd.f32 %v9977_v13, %v9868_v26 }
 0x20b   : > { %2157 = vmatprep.mubr.f32.mxu1 %v16242_v17  ;;  %2606 = vmatprep.mubr.f32.mxu0 %v16242_v17 }
 0x20c   : > { %v9990_v19 = vpop.f32.mrb[28].mxu0  ;;  %v10128_v24 = vmax.f32 %v1496_v11, 0.0  ;;  %v10154_v13 = vmax.f32 %v1501_v14, 0.0 }
 0x20d   : > { %v9994_v21 = vpop.f32.mrb[29].mxu0 }
 0x20e   : > { %8052 = vmatmul.mubr.msk.f32.gmra.mrb[42].mxu1 %vm1846_vm6, %v9988_v18  ;;  %8116 = vmatmul.mubr.msk.f32.gmra.mrb[74].mxu0 %vm1846_vm6, %v9988_v18  ;;  %16422 = vst [vmem:[#allocation13_spill] sm:$0xff] %v10128_v24  ;;  %v1506_v36 = vadd.f32 %v9868_v26, %v9994_v21  ;;  %16423 = vst [vmem:[#allocation14_spill] sm:$0xff] %v10154_v13  ;;  %v1511_v21 = vadd.f32 %v9990_v19, %v9868_v26 }
 0x20f   : > { %2163 = vmatprep.mubr.f32.mxu1 %v16242_v17  ;;  %2612 = vmatprep.mubr.f32.mxu0 %v16242_v17 }
 0x210   : > { %v10005_v29 = vpop.f32.mrb[30].mxu0  ;;  %v10164_v11 = vmax.f32 %v1506_v36, 0.0  ;;  %v10190_v19 = vmax.f32 %v1511_v21, 0.0 }
 0x211   : > { %v10007_v30 = vpop.f32.mrb[31].mxu0 }
 0x212   : > { %8053 = vmatmul.mubr.msk.f32.gmra.mrb[44].mxu1 %vm1846_vm6, %v9996_v23  ;;  %8117 = vmatmul.mubr.msk.f32.gmra.mrb[76].mxu0 %vm1846_vm6, %v9996_v23  ;;  %16424 = vst [vmem:[#allocation15_spill] sm:$0xff] %v10164_v11  ;;  %16426 = vst [vmem:[#allocation16_spill] sm:$0xff] %v10190_v19 }
 0x213   : > { %2169 = vmatprep.mubr.f32.mxu1 %v16242_v17  ;;  %2618 = vmatprep.mubr.f32.mxu0 %v16242_v17 }
 0x214   : > { %v10020_v33 = vpop.f32.mrb[32].mxu0 }
 0x215   : > { %v10022_v34 = vpop.f32.mrb[33].mxu0 }
 0x216   : > { %8054 = vmatmul.mubr.msk.f32.gmra.mrb[46].mxu1 %vm1846_vm6, %v10018_v32  ;;  %8118 = vmatmul.mubr.msk.f32.gmra.mrb[78].mxu0 %vm1846_vm6, %v10018_v32 }
 0x217   : > { %2175 = vmatprep.mubr.f32.mxu1 %v16242_v17  ;;  %2624 = vmatprep.mubr.f32.mxu0 %v16242_v17 }
 0x218   : > { %v10034_v38 = vpop.f32.mrb[34].mxu0 }
 0x219   : > { %v10036_v40 = vpop.f32.mrb[35].mxu0 }
 0x21a   : > { %8055 = vmatmul.mubr.msk.f32.gmra.mrb[48].mxu1 %vm1846_vm6, %v10024_v35  ;;  %8119 = vmatmul.mubr.msk.f32.gmra.mrb[80].mxu0 %vm1846_vm6, %v10024_v35 }
 0x21b   : > { %2181 = vmatprep.mubr.f32.mxu1 %v16242_v17  ;;  %2630 = vmatprep.mubr.f32.mxu0 %v16242_v17 }
 0x21c   : > { %v10052_v46 = vpop.f32.mrb[36].mxu0 }
 0x21d   : > { %v10054_v48 = vpop.f32.mrb[37].mxu0 }
 0x21e   : > { %8056 = vmatmul.mubr.msk.f32.gmra.mrb[50].mxu1 %vm1846_vm6, %v10050_v45  ;;  %8120 = vmatmul.mubr.msk.f32.gmra.mrb[82].mxu0 %vm1846_vm6, %v10050_v45 }
 0x21f   : > { %2187 = vmatprep.mubr.f32.mxu1 %v16242_v17  ;;  %2636 = vmatprep.mubr.f32.mxu0 %v16242_v17 }
 0x220   : > { %v10070_v54 = vpop.f32.mrb[38].mxu0 }
 0x221   : > { %v10072_v56 = vpop.f32.mrb[39].mxu0 }
 0x222   : > { %8057 = vmatmul.mubr.msk.f32.gmra.mrb[52].mxu1 %vm1846_vm6, %v10056_v49  ;;  %8121 = vmatmul.mubr.msk.f32.gmra.mrb[84].mxu0 %vm1846_vm6, %v10056_v49 }
 0x223   : > { %2193 = vmatprep.mubr.f32.mxu1 %v16242_v17  ;;  %2642 = vmatprep.mubr.f32.mxu0 %v16242_v17 }
 0x224   : > { %v10088_v62 = vpop.f32.mrb[40].mxu0 }
 0x225   : > { %v10090_v0 = vpop.f32.mrb[41].mxu0 }
 0x226   : > { %8058 = vmatmul.mubr.msk.f32.gmra.mrb[54].mxu1 %vm1846_vm6, %v10086_v61  ;;  %8122 = vmatmul.mubr.msk.f32.gmra.mrb[86].mxu0 %vm1846_vm6, %v10086_v61 }
 0x227   : > { %2199 = vmatprep.mubr.f32.mxu1 %v16242_v17  ;;  %2648 = vmatprep.mubr.f32.mxu0 %v16242_v17 }
 0x228   : > { %v10102_v3 = vpop.f32.mrb[42].mxu0 }
 0x229   : > { %v10106_v8 = vpop.f32.mrb[43].mxu0 }
 0x22a   : > { %8059 = vmatmul.mubr.msk.f32.gmra.mrb[56].mxu1 %vm1846_vm6, %v10092_v1  ;;  %8123 = vmatmul.mubr.msk.f32.gmra.mrb[88].mxu0 %vm1846_vm6, %v10092_v1 }
 0x22b   : > { %2205 = vmatprep.mubr.f32.mxu1 %v16242_v17  ;;  %2654 = vmatprep.mubr.f32.mxu0 %v16242_v17 }
 0x22c   : > { %v10120_v12 = vpop.f32.mrb[44].mxu0 }
 0x22d   : > { %v10124_v16 = vpop.f32.mrb[45].mxu0 }
 0x22e   : > { %8060 = vmatmul.mubr.msk.f32.gmra.mrb[58].mxu1 %vm1846_vm6, %v10118_v6  ;;  %8124 = vmatmul.mubr.msk.f32.gmra.mrb[90].mxu0 %vm1846_vm6, %v10118_v6 }
 0x22f   : > { %2211 = vmatprep.mubr.f32.mxu1 %v16242_v17  ;;  %2660 = vmatprep.mubr.f32.mxu0 %v16242_v17 }
 0x230   : > { %v10138_v25 = vpop.f32.mrb[46].mxu0 }
 0x231   : > { %v10142_v28 = vpop.f32.mrb[47].mxu0 }
 0x232   : > { %8061 = vmatmul.mubr.msk.f32.gmra.mrb[60].mxu1 %vm1846_vm6, %v10128_v24  ;;  %8125 = vmatmul.mubr.msk.f32.gmra.mrb[92].mxu0 %vm1846_vm6, %v10128_v24  ;;  %v10176_v24 = vpop.f32.mrb[22].mxu1 }
 0x233   : > { %2217 = vmatprep.mubr.f32.mxu1 %v16242_v17  ;;  %2666 = vmatprep.mubr.f32.mxu0 %v16242_v17  ;;  %v10180_v36 = vpop.f32.mrb[23].mxu1 }
 0x234   : > { %v10156_v41 = vpop.f32.mrb[48].mxu0 }
 0x235   : > { %v10160_v57 = vpop.f32.mrb[49].mxu0 }
 0x236   : > { %8062 = vmatmul.mubr.msk.f32.gmra.mrb[62].mxu1 %vm1846_vm6, %v10154_v13  ;;  %8126 = vmatmul.mubr.msk.f32.gmra.mrb[94].mxu0 %vm1846_vm6, %v10154_v13  ;;  %v16425_v13 = vmov 0.0  }
 0x237   : > { %2223 = vmatprep.mubr.f32.mxu1 %v16242_v17  ;;  %2672 = vmatprep.mubr.f32.mxu0 %v16242_v17  ;;  %v1516_v17 = vadd.f32 %v9868_v26, %v10007_v30  ;;  %v1521_v30 = vadd.f32 %v10005_v29, %v9868_v26 }
 0x238   : > { %v10174_v14 = vpop.f32.mrb[50].mxu0 }
 0x239   : > { %v10178_v6 = vpop.f32.mrb[51].mxu0  ;;  %v10196_v49 = vmax.f32 %v1516_v17, 0.0  ;;  %v1526_v17 = vadd.f32 %v9868_v26, %v10022_v34  ;;  %v1531_v34 = vadd.f32 %v10020_v33, %v9868_v26  ;;  %v1541_v33 = vadd.f32 %v10034_v38, %v9868_v26 }
 0x23a   : > { %8063 = vmatmul.mubr.msk.f32.gmra.mrb[64].mxu1 %vm1846_vm6, %v10164_v11  ;;  %8127 = vmatmul.mubr.msk.f32.gmra.mrb[96].mxu0 %vm1846_vm6, %v10164_v11  ;;  %v1551_v38 = vadd.f32 %v10052_v46, %v9868_v26  ;;  %v1561_v46 = vadd.f32 %v10070_v54, %v9868_v26  ;;  %v1571_v54 = vadd.f32 %v10088_v62, %v9868_v26 }
 0x23b   : > { %2229 = vmatprep.mubr.f32.mxu1 %v16425_v13  ;;  %2678 = vmatprep.mubr.f32.mxu0 %v16425_v13  ;;  %v10220_v29 = vmax.f32 %v1526_v17, 0.0  ;;  %v10238_v17 = vmax.f32 %v1531_v34, 0.0  ;;  %v10258_v34 = vmax.f32 %v1541_v33, 0.0  ;;  %v1581_v62 = vadd.f32 %v10102_v3, %v9868_v26 }
 0x23c   : > { %v10192_v1 = vpop.f32.mrb[52].mxu0  ;;  %v10278_v33 = vmax.f32 %v1551_v38, 0.0  ;;  %v10298_v38 = vmax.f32 %v1561_v46, 0.0  ;;  %v10318_v46 = vmax.f32 %v1571_v54, 0.0  ;;  %v1591_v3 = vadd.f32 %v10120_v12, %v9868_v26 }
 0x23d   : > { %v10194_v61 = vpop.f32.mrb[53].mxu0  ;;  %v10338_v54 = vmax.f32 %v1581_v62, 0.0  ;;  %v1601_v12 = vadd.f32 %v10138_v25, %v9868_v26  ;;  %v1611_v25 = vadd.f32 %v10156_v41, %v9868_v26 }
 0x23e   : > { %8064 = vmatmul.mubr.msk.f32.gmra.mrb[66].mxu1 %vm1846_vm6, %v10190_v19  ;;  %8128 = vmatmul.mubr.msk.f32.gmra.mrb[98].mxu0 %vm1846_vm6, %v10190_v19  ;;  %v10218_v19 = vmax.f32 %v1521_v30, 0.0  ;;  %v1536_v30 = vadd.f32 %v9868_v26, %v10036_v40  ;;  %v1546_v40 = vadd.f32 %v9868_v26, %v10054_v48  ;;  %v1556_v48 = vadd.f32 %v9868_v26, %v10072_v56 }
 0x23f   : > { %2235 = vmatprep.mubr.f32.mxu1 %v16425_v13  ;;  %2684 = vmatprep.mubr.f32.mxu0 %v16425_v13  ;;  %v1566_v56 = vadd.f32 %v9868_v26, %v10090_v0  ;;  %v1576_v0 = vadd.f32 %v9868_v26, %v10106_v8  ;;  %v1586_v8 = vadd.f32 %v9868_v26, %v10124_v16  ;;  %v10358_v62 = vmax.f32 %v1591_v3, 0.0 }
 0x240   : > { %v10206_v21 = vpop.f32.mrb[54].mxu0  ;;  %16427 = vst [vmem:[#allocation17_spill] sm:$0xff] %v10218_v19  ;;  %v1596_v16 = vadd.f32 %v9868_v26, %v10142_v28  ;;  %v1606_v28 = vadd.f32 %v9868_v26, %v10160_v57  ;;  %v10378_v3 = vmax.f32 %v1601_v12, 0.0  ;;  %v1616_v57 = vadd.f32 %v9868_v26, %v10178_v6 }
 0x241   : > { %v10208_v11 = vpop.f32.mrb[55].mxu0  ;;  %v10398_v12 = vmax.f32 %v1611_v25, 0.0  ;;  %v1621_v6 = vadd.f32 %v10174_v14, %v9868_v26  ;;  %v1626_v41 = vadd.f32 %v9868_v26, %v10194_v61  ;;  %v1631_v61 = vadd.f32 %v10192_v1, %v9868_v26 }
 0x242   : > { %8065 = vmatmul.mubr.msk.f32.gmra.mrb[68].mxu1 %vm1846_vm6, %v10196_v49  ;;  %8129 = vmatmul.mubr.msk.f32.gmra.mrb[100].mxu0 %vm1846_vm6, %v10196_v49  ;;  %v1636_v14 = vadd.f32 %v9868_v26, %v10208_v11  ;;  %v1641_v1 = vadd.f32 %v10206_v21, %v9868_v26  ;;  %v1651_v21 = vadd.f32 %v10044_v42, %v9868_v26 }
 0x243   : > { %2241 = vmatprep.mubr.f32.mxu1 %v16425_v13  ;;  %2690 = vmatprep.mubr.f32.mxu0 %v16425_v13  ;;  %v10418_v25 = vmax.f32 %v1621_v6, 0.0  ;;  %v10438_v6 = vmax.f32 %v1631_v61, 0.0  ;;  %v1646_v61 = vadd.f32 %v9868_v26, %v10048_v43  ;;  %v1661_v42 = vadd.f32 %v10062_v50, %v9868_v26 }
 0x244   : > { %v10456_v11 = vmax.f32 %v1641_v1, 0.0  ;;  %v10476_v43 = vmax.f32 %v1651_v21, 0.0  ;;  %v1656_v1 = vadd.f32 %v9868_v26, %v10066_v51  ;;  %v1666_v21 = vadd.f32 %v9868_v26, %v10084_v59 }
 0x245   : > { %v10496_v51 = vmax.f32 %v1661_v42, 0.0  ;;  %v1671_v50 = vadd.f32 %v10080_v58, %v9868_v26  ;;  %v1676_v42 = vadd.f32 %v9868_v26, %v10108_v9  ;;  %v1681_v9 = vadd.f32 %v10104_v7, %v9868_v26 }
 0x246   : > { %8066 = vmatmul.mubr.msk.f32.gmra.mrb[70].mxu1 %vm1846_vm6, %v10218_v19  ;;  %8130 = vmatmul.mubr.msk.f32.gmra.mrb[102].mxu0 %vm1846_vm6, %v10218_v19  ;;  %v10240_v19 = vmax.f32 %v1536_v30, 0.0  ;;  %v10260_v30 = vmax.f32 %v1546_v40, 0.0  ;;  %v10280_v40 = vmax.f32 %v1556_v48, 0.0  ;;  %v10300_v48 = vmax.f32 %v1566_v56, 0.0 }
 0x247   : > { %2247 = vmatprep.mubr.f32.mxu1 %v16425_v13  ;;  %2696 = vmatprep.mubr.f32.mxu0 %v16425_v13  ;;  %v10320_v56 = vmax.f32 %v1576_v0, 0.0  ;;  %v10340_v0 = vmax.f32 %v1586_v8, 0.0  ;;  %v10360_v8 = vmax.f32 %v1596_v16, 0.0  ;;  %v10380_v16 = vmax.f32 %v1606_v28, 0.0  ;;  %16429 = vst [vmem:[#allocation19_spill] sm:$0xff] %v10496_v51 }
 0x248   : > { %v10400_v28 = vmax.f32 %v1616_v57, 0.0  ;;  %v10420_v57 = vmax.f32 %v1626_v41, 0.0  ;;  %v10440_v41 = vmax.f32 %v1636_v14, 0.0  ;;  %v10468_v14 = vmax.f32 %v1646_v61, 0.0 }
 0x249   : > { %v10488_v61 = vmax.f32 %v1656_v1, 0.0  ;;  %v10508_v1 = vmax.f32 %v1666_v21, 0.0  ;;  %v10516_v59 = vmax.f32 %v1671_v50, 0.0  ;;  %v10536_v50 = vmax.f32 %v1676_v42, 0.0 }
 0x24a   : > { %8067 = vmatmul.mubr.msk.f32.gmra.mrb[72].mxu1 %vm1846_vm6, %v10220_v29  ;;  %8131 = vmatmul.mubr.msk.f32.gmra.mrb[104].mxu0 %vm1846_vm6, %v10220_v29  ;;  %v10552_v7 = vmax.f32 %v1681_v9, 0.0  ;;  %v1686_v42 = vadd.f32 %v9868_v26, %v10126_v22  ;;  %v1691_v22 = vadd.f32 %v10122_v15, %v9868_v26 }
 0x24b   : > { %2253 = vmatprep.mubr.f32.mxu1 %v16425_v13  ;;  %2702 = vmatprep.mubr.f32.mxu0 %v16425_v13  ;;  %16428 = vst [vmem:[#allocation18_spill] sm:$0xff] %v10488_v61 }
 0x24c   : > { %v10572_v9 = vmax.f32 %v1686_v42, 0.0  ;;  %v10588_v15 = vmax.f32 %v1691_v22, 0.0  ;;  %v1696_v42 = vadd.f32 %v9868_v26, %v10144_v31  ;;  %v1701_v31 = vadd.f32 %v10140_v27, %v9868_v26 }
 0x24e   : > { %8068 = vmatmul.mubr.msk.f32.gmra.mrb[74].mxu1 %vm1846_vm6, %v10238_v17  ;;  %8132 = vmatmul.mubr.msk.f32.gmra.mrb[106].mxu0 %vm1846_vm6, %v10238_v17  ;;  %16446 = vst [vmem:[#allocation36_spill] sm:$0xff] %v10588_v15  ;;  %v10608_v22 = vmax.f32 %v1696_v42, 0.0  ;;  %v10624_v27 = vmax.f32 %v1701_v31, 0.0  ;;  %v1706_v42 = vadd.f32 %v9868_v26, %v10162_v2  ;;  %v1711_v2 = vadd.f32 %v10158_v53, %v9868_v26 }
 0x24f   : > { %2259 = vmatprep.mubr.f32.mxu1 %v16425_v13  ;;  %2708 = vmatprep.mubr.f32.mxu0 %v16425_v13 }
 0x250   : > { %16451 = vst [vmem:[#allocation41_spill] sm:$0xff] %v10608_v22  ;;  %16456 = vst [vmem:[#allocation46_spill] sm:$0xff] %v10624_v27  ;;  %v10644_v31 = vmax.f32 %v1706_v42, 0.0  ;;  %v10660_v53 = vmax.f32 %v1711_v2, 0.0  ;;  %v1716_v42 = vadd.f32 %v9868_v26, %v10180_v36  ;;  %v1721_v36 = vadd.f32 %v10176_v24, %v9868_v26 }
 0x252   : > { %8069 = vmatmul.mubr.msk.f32.gmra.mrb[76].mxu1 %vm1846_vm6, %v10240_v19  ;;  %8133 = vmatmul.mubr.msk.f32.gmra.mrb[108].mxu0 %vm1846_vm6, %v10240_v19  ;;  %16461 = vst [vmem:[#allocation51_spill] sm:$0xff] %v10644_v31  ;;  %16466 = vst [vmem:[#allocation56_spill] sm:$0xff] %v10660_v53  ;;  %v10680_v2 = vmax.f32 %v1716_v42, 0.0  ;;  %v10696_v26 = vmax.f32 %v1721_v36, 0.0  ;;  %v3976_v36 = vld [vmem:[#allocation5 + $0x68] sm:$0xf] }
 0x253   : > { %2265 = vmatprep.mubr.f32.mxu1 %v16425_v13  ;;  %2714 = vmatprep.mubr.f32.mxu0 %v16425_v13 }
 0x254   : > { %16471 = vst [vmem:[#allocation61_spill] sm:$0xff] %v10680_v2  ;;  %16476 = vst [vmem:[#allocation66_spill] sm:$0xff] %v10696_v26 }
 0x256   : > { %8070 = vmatmul.mubr.msk.f32.gmra.mrb[78].mxu1 %vm1846_vm6, %v10258_v34  ;;  %8134 = vmatmul.mubr.msk.f32.gmra.mrb[110].mxu0 %vm1846_vm6, %v10258_v34 }
 0x257   : > { %2271 = vmatprep.mubr.f32.mxu1 %v16425_v13  ;;  %2720 = vmatprep.mubr.f32.mxu0 %v16425_v13 }
 0x25a   : > { %8071 = vmatmul.mubr.msk.f32.gmra.mrb[80].mxu1 %vm1846_vm6, %v10260_v30  ;;  %8135 = vmatmul.mubr.msk.f32.gmra.mrb[112].mxu0 %vm1846_vm6, %v10260_v30 }
 0x25b   : > { %2277 = vmatprep.mubr.f32.mxu1 %v16425_v13  ;;  %2726 = vmatprep.mubr.f32.mxu0 %v16425_v13 }
 0x25e   : > { %8072 = vmatmul.mubr.msk.f32.gmra.mrb[82].mxu1 %vm1846_vm6, %v10278_v33  ;;  %8136 = vmatmul.mubr.msk.f32.gmra.mrb[114].mxu0 %vm1846_vm6, %v10278_v33 }
 0x25f   : > { %2283 = vmatprep.mubr.f32.mxu1 %v16425_v13  ;;  %2732 = vmatprep.mubr.f32.mxu0 %v16425_v13 }
 0x262   : > { %8073 = vmatmul.mubr.msk.f32.gmra.mrb[84].mxu1 %vm1846_vm6, %v10280_v40  ;;  %8137 = vmatmul.mubr.msk.f32.gmra.mrb[116].mxu0 %vm1846_vm6, %v10280_v40 }
 0x263   : > { %2289 = vmatprep.mubr.f32.mxu1 %v16425_v13  ;;  %2738 = vmatprep.mubr.f32.mxu0 %v16425_v13 }
 0x266   : > { %8074 = vmatmul.mubr.msk.f32.gmra.mrb[86].mxu1 %vm1846_vm6, %v10298_v38  ;;  %8138 = vmatmul.mubr.msk.f32.gmra.mrb[118].mxu0 %vm1846_vm6, %v10298_v38 }
 0x267   : > { %2295 = vmatprep.mubr.f32.mxu1 %v16425_v13  ;;  %2744 = vmatprep.mubr.f32.mxu0 %v16425_v13 }
 0x26a   : > { %8075 = vmatmul.mubr.msk.f32.gmra.mrb[88].mxu1 %vm1846_vm6, %v10300_v48  ;;  %8139 = vmatmul.mubr.msk.f32.gmra.mrb[120].mxu0 %vm1846_vm6, %v10300_v48 }
 0x26b   : > { %2301 = vmatprep.mubr.f32.mxu1 %v16425_v13  ;;  %2750 = vmatprep.mubr.f32.mxu0 %v16425_v13 }
 0x26e   : > { %8076 = vmatmul.mubr.msk.f32.gmra.mrb[90].mxu1 %vm1846_vm6, %v10318_v46  ;;  %8140 = vmatmul.mubr.msk.f32.gmra.mrb[122].mxu0 %vm1846_vm6, %v10318_v46 }
 0x26f   : > { %2307 = vmatprep.mubr.f32.mxu1 %v16425_v13  ;;  %2756 = vmatprep.mubr.f32.mxu0 %v16425_v13 }
 0x272   : > { %8077 = vmatmul.mubr.msk.f32.gmra.mrb[92].mxu1 %vm1846_vm6, %v10320_v56  ;;  %8141 = vmatmul.mubr.msk.f32.gmra.mrb[124].mxu0 %vm1846_vm6, %v10320_v56 }
 0x273   : > { %2313 = vmatprep.mubr.f32.mxu1 %v16425_v13  ;;  %2762 = vmatprep.mubr.f32.mxu0 %v16425_v13 }
 0x276   : > { %8078 = vmatmul.mubr.msk.f32.gmra.mrb[94].mxu1 %vm1846_vm6, %v10338_v54  ;;  %8142 = vmatmul.mubr.msk.f32.gmra.mrb[126].mxu0 %vm1846_vm6, %v10338_v54 }
 0x277   : > { %2319 = vmatprep.mubr.f32.mxu1 %v16425_v13  ;;  %2768 = vmatprep.mubr.f32.mxu0 %v16425_v13 }
 0x27a   : > { %8079 = vmatmul.mubr.msk.f32.gmra.mrb[96].mxu1 %vm1846_vm6, %v10340_v0  ;;  %8143 = vmatmul.mubr.msk.f32.gmra.mrb[128].mxu0 %vm1846_vm6, %v10340_v0 }
 0x27b   : > { %2325 = vmatprep.mubr.f32.mxu1 %v16425_v13  ;;  %2774 = vmatprep.mubr.f32.mxu0 %v16425_v13 }
 0x27e   : > { %8080 = vmatmul.mubr.msk.f32.gmra.mrb[98].mxu1 %vm1846_vm6, %v10358_v62  ;;  %8144 = vmatmul.mubr.msk.f32.gmra.mrb[130].mxu0 %vm1846_vm6, %v10358_v62 }
 0x27f   : > { %2331 = vmatprep.mubr.f32.mxu1 %v16425_v13  ;;  %2780 = vmatprep.mubr.f32.mxu0 %v16425_v13 }
 0x282   : > { %8081 = vmatmul.mubr.msk.f32.gmra.mrb[100].mxu1 %vm1846_vm6, %v10360_v8  ;;  %8145 = vmatmul.mubr.msk.f32.gmra.mrb[132].mxu0 %vm1846_vm6, %v10360_v8 }
 0x283   : > { %2337 = vmatprep.mubr.f32.mxu1 %v16425_v13  ;;  %2786 = vmatprep.mubr.f32.mxu0 %v16425_v13 }
 0x286   : > { %8082 = vmatmul.mubr.msk.f32.gmra.mrb[102].mxu1 %vm1846_vm6, %v10378_v3  ;;  %8146 = vmatmul.mubr.msk.f32.gmra.mrb[134].mxu0 %vm1846_vm6, %v10378_v3 }
 0x287   : > { %2343 = vmatprep.mubr.f32.mxu1 %v16425_v13  ;;  %2792 = vmatprep.mubr.f32.mxu0 %v16425_v13 }
 0x28a   : > { %8083 = vmatmul.mubr.msk.f32.gmra.mrb[104].mxu1 %vm1846_vm6, %v10380_v16  ;;  %8147 = vmatmul.mubr.msk.f32.gmra.mrb[136].mxu0 %vm1846_vm6, %v10380_v16 }
 0x28b   : > { %2349 = vmatprep.mubr.f32.mxu1 %v16425_v13  ;;  %2798 = vmatprep.mubr.f32.mxu0 %v16425_v13 }
 0x28e   : > { %8084 = vmatmul.mubr.msk.f32.gmra.mrb[106].mxu1 %vm1846_vm6, %v10398_v12  ;;  %8148 = vmatmul.mubr.msk.f32.gmra.mrb[138].mxu0 %vm1846_vm6, %v10398_v12 }
 0x28f   : > { %2355 = vmatprep.mubr.f32.mxu1 %v16425_v13  ;;  %2804 = vmatprep.mubr.f32.mxu0 %v16425_v13 }
 0x292   : > { %8085 = vmatmul.mubr.msk.f32.gmra.mrb[108].mxu1 %vm1846_vm6, %v10400_v28  ;;  %8149 = vmatmul.mubr.msk.f32.gmra.mrb[140].mxu0 %vm1846_vm6, %v10400_v28 }
 0x293   : > { %2361 = vmatprep.mubr.f32.mxu1 %v16425_v13  ;;  %2810 = vmatprep.mubr.f32.mxu0 %v16425_v13 }
 0x296   : > { %8086 = vmatmul.mubr.msk.f32.gmra.mrb[110].mxu1 %vm1846_vm6, %v10418_v25  ;;  %8150 = vmatmul.mubr.msk.f32.gmra.mrb[142].mxu0 %vm1846_vm6, %v10418_v25 }
 0x297   : > { %2367 = vmatprep.mubr.f32.mxu1 %v16425_v13  ;;  %2816 = vmatprep.mubr.f32.mxu0 %v16425_v13 }
 0x29a   : > { %8087 = vmatmul.mubr.msk.f32.gmra.mrb[112].mxu1 %vm1846_vm6, %v10420_v57  ;;  %8151 = vmatmul.mubr.msk.f32.gmra.mrb[144].mxu0 %vm1846_vm6, %v10420_v57 }
 0x29b   : > { %2373 = vmatprep.mubr.f32.mxu1 %v16425_v13  ;;  %2822 = vmatprep.mubr.f32.mxu0 %v16425_v13 }
 0x29e   : > { %8088 = vmatmul.mubr.msk.f32.gmra.mrb[114].mxu1 %vm1846_vm6, %v10438_v6  ;;  %8152 = vmatmul.mubr.msk.f32.gmra.mrb[146].mxu0 %vm1846_vm6, %v10438_v6 }
 0x29f   : > { %2379 = vmatprep.mubr.f32.mxu1 %v16425_v13  ;;  %2828 = vmatprep.mubr.f32.mxu0 %v16425_v13 }
 0x2a2   : > { %8089 = vmatmul.mubr.msk.f32.gmra.mrb[116].mxu1 %vm1846_vm6, %v10440_v41  ;;  %8153 = vmatmul.mubr.msk.f32.gmra.mrb[148].mxu0 %vm1846_vm6, %v10440_v41 }
 0x2a3   : > { %2385 = vmatprep.mubr.f32.mxu1 %v16425_v13  ;;  %2834 = vmatprep.mubr.f32.mxu0 %v16425_v13 }
 0x2a6   : > { %8090 = vmatmul.mubr.msk.f32.gmra.mrb[118].mxu1 %vm1846_vm6, %v10456_v11  ;;  %8154 = vmatmul.mubr.msk.f32.gmra.mrb[150].mxu0 %vm1846_vm6, %v10456_v11 }
 0x2a7   : > { %2391 = vmatprep.mubr.f32.mxu1 %v16425_v13  ;;  %2840 = vmatprep.mubr.f32.mxu0 %v16425_v13 }
 0x2aa   : > { %8091 = vmatmul.mubr.msk.f32.gmra.mrb[120].mxu1 %vm1846_vm6, %v10468_v14  ;;  %8155 = vmatmul.mubr.msk.f32.gmra.mrb[152].mxu0 %vm1846_vm6, %v10468_v14 }
 0x2ab   : > { %2397 = vmatprep.mubr.f32.mxu1 %v16425_v13  ;;  %2846 = vmatprep.mubr.f32.mxu0 %v16425_v13 }
 0x2ae   : > { %8092 = vmatmul.mubr.msk.f32.gmra.mrb[122].mxu1 %vm1846_vm6, %v10476_v43  ;;  %8156 = vmatmul.mubr.msk.f32.gmra.mrb[154].mxu0 %vm1846_vm6, %v10476_v43 }
 0x2af   : > { %2403 = vmatprep.mubr.f32.mxu1 %v16425_v13  ;;  %2852 = vmatprep.mubr.f32.mxu0 %v16425_v13 }
 0x2b2   : > { %8093 = vmatmul.mubr.msk.f32.gmra.mrb[124].mxu1 %vm1846_vm6, %v10488_v61  ;;  %8157 = vmatmul.mubr.msk.f32.gmra.mrb[156].mxu0 %vm1846_vm6, %v10488_v61 }
 0x2b3   : > { %2409 = vmatprep.mubr.f32.mxu1 %v16425_v13  ;;  %2858 = vmatprep.mubr.f32.mxu0 %v16425_v13 }
 0x2b6   : > { %8094 = vmatmul.mubr.msk.f32.gmra.mrb[126].mxu1 %vm1846_vm6, %v10496_v51  ;;  %8158 = vmatmul.mubr.msk.f32.gmra.mrb[158].mxu0 %vm1846_vm6, %v10496_v51 }
 0x2b7   : > { %2415 = vmatprep.mubr.f32.mxu1 %v16425_v13  ;;  %2864 = vmatprep.mubr.f32.mxu0 %v16425_v13 }
 0x2ba   : > { %8095 = vmatmul.mubr.msk.f32.gmra.mrb[128].mxu1 %vm1846_vm6, %v10508_v1  ;;  %8159 = vmatmul.mubr.msk.f32.gmra.mrb[160].mxu0 %vm1846_vm6, %v10508_v1 }
 0x2bb   : > { %2421 = vmatprep.mubr.f32.mxu1 %v16425_v13  ;;  %2870 = vmatprep.mubr.f32.mxu0 %v16425_v13 }
 0x2bd   : > { %v10520_v51 = vpop.f32.mrb[24].mxu1  ;;  %v10522_v58 = vpop.f32.mrb[56].mxu0 }
 0x2be   : > { %16430 = vst [vmem:[#allocation20_spill] sm:$0xff] %v10520_v51  ;;  %16431 = vst [vmem:[#allocation21_spill] sm:$0xff] %v10522_v58  ;;  %v10524_v21 = vpop.f32.mrb[25].mxu1  ;;  %8096 = vmatmul.mubr.msk.f32.gmra.mrb[130].mxu1 %vm1846_vm6, %v10516_v59  ;;  %v10528_v61 = vpop.f32.mrb[57].mxu0  ;;  %8160 = vmatmul.mubr.msk.f32.gmra.mrb[162].mxu0 %vm1846_vm6, %v10516_v59 }
 0x2bf   : > { %16432 = vst [vmem:[#allocation22_spill] sm:$0xff] %v10524_v21  ;;  %16433 = vst [vmem:[#allocation23_spill] sm:$0xff] %v10528_v61  ;;  %2427 = vmatprep.mubr.f32.mxu1 %v16425_v13  ;;  %2876 = vmatprep.mubr.f32.mxu0 %v16425_v13 }
 0x2c1   : > { %v10538_v58 = vpop.f32.mrb[26].mxu1  ;;  %v10540_v21 = vpop.f32.mrb[58].mxu0 }
 0x2c2   : > { %16434 = vst [vmem:[#allocation24_spill] sm:$0xff] %v10538_v58  ;;  %16435 = vst [vmem:[#allocation25_spill] sm:$0xff] %v10540_v21  ;;  %v10542_v51 = vpop.f32.mrb[27].mxu1  ;;  %8097 = vmatmul.mubr.msk.f32.gmra.mrb[132].mxu1 %vm1846_vm6, %v10536_v50  ;;  %v10546_v61 = vpop.f32.mrb[59].mxu0  ;;  %8161 = vmatmul.mubr.msk.f32.gmra.mrb[164].mxu0 %vm1846_vm6, %v10536_v50 }
 0x2c3   : > { %16436 = vst [vmem:[#allocation26_spill] sm:$0xff] %v10542_v51  ;;  %16437 = vst [vmem:[#allocation27_spill] sm:$0xff] %v10546_v61  ;;  %2433 = vmatprep.mubr.f32.mxu1 %v16425_v13  ;;  %2882 = vmatprep.mubr.f32.mxu0 %v16425_v13 }
 0x2c5   : > { %v10556_v21 = vpop.f32.mrb[28].mxu1  ;;  %v10558_v51 = vpop.f32.mrb[60].mxu0 }
 0x2c6   : > { %16438 = vst [vmem:[#allocation28_spill] sm:$0xff] %v10556_v21  ;;  %16439 = vst [vmem:[#allocation29_spill] sm:$0xff] %v10558_v51  ;;  %v10560_v58 = vpop.f32.mrb[29].mxu1  ;;  %8098 = vmatmul.mubr.msk.f32.gmra.mrb[134].mxu1 %vm1846_vm6, %v10552_v7  ;;  %v10564_v61 = vpop.f32.mrb[61].mxu0  ;;  %8162 = vmatmul.mubr.msk.f32.gmra.mrb[166].mxu0 %vm1846_vm6, %v10552_v7 }
 0x2c7   : > { %16440 = vst [vmem:[#allocation30_spill] sm:$0xff] %v10560_v58  ;;  %16441 = vst [vmem:[#allocation31_spill] sm:$0xff] %v10564_v61  ;;  %2439 = vmatprep.mubr.f32.mxu1 %v16425_v13  ;;  %2888 = vmatprep.mubr.f32.mxu0 %v16425_v13 }
 0x2c9   : > { %v10574_v51 = vpop.f32.mrb[30].mxu1  ;;  %v10576_v58 = vpop.f32.mrb[62].mxu0 }
 0x2ca   : > { %16442 = vst [vmem:[#allocation32_spill] sm:$0xff] %v10574_v51  ;;  %16443 = vst [vmem:[#allocation33_spill] sm:$0xff] %v10576_v58  ;;  %v10578_v21 = vpop.f32.mrb[31].mxu1  ;;  %8099 = vmatmul.mubr.msk.f32.gmra.mrb[136].mxu1 %vm1846_vm6, %v10572_v9  ;;  %v10582_v61 = vpop.f32.mrb[63].mxu0  ;;  %8163 = vmatmul.mubr.msk.f32.gmra.mrb[168].mxu0 %vm1846_vm6, %v10572_v9 }
 0x2cb   : > { %16444 = vst [vmem:[#allocation34_spill] sm:$0xff] %v10578_v21  ;;  %16445 = vst [vmem:[#allocation35_spill] sm:$0xff] %v10582_v61  ;;  %2445 = vmatprep.mubr.f32.mxu1 %v16425_v13  ;;  %2894 = vmatprep.mubr.f32.mxu0 %v16425_v13 }
 0x2cd   : > { %v10592_v58 = vpop.f32.mrb[32].mxu1  ;;  %v10594_v21 = vpop.f32.mrb[64].mxu0 }
 0x2ce   : > { %16447 = vst [vmem:[#allocation37_spill] sm:$0xff] %v10592_v58  ;;  %16448 = vst [vmem:[#allocation38_spill] sm:$0xff] %v10594_v21  ;;  %v10596_v51 = vpop.f32.mrb[33].mxu1  ;;  %8100 = vmatmul.mubr.msk.f32.gmra.mrb[138].mxu1 %vm1846_vm6, %v10588_v15  ;;  %v10600_v61 = vpop.f32.mrb[65].mxu0  ;;  %8164 = vmatmul.mubr.msk.f32.gmra.mrb[170].mxu0 %vm1846_vm6, %v10588_v15 }
 0x2cf   : > { %16449 = vst [vmem:[#allocation39_spill] sm:$0xff] %v10596_v51  ;;  %16450 = vst [vmem:[#allocation40_spill] sm:$0xff] %v10600_v61  ;;  %2451 = vmatprep.mubr.f32.mxu1 %v16425_v13  ;;  %2900 = vmatprep.mubr.f32.mxu0 %v16425_v13 }
 0x2d1   : > { %v10610_v21 = vpop.f32.mrb[34].mxu1  ;;  %v10612_v51 = vpop.f32.mrb[66].mxu0 }
 0x2d2   : > { %16452 = vst [vmem:[#allocation42_spill] sm:$0xff] %v10610_v21  ;;  %16453 = vst [vmem:[#allocation43_spill] sm:$0xff] %v10612_v51  ;;  %v10614_v58 = vpop.f32.mrb[35].mxu1  ;;  %8101 = vmatmul.mubr.msk.f32.gmra.mrb[140].mxu1 %vm1846_vm6, %v10608_v22  ;;  %v10618_v61 = vpop.f32.mrb[67].mxu0  ;;  %8165 = vmatmul.mubr.msk.f32.gmra.mrb[172].mxu0 %vm1846_vm6, %v10608_v22 }
 0x2d3   : > { %16454 = vst [vmem:[#allocation44_spill] sm:$0xff] %v10614_v58  ;;  %16455 = vst [vmem:[#allocation45_spill] sm:$0xff] %v10618_v61  ;;  %2457 = vmatprep.mubr.f32.mxu1 %v16425_v13  ;;  %2906 = vmatprep.mubr.f32.mxu0 %v16425_v13 }
 0x2d5   : > { %v10628_v51 = vpop.f32.mrb[36].mxu1  ;;  %v10630_v58 = vpop.f32.mrb[68].mxu0 }
 0x2d6   : > { %16457 = vst [vmem:[#allocation47_spill] sm:$0xff] %v10628_v51  ;;  %16458 = vst [vmem:[#allocation48_spill] sm:$0xff] %v10630_v58  ;;  %v10632_v21 = vpop.f32.mrb[37].mxu1  ;;  %8102 = vmatmul.mubr.msk.f32.gmra.mrb[142].mxu1 %vm1846_vm6, %v10624_v27  ;;  %v10636_v61 = vpop.f32.mrb[69].mxu0  ;;  %8166 = vmatmul.mubr.msk.f32.gmra.mrb[174].mxu0 %vm1846_vm6, %v10624_v27 }
 0x2d7   : > { %16459 = vst [vmem:[#allocation49_spill] sm:$0xff] %v10632_v21  ;;  %16460 = vst [vmem:[#allocation50_spill] sm:$0xff] %v10636_v61  ;;  %2463 = vmatprep.mubr.f32.mxu1 %v16425_v13  ;;  %2912 = vmatprep.mubr.f32.mxu0 %v16425_v13 }
 0x2d9   : > { %v10646_v58 = vpop.f32.mrb[38].mxu1  ;;  %v10648_v21 = vpop.f32.mrb[70].mxu0 }
 0x2da   : > { %16462 = vst [vmem:[#allocation52_spill] sm:$0xff] %v10646_v58  ;;  %16463 = vst [vmem:[#allocation53_spill] sm:$0xff] %v10648_v21  ;;  %v10650_v51 = vpop.f32.mrb[39].mxu1  ;;  %8103 = vmatmul.mubr.msk.f32.gmra.mrb[144].mxu1 %vm1846_vm6, %v10644_v31  ;;  %v10654_v61 = vpop.f32.mrb[71].mxu0  ;;  %8167 = vmatmul.mubr.msk.f32.gmra.mrb[176].mxu0 %vm1846_vm6, %v10644_v31 }
 0x2db   : > { %16464 = vst [vmem:[#allocation54_spill] sm:$0xff] %v10650_v51  ;;  %16465 = vst [vmem:[#allocation55_spill] sm:$0xff] %v10654_v61  ;;  %2469 = vmatprep.mubr.f32.mxu1 %v16425_v13  ;;  %2918 = vmatprep.mubr.f32.mxu0 %v16425_v13 }
 0x2dd   : > { %v10664_v21 = vpop.f32.mrb[40].mxu1  ;;  %v10666_v51 = vpop.f32.mrb[72].mxu0 }
 0x2de   : > { %16467 = vst [vmem:[#allocation57_spill] sm:$0xff] %v10664_v21  ;;  %16468 = vst [vmem:[#allocation58_spill] sm:$0xff] %v10666_v51  ;;  %v10668_v58 = vpop.f32.mrb[41].mxu1  ;;  %8104 = vmatmul.mubr.msk.f32.gmra.mrb[146].mxu1 %vm1846_vm6, %v10660_v53  ;;  %v10672_v61 = vpop.f32.mrb[73].mxu0  ;;  %8168 = vmatmul.mubr.msk.f32.gmra.mrb[178].mxu0 %vm1846_vm6, %v10660_v53 }
 0x2df   : > { %16469 = vst [vmem:[#allocation59_spill] sm:$0xff] %v10668_v58  ;;  %16470 = vst [vmem:[#allocation60_spill] sm:$0xff] %v10672_v61  ;;  %2475 = vmatprep.mubr.f32.mxu1 %v16425_v13  ;;  %2924 = vmatprep.mubr.f32.mxu0 %v16425_v13 }
 0x2e1   : > { %v10682_v51 = vpop.f32.mrb[42].mxu1  ;;  %v10684_v58 = vpop.f32.mrb[74].mxu0 }
 0x2e2   : > { %16472 = vst [vmem:[#allocation62_spill] sm:$0xff] %v10682_v51  ;;  %16473 = vst [vmem:[#allocation63_spill] sm:$0xff] %v10684_v58  ;;  %v10686_v21 = vpop.f32.mrb[43].mxu1  ;;  %8105 = vmatmul.mubr.msk.f32.gmra.mrb[148].mxu1 %vm1846_vm6, %v10680_v2  ;;  %v10690_v61 = vpop.f32.mrb[75].mxu0  ;;  %8169 = vmatmul.mubr.msk.f32.gmra.mrb[180].mxu0 %vm1846_vm6, %v10680_v2  ;;  %v3973_v51 = vld [vmem:[#allocation5 + $0x50] sm:$0xf] }
 0x2e3   : > { %16474 = vst [vmem:[#allocation64_spill] sm:$0xff] %v10686_v21  ;;  %16475 = vst [vmem:[#allocation65_spill] sm:$0xff] %v10690_v61  ;;  %2481 = vmatprep.mubr.f32.mxu1 %v16425_v13  ;;  %2930 = vmatprep.mubr.f32.mxu0 %v16425_v13  ;;  %v3971_v61 = vld [vmem:[#allocation5 + $0x40] sm:$0xf]  ;;  %v9093_v31 = vpack.c.bf16 %v3973_v51, %v9960_v4 }
 0x2e4   : > { %v3963_v2 = vld [vmem:[#allocation5] sm:$0xff] }
 0x2e5   : > { %v10698_v24 = vpop.f32.mrb[44].mxu1  ;;  %v10700_v42 = vpop.f32.mrb[76].mxu0  ;;  %v9087_v53 = vpack.c.bf16 %v3971_v61, %v3963_v2 }
 0x2e6   : > { %16477 = vst [vmem:[#allocation67_spill] sm:$0xff] %v10698_v24  ;;  %16478 = vst [vmem:[#allocation68_spill] sm:$0xff] %v10700_v42  ;;  %v10702_v58 = vpop.f32.mrb[45].mxu1  ;;  %8106 = vmatmul.mubr.msk.f32.gmra.mrb[150].mxu1 %vm1846_vm6, %v10696_v26  ;;  %v10706_v21 = vpop.f32.mrb[77].mxu0  ;;  %8170 = vmatmul.mubr.msk.f32.gmra.mrb[182].mxu0 %vm1846_vm6, %v10696_v26  ;;  %v3978_v24 = vld [vmem:[#allocation5 + $0x78] sm:$0xf] }
 0x2e7   : > { %16479 = vst [vmem:[#allocation69_spill] sm:$0xff] %v10702_v58  ;;  %16480 = vst [vmem:[#allocation70_spill] sm:$0xff] %v10706_v21  ;;  %3001 = vmatprep.mubr.f32.mxu1 %v16425_v13  ;;  %3450 = vmatprep.mubr.f32.mxu0 %v16425_v13  ;;  %v3968_v21 = vld [vmem:[#allocation5 + $0x28] sm:$0xff]  ;;  %v9102_v15 = vpack.c.bf16 %v3978_v24, %v9992_v20 }
 0x2e8   : > { %v9096_v22 = vpack.c.bf16 %v3976_v36, %v3968_v21 }
 0x2e9   : > { %v10712_v42 = vpop.f32.mrb[46].mxu1  ;;  %v10714_v58 = vpop.f32.mrb[78].mxu0 }
 0x2ea   : > { %v10717_v27 = vpop.f32.mrb[47].mxu1  ;;  %v10719_v26 = vpop.f32.mrb[79].mxu0  ;;  %8171 = vmatmul.mubr.msk.f32.vlgmr.msra.gmra.mrb[152].mxu1 %vm1846_vm6, %v9884_v37  ;;  %8235 = vmatmul.mubr.msk.f32.vlgmr.msra.gmra.mrb[184].mxu0 %vm1846_vm6, %v9884_v37 }
 0x2eb   : > { %9089 = vmatpush1.bf16.msk.msra.mxu1 %vm9887_vm8, %v9087_v53  ;;  %9095 = vmatpush1.bf16.msk.msra.mxu0 %vm9887_vm8, %v9093_v31 }
 0x2ec   : > { %9098 = vmatprep.subr.msk.bf16.mxu1 %vm9887_vm8, %v9096_v22  ;;  %9104 = vmatprep.subr.msk.bf16.mxu0 %vm9887_vm8, %v9102_v15 }
 0x2ed   : > { %v10734_v4 = vpop.f32.mrb[48].mxu1  ;;  %v10736_v61 = vpop.f32.mrb[80].mxu0  ;;  %3007 = vmatprep.mubr.f32.mxu1 %v16425_v13  ;;  %3456 = vmatprep.mubr.f32.mxu0 %v16425_v13 }
 0x2ee   : > { %v10740_v37 = vpop.f32.mrb[49].mxu1  ;;  %v10742_v20 = vpop.f32.mrb[81].mxu0  ;;  %8172 = vmatmul.mubr.msk.f32.gmra.mrb[154].mxu1 %vm1846_vm6, %v9897_v44  ;;  %8236 = vmatmul.mubr.msk.f32.gmra.mrb[186].mxu0 %vm1846_vm6, %v9897_v44 }
 0x2ef   : > { %3013 = vmatprep.mubr.f32.mxu1 %v16425_v13  ;;  %3462 = vmatprep.mubr.f32.mxu0 %v16425_v13 }
 0x2f1   : > { %v10750_v51 = vpop.f32.mrb[50].mxu1  ;;  %v10752_v21 = vpop.f32.mrb[82].mxu0 }
 0x2f2   : > { %v10754_v15 = vpop.f32.mrb[51].mxu1  ;;  %v10756_v22 = vpop.f32.mrb[83].mxu0  ;;  %8173 = vmatmul.mubr.msk.f32.gmra.mrb[156].mxu1 %vm1846_vm6, %v9902_v47  ;;  %8237 = vmatmul.mubr.msk.f32.gmra.mrb[188].mxu0 %vm1846_vm6, %v9902_v47 }
 0x2f3   : > { %3019 = vmatprep.mubr.f32.mxu1 %v16425_v13  ;;  %3468 = vmatprep.mubr.f32.mxu0 %v16425_v13 }
 0x2f5   : > { %v10764_v44 = vpop.f32.mrb[52].mxu1  ;;  %v10766_v31 = vpop.f32.mrb[84].mxu0 }
 0x2f6   : > { %16481 = vst [vmem:[#allocation71_spill] sm:$0xff] %v10766_v31  ;;  %v10768_v53 = vpop.f32.mrb[53].mxu1  ;;  %v10770_v2 = vpop.f32.mrb[85].mxu0  ;;  %8174 = vmatmul.mubr.msk.f32.gmra.mrb[158].mxu1 %vm1846_vm6, %v9918_v52  ;;  %8238 = vmatmul.mubr.msk.f32.gmra.mrb[190].mxu0 %vm1846_vm6, %v9918_v52 }
 0x2f7   : > { %16482 = vst [vmem:[#allocation72_spill] sm:$0xff] %v10770_v2  ;;  %3025 = vmatprep.mubr.f32.mxu1 %v16425_v13  ;;  %3474 = vmatprep.mubr.f32.mxu0 %v16425_v13 }
 0x2f9   : > { %v10778_v47 = vpop.f32.mrb[54].mxu1  ;;  %v10780_v24 = vpop.f32.mrb[86].mxu0 }
 0x2fa   : > { %16483 = vst [vmem:[#allocation73_spill] sm:$0xff] %v10778_v47  ;;  %16484 = vst [vmem:[#allocation74_spill] sm:$0xff] %v10780_v24  ;;  %v10782_v36 = vpop.f32.mrb[55].mxu1  ;;  %v10784_v31 = vpop.f32.mrb[87].mxu0  ;;  %8175 = vmatmul.mubr.msk.f32.gmra.mrb[160].mxu1 %vm1846_vm6, %v9920_v55  ;;  %8239 = vmatmul.mubr.msk.f32.gmra.mrb[192].mxu0 %vm1846_vm6, %v9920_v55 }
 0x2fb   : > { %16485 = vst [vmem:[#allocation75_spill] sm:$0xff] %v10784_v31  ;;  %3031 = vmatprep.mubr.f32.mxu1 %v16425_v13  ;;  %3480 = vmatprep.mubr.f32.mxu0 %v16425_v13 }
 0x2fd   : > { %v10792_v52 = vpop.f32.mrb[56].mxu1  ;;  %v10794_v2 = vpop.f32.mrb[88].mxu0 }
 0x2fe   : > { %16486 = vst [vmem:[#allocation76_spill] sm:$0xff] %v10792_v52  ;;  %16487 = vst [vmem:[#allocation77_spill] sm:$0xff] %v10794_v2  ;;  %v10796_v47 = vpop.f32.mrb[57].mxu1  ;;  %v10798_v24 = vpop.f32.mrb[89].mxu0  ;;  %8176 = vmatmul.mubr.msk.f32.gmra.mrb[162].mxu1 %vm1846_vm6, %v9936_v60  ;;  %8240 = vmatmul.mubr.msk.f32.gmra.mrb[194].mxu0 %vm1846_vm6, %v9936_v60 }
 0x2ff   : > { %16488 = vst [vmem:[#allocation78_spill] sm:$0xff] %v10798_v24  ;;  %3037 = vmatprep.mubr.f32.mxu1 %v16425_v13  ;;  %3486 = vmatprep.mubr.f32.mxu0 %v16425_v13 }
 0x301   : > { %v10806_v55 = vpop.f32.mrb[58].mxu1  ;;  %v10808_v31 = vpop.f32.mrb[90].mxu0 }
 0x302   : > { %16489 = vst [vmem:[#allocation79_spill] sm:$0xff] %v10806_v55  ;;  %16490 = vst [vmem:[#allocation80_spill] sm:$0xff] %v10808_v31  ;;  %v10810_v52 = vpop.f32.mrb[59].mxu1  ;;  %v10812_v2 = vpop.f32.mrb[91].mxu0  ;;  %8177 = vmatmul.mubr.msk.f32.gmra.mrb[164].mxu1 %vm1846_vm6, %v9940_v63  ;;  %8241 = vmatmul.mubr.msk.f32.gmra.mrb[196].mxu0 %vm1846_vm6, %v9940_v63 }
 0x303   : > { %16491 = vst [vmem:[#allocation81_spill] sm:$0xff] %v10812_v2  ;;  %3043 = vmatprep.mubr.f32.mxu1 %v16425_v13  ;;  %3492 = vmatprep.mubr.f32.mxu0 %v16425_v13 }
 0x305   : > { %v10820_v60 = vpop.f32.mrb[60].mxu1  ;;  %v10822_v24 = vpop.f32.mrb[92].mxu0 }
 0x306   : > { %16492 = vst [vmem:[#allocation82_spill] sm:$0xff] %v10820_v60  ;;  %16493 = vst [vmem:[#allocation83_spill] sm:$0xff] %v10822_v24  ;;  %v10824_v55 = vpop.f32.mrb[61].mxu1  ;;  %v10826_v31 = vpop.f32.mrb[93].mxu0  ;;  %8178 = vmatmul.mubr.msk.f32.gmra.mrb[166].mxu1 %vm1846_vm6, %v9962_v5  ;;  %8242 = vmatmul.mubr.msk.f32.gmra.mrb[198].mxu0 %vm1846_vm6, %v9962_v5 }
 0x307   : > { %16494 = vst [vmem:[#allocation84_spill] sm:$0xff] %v10826_v31  ;;  %3049 = vmatprep.mubr.f32.mxu1 %v16425_v13  ;;  %3498 = vmatprep.mubr.f32.mxu0 %v16425_v13 }
 0x309   : > { %v10834_v63 = vpop.f32.mrb[62].mxu1  ;;  %v10836_v2 = vpop.f32.mrb[94].mxu0 }
 0x30a   : > { %16495 = vst [vmem:[#allocation85_spill] sm:$0xff] %v10834_v63  ;;  %16496 = vst [vmem:[#allocation86_spill] sm:$0xff] %v10836_v2  ;;  %v10838_v60 = vpop.f32.mrb[63].mxu1  ;;  %v10840_v24 = vpop.f32.mrb[95].mxu0  ;;  %8179 = vmatmul.mubr.msk.f32.gmra.mrb[168].mxu1 %vm1846_vm6, %v9968_v10  ;;  %8243 = vmatmul.mubr.msk.f32.gmra.mrb[200].mxu0 %vm1846_vm6, %v9968_v10 }
 0x30b   : > { %16497 = vst [vmem:[#allocation87_spill] sm:$0xff] %v10840_v24  ;;  %3055 = vmatprep.mubr.f32.mxu1 %v16425_v13  ;;  %3504 = vmatprep.mubr.f32.mxu0 %v16425_v13 }
 0x30d   : > { %v10848_v5 = vpop.f32.mrb[64].mxu1  ;;  %v10850_v31 = vpop.f32.mrb[96].mxu0 }
 0x30e   : > { %16498 = vst [vmem:[#allocation88_spill] sm:$0xff] %v10848_v5  ;;  %16499 = vst [vmem:[#allocation89_spill] sm:$0xff] %v10850_v31  ;;  %v10852_v63 = vpop.f32.mrb[65].mxu1  ;;  %v10854_v2 = vpop.f32.mrb[97].mxu0  ;;  %8180 = vmatmul.mubr.msk.f32.gmra.mrb[170].mxu1 %vm1846_vm6, %v9988_v18  ;;  %8244 = vmatmul.mubr.msk.f32.gmra.mrb[202].mxu0 %vm1846_vm6, %v9988_v18 }
 0x30f   : > { %16500 = vst [vmem:[#allocation90_spill] sm:$0xff] %v10854_v2  ;;  %3061 = vmatprep.mubr.f32.mxu1 %v16425_v13  ;;  %3510 = vmatprep.mubr.f32.mxu0 %v16425_v13 }
 0x311   : > { %v10862_v10 = vpop.f32.mrb[66].mxu1  ;;  %v10864_v24 = vpop.f32.mrb[98].mxu0 }
 0x312   : > { %16501 = vst [vmem:[#allocation91_spill] sm:$0xff] %v10862_v10  ;;  %16502 = vst [vmem:[#allocation92_spill] sm:$0xff] %v10864_v24  ;;  %v10866_v5 = vpop.f32.mrb[67].mxu1  ;;  %v10868_v31 = vpop.f32.mrb[99].mxu0  ;;  %8181 = vmatmul.mubr.msk.f32.gmra.mrb[172].mxu1 %vm1846_vm6, %v9996_v23  ;;  %8245 = vmatmul.mubr.msk.f32.gmra.mrb[204].mxu0 %vm1846_vm6, %v9996_v23 }
 0x313   : > { %16503 = vst [vmem:[#allocation93_spill] sm:$0xff] %v10868_v31  ;;  %3067 = vmatprep.mubr.f32.mxu1 %v16425_v13  ;;  %3516 = vmatprep.mubr.f32.mxu0 %v16425_v13 }
 0x315   : > { %v10876_v18 = vpop.f32.mrb[68].mxu1  ;;  %v10878_v2 = vpop.f32.mrb[100].mxu0 }
 0x316   : > { %16504 = vst [vmem:[#allocation94_spill] sm:$0xff] %v10876_v18  ;;  %16505 = vst [vmem:[#allocation95_spill] sm:$0xff] %v10878_v2  ;;  %v10880_v10 = vpop.f32.mrb[69].mxu1  ;;  %v10882_v24 = vpop.f32.mrb[101].mxu0  ;;  %8182 = vmatmul.mubr.msk.f32.gmra.mrb[174].mxu1 %vm1846_vm6, %v10018_v32  ;;  %8246 = vmatmul.mubr.msk.f32.gmra.mrb[206].mxu0 %vm1846_vm6, %v10018_v32 }
 0x317   : > { %16506 = vst [vmem:[#allocation96_spill] sm:$0xff] %v10882_v24  ;;  %3073 = vmatprep.mubr.f32.mxu1 %v16425_v13  ;;  %3522 = vmatprep.mubr.f32.mxu0 %v16425_v13 }
 0x319   : > { %v10890_v23 = vpop.f32.mrb[70].mxu1  ;;  %v10892_v31 = vpop.f32.mrb[102].mxu0 }
 0x31a   : > { %16507 = vst [vmem:[#allocation97_spill] sm:$0xff] %v10890_v23  ;;  %16508 = vst [vmem:[#allocation98_spill] sm:$0xff] %v10892_v31  ;;  %v10894_v18 = vpop.f32.mrb[71].mxu1  ;;  %v10896_v2 = vpop.f32.mrb[103].mxu0  ;;  %8183 = vmatmul.mubr.msk.f32.gmra.mrb[176].mxu1 %vm1846_vm6, %v10024_v35  ;;  %8247 = vmatmul.mubr.msk.f32.gmra.mrb[208].mxu0 %vm1846_vm6, %v10024_v35 }
 0x31b   : > { %16509 = vst [vmem:[#allocation99_spill] sm:$0xff] %v10896_v2  ;;  %3079 = vmatprep.mubr.f32.mxu1 %v16425_v13  ;;  %3528 = vmatprep.mubr.f32.mxu0 %v16425_v13 }
 0x31d   : > { %v10904_v32 = vpop.f32.mrb[72].mxu1  ;;  %v10906_v24 = vpop.f32.mrb[104].mxu0 }
 0x31e   : > { %16510 = vst [vmem:[#allocation100_spill] sm:$0xff] %v10904_v32  ;;  %16511 = vst [vmem:[#allocation101_spill] sm:$0xff] %v10906_v24  ;;  %v10908_v23 = vpop.f32.mrb[73].mxu1  ;;  %v10910_v31 = vpop.f32.mrb[105].mxu0  ;;  %8184 = vmatmul.mubr.msk.f32.gmra.mrb[178].mxu1 %vm1846_vm6, %v10050_v45  ;;  %8248 = vmatmul.mubr.msk.f32.gmra.mrb[210].mxu0 %vm1846_vm6, %v10050_v45 }
 0x31f   : > { %16512 = vst [vmem:[#allocation102_spill] sm:$0xff] %v10908_v23  ;;  %16513 = vst [vmem:[#allocation103_spill] sm:$0xff] %v10910_v31  ;;  %3085 = vmatprep.mubr.f32.mxu1 %v16425_v13  ;;  %3534 = vmatprep.mubr.f32.mxu0 %v16425_v13  ;;  %v16518_v23 = vld [vmem:[#allocation9_spill] sm:$0xff] }
 0x321   : > { %v10918_v35 = vpop.f32.mrb[74].mxu1  ;;  %v10920_v2 = vpop.f32.mrb[106].mxu0 }
 0x322   : > { %16514 = vst [vmem:[#allocation104_spill] sm:$0xff] %v10918_v35  ;;  %16515 = vst [vmem:[#allocation105_spill] sm:$0xff] %v10920_v2  ;;  %v10922_v32 = vpop.f32.mrb[75].mxu1  ;;  %v10924_v24 = vpop.f32.mrb[107].mxu0  ;;  %8185 = vmatmul.mubr.msk.f32.gmra.mrb[180].mxu1 %vm1846_vm6, %v16518_v23  ;;  %8249 = vmatmul.mubr.msk.f32.gmra.mrb[212].mxu0 %vm1846_vm6, %v16518_v23 }
 0x323   : > { %16516 = vst [vmem:[#allocation106_spill] sm:$0xff] %v10922_v32  ;;  %16517 = vst [vmem:[#allocation107_spill] sm:$0xff] %v10924_v24  ;;  %3091 = vmatprep.mubr.f32.mxu1 %v16425_v13  ;;  %3540 = vmatprep.mubr.f32.mxu0 %v16425_v13  ;;  %v16523_v32 = vld [vmem:[#allocation10_spill] sm:$0xff] }
 0x325   : > { %v10932_v45 = vpop.f32.mrb[76].mxu1  ;;  %v10934_v31 = vpop.f32.mrb[108].mxu0 }
 0x326   : > { %16519 = vst [vmem:[#allocation9_spill] sm:$0xff] %v10932_v45  ;;  %16520 = vst [vmem:[#allocation108_spill] sm:$0xff] %v10934_v31  ;;  %v10936_v35 = vpop.f32.mrb[77].mxu1  ;;  %v10938_v2 = vpop.f32.mrb[109].mxu0  ;;  %8186 = vmatmul.mubr.msk.f32.gmra.mrb[182].mxu1 %vm1846_vm6, %v16523_v32  ;;  %8250 = vmatmul.mubr.msk.f32.gmra.mrb[214].mxu0 %vm1846_vm6, %v16523_v32 }
 0x327   : > { %16521 = vst [vmem:[#allocation109_spill] sm:$0xff] %v10936_v35  ;;  %16522 = vst [vmem:[#allocation110_spill] sm:$0xff] %v10938_v2  ;;  %3097 = vmatprep.mubr.f32.mxu1 %v16425_v13  ;;  %3546 = vmatprep.mubr.f32.mxu0 %v16425_v13  ;;  %v16528_v35 = vld [vmem:[#allocation11_spill] sm:$0xff] }
 0x329   : > { %v10946_v23 = vpop.f32.mrb[78].mxu1  ;;  %v10948_v24 = vpop.f32.mrb[110].mxu0 }
 0x32a   : > { %16524 = vst [vmem:[#allocation10_spill] sm:$0xff] %v10946_v23  ;;  %16525 = vst [vmem:[#allocation111_spill] sm:$0xff] %v10948_v24  ;;  %v10950_v45 = vpop.f32.mrb[79].mxu1  ;;  %v10952_v31 = vpop.f32.mrb[111].mxu0  ;;  %8187 = vmatmul.mubr.msk.f32.gmra.mrb[184].mxu1 %vm1846_vm6, %v16528_v35  ;;  %8251 = vmatmul.mubr.msk.f32.gmra.mrb[216].mxu0 %vm1846_vm6, %v16528_v35 }
 0x32b   : > { %16526 = vst [vmem:[#allocation112_spill] sm:$0xff] %v10950_v45  ;;  %16527 = vst [vmem:[#allocation113_spill] sm:$0xff] %v10952_v31  ;;  %3103 = vmatprep.mubr.f32.mxu1 %v16425_v13  ;;  %3552 = vmatprep.mubr.f32.mxu0 %v16425_v13  ;;  %v16533_v45 = vld [vmem:[#allocation12_spill] sm:$0xff] }
 0x32d   : > { %v10960_v32 = vpop.f32.mrb[80].mxu1  ;;  %v10962_v2 = vpop.f32.mrb[112].mxu0 }
 0x32e   : > { %16529 = vst [vmem:[#allocation11_spill] sm:$0xff] %v10960_v32  ;;  %16530 = vst [vmem:[#allocation114_spill] sm:$0xff] %v10962_v2  ;;  %v10964_v23 = vpop.f32.mrb[81].mxu1  ;;  %v10966_v24 = vpop.f32.mrb[113].mxu0  ;;  %8188 = vmatmul.mubr.msk.f32.gmra.mrb[186].mxu1 %vm1846_vm6, %v16533_v45  ;;  %8252 = vmatmul.mubr.msk.f32.gmra.mrb[218].mxu0 %vm1846_vm6, %v16533_v45 }
 0x32f   : > { %16531 = vst [vmem:[#allocation115_spill] sm:$0xff] %v10964_v23  ;;  %16532 = vst [vmem:[#allocation116_spill] sm:$0xff] %v10966_v24  ;;  %3109 = vmatprep.mubr.f32.mxu1 %v16425_v13  ;;  %3558 = vmatprep.mubr.f32.mxu0 %v16425_v13  ;;  %v16538_v23 = vld [vmem:[#allocation13_spill] sm:$0xff] }
 0x331   : > { %v10974_v35 = vpop.f32.mrb[82].mxu1  ;;  %v10976_v31 = vpop.f32.mrb[114].mxu0 }
 0x332   : > { %16534 = vst [vmem:[#allocation12_spill] sm:$0xff] %v10974_v35  ;;  %16535 = vst [vmem:[#allocation117_spill] sm:$0xff] %v10976_v31  ;;  %v10978_v32 = vpop.f32.mrb[83].mxu1  ;;  %v10980_v2 = vpop.f32.mrb[115].mxu0  ;;  %8189 = vmatmul.mubr.msk.f32.gmra.mrb[188].mxu1 %vm1846_vm6, %v16538_v23  ;;  %8253 = vmatmul.mubr.msk.f32.gmra.mrb[220].mxu0 %vm1846_vm6, %v16538_v23 }
 0x333   : > { %16536 = vst [vmem:[#allocation118_spill] sm:$0xff] %v10978_v32  ;;  %16537 = vst [vmem:[#allocation119_spill] sm:$0xff] %v10980_v2  ;;  %3115 = vmatprep.mubr.f32.mxu1 %v16425_v13  ;;  %3564 = vmatprep.mubr.f32.mxu0 %v16425_v13  ;;  %v16543_v32 = vld [vmem:[#allocation14_spill] sm:$0xff] }
 0x335   : > { %v10988_v45 = vpop.f32.mrb[84].mxu1  ;;  %v10990_v24 = vpop.f32.mrb[116].mxu0 }
 0x336   : > { %16539 = vst [vmem:[#allocation13_spill] sm:$0xff] %v10988_v45  ;;  %16540 = vst [vmem:[#allocation120_spill] sm:$0xff] %v10990_v24  ;;  %v10992_v35 = vpop.f32.mrb[85].mxu1  ;;  %v10994_v31 = vpop.f32.mrb[117].mxu0  ;;  %8190 = vmatmul.mubr.msk.f32.gmra.mrb[190].mxu1 %vm1846_vm6, %v16543_v32  ;;  %8254 = vmatmul.mubr.msk.f32.gmra.mrb[222].mxu0 %vm1846_vm6, %v16543_v32 }
 0x337   : > { %16541 = vst [vmem:[#allocation121_spill] sm:$0xff] %v10992_v35  ;;  %16542 = vst [vmem:[#allocation122_spill] sm:$0xff] %v10994_v31  ;;  %3121 = vmatprep.mubr.f32.mxu1 %v16425_v13  ;;  %3570 = vmatprep.mubr.f32.mxu0 %v16425_v13  ;;  %v16548_v35 = vld [vmem:[#allocation15_spill] sm:$0xff] }
 0x339   : > { %v11002_v23 = vpop.f32.mrb[86].mxu1  ;;  %v11004_v2 = vpop.f32.mrb[118].mxu0 }
 0x33a   : > { %16544 = vst [vmem:[#allocation14_spill] sm:$0xff] %v11002_v23  ;;  %16545 = vst [vmem:[#allocation123_spill] sm:$0xff] %v11004_v2  ;;  %v11006_v45 = vpop.f32.mrb[87].mxu1  ;;  %v11008_v24 = vpop.f32.mrb[119].mxu0  ;;  %8191 = vmatmul.mubr.msk.f32.gmra.mrb[192].mxu1 %vm1846_vm6, %v16548_v35  ;;  %8255 = vmatmul.mubr.msk.f32.gmra.mrb[224].mxu0 %vm1846_vm6, %v16548_v35 }
 0x33b   : > { %16546 = vst [vmem:[#allocation124_spill] sm:$0xff] %v11006_v45  ;;  %16547 = vst [vmem:[#allocation125_spill] sm:$0xff] %v11008_v24  ;;  %3127 = vmatprep.mubr.f32.mxu1 %v16425_v13  ;;  %3576 = vmatprep.mubr.f32.mxu0 %v16425_v13  ;;  %v16553_v45 = vld [vmem:[#allocation16_spill] sm:$0xff] }
 0x33d   : > { %v11016_v32 = vpop.f32.mrb[88].mxu1  ;;  %v11018_v31 = vpop.f32.mrb[120].mxu0 }
 0x33e   : > { %16549 = vst [vmem:[#allocation15_spill] sm:$0xff] %v11016_v32  ;;  %16550 = vst [vmem:[#allocation126_spill] sm:$0xff] %v11018_v31  ;;  %v11020_v23 = vpop.f32.mrb[89].mxu1  ;;  %v11022_v2 = vpop.f32.mrb[121].mxu0  ;;  %8192 = vmatmul.mubr.msk.f32.gmra.mrb[194].mxu1 %vm1846_vm6, %v16553_v45  ;;  %8256 = vmatmul.mubr.msk.f32.gmra.mrb[226].mxu0 %vm1846_vm6, %v16553_v45 }
 0x33f   : > { %16551 = vst [vmem:[#allocation127_spill] sm:$0xff] %v11020_v23  ;;  %16552 = vst [vmem:[#allocation128_spill] sm:$0xff] %v11022_v2  ;;  %3133 = vmatprep.mubr.f32.mxu1 %v16425_v13  ;;  %3582 = vmatprep.mubr.f32.mxu0 %v16425_v13 }
 0x341   : > { %v11030_v35 = vpop.f32.mrb[90].mxu1  ;;  %v11032_v24 = vpop.f32.mrb[122].mxu0 }
 0x342   : > { %16554 = vst [vmem:[#allocation16_spill] sm:$0xff] %v11030_v35  ;;  %16555 = vst [vmem:[#allocation129_spill] sm:$0xff] %v11032_v24  ;;  %v11034_v32 = vpop.f32.mrb[91].mxu1  ;;  %v11036_v31 = vpop.f32.mrb[123].mxu0  ;;  %8193 = vmatmul.mubr.msk.f32.gmra.mrb[196].mxu1 %vm1846_vm6, %v10196_v49  ;;  %8257 = vmatmul.mubr.msk.f32.gmra.mrb[228].mxu0 %vm1846_vm6, %v10196_v49 }
 0x343   : > { %16556 = vst [vmem:[#allocation130_spill] sm:$0xff] %v11034_v32  ;;  %16557 = vst [vmem:[#allocation131_spill] sm:$0xff] %v11036_v31  ;;  %3139 = vmatprep.mubr.f32.mxu1 %v16425_v13  ;;  %3588 = vmatprep.mubr.f32.mxu0 %v16425_v13  ;;  %v16562_v32 = vld [vmem:[#allocation17_spill] sm:$0xff] }
 0x345   : > { %v11044_v45 = vpop.f32.mrb[92].mxu1  ;;  %v11046_v2 = vpop.f32.mrb[124].mxu0 }
 0x346   : > { %16558 = vst [vmem:[#allocation132_spill] sm:$0xff] %v11044_v45  ;;  %16559 = vst [vmem:[#allocation133_spill] sm:$0xff] %v11046_v2  ;;  %v11048_v35 = vpop.f32.mrb[93].mxu1  ;;  %v11050_v24 = vpop.f32.mrb[125].mxu0  ;;  %8194 = vmatmul.mubr.msk.f32.gmra.mrb[198].mxu1 %vm1846_vm6, %v16562_v32  ;;  %8258 = vmatmul.mubr.msk.f32.gmra.mrb[230].mxu0 %vm1846_vm6, %v16562_v32 }
 0x347   : > { %16560 = vst [vmem:[#allocation134_spill] sm:$0xff] %v11048_v35  ;;  %16561 = vst [vmem:[#allocation135_spill] sm:$0xff] %v11050_v24  ;;  %3145 = vmatprep.mubr.f32.mxu1 %v16425_v13  ;;  %3594 = vmatprep.mubr.f32.mxu0 %v16425_v13 }
 0x349   : > { %v11058_v49 = vpop.f32.mrb[94].mxu1  ;;  %v11060_v31 = vpop.f32.mrb[126].mxu0 }
 0x34a   : > { %16563 = vst [vmem:[#allocation17_spill] sm:$0xff] %v11058_v49  ;;  %16564 = vst [vmem:[#allocation136_spill] sm:$0xff] %v11060_v31  ;;  %v11062_v45 = vpop.f32.mrb[95].mxu1  ;;  %v11064_v2 = vpop.f32.mrb[127].mxu0  ;;  %8195 = vmatmul.mubr.msk.f32.gmra.mrb[200].mxu1 %vm1846_vm6, %v10220_v29  ;;  %8259 = vmatmul.mubr.msk.f32.gmra.mrb[232].mxu0 %vm1846_vm6, %v10220_v29 }
 0x34b   : > { %16565 = vst [vmem:[#allocation137_spill] sm:$0xff] %v11062_v45  ;;  %16566 = vst [vmem:[#allocation138_spill] sm:$0xff] %v11064_v2  ;;  %3151 = vmatprep.mubr.f32.mxu1 %v16425_v13  ;;  %3600 = vmatprep.mubr.f32.mxu0 %v16425_v13 }
 0x34d   : > { %v11072_v32 = vpop.f32.mrb[96].mxu1  ;;  %v11074_v24 = vpop.f32.mrb[128].mxu0 }
 0x34e   : > { %16567 = vst [vmem:[#allocation139_spill] sm:$0xff] %v11072_v32  ;;  %16568 = vst [vmem:[#allocation140_spill] sm:$0xff] %v11074_v24  ;;  %v11076_v49 = vpop.f32.mrb[97].mxu1  ;;  %v11078_v31 = vpop.f32.mrb[129].mxu0  ;;  %8196 = vmatmul.mubr.msk.f32.gmra.mrb[202].mxu1 %vm1846_vm6, %v10238_v17  ;;  %8260 = vmatmul.mubr.msk.f32.gmra.mrb[234].mxu0 %vm1846_vm6, %v10238_v17 }
 0x34f   : > { %16569 = vst [vmem:[#allocation141_spill] sm:$0xff] %v11076_v49  ;;  %16570 = vst [vmem:[#allocation142_spill] sm:$0xff] %v11078_v31  ;;  %3157 = vmatprep.mubr.f32.mxu1 %v16425_v13  ;;  %3606 = vmatprep.mubr.f32.mxu0 %v16425_v13 }
 0x351   : > { %v11086_v29 = vpop.f32.mrb[98].mxu1  ;;  %v11088_v2 = vpop.f32.mrb[130].mxu0 }
 0x352   : > { %16571 = vst [vmem:[#allocation143_spill] sm:$0xff] %v11086_v29  ;;  %16572 = vst [vmem:[#allocation144_spill] sm:$0xff] %v11088_v2  ;;  %v11090_v32 = vpop.f32.mrb[99].mxu1  ;;  %v11092_v24 = vpop.f32.mrb[131].mxu0  ;;  %8197 = vmatmul.mubr.msk.f32.gmra.mrb[204].mxu1 %vm1846_vm6, %v10240_v19  ;;  %8261 = vmatmul.mubr.msk.f32.gmra.mrb[236].mxu0 %vm1846_vm6, %v10240_v19 }
 0x353   : > { %16573 = vst [vmem:[#allocation145_spill] sm:$0xff] %v11090_v32  ;;  %16574 = vst [vmem:[#allocation146_spill] sm:$0xff] %v11092_v24  ;;  %3163 = vmatprep.mubr.f32.mxu1 %v16425_v13  ;;  %3612 = vmatprep.mubr.f32.mxu0 %v16425_v13 }
 0x355   : > { %v11100_v17 = vpop.f32.mrb[100].mxu1  ;;  %v11102_v31 = vpop.f32.mrb[132].mxu0 }
 0x356   : > { %16575 = vst [vmem:[#allocation147_spill] sm:$0xff] %v11100_v17  ;;  %16576 = vst [vmem:[#allocation148_spill] sm:$0xff] %v11102_v31  ;;  %v11104_v29 = vpop.f32.mrb[101].mxu1  ;;  %v11106_v2 = vpop.f32.mrb[133].mxu0  ;;  %8198 = vmatmul.mubr.msk.f32.gmra.mrb[206].mxu1 %vm1846_vm6, %v10258_v34  ;;  %8262 = vmatmul.mubr.msk.f32.gmra.mrb[238].mxu0 %vm1846_vm6, %v10258_v34 }
 0x357   : > { %16577 = vst [vmem:[#allocation149_spill] sm:$0xff] %v11104_v29  ;;  %16578 = vst [vmem:[#allocation150_spill] sm:$0xff] %v11106_v2  ;;  %3169 = vmatprep.mubr.f32.mxu1 %v16425_v13  ;;  %3618 = vmatprep.mubr.f32.mxu0 %v16425_v13 }
 0x359   : > { %v11114_v19 = vpop.f32.mrb[102].mxu1  ;;  %v11116_v24 = vpop.f32.mrb[134].mxu0 }
 0x35a   : > { %16579 = vst [vmem:[#allocation151_spill] sm:$0xff] %v11114_v19  ;;  %16580 = vst [vmem:[#allocation152_spill] sm:$0xff] %v11116_v24  ;;  %v11118_v17 = vpop.f32.mrb[103].mxu1  ;;  %v11120_v31 = vpop.f32.mrb[135].mxu0  ;;  %8199 = vmatmul.mubr.msk.f32.gmra.mrb[208].mxu1 %vm1846_vm6, %v10260_v30  ;;  %8263 = vmatmul.mubr.msk.f32.gmra.mrb[240].mxu0 %vm1846_vm6, %v10260_v30 }
 0x35b   : > { %16581 = vst [vmem:[#allocation153_spill] sm:$0xff] %v11118_v17  ;;  %16582 = vst [vmem:[#allocation154_spill] sm:$0xff] %v11120_v31  ;;  %3175 = vmatprep.mubr.f32.mxu1 %v16425_v13  ;;  %3624 = vmatprep.mubr.f32.mxu0 %v16425_v13 }
 0x35d   : > { %v11128_v34 = vpop.f32.mrb[104].mxu1  ;;  %v11130_v2 = vpop.f32.mrb[136].mxu0 }
 0x35e   : > { %16583 = vst [vmem:[#allocation155_spill] sm:$0xff] %v11128_v34  ;;  %16584 = vst [vmem:[#allocation156_spill] sm:$0xff] %v11130_v2  ;;  %v11132_v19 = vpop.f32.mrb[105].mxu1  ;;  %v11134_v24 = vpop.f32.mrb[137].mxu0  ;;  %8200 = vmatmul.mubr.msk.f32.gmra.mrb[210].mxu1 %vm1846_vm6, %v10278_v33  ;;  %8264 = vmatmul.mubr.msk.f32.gmra.mrb[242].mxu0 %vm1846_vm6, %v10278_v33 }
 0x35f   : > { %16585 = vst [vmem:[#allocation157_spill] sm:$0xff] %v11132_v19  ;;  %16586 = vst [vmem:[#allocation158_spill] sm:$0xff] %v11134_v24  ;;  %3181 = vmatprep.mubr.f32.mxu1 %v16425_v13  ;;  %3630 = vmatprep.mubr.f32.mxu0 %v16425_v13 }
 0x361   : > { %v11142_v30 = vpop.f32.mrb[106].mxu1  ;;  %v11144_v31 = vpop.f32.mrb[138].mxu0 }
 0x362   : > { %16587 = vst [vmem:[#allocation159_spill] sm:$0xff] %v11142_v30  ;;  %16588 = vst [vmem:[#allocation160_spill] sm:$0xff] %v11144_v31  ;;  %v11146_v34 = vpop.f32.mrb[107].mxu1  ;;  %v11148_v2 = vpop.f32.mrb[139].mxu0  ;;  %8201 = vmatmul.mubr.msk.f32.gmra.mrb[212].mxu1 %vm1846_vm6, %v10280_v40  ;;  %8265 = vmatmul.mubr.msk.f32.gmra.mrb[244].mxu0 %vm1846_vm6, %v10280_v40 }
 0x363   : > { %16589 = vst [vmem:[#allocation161_spill] sm:$0xff] %v11146_v34  ;;  %16590 = vst [vmem:[#allocation162_spill] sm:$0xff] %v11148_v2  ;;  %3187 = vmatprep.mubr.f32.mxu1 %v16425_v13  ;;  %3636 = vmatprep.mubr.f32.mxu0 %v16425_v13 }
 0x365   : > { %v11156_v33 = vpop.f32.mrb[108].mxu1  ;;  %v11158_v24 = vpop.f32.mrb[140].mxu0 }
 0x366   : > { %16591 = vst [vmem:[#allocation163_spill] sm:$0xff] %v11156_v33  ;;  %16592 = vst [vmem:[#allocation164_spill] sm:$0xff] %v11158_v24  ;;  %v11160_v30 = vpop.f32.mrb[109].mxu1  ;;  %v11162_v31 = vpop.f32.mrb[141].mxu0  ;;  %8202 = vmatmul.mubr.msk.f32.gmra.mrb[214].mxu1 %vm1846_vm6, %v10298_v38  ;;  %8266 = vmatmul.mubr.msk.f32.gmra.mrb[246].mxu0 %vm1846_vm6, %v10298_v38 }
 0x367   : > { %16593 = vst [vmem:[#allocation165_spill] sm:$0xff] %v11160_v30  ;;  %16594 = vst [vmem:[#allocation166_spill] sm:$0xff] %v11162_v31  ;;  %3193 = vmatprep.mubr.f32.mxu1 %v16425_v13  ;;  %3642 = vmatprep.mubr.f32.mxu0 %v16425_v13 }
 0x369   : > { %v11170_v40 = vpop.f32.mrb[110].mxu1  ;;  %v11172_v2 = vpop.f32.mrb[142].mxu0 }
 0x36a   : > { %16595 = vst [vmem:[#allocation167_spill] sm:$0xff] %v11170_v40  ;;  %16596 = vst [vmem:[#allocation168_spill] sm:$0xff] %v11172_v2  ;;  %v11174_v33 = vpop.f32.mrb[111].mxu1  ;;  %v11176_v24 = vpop.f32.mrb[143].mxu0  ;;  %8203 = vmatmul.mubr.msk.f32.gmra.mrb[216].mxu1 %vm1846_vm6, %v10300_v48  ;;  %8267 = vmatmul.mubr.msk.f32.gmra.mrb[248].mxu0 %vm1846_vm6, %v10300_v48 }
 0x36b   : > { %16597 = vst [vmem:[#allocation169_spill] sm:$0xff] %v11174_v33  ;;  %16598 = vst [vmem:[#allocation170_spill] sm:$0xff] %v11176_v24  ;;  %3199 = vmatprep.mubr.f32.mxu1 %v16425_v13  ;;  %3648 = vmatprep.mubr.f32.mxu0 %v16425_v13 }
 0x36d   : > { %v11184_v38 = vpop.f32.mrb[112].mxu1  ;;  %v11186_v31 = vpop.f32.mrb[144].mxu0 }
 0x36e   : > { %16599 = vst [vmem:[#allocation171_spill] sm:$0xff] %v11184_v38  ;;  %16600 = vst [vmem:[#allocation172_spill] sm:$0xff] %v11186_v31  ;;  %v11188_v40 = vpop.f32.mrb[113].mxu1  ;;  %v11190_v2 = vpop.f32.mrb[145].mxu0  ;;  %8204 = vmatmul.mubr.msk.f32.gmra.mrb[218].mxu1 %vm1846_vm6, %v10318_v46  ;;  %8268 = vmatmul.mubr.msk.f32.gmra.mrb[250].mxu0 %vm1846_vm6, %v10318_v46 }
 0x36f   : > { %16601 = vst [vmem:[#allocation173_spill] sm:$0xff] %v11188_v40  ;;  %16602 = vst [vmem:[#allocation174_spill] sm:$0xff] %v11190_v2  ;;  %3205 = vmatprep.mubr.f32.mxu1 %v16425_v13  ;;  %3654 = vmatprep.mubr.f32.mxu0 %v16425_v13 }
 0x371   : > { %v11198_v48 = vpop.f32.mrb[114].mxu1  ;;  %v11200_v24 = vpop.f32.mrb[146].mxu0 }
 0x372   : > { %16603 = vst [vmem:[#allocation175_spill] sm:$0xff] %v11198_v48  ;;  %16604 = vst [vmem:[#allocation176_spill] sm:$0xff] %v11200_v24  ;;  %v11202_v38 = vpop.f32.mrb[115].mxu1  ;;  %v11204_v31 = vpop.f32.mrb[147].mxu0  ;;  %8205 = vmatmul.mubr.msk.f32.gmra.mrb[220].mxu1 %vm1846_vm6, %v10320_v56  ;;  %8269 = vmatmul.mubr.msk.f32.gmra.mrb[252].mxu0 %vm1846_vm6, %v10320_v56 }
 0x373   : > { %16605 = vst [vmem:[#allocation177_spill] sm:$0xff] %v11202_v38  ;;  %16606 = vst [vmem:[#allocation178_spill] sm:$0xff] %v11204_v31  ;;  %3211 = vmatprep.mubr.f32.mxu1 %v16425_v13  ;;  %3660 = vmatprep.mubr.f32.mxu0 %v16425_v13 }
 0x375   : > { %v11212_v46 = vpop.f32.mrb[116].mxu1  ;;  %v11214_v2 = vpop.f32.mrb[148].mxu0 }
 0x376   : > { %16607 = vst [vmem:[#allocation179_spill] sm:$0xff] %v11212_v46  ;;  %16608 = vst [vmem:[#allocation180_spill] sm:$0xff] %v11214_v2  ;;  %v11216_v48 = vpop.f32.mrb[117].mxu1  ;;  %v11218_v24 = vpop.f32.mrb[149].mxu0  ;;  %8206 = vmatmul.mubr.msk.f32.gmra.mrb[222].mxu1 %vm1846_vm6, %v10338_v54  ;;  %8270 = vmatmul.mubr.msk.f32.gmra.mrb[254].mxu0 %vm1846_vm6, %v10338_v54 }
 0x377   : > { %16609 = vst [vmem:[#allocation181_spill] sm:$0xff] %v11216_v48  ;;  %16610 = vst [vmem:[#allocation182_spill] sm:$0xff] %v11218_v24  ;;  %3217 = vmatprep.mubr.f32.mxu1 %v16425_v13  ;;  %3666 = vmatprep.mubr.f32.mxu0 %v16425_v13 }
 0x379   : > { %v11226_v56 = vpop.f32.mrb[118].mxu1  ;;  %v11228_v31 = vpop.f32.mrb[150].mxu0 }
 0x37a   : > { %16611 = vst [vmem:[#allocation183_spill] sm:$0xff] %v11226_v56  ;;  %16612 = vst [vmem:[#allocation184_spill] sm:$0xff] %v11228_v31  ;;  %v11230_v46 = vpop.f32.mrb[119].mxu1  ;;  %v11232_v2 = vpop.f32.mrb[151].mxu0  ;;  %8207 = vmatmul.mubr.msk.f32.gmra.mrb[224].mxu1 %vm1846_vm6, %v10340_v0  ;;  %8271 = vmatmul.mubr.msk.f32.gmra.mrb[0].mxu0 %vm1846_vm6, %v10340_v0 }
 0x37b   : > { %16613 = vst [vmem:[#allocation185_spill] sm:$0xff] %v11230_v46  ;;  %16614 = vst [vmem:[#allocation186_spill] sm:$0xff] %v11232_v2  ;;  %3223 = vmatprep.mubr.f32.mxu1 %v16425_v13  ;;  %3672 = vmatprep.mubr.f32.mxu0 %v16425_v13 }
 0x37d   : > { %v11240_v54 = vpop.f32.mrb[120].mxu1  ;;  %v11242_v24 = vpop.f32.mrb[152].mxu0 }
 0x37e   : > { %16615 = vst [vmem:[#allocation187_spill] sm:$0xff] %v11240_v54  ;;  %16616 = vst [vmem:[#allocation188_spill] sm:$0xff] %v11242_v24  ;;  %v11244_v56 = vpop.f32.mrb[121].mxu1  ;;  %v11246_v31 = vpop.f32.mrb[153].mxu0  ;;  %8208 = vmatmul.mubr.msk.f32.gmra.mrb[226].mxu1 %vm1846_vm6, %v10358_v62  ;;  %8272 = vmatmul.mubr.msk.f32.gmra.mrb[2].mxu0 %vm1846_vm6, %v10358_v62 }
 0x37f   : > { %16617 = vst [vmem:[#allocation189_spill] sm:$0xff] %v11244_v56  ;;  %16618 = vst [vmem:[#allocation190_spill] sm:$0xff] %v11246_v31  ;;  %3229 = vmatprep.mubr.f32.mxu1 %v16425_v13  ;;  %3678 = vmatprep.mubr.f32.mxu0 %v16425_v13 }
 0x381   : > { %v11254_v0 = vpop.f32.mrb[122].mxu1  ;;  %v11256_v2 = vpop.f32.mrb[154].mxu0 }
 0x382   : > { %16619 = vst [vmem:[#allocation191_spill] sm:$0xff] %v11254_v0  ;;  %16620 = vst [vmem:[#allocation192_spill] sm:$0xff] %v11256_v2  ;;  %v11258_v54 = vpop.f32.mrb[123].mxu1  ;;  %v11260_v24 = vpop.f32.mrb[155].mxu0  ;;  %8209 = vmatmul.mubr.msk.f32.gmra.mrb[228].mxu1 %vm1846_vm6, %v10360_v8  ;;  %8273 = vmatmul.mubr.msk.f32.gmra.mrb[4].mxu0 %vm1846_vm6, %v10360_v8 }
 0x383   : > { %16621 = vst [vmem:[#allocation193_spill] sm:$0xff] %v11258_v54  ;;  %16622 = vst [vmem:[#allocation194_spill] sm:$0xff] %v11260_v24  ;;  %3235 = vmatprep.mubr.f32.mxu1 %v16425_v13  ;;  %3684 = vmatprep.mubr.f32.mxu0 %v16425_v13 }
 0x385   : > { %v11268_v62 = vpop.f32.mrb[124].mxu1  ;;  %v11270_v31 = vpop.f32.mrb[156].mxu0 }
 0x386   : > { %16623 = vst [vmem:[#allocation195_spill] sm:$0xff] %v11268_v62  ;;  %16624 = vst [vmem:[#allocation196_spill] sm:$0xff] %v11270_v31  ;;  %v11272_v0 = vpop.f32.mrb[125].mxu1  ;;  %v11274_v2 = vpop.f32.mrb[157].mxu0  ;;  %8210 = vmatmul.mubr.msk.f32.gmra.mrb[230].mxu1 %vm1846_vm6, %v10378_v3  ;;  %8274 = vmatmul.mubr.msk.f32.gmra.mrb[6].mxu0 %vm1846_vm6, %v10378_v3 }
 0x387   : > { %16625 = vst [vmem:[#allocation197_spill] sm:$0xff] %v11272_v0  ;;  %16626 = vst [vmem:[#allocation198_spill] sm:$0xff] %v11274_v2  ;;  %3241 = vmatprep.mubr.f32.mxu1 %v16425_v13  ;;  %3690 = vmatprep.mubr.f32.mxu0 %v16425_v13 }
 0x389   : > { %v11282_v8 = vpop.f32.mrb[126].mxu1  ;;  %v11284_v24 = vpop.f32.mrb[158].mxu0 }
 0x38a   : > { %16627 = vst [vmem:[#allocation199_spill] sm:$0xff] %v11282_v8  ;;  %16628 = vst [vmem:[#allocation200_spill] sm:$0xff] %v11284_v24  ;;  %v11286_v62 = vpop.f32.mrb[127].mxu1  ;;  %v11288_v31 = vpop.f32.mrb[159].mxu0  ;;  %8211 = vmatmul.mubr.msk.f32.gmra.mrb[232].mxu1 %vm1846_vm6, %v10380_v16  ;;  %8275 = vmatmul.mubr.msk.f32.gmra.mrb[8].mxu0 %vm1846_vm6, %v10380_v16 }
 0x38b   : > { %16629 = vst [vmem:[#allocation201_spill] sm:$0xff] %v11286_v62  ;;  %16630 = vst [vmem:[#allocation202_spill] sm:$0xff] %v11288_v31  ;;  %3247 = vmatprep.mubr.f32.mxu1 %v16425_v13  ;;  %3696 = vmatprep.mubr.f32.mxu0 %v16425_v13 }
 0x38d   : > { %v11296_v3 = vpop.f32.mrb[128].mxu1  ;;  %v11298_v2 = vpop.f32.mrb[160].mxu0 }
 0x38e   : > { %16631 = vst [vmem:[#allocation203_spill] sm:$0xff] %v11296_v3  ;;  %16632 = vst [vmem:[#allocation204_spill] sm:$0xff] %v11298_v2  ;;  %v11300_v8 = vpop.f32.mrb[129].mxu1  ;;  %v11302_v24 = vpop.f32.mrb[161].mxu0  ;;  %8212 = vmatmul.mubr.msk.f32.gmra.mrb[234].mxu1 %vm1846_vm6, %v10398_v12  ;;  %8276 = vmatmul.mubr.msk.f32.gmra.mrb[10].mxu0 %vm1846_vm6, %v10398_v12 }
 0x38f   : > { %16633 = vst [vmem:[#allocation205_spill] sm:$0xff] %v11300_v8  ;;  %16634 = vst [vmem:[#allocation206_spill] sm:$0xff] %v11302_v24  ;;  %3253 = vmatprep.mubr.f32.mxu1 %v16425_v13  ;;  %3702 = vmatprep.mubr.f32.mxu0 %v16425_v13 }
 0x391   : > { %v11310_v16 = vpop.f32.mrb[130].mxu1  ;;  %v11312_v31 = vpop.f32.mrb[162].mxu0 }
 0x392   : > { %16635 = vst [vmem:[#allocation207_spill] sm:$0xff] %v11310_v16  ;;  %16636 = vst [vmem:[#allocation208_spill] sm:$0xff] %v11312_v31  ;;  %v11314_v3 = vpop.f32.mrb[131].mxu1  ;;  %v11316_v2 = vpop.f32.mrb[163].mxu0  ;;  %8213 = vmatmul.mubr.msk.f32.gmra.mrb[236].mxu1 %vm1846_vm6, %v10400_v28  ;;  %8277 = vmatmul.mubr.msk.f32.gmra.mrb[12].mxu0 %vm1846_vm6, %v10400_v28 }
 0x393   : > { %16637 = vst [vmem:[#allocation209_spill] sm:$0xff] %v11314_v3  ;;  %16638 = vst [vmem:[#allocation210_spill] sm:$0xff] %v11316_v2  ;;  %3259 = vmatprep.mubr.f32.mxu1 %v16425_v13  ;;  %3708 = vmatprep.mubr.f32.mxu0 %v16425_v13 }
 0x395   : > { %v11324_v12 = vpop.f32.mrb[132].mxu1  ;;  %v11326_v24 = vpop.f32.mrb[164].mxu0 }
 0x396   : > { %16639 = vst [vmem:[#allocation211_spill] sm:$0xff] %v11324_v12  ;;  %16640 = vst [vmem:[#allocation212_spill] sm:$0xff] %v11326_v24  ;;  %v11328_v16 = vpop.f32.mrb[133].mxu1  ;;  %v11330_v31 = vpop.f32.mrb[165].mxu0  ;;  %8214 = vmatmul.mubr.msk.f32.gmra.mrb[238].mxu1 %vm1846_vm6, %v10418_v25  ;;  %8278 = vmatmul.mubr.msk.f32.gmra.mrb[14].mxu0 %vm1846_vm6, %v10418_v25 }
 0x397   : > { %16641 = vst [vmem:[#allocation213_spill] sm:$0xff] %v11328_v16  ;;  %16642 = vst [vmem:[#allocation214_spill] sm:$0xff] %v11330_v31  ;;  %3265 = vmatprep.mubr.f32.mxu1 %v16425_v13  ;;  %3714 = vmatprep.mubr.f32.mxu0 %v16425_v13 }
 0x399   : > { %v11338_v28 = vpop.f32.mrb[134].mxu1  ;;  %v11340_v2 = vpop.f32.mrb[166].mxu0 }
 0x39a   : > { %16643 = vst [vmem:[#allocation215_spill] sm:$0xff] %v11338_v28  ;;  %16644 = vst [vmem:[#allocation216_spill] sm:$0xff] %v11340_v2  ;;  %v11342_v12 = vpop.f32.mrb[135].mxu1  ;;  %v11344_v24 = vpop.f32.mrb[167].mxu0  ;;  %8215 = vmatmul.mubr.msk.f32.gmra.mrb[240].mxu1 %vm1846_vm6, %v10420_v57  ;;  %8279 = vmatmul.mubr.msk.f32.gmra.mrb[16].mxu0 %vm1846_vm6, %v10420_v57 }
 0x39b   : > { %16645 = vst [vmem:[#allocation217_spill] sm:$0xff] %v11342_v12  ;;  %16646 = vst [vmem:[#allocation218_spill] sm:$0xff] %v11344_v24  ;;  %3271 = vmatprep.mubr.f32.mxu1 %v16425_v13  ;;  %3720 = vmatprep.mubr.f32.mxu0 %v16425_v13 }
 0x39d   : > { %v11352_v25 = vpop.f32.mrb[136].mxu1  ;;  %v11354_v31 = vpop.f32.mrb[168].mxu0 }
 0x39e   : > { %16647 = vst [vmem:[#allocation219_spill] sm:$0xff] %v11352_v25  ;;  %16648 = vst [vmem:[#allocation220_spill] sm:$0xff] %v11354_v31  ;;  %v11356_v28 = vpop.f32.mrb[137].mxu1  ;;  %v11358_v2 = vpop.f32.mrb[169].mxu0  ;;  %8216 = vmatmul.mubr.msk.f32.gmra.mrb[242].mxu1 %vm1846_vm6, %v10438_v6  ;;  %8280 = vmatmul.mubr.msk.f32.gmra.mrb[18].mxu0 %vm1846_vm6, %v10438_v6 }
 0x39f   : > { %16649 = vst [vmem:[#allocation221_spill] sm:$0xff] %v11356_v28  ;;  %16650 = vst [vmem:[#allocation222_spill] sm:$0xff] %v11358_v2  ;;  %3277 = vmatprep.mubr.f32.mxu1 %v16425_v13  ;;  %3726 = vmatprep.mubr.f32.mxu0 %v16425_v13 }
 0x3a1   : > { %v11366_v57 = vpop.f32.mrb[138].mxu1  ;;  %v11368_v24 = vpop.f32.mrb[170].mxu0 }
 0x3a2   : > { %16651 = vst [vmem:[#allocation223_spill] sm:$0xff] %v11366_v57  ;;  %16652 = vst [vmem:[#allocation224_spill] sm:$0xff] %v11368_v24  ;;  %v11370_v25 = vpop.f32.mrb[139].mxu1  ;;  %v11372_v31 = vpop.f32.mrb[171].mxu0  ;;  %8217 = vmatmul.mubr.msk.f32.gmra.mrb[244].mxu1 %vm1846_vm6, %v10440_v41  ;;  %8281 = vmatmul.mubr.msk.f32.gmra.mrb[20].mxu0 %vm1846_vm6, %v10440_v41 }
 0x3a3   : > { %16653 = vst [vmem:[#allocation225_spill] sm:$0xff] %v11370_v25  ;;  %16654 = vst [vmem:[#allocation226_spill] sm:$0xff] %v11372_v31  ;;  %3283 = vmatprep.mubr.f32.mxu1 %v16425_v13  ;;  %3732 = vmatprep.mubr.f32.mxu0 %v16425_v13 }
 0x3a5   : > { %v11380_v6 = vpop.f32.mrb[140].mxu1  ;;  %v11382_v2 = vpop.f32.mrb[172].mxu0 }
 0x3a6   : > { %16655 = vst [vmem:[#allocation227_spill] sm:$0xff] %v11380_v6  ;;  %16656 = vst [vmem:[#allocation228_spill] sm:$0xff] %v11382_v2  ;;  %v11384_v57 = vpop.f32.mrb[141].mxu1  ;;  %v11386_v24 = vpop.f32.mrb[173].mxu0  ;;  %8218 = vmatmul.mubr.msk.f32.gmra.mrb[246].mxu1 %vm1846_vm6, %v10456_v11  ;;  %8282 = vmatmul.mubr.msk.f32.gmra.mrb[22].mxu0 %vm1846_vm6, %v10456_v11 }
 0x3a7   : > { %16657 = vst [vmem:[#allocation229_spill] sm:$0xff] %v11384_v57  ;;  %16658 = vst [vmem:[#allocation230_spill] sm:$0xff] %v11386_v24  ;;  %3289 = vmatprep.mubr.f32.mxu1 %v16425_v13  ;;  %3738 = vmatprep.mubr.f32.mxu0 %v16425_v13 }
 0x3a9   : > { %v11394_v41 = vpop.f32.mrb[142].mxu1  ;;  %v11396_v31 = vpop.f32.mrb[174].mxu0 }
 0x3aa   : > { %16659 = vst [vmem:[#allocation231_spill] sm:$0xff] %v11394_v41  ;;  %16660 = vst [vmem:[#allocation232_spill] sm:$0xff] %v11396_v31  ;;  %v11398_v6 = vpop.f32.mrb[143].mxu1  ;;  %v11400_v2 = vpop.f32.mrb[175].mxu0  ;;  %8219 = vmatmul.mubr.msk.f32.gmra.mrb[248].mxu1 %vm1846_vm6, %v10468_v14  ;;  %8283 = vmatmul.mubr.msk.f32.gmra.mrb[24].mxu0 %vm1846_vm6, %v10468_v14 }
 0x3ab   : > { %16661 = vst [vmem:[#allocation233_spill] sm:$0xff] %v11398_v6  ;;  %16662 = vst [vmem:[#allocation234_spill] sm:$0xff] %v11400_v2  ;;  %3295 = vmatprep.mubr.f32.mxu1 %v16425_v13  ;;  %3744 = vmatprep.mubr.f32.mxu0 %v16425_v13 }
 0x3ad   : > { %v11408_v11 = vpop.f32.mrb[144].mxu1  ;;  %v11410_v24 = vpop.f32.mrb[176].mxu0 }
 0x3ae   : > { %16663 = vst [vmem:[#allocation235_spill] sm:$0xff] %v11408_v11  ;;  %16664 = vst [vmem:[#allocation236_spill] sm:$0xff] %v11410_v24  ;;  %v11412_v41 = vpop.f32.mrb[145].mxu1  ;;  %v11414_v31 = vpop.f32.mrb[177].mxu0  ;;  %8220 = vmatmul.mubr.msk.f32.gmra.mrb[250].mxu1 %vm1846_vm6, %v10476_v43  ;;  %8284 = vmatmul.mubr.msk.f32.gmra.mrb[26].mxu0 %vm1846_vm6, %v10476_v43 }
 0x3af   : > { %16665 = vst [vmem:[#allocation237_spill] sm:$0xff] %v11412_v41  ;;  %16666 = vst [vmem:[#allocation238_spill] sm:$0xff] %v11414_v31  ;;  %3301 = vmatprep.mubr.f32.mxu1 %v16425_v13  ;;  %3750 = vmatprep.mubr.f32.mxu0 %v16425_v13  ;;  %v16671_v41 = vld [vmem:[#allocation18_spill] sm:$0xff] }
 0x3b1   : > { %v11422_v14 = vpop.f32.mrb[146].mxu1  ;;  %v11424_v2 = vpop.f32.mrb[178].mxu0 }
 0x3b2   : > { %16667 = vst [vmem:[#allocation239_spill] sm:$0xff] %v11422_v14  ;;  %16668 = vst [vmem:[#allocation240_spill] sm:$0xff] %v11424_v2  ;;  %v11426_v11 = vpop.f32.mrb[147].mxu1  ;;  %v11428_v24 = vpop.f32.mrb[179].mxu0  ;;  %8221 = vmatmul.mubr.msk.f32.gmra.mrb[252].mxu1 %vm1846_vm6, %v16671_v41  ;;  %8285 = vmatmul.mubr.msk.f32.gmra.mrb[28].mxu0 %vm1846_vm6, %v16671_v41 }
 0x3b3   : > { %16669 = vst [vmem:[#allocation241_spill] sm:$0xff] %v11426_v11  ;;  %16670 = vst [vmem:[#allocation242_spill] sm:$0xff] %v11428_v24  ;;  %3307 = vmatprep.mubr.f32.mxu1 %v16425_v13  ;;  %3756 = vmatprep.mubr.f32.mxu0 %v16425_v13  ;;  %v16676_v11 = vld [vmem:[#allocation19_spill] sm:$0xff] }
 0x3b5   : > { %v11436_v43 = vpop.f32.mrb[148].mxu1  ;;  %v11438_v31 = vpop.f32.mrb[180].mxu0 }
 0x3b6   : > { %16672 = vst [vmem:[#allocation18_spill] sm:$0xff] %v11436_v43  ;;  %16673 = vst [vmem:[#allocation243_spill] sm:$0xff] %v11438_v31  ;;  %v11440_v14 = vpop.f32.mrb[149].mxu1  ;;  %v11442_v2 = vpop.f32.mrb[181].mxu0  ;;  %8222 = vmatmul.mubr.msk.f32.gmra.mrb[254].mxu1 %vm1846_vm6, %v16676_v11  ;;  %8286 = vmatmul.mubr.msk.f32.gmra.mrb[30].mxu0 %vm1846_vm6, %v16676_v11 }
 0x3b7   : > { %16674 = vst [vmem:[#allocation244_spill] sm:$0xff] %v11440_v14  ;;  %16675 = vst [vmem:[#allocation245_spill] sm:$0xff] %v11442_v2  ;;  %3313 = vmatprep.mubr.f32.mxu1 %v16425_v13  ;;  %3762 = vmatprep.mubr.f32.mxu0 %v16425_v13 }
 0x3b9   : > { %v11450_v41 = vpop.f32.mrb[150].mxu1  ;;  %v11452_v24 = vpop.f32.mrb[182].mxu0 }
 0x3ba   : > { %16677 = vst [vmem:[#allocation19_spill] sm:$0xff] %v11450_v41  ;;  %16678 = vst [vmem:[#allocation246_spill] sm:$0xff] %v11452_v24  ;;  %v11454_v43 = vpop.f32.mrb[151].mxu1  ;;  %v11456_v31 = vpop.f32.mrb[183].mxu0  ;;  %8223 = vmatmul.mubr.msk.f32.gmra.mrb[0].mxu1 %vm1846_vm6, %v10508_v1  ;;  %8287 = vmatmul.mubr.msk.f32.gmra.mrb[32].mxu0 %vm1846_vm6, %v10508_v1 }
 0x3bb   : > { %16679 = vst [vmem:[#allocation247_spill] sm:$0xff] %v11454_v43  ;;  %16680 = vst [vmem:[#allocation248_spill] sm:$0xff] %v11456_v31  ;;  %3319 = vmatprep.mubr.f32.mxu1 %v16425_v13  ;;  %3768 = vmatprep.mubr.f32.mxu0 %v16425_v13 }
 0x3bd   : > { %v11464_v11 = vpop.f32.mrb[152].mxu1  ;;  %v11466_v2 = vpop.f32.mrb[184].mxu0 }
 0x3be   : > { %16681 = vst [vmem:[#allocation249_spill] sm:$0xff] %v11464_v11  ;;  %16682 = vst [vmem:[#allocation250_spill] sm:$0xff] %v11466_v2  ;;  %v11468_v41 = vpop.f32.mrb[153].mxu1  ;;  %8224 = vmatmul.mubr.msk.f32.gmra.mrb[2].mxu1 %vm1846_vm6, %v10516_v59  ;;  %v11472_v31 = vpop.f32.mrb[185].mxu0  ;;  %8288 = vmatmul.mubr.msk.f32.gmra.mrb[34].mxu0 %vm1846_vm6, %v10516_v59  ;;  %v3977_v2 = vld [vmem:[#allocation5 + $0x70] sm:$0xf] }
 0x3bf   : > { %16683 = vst [vmem:[#allocation251_spill] sm:$0xff] %v11468_v41  ;;  %16684 = vst [vmem:[#allocation252_spill] sm:$0xff] %v11472_v31  ;;  %3325 = vmatprep.mubr.f32.mxu1 %v16425_v13  ;;  %3774 = vmatprep.mubr.f32.mxu0 %v16425_v13 }
 0x3c1   : > { %v11478_v1 = vpop.f32.mrb[154].mxu1  ;;  %v11480_v43 = vpop.f32.mrb[186].mxu0 }
 0x3c2   : > { %16685 = vst [vmem:[#allocation253_spill] sm:$0xff] %v11478_v1  ;;  %16686 = vst [vmem:[#allocation254_spill] sm:$0xff] %v11480_v43  ;;  %v11482_v11 = vpop.f32.mrb[155].mxu1  ;;  %8225 = vmatmul.mubr.msk.f32.gmra.mrb[4].mxu1 %vm1846_vm6, %v10536_v50  ;;  %v11486_v41 = vpop.f32.mrb[187].mxu0  ;;  %8289 = vmatmul.mubr.msk.f32.gmra.mrb[36].mxu0 %vm1846_vm6, %v10536_v50  ;;  %v3969_v43 = vld [vmem:[#allocation5 + $0x30] sm:$0xff] }
 0x3c3   : > { %16687 = vst [vmem:[#allocation255_spill] sm:$0xff] %v11482_v11  ;;  %16688 = vst [vmem:[#allocation256_spill] sm:$0xff] %v11486_v41  ;;  %3331 = vmatprep.mubr.f32.mxu1 %v16425_v13  ;;  %3780 = vmatprep.mubr.f32.mxu0 %v16425_v13  ;;  %v9105_v14 = vpack.c.bf16 %v3977_v2, %v3969_v43  ;;  %v8707_v2 = vld [vmem:[%s16222_s3 + $0x8] sm:$0xff]  }
 0x3c4   : > { %v11658_v39 = vunpack.c.l.bf16 %v8707_v2 }
 0x3c5   : > { %v11492_v59 = vpop.f32.mrb[156].mxu1  ;;  %v11494_v31 = vpop.f32.mrb[188].mxu0 }
 0x3c6   : > { %16689 = vst [vmem:[#allocation257_spill] sm:$0xff] %v11492_v59  ;;  %16690 = vst [vmem:[#allocation258_spill] sm:$0xff] %v11494_v31  ;;  %v11496_v1 = vpop.f32.mrb[157].mxu1  ;;  %8226 = vmatmul.mubr.msk.f32.gmra.mrb[6].mxu1 %vm1846_vm6, %v10552_v7  ;;  %v11500_v11 = vpop.f32.mrb[189].mxu0  ;;  %8290 = vmatmul.mubr.msk.f32.gmra.mrb[38].mxu0 %vm1846_vm6, %v10552_v7  ;;  %v16730_v31 = vld [vmem:[#allocation66_spill] sm:$0xff] }
 0x3c7   : > { %16691 = vst [vmem:[#allocation259_spill] sm:$0xff] %v11496_v1  ;;  %16692 = vst [vmem:[#allocation260_spill] sm:$0xff] %v11500_v11  ;;  %3337 = vmatprep.mubr.f32.mxu1 %v16425_v13  ;;  %3786 = vmatprep.mubr.f32.mxu0 %v16425_v13 }
 0x3c9   : > { %v11506_v50 = vpop.f32.mrb[158].mxu1  ;;  %v11508_v41 = vpop.f32.mrb[190].mxu0 }
 0x3ca   : > { %16693 = vst [vmem:[#allocation261_spill] sm:$0xff] %v11506_v50  ;;  %16694 = vst [vmem:[#allocation262_spill] sm:$0xff] %v11508_v41  ;;  %v11510_v59 = vpop.f32.mrb[159].mxu1  ;;  %8227 = vmatmul.mubr.msk.f32.gmra.mrb[8].mxu1 %vm1846_vm6, %v10572_v9  ;;  %v11514_v1 = vpop.f32.mrb[191].mxu0  ;;  %8291 = vmatmul.mubr.msk.f32.gmra.mrb[40].mxu0 %vm1846_vm6, %v10572_v9  ;;  %v16700_v41 = vld [vmem:[#allocation36_spill] sm:$0xff] }
 0x3cb   : > { %16695 = vst [vmem:[#allocation263_spill] sm:$0xff] %v11510_v59  ;;  %16696 = vst [vmem:[#allocation264_spill] sm:$0xff] %v11514_v1  ;;  %3343 = vmatprep.mubr.f32.mxu1 %v16425_v13  ;;  %3792 = vmatprep.mubr.f32.mxu0 %v16425_v13 }
 0x3cd   : > { %v11520_v7 = vpop.f32.mrb[160].mxu1  ;;  %v11522_v11 = vpop.f32.mrb[192].mxu0 }
 0x3ce   : > { %16697 = vst [vmem:[#allocation265_spill] sm:$0xff] %v11520_v7  ;;  %16698 = vst [vmem:[#allocation266_spill] sm:$0xff] %v11522_v11  ;;  %v11524_v50 = vpop.f32.mrb[161].mxu1  ;;  %8228 = vmatmul.mubr.msk.f32.gmra.mrb[10].mxu1 %vm1846_vm6, %v16700_v41  ;;  %v11528_v59 = vpop.f32.mrb[193].mxu0  ;;  %8292 = vmatmul.mubr.msk.f32.gmra.mrb[42].mxu0 %vm1846_vm6, %v16700_v41  ;;  %v16705_v11 = vld [vmem:[#allocation41_spill] sm:$0xff] }
 0x3cf   : > { %16699 = vst [vmem:[#allocation267_spill] sm:$0xff] %v11524_v50  ;;  %16701 = vst [vmem:[#allocation36_spill] sm:$0xff] %v11528_v59  ;;  %3349 = vmatprep.mubr.f32.mxu1 %v16425_v13  ;;  %3798 = vmatprep.mubr.f32.mxu0 %v16425_v13 }
 0x3d1   : > { %v11534_v9 = vpop.f32.mrb[162].mxu1  ;;  %v11536_v1 = vpop.f32.mrb[194].mxu0 }
 0x3d2   : > { %16702 = vst [vmem:[#allocation268_spill] sm:$0xff] %v11534_v9  ;;  %16703 = vst [vmem:[#allocation269_spill] sm:$0xff] %v11536_v1  ;;  %v11538_v7 = vpop.f32.mrb[163].mxu1  ;;  %8229 = vmatmul.mubr.msk.f32.gmra.mrb[12].mxu1 %vm1846_vm6, %v16705_v11  ;;  %v11542_v50 = vpop.f32.mrb[195].mxu0  ;;  %8293 = vmatmul.mubr.msk.f32.gmra.mrb[44].mxu0 %vm1846_vm6, %v16705_v11  ;;  %v16710_v1 = vld [vmem:[#allocation46_spill] sm:$0xff] }
 0x3d3   : > { %16704 = vst [vmem:[#allocation270_spill] sm:$0xff] %v11538_v7  ;;  %16706 = vst [vmem:[#allocation41_spill] sm:$0xff] %v11542_v50  ;;  %3355 = vmatprep.mubr.f32.mxu1 %v16425_v13  ;;  %3804 = vmatprep.mubr.f32.mxu0 %v16425_v13 }
 0x3d5   : > { %v11548_v41 = vpop.f32.mrb[164].mxu1  ;;  %v11550_v59 = vpop.f32.mrb[196].mxu0 }
 0x3d6   : > { %16707 = vst [vmem:[#allocation271_spill] sm:$0xff] %v11548_v41  ;;  %16708 = vst [vmem:[#allocation272_spill] sm:$0xff] %v11550_v59  ;;  %v11552_v9 = vpop.f32.mrb[165].mxu1  ;;  %8230 = vmatmul.mubr.msk.f32.gmra.mrb[14].mxu1 %vm1846_vm6, %v16710_v1  ;;  %v11556_v7 = vpop.f32.mrb[197].mxu0  ;;  %8294 = vmatmul.mubr.msk.f32.gmra.mrb[46].mxu0 %vm1846_vm6, %v16710_v1  ;;  %v16715_v59 = vld [vmem:[#allocation51_spill] sm:$0xff] }
 0x3d7   : > { %16709 = vst [vmem:[#allocation273_spill] sm:$0xff] %v11552_v9  ;;  %16711 = vst [vmem:[#allocation46_spill] sm:$0xff] %v11556_v7  ;;  %3361 = vmatprep.mubr.f32.mxu1 %v16425_v13  ;;  %3810 = vmatprep.mubr.f32.mxu0 %v16425_v13 }
 0x3d9   : > { %v11562_v11 = vpop.f32.mrb[166].mxu1  ;;  %v11564_v50 = vpop.f32.mrb[198].mxu0 }
 0x3da   : > { %16712 = vst [vmem:[#allocation274_spill] sm:$0xff] %v11562_v11  ;;  %16713 = vst [vmem:[#allocation275_spill] sm:$0xff] %v11564_v50  ;;  %v11566_v41 = vpop.f32.mrb[167].mxu1  ;;  %8231 = vmatmul.mubr.msk.f32.gmra.mrb[16].mxu1 %vm1846_vm6, %v16715_v59  ;;  %v11570_v9 = vpop.f32.mrb[199].mxu0  ;;  %8295 = vmatmul.mubr.msk.f32.gmra.mrb[48].mxu0 %vm1846_vm6, %v16715_v59  ;;  %v16720_v50 = vld [vmem:[#allocation56_spill] sm:$0xff] }
 0x3db   : > { %16714 = vst [vmem:[#allocation276_spill] sm:$0xff] %v11566_v41  ;;  %16716 = vst [vmem:[#allocation51_spill] sm:$0xff] %v11570_v9  ;;  %3367 = vmatprep.mubr.f32.mxu1 %v16425_v13  ;;  %3816 = vmatprep.mubr.f32.mxu0 %v16425_v13 }
 0x3dd   : > { %v11576_v1 = vpop.f32.mrb[168].mxu1  ;;  %v11578_v7 = vpop.f32.mrb[200].mxu0 }
 0x3de   : > { %16717 = vst [vmem:[#allocation277_spill] sm:$0xff] %v11576_v1  ;;  %16718 = vst [vmem:[#allocation278_spill] sm:$0xff] %v11578_v7  ;;  %v11580_v11 = vpop.f32.mrb[169].mxu1  ;;  %8232 = vmatmul.mubr.msk.f32.gmra.mrb[18].mxu1 %vm1846_vm6, %v16720_v50  ;;  %v11584_v41 = vpop.f32.mrb[201].mxu0  ;;  %8296 = vmatmul.mubr.msk.f32.gmra.mrb[50].mxu0 %vm1846_vm6, %v16720_v50  ;;  %v16725_v7 = vld [vmem:[#allocation61_spill] sm:$0xff]  ;;  %v8580_v50 = vld [vmem:[%s16222_s3] sm:$0xff]  }
 0x3df   : > { %16719 = vst [vmem:[#allocation279_spill] sm:$0xff] %v11580_v11  ;;  %16721 = vst [vmem:[#allocation56_spill] sm:$0xff] %v11584_v41  ;;  %3373 = vmatprep.mubr.f32.mxu1 %v16425_v13  ;;  %3822 = vmatprep.mubr.f32.mxu0 %v16425_v13 }
 0x3e1   : > { %v11590_v59 = vpop.f32.mrb[170].mxu1  ;;  %v11592_v9 = vpop.f32.mrb[202].mxu0 }
 0x3e2   : > { %16722 = vst [vmem:[#allocation280_spill] sm:$0xff] %v11590_v59  ;;  %16723 = vst [vmem:[#allocation281_spill] sm:$0xff] %v11592_v9  ;;  %v11594_v1 = vpop.f32.mrb[171].mxu1  ;;  %8233 = vmatmul.mubr.msk.f32.gmra.mrb[20].mxu1 %vm1846_vm6, %v16725_v7  ;;  %v11598_v11 = vpop.f32.mrb[203].mxu0  ;;  %8297 = vmatmul.mubr.msk.f32.gmra.mrb[52].mxu0 %vm1846_vm6, %v16725_v7  ;;  %v11619_v7 = vunpack.c.l.bf16 %v8580_v50 }
 0x3e3   : > { %16724 = vst [vmem:[#allocation282_spill] sm:$0xff] %v11594_v1  ;;  %16726 = vst [vmem:[#allocation61_spill] sm:$0xff] %v11598_v11  ;;  %3379 = vmatprep.mubr.f32.mxu1 %v16425_v13  ;;  %3828 = vmatprep.mubr.f32.mxu0 %v16425_v13  ;;  %v3975_v1 = vld [vmem:[#allocation5 + $0x60] sm:$0xf] }
 0x3e5   : > { %v11607_v59 = vpop.f32.mrb[172].mxu1  ;;  %v11609_v9 = vpop.f32.mrb[204].mxu0 }
 0x3e6   : > { %16727 = vst [vmem:[#allocation283_spill] sm:$0xff] %v11607_v59  ;;  %16728 = vst [vmem:[#allocation284_spill] sm:$0xff] %v11609_v9  ;;  %v11611_v41 = vpop.f32.mrb[173].mxu1  ;;  %8234 = vmatmul.mubr.msk.f32.gmra.mrb[22].mxu1 %vm1846_vm6, %v16730_v31  ;;  %v11615_v11 = vpop.f32.mrb[205].mxu0  ;;  %8298 = vmatmul.mubr.msk.f32.gmra.mrb[54].mxu0 %vm1846_vm6, %v16730_v31  ;;  %v3967_v9 = vld [vmem:[#allocation5 + $0x20] sm:$0xff]  ;;  %v11635_v31 = vunpack.c.h.bf16 %v8580_v50 }
 0x3e7   : > { %16729 = vst [vmem:[#allocation285_spill] sm:$0xff] %v11611_v41  ;;  %16731 = vst [vmem:[#allocation66_spill] sm:$0xff] %v11615_v11  ;;  %4260 = vmatprep.mubr.f32.mxu1 %v16425_v13  ;;  %4709 = vmatprep.mubr.f32.mxu0 %v16425_v13  ;;  %v9099_v24 = vpack.c.bf16 %v3975_v1, %v3967_v9 }
 0x3e9   : > { %v11623_v59 = vpop.f32.mrb[174].mxu1  ;;  %v11625_v41 = vpop.f32.mrb[206].mxu0 }
 0x3ea   : > { %16732 = vst [vmem:[#allocation286_spill] sm:$0xff] %v11623_v59  ;;  %16733 = vst [vmem:[#allocation287_spill] sm:$0xff] %v11625_v41  ;;  %v11627_v11 = vpop.f32.mrb[175].mxu1  ;;  %v11629_v6 = vpop.f32.mrb[207].mxu0  ;;  %8301 = vmatmul.mubr.msk.f32.vlgmr.msra.gmra.mrb[24].mxu1 %vm3979_vm9, %v11619_v7  ;;  %8367 = vmatmul.mubr.msk.f32.vlgmr.msra.gmra.mrb[56].mxu0 %vm3979_vm9, %v11619_v7 }
 0x3eb   : > { %16734 = vst [vmem:[#allocation288_spill] sm:$0xff] %v11627_v11  ;;  %16735 = vst [vmem:[#allocation289_spill] sm:$0xff] %v11629_v6  ;;  %9101 = vmatpush1.bf16.msk.msra.mxu1 %vm9887_vm8, %v9099_v24  ;;  %9107 = vmatpush1.bf16.msk.msra.mxu0 %vm9887_vm8, %v9105_v14 }
 0x3ec   : > { %4266 = vmatprep.mubr.f32.mxu1 %v16425_v13  ;;  %4715 = vmatprep.mubr.f32.mxu0 %v16425_v13 }
 0x3ed   : > { %v11646_v43 = vpop.f32.mrb[176].mxu1  ;;  %v11648_v9 = vpop.f32.mrb[208].mxu0 }
 0x3ee   : > { %16736 = vst [vmem:[#allocation290_spill] sm:$0xff] %v11646_v43  ;;  %16737 = vst [vmem:[#allocation291_spill] sm:$0xff] %v11648_v9  ;;  %v11650_v1 = vpop.f32.mrb[177].mxu1  ;;  %v11652_v50 = vpop.f32.mrb[209].mxu0  ;;  %8302 = vmatmul.mubr.msk.f32.gmra.mrb[26].mxu1 %vm3979_vm9, %v11635_v31  ;;  %8368 = vmatmul.mubr.msk.f32.gmra.mrb[58].mxu0 %vm3979_vm9, %v11635_v31 }
 0x3ef   : > { %16738 = vst [vmem:[#allocation292_spill] sm:$0xff] %v11650_v1  ;;  %16739 = vst [vmem:[#allocation293_spill] sm:$0xff] %v11652_v50  ;;  %4272 = vmatprep.mubr.f32.mxu1 %v16425_v13  ;;  %4721 = vmatprep.mubr.f32.mxu0 %v16425_v13  ;;  %v11674_v50 = vunpack.c.h.bf16 %v8707_v2 }
 0x3f1   : > { %v11662_v24 = vpop.f32.mrb[178].mxu1  ;;  %v11664_v14 = vpop.f32.mrb[210].mxu0 }
 0x3f2   : > { %16740 = vst [vmem:[#allocation294_spill] sm:$0xff] %v11662_v24  ;;  %16741 = vst [vmem:[#allocation295_spill] sm:$0xff] %v11664_v14  ;;  %v11666_v9 = vpop.f32.mrb[179].mxu1  ;;  %v11668_v1 = vpop.f32.mrb[211].mxu0  ;;  %8303 = vmatmul.mubr.msk.f32.gmra.mrb[28].mxu1 %vm3979_vm9, %v11658_v39  ;;  %8369 = vmatmul.mubr.msk.f32.gmra.mrb[60].mxu0 %vm3979_vm9, %v11658_v39  ;;  %v8708_v14 = vld [vmem:[%s16222_s3 + $0x10] sm:$0xff]  }
 0x3f3   : > { %16742 = vst [vmem:[#allocation296_spill] sm:$0xff] %v11666_v9  ;;  %16743 = vst [vmem:[#allocation297_spill] sm:$0xff] %v11668_v1  ;;  %4278 = vmatprep.mubr.f32.mxu1 %v16425_v13  ;;  %4727 = vmatprep.mubr.f32.mxu0 %v16425_v13  ;;  %v11693_v2 = vunpack.c.l.bf16 %v8708_v14 }
 0x3f5   : > { %v11681_v24 = vpop.f32.mrb[180].mxu1  ;;  %v11683_v9 = vpop.f32.mrb[212].mxu0 }
 0x3f6   : > { %16744 = vst [vmem:[#allocation298_spill] sm:$0xff] %v11681_v24  ;;  %16745 = vst [vmem:[#allocation299_spill] sm:$0xff] %v11683_v9  ;;  %v11685_v1 = vpop.f32.mrb[181].mxu1  ;;  %v11687_v43 = vpop.f32.mrb[213].mxu0  ;;  %8304 = vmatmul.mubr.msk.f32.gmra.mrb[30].mxu1 %vm3979_vm9, %v11674_v50  ;;  %8370 = vmatmul.mubr.msk.f32.gmra.mrb[62].mxu0 %vm3979_vm9, %v11674_v50 }
 0x3f7   : > { %16746 = vst [vmem:[#allocation300_spill] sm:$0xff] %v11685_v1  ;;  %16747 = vst [vmem:[#allocation301_spill] sm:$0xff] %v11687_v43  ;;  %4284 = vmatprep.mubr.f32.mxu1 %v16425_v13  ;;  %4733 = vmatprep.mubr.f32.mxu0 %v16425_v13  ;;  %v11709_v43 = vunpack.c.h.bf16 %v8708_v14 }
 0x3f9   : > { %v11697_v6 = vpop.f32.mrb[182].mxu1  ;;  %v11699_v24 = vpop.f32.mrb[214].mxu0 }
 0x3fa   : > { %16748 = vst [vmem:[#allocation302_spill] sm:$0xff] %v11697_v6  ;;  %16749 = vst [vmem:[#allocation303_spill] sm:$0xff] %v11699_v24  ;;  %v11701_v9 = vpop.f32.mrb[183].mxu1  ;;  %v11703_v1 = vpop.f32.mrb[215].mxu0  ;;  %8305 = vmatmul.mubr.msk.f32.gmra.mrb[32].mxu1 %vm3979_vm9, %v11693_v2  ;;  %8371 = vmatmul.mubr.msk.f32.gmra.mrb[64].mxu0 %vm3979_vm9, %v11693_v2  ;;  %v8709_v24 = vld [vmem:[%s16222_s3 + $0x18] sm:$0xff]  }
 0x3fb   : > { %16750 = vst [vmem:[#allocation304_spill] sm:$0xff] %v11701_v9  ;;  %16751 = vst [vmem:[#allocation305_spill] sm:$0xff] %v11703_v1  ;;  %4290 = vmatprep.mubr.f32.mxu1 %v16425_v13  ;;  %4739 = vmatprep.mubr.f32.mxu0 %v16425_v13  ;;  %v11728_v14 = vunpack.c.l.bf16 %v8709_v24 }
 0x3fd   : > { %v11716_v6 = vpop.f32.mrb[184].mxu1  ;;  %v11718_v9 = vpop.f32.mrb[216].mxu0 }
 0x3fe   : > { %16752 = vst [vmem:[#allocation306_spill] sm:$0xff] %v11716_v6  ;;  %16753 = vst [vmem:[#allocation307_spill] sm:$0xff] %v11718_v9  ;;  %v11720_v1 = vpop.f32.mrb[185].mxu1  ;;  %v11722_v11 = vpop.f32.mrb[217].mxu0  ;;  %8306 = vmatmul.mubr.msk.f32.gmra.mrb[34].mxu1 %vm3979_vm9, %v11709_v43  ;;  %8372 = vmatmul.mubr.msk.f32.gmra.mrb[66].mxu0 %vm3979_vm9, %v11709_v43 }
 0x3ff   : > { %16754 = vst [vmem:[#allocation308_spill] sm:$0xff] %v11720_v1  ;;  %16755 = vst [vmem:[#allocation309_spill] sm:$0xff] %v11722_v11  ;;  %4296 = vmatprep.mubr.f32.mxu1 %v16425_v13  ;;  %4745 = vmatprep.mubr.f32.mxu0 %v16425_v13  ;;  %v11744_v11 = vunpack.c.h.bf16 %v8709_v24 }
 0x401   : > { %v11732_v41 = vpop.f32.mrb[186].mxu1  ;;  %v11734_v6 = vpop.f32.mrb[218].mxu0 }
 0x402   : > { %16756 = vst [vmem:[#allocation310_spill] sm:$0xff] %v11732_v41  ;;  %16757 = vst [vmem:[#allocation311_spill] sm:$0xff] %v11734_v6  ;;  %v11736_v9 = vpop.f32.mrb[187].mxu1  ;;  %v11738_v1 = vpop.f32.mrb[219].mxu0  ;;  %8307 = vmatmul.mubr.msk.f32.gmra.mrb[36].mxu1 %vm3979_vm9, %v11728_v14  ;;  %8373 = vmatmul.mubr.msk.f32.gmra.mrb[68].mxu0 %vm3979_vm9, %v11728_v14  ;;  %v8710_v6 = vld [vmem:[%s16222_s3 + $0x20] sm:$0xff]  }
 0x403   : > { %16758 = vst [vmem:[#allocation312_spill] sm:$0xff] %v11736_v9  ;;  %16759 = vst [vmem:[#allocation313_spill] sm:$0xff] %v11738_v1  ;;  %4302 = vmatprep.mubr.f32.mxu1 %v16425_v13  ;;  %4751 = vmatprep.mubr.f32.mxu0 %v16425_v13  ;;  %v11763_v24 = vunpack.c.l.bf16 %v8710_v6 }
 0x405   : > { %v11751_v41 = vpop.f32.mrb[188].mxu1  ;;  %v11753_v9 = vpop.f32.mrb[220].mxu0 }
 0x406   : > { %16760 = vst [vmem:[#allocation314_spill] sm:$0xff] %v11751_v41  ;;  %16761 = vst [vmem:[#allocation315_spill] sm:$0xff] %v11753_v9  ;;  %v11755_v1 = vpop.f32.mrb[189].mxu1  ;;  %v11757_v59 = vpop.f32.mrb[221].mxu0  ;;  %8308 = vmatmul.mubr.msk.f32.gmra.mrb[38].mxu1 %vm3979_vm9, %v11744_v11  ;;  %8374 = vmatmul.mubr.msk.f32.gmra.mrb[70].mxu0 %vm3979_vm9, %v11744_v11 }
 0x407   : > { %16762 = vst [vmem:[#allocation316_spill] sm:$0xff] %v11755_v1  ;;  %16763 = vst [vmem:[#allocation317_spill] sm:$0xff] %v11757_v59  ;;  %4308 = vmatprep.mubr.f32.mxu1 %v16425_v13  ;;  %4757 = vmatprep.mubr.f32.mxu0 %v16425_v13  ;;  %v11779_v59 = vunpack.c.h.bf16 %v8710_v6 }
 0x409   : > { %v11767_v57 = vpop.f32.mrb[190].mxu1  ;;  %v11769_v41 = vpop.f32.mrb[222].mxu0 }
 0x40a   : > { %16764 = vst [vmem:[#allocation318_spill] sm:$0xff] %v11767_v57  ;;  %16765 = vst [vmem:[#allocation319_spill] sm:$0xff] %v11769_v41  ;;  %v11771_v9 = vpop.f32.mrb[191].mxu1  ;;  %v11773_v1 = vpop.f32.mrb[223].mxu0  ;;  %8309 = vmatmul.mubr.msk.f32.gmra.mrb[40].mxu1 %vm3979_vm9, %v11763_v24  ;;  %8375 = vmatmul.mubr.msk.f32.gmra.mrb[72].mxu0 %vm3979_vm9, %v11763_v24  ;;  %v8711_v41 = vld [vmem:[%s16222_s3 + $0x28] sm:$0xff]  }
 0x40b   : > { %16766 = vst [vmem:[#allocation320_spill] sm:$0xff] %v11771_v9  ;;  %16767 = vst [vmem:[#allocation321_spill] sm:$0xff] %v11773_v1  ;;  %4314 = vmatprep.mubr.f32.mxu1 %v16425_v13  ;;  %4763 = vmatprep.mubr.f32.mxu0 %v16425_v13  ;;  %v11798_v6 = vunpack.c.l.bf16 %v8711_v41 }
 0x40d   : > { %v11786_v57 = vpop.f32.mrb[192].mxu1  ;;  %v11788_v9 = vpop.f32.mrb[224].mxu0 }
 0x40e   : > { %16768 = vst [vmem:[#allocation322_spill] sm:$0xff] %v11786_v57  ;;  %16769 = vst [vmem:[#allocation323_spill] sm:$0xff] %v11788_v9  ;;  %v11790_v1 = vpop.f32.mrb[193].mxu1  ;;  %v11792_v25 = vpop.f32.mrb[225].mxu0  ;;  %8310 = vmatmul.mubr.msk.f32.gmra.mrb[42].mxu1 %vm3979_vm9, %v11779_v59  ;;  %8376 = vmatmul.mubr.msk.f32.gmra.mrb[74].mxu0 %vm3979_vm9, %v11779_v59 }
 0x40f   : > { %16770 = vst [vmem:[#allocation324_spill] sm:$0xff] %v11790_v1  ;;  %16771 = vst [vmem:[#allocation325_spill] sm:$0xff] %v11792_v25  ;;  %4320 = vmatprep.mubr.f32.mxu1 %v16425_v13  ;;  %4769 = vmatprep.mubr.f32.mxu0 %v16425_v13  ;;  %v11814_v25 = vunpack.c.h.bf16 %v8711_v41 }
 0x411   : > { %v11802_v28 = vpop.f32.mrb[194].mxu1  ;;  %v11804_v57 = vpop.f32.mrb[226].mxu0 }
 0x412   : > { %16772 = vst [vmem:[#allocation326_spill] sm:$0xff] %v11802_v28  ;;  %16773 = vst [vmem:[#allocation327_spill] sm:$0xff] %v11804_v57  ;;  %v11806_v9 = vpop.f32.mrb[195].mxu1  ;;  %v11808_v1 = vpop.f32.mrb[227].mxu0  ;;  %8311 = vmatmul.mubr.msk.f32.gmra.mrb[44].mxu1 %vm3979_vm9, %v11798_v6  ;;  %8377 = vmatmul.mubr.msk.f32.gmra.mrb[76].mxu0 %vm3979_vm9, %v11798_v6  ;;  %v8712_v57 = vld [vmem:[%s16222_s3 + $0x30] sm:$0xff]  }
 0x413   : > { %16774 = vst [vmem:[#allocation328_spill] sm:$0xff] %v11806_v9  ;;  %16775 = vst [vmem:[#allocation329_spill] sm:$0xff] %v11808_v1  ;;  %4326 = vmatprep.mubr.f32.mxu1 %v16425_v13  ;;  %4775 = vmatprep.mubr.f32.mxu0 %v16425_v13  ;;  %v11833_v41 = vunpack.c.l.bf16 %v8712_v57 }
 0x415   : > { %v11821_v28 = vpop.f32.mrb[196].mxu1  ;;  %v11823_v9 = vpop.f32.mrb[228].mxu0 }
 0x416   : > { %16776 = vst [vmem:[#allocation330_spill] sm:$0xff] %v11821_v28  ;;  %16777 = vst [vmem:[#allocation331_spill] sm:$0xff] %v11823_v9  ;;  %v11825_v1 = vpop.f32.mrb[197].mxu1  ;;  %v11827_v12 = vpop.f32.mrb[229].mxu0  ;;  %8312 = vmatmul.mubr.msk.f32.gmra.mrb[46].mxu1 %vm3979_vm9, %v11814_v25  ;;  %8378 = vmatmul.mubr.msk.f32.gmra.mrb[78].mxu0 %vm3979_vm9, %v11814_v25 }
 0x417   : > { %16778 = vst [vmem:[#allocation332_spill] sm:$0xff] %v11825_v1  ;;  %16779 = vst [vmem:[#allocation333_spill] sm:$0xff] %v11827_v12  ;;  %4332 = vmatprep.mubr.f32.mxu1 %v16425_v13  ;;  %4781 = vmatprep.mubr.f32.mxu0 %v16425_v13  ;;  %v11849_v12 = vunpack.c.h.bf16 %v8712_v57 }
 0x419   : > { %v11837_v16 = vpop.f32.mrb[198].mxu1  ;;  %v11839_v28 = vpop.f32.mrb[230].mxu0 }
 0x41a   : > { %16780 = vst [vmem:[#allocation334_spill] sm:$0xff] %v11837_v16  ;;  %16781 = vst [vmem:[#allocation335_spill] sm:$0xff] %v11839_v28  ;;  %v11841_v9 = vpop.f32.mrb[199].mxu1  ;;  %v11843_v1 = vpop.f32.mrb[231].mxu0  ;;  %8313 = vmatmul.mubr.msk.f32.gmra.mrb[48].mxu1 %vm3979_vm9, %v11833_v41  ;;  %8379 = vmatmul.mubr.msk.f32.gmra.mrb[80].mxu0 %vm3979_vm9, %v11833_v41  ;;  %v8713_v28 = vld [vmem:[%s16222_s3 + $0x38] sm:$0xff]  }
 0x41b   : > { %16782 = vst [vmem:[#allocation336_spill] sm:$0xff] %v11841_v9  ;;  %16783 = vst [vmem:[#allocation337_spill] sm:$0xff] %v11843_v1  ;;  %4338 = vmatprep.mubr.f32.mxu1 %v16425_v13  ;;  %4787 = vmatprep.mubr.f32.mxu0 %v16425_v13  ;;  %v11868_v57 = vunpack.c.l.bf16 %v8713_v28 }
 0x41d   : > { %v11856_v16 = vpop.f32.mrb[200].mxu1  ;;  %v11858_v9 = vpop.f32.mrb[232].mxu0 }
 0x41e   : > { %16784 = vst [vmem:[#allocation338_spill] sm:$0xff] %v11856_v16  ;;  %16785 = vst [vmem:[#allocation339_spill] sm:$0xff] %v11858_v9  ;;  %v11860_v1 = vpop.f32.mrb[201].mxu1  ;;  %v11862_v3 = vpop.f32.mrb[233].mxu0  ;;  %8314 = vmatmul.mubr.msk.f32.gmra.mrb[50].mxu1 %vm3979_vm9, %v11849_v12  ;;  %8380 = vmatmul.mubr.msk.f32.gmra.mrb[82].mxu0 %vm3979_vm9, %v11849_v12 }
 0x41f   : > { %16786 = vst [vmem:[#allocation340_spill] sm:$0xff] %v11860_v1  ;;  %16787 = vst [vmem:[#allocation341_spill] sm:$0xff] %v11862_v3  ;;  %4344 = vmatprep.mubr.f32.mxu1 %v16425_v13  ;;  %4793 = vmatprep.mubr.f32.mxu0 %v16425_v13  ;;  %v11884_v3 = vunpack.c.h.bf16 %v8713_v28 }
 0x421   : > { %v11872_v8 = vpop.f32.mrb[202].mxu1  ;;  %v11874_v16 = vpop.f32.mrb[234].mxu0 }
 0x422   : > { %16788 = vst [vmem:[#allocation342_spill] sm:$0xff] %v11872_v8  ;;  %16789 = vst [vmem:[#allocation343_spill] sm:$0xff] %v11874_v16  ;;  %v11876_v9 = vpop.f32.mrb[203].mxu1  ;;  %v11878_v1 = vpop.f32.mrb[235].mxu0  ;;  %8315 = vmatmul.mubr.msk.f32.gmra.mrb[52].mxu1 %vm3979_vm9, %v11868_v57  ;;  %8381 = vmatmul.mubr.msk.f32.gmra.mrb[84].mxu0 %vm3979_vm9, %v11868_v57  ;;  %v8714_v16 = vld [vmem:[%s16222_s3 + $0x40] sm:$0xff]  }
 0x423   : > { %16790 = vst [vmem:[#allocation344_spill] sm:$0xff] %v11876_v9  ;;  %16791 = vst [vmem:[#allocation345_spill] sm:$0xff] %v11878_v1  ;;  %4350 = vmatprep.mubr.f32.mxu1 %v16425_v13  ;;  %4799 = vmatprep.mubr.f32.mxu0 %v16425_v13  ;;  %v11903_v28 = vunpack.c.l.bf16 %v8714_v16 }
 0x425   : > { %v11891_v8 = vpop.f32.mrb[204].mxu1  ;;  %v11893_v9 = vpop.f32.mrb[236].mxu0 }
 0x426   : > { %16792 = vst [vmem:[#allocation346_spill] sm:$0xff] %v11891_v8  ;;  %16793 = vst [vmem:[#allocation347_spill] sm:$0xff] %v11893_v9  ;;  %v11895_v1 = vpop.f32.mrb[205].mxu1  ;;  %v11897_v62 = vpop.f32.mrb[237].mxu0  ;;  %8316 = vmatmul.mubr.msk.f32.gmra.mrb[54].mxu1 %vm3979_vm9, %v11884_v3  ;;  %8382 = vmatmul.mubr.msk.f32.gmra.mrb[86].mxu0 %vm3979_vm9, %v11884_v3 }
 0x427   : > { %16794 = vst [vmem:[#allocation348_spill] sm:$0xff] %v11895_v1  ;;  %16795 = vst [vmem:[#allocation349_spill] sm:$0xff] %v11897_v62  ;;  %4356 = vmatprep.mubr.f32.mxu1 %v16425_v13  ;;  %4805 = vmatprep.mubr.f32.mxu0 %v16425_v13  ;;  %v11919_v62 = vunpack.c.h.bf16 %v8714_v16 }
 0x429   : > { %v11907_v0 = vpop.f32.mrb[206].mxu1  ;;  %v11909_v8 = vpop.f32.mrb[238].mxu0 }
 0x42a   : > { %16796 = vst [vmem:[#allocation350_spill] sm:$0xff] %v11907_v0  ;;  %16797 = vst [vmem:[#allocation351_spill] sm:$0xff] %v11909_v8  ;;  %v11911_v9 = vpop.f32.mrb[207].mxu1  ;;  %v11913_v1 = vpop.f32.mrb[239].mxu0  ;;  %8317 = vmatmul.mubr.msk.f32.gmra.mrb[56].mxu1 %vm3979_vm9, %v11903_v28  ;;  %8383 = vmatmul.mubr.msk.f32.gmra.mrb[88].mxu0 %vm3979_vm9, %v11903_v28  ;;  %v8715_v8 = vld [vmem:[%s16222_s3 + $0x48] sm:$0xff]  }
 0x42b   : > { %16798 = vst [vmem:[#allocation352_spill] sm:$0xff] %v11911_v9  ;;  %16799 = vst [vmem:[#allocation353_spill] sm:$0xff] %v11913_v1  ;;  %4362 = vmatprep.mubr.f32.mxu1 %v16425_v13  ;;  %4811 = vmatprep.mubr.f32.mxu0 %v16425_v13  ;;  %v11938_v16 = vunpack.c.l.bf16 %v8715_v8 }
 0x42d   : > { %v11926_v0 = vpop.f32.mrb[208].mxu1  ;;  %v11928_v9 = vpop.f32.mrb[240].mxu0 }
 0x42e   : > { %16800 = vst [vmem:[#allocation354_spill] sm:$0xff] %v11926_v0  ;;  %16801 = vst [vmem:[#allocation355_spill] sm:$0xff] %v11928_v9  ;;  %v11930_v1 = vpop.f32.mrb[209].mxu1  ;;  %v11932_v54 = vpop.f32.mrb[241].mxu0  ;;  %8318 = vmatmul.mubr.msk.f32.gmra.mrb[58].mxu1 %vm3979_vm9, %v11919_v62  ;;  %8384 = vmatmul.mubr.msk.f32.gmra.mrb[90].mxu0 %vm3979_vm9, %v11919_v62 }
 0x42f   : > { %16802 = vst [vmem:[#allocation356_spill] sm:$0xff] %v11930_v1  ;;  %16803 = vst [vmem:[#allocation357_spill] sm:$0xff] %v11932_v54  ;;  %4368 = vmatprep.mubr.f32.mxu1 %v16425_v13  ;;  %4817 = vmatprep.mubr.f32.mxu0 %v16425_v13  ;;  %v11954_v54 = vunpack.c.h.bf16 %v8715_v8 }
 0x431   : > { %v11942_v56 = vpop.f32.mrb[210].mxu1  ;;  %v11944_v0 = vpop.f32.mrb[242].mxu0 }
 0x432   : > { %16804 = vst [vmem:[#allocation358_spill] sm:$0xff] %v11942_v56  ;;  %16805 = vst [vmem:[#allocation359_spill] sm:$0xff] %v11944_v0  ;;  %v11946_v9 = vpop.f32.mrb[211].mxu1  ;;  %v11948_v1 = vpop.f32.mrb[243].mxu0  ;;  %8319 = vmatmul.mubr.msk.f32.gmra.mrb[60].mxu1 %vm3979_vm9, %v11938_v16  ;;  %8385 = vmatmul.mubr.msk.f32.gmra.mrb[92].mxu0 %vm3979_vm9, %v11938_v16  ;;  %v8716_v0 = vld [vmem:[%s16222_s3 + $0x50] sm:$0xff]  }
 0x433   : > { %16806 = vst [vmem:[#allocation360_spill] sm:$0xff] %v11946_v9  ;;  %16807 = vst [vmem:[#allocation361_spill] sm:$0xff] %v11948_v1  ;;  %4374 = vmatprep.mubr.f32.mxu1 %v16425_v13  ;;  %4823 = vmatprep.mubr.f32.mxu0 %v16425_v13  ;;  %v11973_v8 = vunpack.c.l.bf16 %v8716_v0 }
 0x435   : > { %v11961_v56 = vpop.f32.mrb[212].mxu1  ;;  %v11963_v9 = vpop.f32.mrb[244].mxu0  ;;  %16812 = vst [vmem:[#allocation366_spill] sm:$0xff] %v11973_v8 }
 0x436   : > { %16808 = vst [vmem:[#allocation362_spill] sm:$0xff] %v11961_v56  ;;  %16809 = vst [vmem:[#allocation363_spill] sm:$0xff] %v11963_v9  ;;  %v11965_v1 = vpop.f32.mrb[213].mxu1  ;;  %v11967_v46 = vpop.f32.mrb[245].mxu0  ;;  %8320 = vmatmul.mubr.msk.f32.gmra.mrb[62].mxu1 %vm3979_vm9, %v11954_v54  ;;  %8386 = vmatmul.mubr.msk.f32.gmra.mrb[94].mxu0 %vm3979_vm9, %v11954_v54 }
 0x437   : > { %16810 = vst [vmem:[#allocation364_spill] sm:$0xff] %v11965_v1  ;;  %16811 = vst [vmem:[#allocation365_spill] sm:$0xff] %v11967_v46  ;;  %4380 = vmatprep.mubr.f32.mxu1 %v16425_v13  ;;  %4829 = vmatprep.mubr.f32.mxu0 %v16425_v13  ;;  %v11989_v46 = vunpack.c.h.bf16 %v8716_v0 }
 0x439   : > { %v11977_v48 = vpop.f32.mrb[214].mxu1  ;;  %v11979_v56 = vpop.f32.mrb[246].mxu0  ;;  %16817 = vst [vmem:[#allocation371_spill] sm:$0xff] %v11989_v46 }
 0x43a   : > { %16813 = vst [vmem:[#allocation367_spill] sm:$0xff] %v11977_v48  ;;  %16814 = vst [vmem:[#allocation368_spill] sm:$0xff] %v11979_v56  ;;  %v11981_v9 = vpop.f32.mrb[215].mxu1  ;;  %v11983_v1 = vpop.f32.mrb[247].mxu0  ;;  %8321 = vmatmul.mubr.msk.f32.gmra.mrb[64].mxu1 %vm3979_vm9, %v11973_v8  ;;  %8387 = vmatmul.mubr.msk.f32.gmra.mrb[96].mxu0 %vm3979_vm9, %v11973_v8  ;;  %v8717_v48 = vld [vmem:[%s16222_s3 + $0x58] sm:$0xff]  }
 0x43b   : > { %16815 = vst [vmem:[#allocation369_spill] sm:$0xff] %v11981_v9  ;;  %16816 = vst [vmem:[#allocation370_spill] sm:$0xff] %v11983_v1  ;;  %4386 = vmatprep.mubr.f32.mxu1 %v16425_v13  ;;  %4835 = vmatprep.mubr.f32.mxu0 %v16425_v13  ;;  %v12008_v0 = vunpack.c.l.bf16 %v8717_v48 }
 0x43d   : > { %v11996_v56 = vpop.f32.mrb[216].mxu1  ;;  %v11998_v9 = vpop.f32.mrb[248].mxu0  ;;  %16822 = vst [vmem:[#allocation376_spill] sm:$0xff] %v12008_v0 }
 0x43e   : > { %16818 = vst [vmem:[#allocation372_spill] sm:$0xff] %v11996_v56  ;;  %16819 = vst [vmem:[#allocation373_spill] sm:$0xff] %v11998_v9  ;;  %v12000_v1 = vpop.f32.mrb[217].mxu1  ;;  %v12002_v38 = vpop.f32.mrb[249].mxu0  ;;  %8322 = vmatmul.mubr.msk.f32.gmra.mrb[66].mxu1 %vm3979_vm9, %v11989_v46  ;;  %8388 = vmatmul.mubr.msk.f32.gmra.mrb[98].mxu0 %vm3979_vm9, %v11989_v46 }
 0x43f   : > { %16820 = vst [vmem:[#allocation374_spill] sm:$0xff] %v12000_v1  ;;  %16821 = vst [vmem:[#allocation375_spill] sm:$0xff] %v12002_v38  ;;  %4392 = vmatprep.mubr.f32.mxu1 %v16425_v13  ;;  %4841 = vmatprep.mubr.f32.mxu0 %v16425_v13  ;;  %v12024_v38 = vunpack.c.h.bf16 %v8717_v48 }
 0x441   : > { %v12012_v40 = vpop.f32.mrb[218].mxu1  ;;  %v12014_v56 = vpop.f32.mrb[250].mxu0  ;;  %16827 = vst [vmem:[#allocation381_spill] sm:$0xff] %v12024_v38 }
 0x442   : > { %16823 = vst [vmem:[#allocation377_spill] sm:$0xff] %v12012_v40  ;;  %16824 = vst [vmem:[#allocation378_spill] sm:$0xff] %v12014_v56  ;;  %v12016_v9 = vpop.f32.mrb[219].mxu1  ;;  %v12018_v1 = vpop.f32.mrb[251].mxu0  ;;  %8323 = vmatmul.mubr.msk.f32.gmra.mrb[68].mxu1 %vm3979_vm9, %v12008_v0  ;;  %8389 = vmatmul.mubr.msk.f32.gmra.mrb[100].mxu0 %vm3979_vm9, %v12008_v0  ;;  %v8718_v40 = vld [vmem:[%s16222_s3 + $0x60] sm:$0xff]  }
 0x443   : > { %16825 = vst [vmem:[#allocation379_spill] sm:$0xff] %v12016_v9  ;;  %16826 = vst [vmem:[#allocation380_spill] sm:$0xff] %v12018_v1  ;;  %4398 = vmatprep.mubr.f32.mxu1 %v16425_v13  ;;  %4847 = vmatprep.mubr.f32.mxu0 %v16425_v13  ;;  %v12043_v48 = vunpack.c.l.bf16 %v8718_v40 }
 0x445   : > { %v12031_v56 = vpop.f32.mrb[220].mxu1  ;;  %v12033_v9 = vpop.f32.mrb[252].mxu0  ;;  %16832 = vst [vmem:[#allocation386_spill] sm:$0xff] %v12043_v48 }
 0x446   : > { %16828 = vst [vmem:[#allocation382_spill] sm:$0xff] %v12031_v56  ;;  %16829 = vst [vmem:[#allocation383_spill] sm:$0xff] %v12033_v9  ;;  %v12035_v1 = vpop.f32.mrb[221].mxu1  ;;  %v12037_v33 = vpop.f32.mrb[253].mxu0  ;;  %8324 = vmatmul.mubr.msk.f32.gmra.mrb[70].mxu1 %vm3979_vm9, %v12024_v38  ;;  %8390 = vmatmul.mubr.msk.f32.gmra.mrb[102].mxu0 %vm3979_vm9, %v12024_v38 }
 0x447   : > { %16830 = vst [vmem:[#allocation384_spill] sm:$0xff] %v12035_v1  ;;  %16831 = vst [vmem:[#allocation385_spill] sm:$0xff] %v12037_v33  ;;  %4404 = vmatprep.mubr.f32.mxu1 %v16425_v13  ;;  %4853 = vmatprep.mubr.f32.mxu0 %v16425_v13  ;;  %v12059_v33 = vunpack.c.h.bf16 %v8718_v40 }
 0x449   : > { %v12047_v30 = vpop.f32.mrb[222].mxu1  ;;  %v12049_v56 = vpop.f32.mrb[254].mxu0  ;;  %16837 = vst [vmem:[#allocation391_spill] sm:$0xff] %v12059_v33 }
 0x44a   : > { %16833 = vst [vmem:[#allocation387_spill] sm:$0xff] %v12047_v30  ;;  %16834 = vst [vmem:[#allocation388_spill] sm:$0xff] %v12049_v56  ;;  %v12051_v9 = vpop.f32.mrb[223].mxu1  ;;  %v12053_v1 = vpop.f32.mrb[255].mxu0  ;;  %8325 = vmatmul.mubr.msk.f32.gmra.mrb[72].mxu1 %vm3979_vm9, %v12043_v48  ;;  %8391 = vmatmul.mubr.msk.f32.gmra.mrb[104].mxu0 %vm3979_vm9, %v12043_v48  ;;  %v8719_v30 = vld [vmem:[%s16222_s3 + $0x68] sm:$0xff]  }
 0x44b   : > { %16835 = vst [vmem:[#allocation389_spill] sm:$0xff] %v12051_v9  ;;  %16836 = vst [vmem:[#allocation390_spill] sm:$0xff] %v12053_v1  ;;  %4410 = vmatprep.mubr.f32.mxu1 %v16425_v13  ;;  %4859 = vmatprep.mubr.f32.mxu0 %v16425_v13  ;;  %v12078_v40 = vunpack.c.l.bf16 %v8719_v30 }
 0x44d   : > { %v12066_v56 = vpop.f32.mrb[224].mxu1  ;;  %v12068_v9 = vpop.f32.mrb[0].mxu0  ;;  %16842 = vst [vmem:[#allocation396_spill] sm:$0xff] %v12078_v40 }
 0x44e   : > { %16838 = vst [vmem:[#allocation392_spill] sm:$0xff] %v12066_v56  ;;  %16839 = vst [vmem:[#allocation393_spill] sm:$0xff] %v12068_v9  ;;  %v12070_v1 = vpop.f32.mrb[225].mxu1  ;;  %v12072_v34 = vpop.f32.mrb[1].mxu0  ;;  %8326 = vmatmul.mubr.msk.f32.gmra.mrb[74].mxu1 %vm3979_vm9, %v12059_v33  ;;  %8392 = vmatmul.mubr.msk.f32.gmra.mrb[106].mxu0 %vm3979_vm9, %v12059_v33 }
 0x44f   : > { %16840 = vst [vmem:[#allocation394_spill] sm:$0xff] %v12070_v1  ;;  %16841 = vst [vmem:[#allocation395_spill] sm:$0xff] %v12072_v34  ;;  %4416 = vmatprep.mubr.f32.mxu1 %v16425_v13  ;;  %4865 = vmatprep.mubr.f32.mxu0 %v16425_v13  ;;  %v12094_v34 = vunpack.c.h.bf16 %v8719_v30 }
 0x451   : > { %v12082_v19 = vpop.f32.mrb[226].mxu1  ;;  %v12084_v56 = vpop.f32.mrb[2].mxu0  ;;  %16847 = vst [vmem:[#allocation401_spill] sm:$0xff] %v12094_v34 }
 0x452   : > { %16843 = vst [vmem:[#allocation397_spill] sm:$0xff] %v12082_v19  ;;  %16844 = vst [vmem:[#allocation398_spill] sm:$0xff] %v12084_v56  ;;  %v12086_v9 = vpop.f32.mrb[227].mxu1  ;;  %v12088_v1 = vpop.f32.mrb[3].mxu0  ;;  %8327 = vmatmul.mubr.msk.f32.gmra.mrb[76].mxu1 %vm3979_vm9, %v12078_v40  ;;  %8393 = vmatmul.mubr.msk.f32.gmra.mrb[108].mxu0 %vm3979_vm9, %v12078_v40  ;;  %v8720_v19 = vld [vmem:[%s16222_s3 + $0x70] sm:$0xff]  }
 0x453   : > { %16845 = vst [vmem:[#allocation399_spill] sm:$0xff] %v12086_v9  ;;  %16846 = vst [vmem:[#allocation400_spill] sm:$0xff] %v12088_v1  ;;  %4422 = vmatprep.mubr.f32.mxu1 %v16425_v13  ;;  %4871 = vmatprep.mubr.f32.mxu0 %v16425_v13  ;;  %v12113_v30 = vunpack.c.l.bf16 %v8720_v19 }
 0x455   : > { %v12101_v56 = vpop.f32.mrb[228].mxu1  ;;  %v12103_v9 = vpop.f32.mrb[4].mxu0  ;;  %16852 = vst [vmem:[#allocation406_spill] sm:$0xff] %v12113_v30 }
 0x456   : > { %16848 = vst [vmem:[#allocation402_spill] sm:$0xff] %v12101_v56  ;;  %16849 = vst [vmem:[#allocation403_spill] sm:$0xff] %v12103_v9  ;;  %v12105_v1 = vpop.f32.mrb[229].mxu1  ;;  %v12107_v17 = vpop.f32.mrb[5].mxu0  ;;  %8328 = vmatmul.mubr.msk.f32.gmra.mrb[78].mxu1 %vm3979_vm9, %v12094_v34  ;;  %8394 = vmatmul.mubr.msk.f32.gmra.mrb[110].mxu0 %vm3979_vm9, %v12094_v34 }
 0x457   : > { %16850 = vst [vmem:[#allocation404_spill] sm:$0xff] %v12105_v1  ;;  %16851 = vst [vmem:[#allocation405_spill] sm:$0xff] %v12107_v17  ;;  %4428 = vmatprep.mubr.f32.mxu1 %v16425_v13  ;;  %4877 = vmatprep.mubr.f32.mxu0 %v16425_v13  ;;  %v12129_v17 = vunpack.c.h.bf16 %v8720_v19 }
 0x459   : > { %v12117_v29 = vpop.f32.mrb[230].mxu1  ;;  %v12119_v56 = vpop.f32.mrb[6].mxu0  ;;  %16857 = vst [vmem:[#allocation411_spill] sm:$0xff] %v12129_v17 }
 0x45a   : > { %16853 = vst [vmem:[#allocation407_spill] sm:$0xff] %v12117_v29  ;;  %16854 = vst [vmem:[#allocation408_spill] sm:$0xff] %v12119_v56  ;;  %v12121_v9 = vpop.f32.mrb[231].mxu1  ;;  %v12123_v1 = vpop.f32.mrb[7].mxu0  ;;  %8329 = vmatmul.mubr.msk.f32.gmra.mrb[80].mxu1 %vm3979_vm9, %v12113_v30  ;;  %8395 = vmatmul.mubr.msk.f32.gmra.mrb[112].mxu0 %vm3979_vm9, %v12113_v30  ;;  %v8721_v29 = vld [vmem:[%s16222_s3 + $0x78] sm:$0xff]  }
 0x45b   : > { %16855 = vst [vmem:[#allocation409_spill] sm:$0xff] %v12121_v9  ;;  %16856 = vst [vmem:[#allocation410_spill] sm:$0xff] %v12123_v1  ;;  %4434 = vmatprep.mubr.f32.mxu1 %v16425_v13  ;;  %4883 = vmatprep.mubr.f32.mxu0 %v16425_v13  ;;  %v12148_v19 = vunpack.c.l.bf16 %v8721_v29 }
 0x45d   : > { %v12136_v56 = vpop.f32.mrb[232].mxu1  ;;  %v12138_v9 = vpop.f32.mrb[8].mxu0  ;;  %16862 = vst [vmem:[#allocation416_spill] sm:$0xff] %v12148_v19 }
 0x45e   : > { %16858 = vst [vmem:[#allocation412_spill] sm:$0xff] %v12136_v56  ;;  %16859 = vst [vmem:[#allocation413_spill] sm:$0xff] %v12138_v9  ;;  %v12140_v1 = vpop.f32.mrb[233].mxu1  ;;  %v12142_v34 = vpop.f32.mrb[9].mxu0  ;;  %8330 = vmatmul.mubr.msk.f32.gmra.mrb[82].mxu1 %vm3979_vm9, %v12129_v17  ;;  %8396 = vmatmul.mubr.msk.f32.gmra.mrb[114].mxu0 %vm3979_vm9, %v12129_v17 }
 0x45f   : > { %16860 = vst [vmem:[#allocation414_spill] sm:$0xff] %v12140_v1  ;;  %16861 = vst [vmem:[#allocation415_spill] sm:$0xff] %v12142_v34  ;;  %4440 = vmatprep.mubr.f32.mxu1 %v16425_v13  ;;  %4889 = vmatprep.mubr.f32.mxu0 %v16425_v13  ;;  %v12164_v34 = vunpack.c.h.bf16 %v8721_v29 }
 0x461   : > { %v12152_v30 = vpop.f32.mrb[234].mxu1  ;;  %v12154_v56 = vpop.f32.mrb[10].mxu0  ;;  %16867 = vst [vmem:[#allocation421_spill] sm:$0xff] %v12164_v34 }
 0x462   : > { %16863 = vst [vmem:[#allocation417_spill] sm:$0xff] %v12152_v30  ;;  %16864 = vst [vmem:[#allocation418_spill] sm:$0xff] %v12154_v56  ;;  %v12156_v9 = vpop.f32.mrb[235].mxu1  ;;  %v12158_v1 = vpop.f32.mrb[11].mxu0  ;;  %8331 = vmatmul.mubr.msk.f32.gmra.mrb[84].mxu1 %vm3979_vm9, %v12148_v19  ;;  %8397 = vmatmul.mubr.msk.f32.gmra.mrb[116].mxu0 %vm3979_vm9, %v12148_v19  ;;  %v8722_v30 = vld [vmem:[%s16222_s3 + $0x80] sm:$0xff]  }
 0x463   : > { %16865 = vst [vmem:[#allocation419_spill] sm:$0xff] %v12156_v9  ;;  %16866 = vst [vmem:[#allocation420_spill] sm:$0xff] %v12158_v1  ;;  %4446 = vmatprep.mubr.f32.mxu1 %v16425_v13  ;;  %4895 = vmatprep.mubr.f32.mxu0 %v16425_v13  ;;  %v12183_v29 = vunpack.c.l.bf16 %v8722_v30 }
 0x465   : > { %v12171_v56 = vpop.f32.mrb[236].mxu1  ;;  %v12173_v9 = vpop.f32.mrb[12].mxu0  ;;  %16872 = vst [vmem:[#allocation426_spill] sm:$0xff] %v12183_v29 }
 0x466   : > { %16868 = vst [vmem:[#allocation422_spill] sm:$0xff] %v12171_v56  ;;  %16869 = vst [vmem:[#allocation423_spill] sm:$0xff] %v12173_v9  ;;  %v12175_v1 = vpop.f32.mrb[237].mxu1  ;;  %v12177_v17 = vpop.f32.mrb[13].mxu0  ;;  %8332 = vmatmul.mubr.msk.f32.gmra.mrb[86].mxu1 %vm3979_vm9, %v12164_v34  ;;  %8398 = vmatmul.mubr.msk.f32.gmra.mrb[118].mxu0 %vm3979_vm9, %v12164_v34 }
 0x467   : > { %16870 = vst [vmem:[#allocation424_spill] sm:$0xff] %v12175_v1  ;;  %16871 = vst [vmem:[#allocation425_spill] sm:$0xff] %v12177_v17  ;;  %4452 = vmatprep.mubr.f32.mxu1 %v16425_v13  ;;  %4901 = vmatprep.mubr.f32.mxu0 %v16425_v13  ;;  %v12199_v17 = vunpack.c.h.bf16 %v8722_v30 }
 0x469   : > { %v12187_v19 = vpop.f32.mrb[238].mxu1  ;;  %v12189_v56 = vpop.f32.mrb[14].mxu0  ;;  %16877 = vst [vmem:[#allocation431_spill] sm:$0xff] %v12199_v17 }
 0x46a   : > { %16873 = vst [vmem:[#allocation427_spill] sm:$0xff] %v12187_v19  ;;  %16874 = vst [vmem:[#allocation428_spill] sm:$0xff] %v12189_v56  ;;  %v12191_v9 = vpop.f32.mrb[239].mxu1  ;;  %v12193_v1 = vpop.f32.mrb[15].mxu0  ;;  %8333 = vmatmul.mubr.msk.f32.gmra.mrb[88].mxu1 %vm3979_vm9, %v12183_v29  ;;  %8399 = vmatmul.mubr.msk.f32.gmra.mrb[120].mxu0 %vm3979_vm9, %v12183_v29  ;;  %v8723_v19 = vld [vmem:[%s16222_s3 + $0x88] sm:$0xff]  }
 0x46b   : > { %16875 = vst [vmem:[#allocation429_spill] sm:$0xff] %v12191_v9  ;;  %16876 = vst [vmem:[#allocation430_spill] sm:$0xff] %v12193_v1  ;;  %4458 = vmatprep.mubr.f32.mxu1 %v16425_v13  ;;  %4907 = vmatprep.mubr.f32.mxu0 %v16425_v13  ;;  %v12218_v30 = vunpack.c.l.bf16 %v8723_v19 }
 0x46d   : > { %v12206_v56 = vpop.f32.mrb[240].mxu1  ;;  %v12208_v9 = vpop.f32.mrb[16].mxu0  ;;  %16882 = vst [vmem:[#allocation436_spill] sm:$0xff] %v12218_v30 }
 0x46e   : > { %16878 = vst [vmem:[#allocation432_spill] sm:$0xff] %v12206_v56  ;;  %16879 = vst [vmem:[#allocation433_spill] sm:$0xff] %v12208_v9  ;;  %v12210_v1 = vpop.f32.mrb[241].mxu1  ;;  %v12212_v34 = vpop.f32.mrb[17].mxu0  ;;  %8334 = vmatmul.mubr.msk.f32.gmra.mrb[90].mxu1 %vm3979_vm9, %v12199_v17  ;;  %8400 = vmatmul.mubr.msk.f32.gmra.mrb[122].mxu0 %vm3979_vm9, %v12199_v17 }
 0x46f   : > { %16880 = vst [vmem:[#allocation434_spill] sm:$0xff] %v12210_v1  ;;  %16881 = vst [vmem:[#allocation435_spill] sm:$0xff] %v12212_v34  ;;  %4464 = vmatprep.mubr.f32.mxu1 %v16425_v13  ;;  %4913 = vmatprep.mubr.f32.mxu0 %v16425_v13  ;;  %v12234_v34 = vunpack.c.h.bf16 %v8723_v19 }
 0x471   : > { %v12222_v29 = vpop.f32.mrb[242].mxu1  ;;  %v12224_v56 = vpop.f32.mrb[18].mxu0  ;;  %16887 = vst [vmem:[#allocation441_spill] sm:$0xff] %v12234_v34 }
 0x472   : > { %16883 = vst [vmem:[#allocation437_spill] sm:$0xff] %v12222_v29  ;;  %16884 = vst [vmem:[#allocation438_spill] sm:$0xff] %v12224_v56  ;;  %v12226_v9 = vpop.f32.mrb[243].mxu1  ;;  %v12228_v1 = vpop.f32.mrb[19].mxu0  ;;  %8335 = vmatmul.mubr.msk.f32.gmra.mrb[92].mxu1 %vm3979_vm9, %v12218_v30  ;;  %8401 = vmatmul.mubr.msk.f32.gmra.mrb[124].mxu0 %vm3979_vm9, %v12218_v30  ;;  %v8724_v29 = vld [vmem:[%s16222_s3 + $0x90] sm:$0xff]  }
 0x473   : > { %16885 = vst [vmem:[#allocation439_spill] sm:$0xff] %v12226_v9  ;;  %16886 = vst [vmem:[#allocation440_spill] sm:$0xff] %v12228_v1  ;;  %4470 = vmatprep.mubr.f32.mxu1 %v16425_v13  ;;  %4919 = vmatprep.mubr.f32.mxu0 %v16425_v13  ;;  %v12253_v19 = vunpack.c.l.bf16 %v8724_v29 }
 0x475   : > { %v12241_v56 = vpop.f32.mrb[244].mxu1  ;;  %v12243_v9 = vpop.f32.mrb[20].mxu0  ;;  %16892 = vst [vmem:[#allocation446_spill] sm:$0xff] %v12253_v19 }
 0x476   : > { %16888 = vst [vmem:[#allocation442_spill] sm:$0xff] %v12241_v56  ;;  %16889 = vst [vmem:[#allocation443_spill] sm:$0xff] %v12243_v9  ;;  %v12245_v1 = vpop.f32.mrb[245].mxu1  ;;  %v12247_v17 = vpop.f32.mrb[21].mxu0  ;;  %8336 = vmatmul.mubr.msk.f32.gmra.mrb[94].mxu1 %vm3979_vm9, %v12234_v34  ;;  %8402 = vmatmul.mubr.msk.f32.gmra.mrb[126].mxu0 %vm3979_vm9, %v12234_v34 }
 0x477   : > { %16890 = vst [vmem:[#allocation444_spill] sm:$0xff] %v12245_v1  ;;  %16891 = vst [vmem:[#allocation445_spill] sm:$0xff] %v12247_v17  ;;  %4476 = vmatprep.mubr.f32.mxu1 %v16425_v13  ;;  %4925 = vmatprep.mubr.f32.mxu0 %v16425_v13  ;;  %v12269_v17 = vunpack.c.h.bf16 %v8724_v29 }
 0x479   : > { %v12257_v30 = vpop.f32.mrb[246].mxu1  ;;  %v12259_v56 = vpop.f32.mrb[22].mxu0  ;;  %16897 = vst [vmem:[#allocation451_spill] sm:$0xff] %v12269_v17 }
 0x47a   : > { %16893 = vst [vmem:[#allocation447_spill] sm:$0xff] %v12257_v30  ;;  %16894 = vst [vmem:[#allocation448_spill] sm:$0xff] %v12259_v56  ;;  %v12261_v9 = vpop.f32.mrb[247].mxu1  ;;  %v12263_v1 = vpop.f32.mrb[23].mxu0  ;;  %8337 = vmatmul.mubr.msk.f32.gmra.mrb[96].mxu1 %vm3979_vm9, %v12253_v19  ;;  %8403 = vmatmul.mubr.msk.f32.gmra.mrb[128].mxu0 %vm3979_vm9, %v12253_v19  ;;  %v8725_v30 = vld [vmem:[%s16222_s3 + $0x98] sm:$0xff]  }
 0x47b   : > { %16895 = vst [vmem:[#allocation449_spill] sm:$0xff] %v12261_v9  ;;  %16896 = vst [vmem:[#allocation450_spill] sm:$0xff] %v12263_v1  ;;  %4482 = vmatprep.mubr.f32.mxu1 %v16425_v13  ;;  %4931 = vmatprep.mubr.f32.mxu0 %v16425_v13  ;;  %v12288_v29 = vunpack.c.l.bf16 %v8725_v30 }
 0x47d   : > { %v12276_v56 = vpop.f32.mrb[248].mxu1  ;;  %v12278_v9 = vpop.f32.mrb[24].mxu0  ;;  %16902 = vst [vmem:[#allocation456_spill] sm:$0xff] %v12288_v29 }
 0x47e   : > { %16898 = vst [vmem:[#allocation452_spill] sm:$0xff] %v12276_v56  ;;  %16899 = vst [vmem:[#allocation453_spill] sm:$0xff] %v12278_v9  ;;  %v12280_v1 = vpop.f32.mrb[249].mxu1  ;;  %v12282_v34 = vpop.f32.mrb[25].mxu0  ;;  %8338 = vmatmul.mubr.msk.f32.gmra.mrb[98].mxu1 %vm3979_vm9, %v12269_v17  ;;  %8404 = vmatmul.mubr.msk.f32.gmra.mrb[130].mxu0 %vm3979_vm9, %v12269_v17 }
 0x47f   : > { %16900 = vst [vmem:[#allocation454_spill] sm:$0xff] %v12280_v1  ;;  %16901 = vst [vmem:[#allocation455_spill] sm:$0xff] %v12282_v34  ;;  %4488 = vmatprep.mubr.f32.mxu1 %v16425_v13  ;;  %4937 = vmatprep.mubr.f32.mxu0 %v16425_v13  ;;  %v12304_v34 = vunpack.c.h.bf16 %v8725_v30 }
 0x481   : > { %v12292_v19 = vpop.f32.mrb[250].mxu1  ;;  %v12294_v56 = vpop.f32.mrb[26].mxu0  ;;  %16907 = vst [vmem:[#allocation461_spill] sm:$0xff] %v12304_v34 }
 0x482   : > { %16903 = vst [vmem:[#allocation457_spill] sm:$0xff] %v12292_v19  ;;  %16904 = vst [vmem:[#allocation458_spill] sm:$0xff] %v12294_v56  ;;  %v12296_v9 = vpop.f32.mrb[251].mxu1  ;;  %v12298_v1 = vpop.f32.mrb[27].mxu0  ;;  %8339 = vmatmul.mubr.msk.f32.gmra.mrb[100].mxu1 %vm3979_vm9, %v12288_v29  ;;  %8405 = vmatmul.mubr.msk.f32.gmra.mrb[132].mxu0 %vm3979_vm9, %v12288_v29  ;;  %v8726_v19 = vld [vmem:[%s16222_s3 + $0xa0] sm:$0xff]  }
 0x483   : > { %16905 = vst [vmem:[#allocation459_spill] sm:$0xff] %v12296_v9  ;;  %16906 = vst [vmem:[#allocation460_spill] sm:$0xff] %v12298_v1  ;;  %4494 = vmatprep.mubr.f32.mxu1 %v16425_v13  ;;  %4943 = vmatprep.mubr.f32.mxu0 %v16425_v13  ;;  %v12323_v30 = vunpack.c.l.bf16 %v8726_v19 }
 0x485   : > { %v12311_v56 = vpop.f32.mrb[252].mxu1  ;;  %v12313_v9 = vpop.f32.mrb[28].mxu0  ;;  %16912 = vst [vmem:[#allocation466_spill] sm:$0xff] %v12323_v30 }
 0x486   : > { %16908 = vst [vmem:[#allocation462_spill] sm:$0xff] %v12311_v56  ;;  %16909 = vst [vmem:[#allocation463_spill] sm:$0xff] %v12313_v9  ;;  %v12315_v1 = vpop.f32.mrb[253].mxu1  ;;  %v12317_v17 = vpop.f32.mrb[29].mxu0  ;;  %8340 = vmatmul.mubr.msk.f32.gmra.mrb[102].mxu1 %vm3979_vm9, %v12304_v34  ;;  %8406 = vmatmul.mubr.msk.f32.gmra.mrb[134].mxu0 %vm3979_vm9, %v12304_v34 }
 0x487   : > { %16910 = vst [vmem:[#allocation464_spill] sm:$0xff] %v12315_v1  ;;  %16911 = vst [vmem:[#allocation465_spill] sm:$0xff] %v12317_v17  ;;  %4500 = vmatprep.mubr.f32.mxu1 %v16425_v13  ;;  %4949 = vmatprep.mubr.f32.mxu0 %v16425_v13  ;;  %v12339_v17 = vunpack.c.h.bf16 %v8726_v19 }
 0x489   : > { %v12327_v29 = vpop.f32.mrb[254].mxu1  ;;  %v12329_v56 = vpop.f32.mrb[30].mxu0  ;;  %16917 = vst [vmem:[#allocation471_spill] sm:$0xff] %v12339_v17 }
 0x48a   : > { %16913 = vst [vmem:[#allocation467_spill] sm:$0xff] %v12327_v29  ;;  %16914 = vst [vmem:[#allocation468_spill] sm:$0xff] %v12329_v56  ;;  %v12331_v9 = vpop.f32.mrb[255].mxu1  ;;  %v12333_v1 = vpop.f32.mrb[31].mxu0  ;;  %8341 = vmatmul.mubr.msk.f32.gmra.mrb[104].mxu1 %vm3979_vm9, %v12323_v30  ;;  %8407 = vmatmul.mubr.msk.f32.gmra.mrb[136].mxu0 %vm3979_vm9, %v12323_v30  ;;  %v8727_v29 = vld [vmem:[%s16222_s3 + $0xa8] sm:$0xff]  }
 0x48b   : > { %16915 = vst [vmem:[#allocation469_spill] sm:$0xff] %v12331_v9  ;;  %16916 = vst [vmem:[#allocation470_spill] sm:$0xff] %v12333_v1  ;;  %4506 = vmatprep.mubr.f32.mxu1 %v16425_v13  ;;  %4955 = vmatprep.mubr.f32.mxu0 %v16425_v13  ;;  %v12358_v19 = vunpack.c.l.bf16 %v8727_v29 }
 0x48d   : > { %v12346_v56 = vpop.f32.mrb[0].mxu1  ;;  %v12348_v9 = vpop.f32.mrb[32].mxu0  ;;  %16922 = vst [vmem:[#allocation476_spill] sm:$0xff] %v12358_v19 }
 0x48e   : > { %16918 = vst [vmem:[#allocation472_spill] sm:$0xff] %v12346_v56  ;;  %16919 = vst [vmem:[#allocation473_spill] sm:$0xff] %v12348_v9  ;;  %v12350_v1 = vpop.f32.mrb[1].mxu1  ;;  %v12352_v34 = vpop.f32.mrb[33].mxu0  ;;  %8342 = vmatmul.mubr.msk.f32.gmra.mrb[106].mxu1 %vm3979_vm9, %v12339_v17  ;;  %8408 = vmatmul.mubr.msk.f32.gmra.mrb[138].mxu0 %vm3979_vm9, %v12339_v17 }
 0x48f   : > { %16920 = vst [vmem:[#allocation474_spill] sm:$0xff] %v12350_v1  ;;  %16921 = vst [vmem:[#allocation475_spill] sm:$0xff] %v12352_v34  ;;  %4512 = vmatprep.mubr.f32.mxu1 %v16425_v13  ;;  %4961 = vmatprep.mubr.f32.mxu0 %v16425_v13  ;;  %v12374_v34 = vunpack.c.h.bf16 %v8727_v29 }
 0x491   : > { %v12362_v30 = vpop.f32.mrb[2].mxu1  ;;  %v12364_v56 = vpop.f32.mrb[34].mxu0  ;;  %16927 = vst [vmem:[#allocation481_spill] sm:$0xff] %v12374_v34 }
 0x492   : > { %16923 = vst [vmem:[#allocation477_spill] sm:$0xff] %v12362_v30  ;;  %16924 = vst [vmem:[#allocation478_spill] sm:$0xff] %v12364_v56  ;;  %v12366_v9 = vpop.f32.mrb[3].mxu1  ;;  %v12368_v1 = vpop.f32.mrb[35].mxu0  ;;  %8343 = vmatmul.mubr.msk.f32.gmra.mrb[108].mxu1 %vm3979_vm9, %v12358_v19  ;;  %8409 = vmatmul.mubr.msk.f32.gmra.mrb[140].mxu0 %vm3979_vm9, %v12358_v19  ;;  %v8728_v30 = vld [vmem:[%s16222_s3 + $0xb0] sm:$0xff]  }
 0x493   : > { %16925 = vst [vmem:[#allocation479_spill] sm:$0xff] %v12366_v9  ;;  %16926 = vst [vmem:[#allocation480_spill] sm:$0xff] %v12368_v1  ;;  %4518 = vmatprep.mubr.f32.mxu1 %v16425_v13  ;;  %4967 = vmatprep.mubr.f32.mxu0 %v16425_v13  ;;  %v12393_v29 = vunpack.c.l.bf16 %v8728_v30 }
 0x495   : > { %v12381_v56 = vpop.f32.mrb[4].mxu1  ;;  %v12383_v9 = vpop.f32.mrb[36].mxu0  ;;  %16932 = vst [vmem:[#allocation486_spill] sm:$0xff] %v12393_v29 }
 0x496   : > { %16928 = vst [vmem:[#allocation482_spill] sm:$0xff] %v12381_v56  ;;  %16929 = vst [vmem:[#allocation483_spill] sm:$0xff] %v12383_v9  ;;  %v12385_v1 = vpop.f32.mrb[5].mxu1  ;;  %v12387_v17 = vpop.f32.mrb[37].mxu0  ;;  %8344 = vmatmul.mubr.msk.f32.gmra.mrb[110].mxu1 %vm3979_vm9, %v12374_v34  ;;  %8410 = vmatmul.mubr.msk.f32.gmra.mrb[142].mxu0 %vm3979_vm9, %v12374_v34 }
 0x497   : > { %16930 = vst [vmem:[#allocation484_spill] sm:$0xff] %v12385_v1  ;;  %16931 = vst [vmem:[#allocation485_spill] sm:$0xff] %v12387_v17  ;;  %4524 = vmatprep.mubr.f32.mxu1 %v16425_v13  ;;  %4973 = vmatprep.mubr.f32.mxu0 %v16425_v13  ;;  %v12409_v17 = vunpack.c.h.bf16 %v8728_v30 }
 0x499   : > { %v12397_v19 = vpop.f32.mrb[6].mxu1  ;;  %v12399_v56 = vpop.f32.mrb[38].mxu0  ;;  %16937 = vst [vmem:[#allocation491_spill] sm:$0xff] %v12409_v17 }
 0x49a   : > { %16933 = vst [vmem:[#allocation487_spill] sm:$0xff] %v12397_v19  ;;  %16934 = vst [vmem:[#allocation488_spill] sm:$0xff] %v12399_v56  ;;  %v12401_v9 = vpop.f32.mrb[7].mxu1  ;;  %v12403_v1 = vpop.f32.mrb[39].mxu0  ;;  %8345 = vmatmul.mubr.msk.f32.gmra.mrb[112].mxu1 %vm3979_vm9, %v12393_v29  ;;  %8411 = vmatmul.mubr.msk.f32.gmra.mrb[144].mxu0 %vm3979_vm9, %v12393_v29  ;;  %v8729_v19 = vld [vmem:[%s16222_s3 + $0xb8] sm:$0xff]  }
 0x49b   : > { %16935 = vst [vmem:[#allocation489_spill] sm:$0xff] %v12401_v9  ;;  %16936 = vst [vmem:[#allocation490_spill] sm:$0xff] %v12403_v1  ;;  %4530 = vmatprep.mubr.f32.mxu1 %v16425_v13  ;;  %4979 = vmatprep.mubr.f32.mxu0 %v16425_v13  ;;  %v12428_v30 = vunpack.c.l.bf16 %v8729_v19 }
 0x49d   : > { %v12416_v56 = vpop.f32.mrb[8].mxu1  ;;  %v12418_v9 = vpop.f32.mrb[40].mxu0  ;;  %16942 = vst [vmem:[#allocation496_spill] sm:$0xff] %v12428_v30 }
 0x49e   : > { %16938 = vst [vmem:[#allocation492_spill] sm:$0xff] %v12416_v56  ;;  %16939 = vst [vmem:[#allocation493_spill] sm:$0xff] %v12418_v9  ;;  %v12420_v1 = vpop.f32.mrb[9].mxu1  ;;  %v12422_v34 = vpop.f32.mrb[41].mxu0  ;;  %8346 = vmatmul.mubr.msk.f32.gmra.mrb[114].mxu1 %vm3979_vm9, %v12409_v17  ;;  %8412 = vmatmul.mubr.msk.f32.gmra.mrb[146].mxu0 %vm3979_vm9, %v12409_v17 }
 0x49f   : > { %16940 = vst [vmem:[#allocation494_spill] sm:$0xff] %v12420_v1  ;;  %16941 = vst [vmem:[#allocation495_spill] sm:$0xff] %v12422_v34  ;;  %4536 = vmatprep.mubr.f32.mxu1 %v16425_v13  ;;  %4985 = vmatprep.mubr.f32.mxu0 %v16425_v13  ;;  %v12444_v34 = vunpack.c.h.bf16 %v8729_v19 }
 0x4a1   : > { %v12432_v29 = vpop.f32.mrb[10].mxu1  ;;  %v12434_v56 = vpop.f32.mrb[42].mxu0  ;;  %16947 = vst [vmem:[#allocation501_spill] sm:$0xff] %v12444_v34 }
 0x4a2   : > { %16943 = vst [vmem:[#allocation497_spill] sm:$0xff] %v12432_v29  ;;  %16944 = vst [vmem:[#allocation498_spill] sm:$0xff] %v12434_v56  ;;  %v12436_v9 = vpop.f32.mrb[11].mxu1  ;;  %v12438_v1 = vpop.f32.mrb[43].mxu0  ;;  %8347 = vmatmul.mubr.msk.f32.gmra.mrb[116].mxu1 %vm3979_vm9, %v12428_v30  ;;  %8413 = vmatmul.mubr.msk.f32.gmra.mrb[148].mxu0 %vm3979_vm9, %v12428_v30  ;;  %v8730_v29 = vld [vmem:[%s16222_s3 + $0xc0] sm:$0xff]  }
 0x4a3   : > { %16945 = vst [vmem:[#allocation499_spill] sm:$0xff] %v12436_v9  ;;  %16946 = vst [vmem:[#allocation500_spill] sm:$0xff] %v12438_v1  ;;  %4542 = vmatprep.mubr.f32.mxu1 %v16425_v13  ;;  %4991 = vmatprep.mubr.f32.mxu0 %v16425_v13  ;;  %v12463_v19 = vunpack.c.l.bf16 %v8730_v29 }
 0x4a5   : > { %v12451_v56 = vpop.f32.mrb[12].mxu1  ;;  %v12453_v9 = vpop.f32.mrb[44].mxu0  ;;  %16952 = vst [vmem:[#allocation506_spill] sm:$0xff] %v12463_v19 }
 0x4a6   : > { %16948 = vst [vmem:[#allocation502_spill] sm:$0xff] %v12451_v56  ;;  %16949 = vst [vmem:[#allocation503_spill] sm:$0xff] %v12453_v9  ;;  %v12455_v1 = vpop.f32.mrb[13].mxu1  ;;  %v12457_v17 = vpop.f32.mrb[45].mxu0  ;;  %8348 = vmatmul.mubr.msk.f32.gmra.mrb[118].mxu1 %vm3979_vm9, %v12444_v34  ;;  %8414 = vmatmul.mubr.msk.f32.gmra.mrb[150].mxu0 %vm3979_vm9, %v12444_v34 }
 0x4a7   : > { %16950 = vst [vmem:[#allocation504_spill] sm:$0xff] %v12455_v1  ;;  %16951 = vst [vmem:[#allocation505_spill] sm:$0xff] %v12457_v17  ;;  %4548 = vmatprep.mubr.f32.mxu1 %v16425_v13  ;;  %4997 = vmatprep.mubr.f32.mxu0 %v16425_v13  ;;  %v12479_v17 = vunpack.c.h.bf16 %v8730_v29 }
 0x4a9   : > { %v12467_v30 = vpop.f32.mrb[14].mxu1  ;;  %v12469_v56 = vpop.f32.mrb[46].mxu0  ;;  %16957 = vst [vmem:[#allocation511_spill] sm:$0xff] %v12479_v17 }
 0x4aa   : > { %16953 = vst [vmem:[#allocation507_spill] sm:$0xff] %v12467_v30  ;;  %16954 = vst [vmem:[#allocation508_spill] sm:$0xff] %v12469_v56  ;;  %v12471_v9 = vpop.f32.mrb[15].mxu1  ;;  %v12473_v1 = vpop.f32.mrb[47].mxu0  ;;  %8349 = vmatmul.mubr.msk.f32.gmra.mrb[120].mxu1 %vm3979_vm9, %v12463_v19  ;;  %8415 = vmatmul.mubr.msk.f32.gmra.mrb[152].mxu0 %vm3979_vm9, %v12463_v19  ;;  %v8731_v30 = vld [vmem:[%s16222_s3 + $0xc8] sm:$0xff]   ;;  %v1806_v56 = vlaneseq }
 0x4ab   : > { %16955 = vst [vmem:[#allocation509_spill] sm:$0xff] %v12471_v9  ;;  %16956 = vst [vmem:[#allocation510_spill] sm:$0xff] %v12473_v1  ;;  %4554 = vmatprep.mubr.f32.mxu1 %v16425_v13  ;;  %5003 = vmatprep.mubr.f32.mxu0 %v16425_v13  ;;  %v12498_v29 = vunpack.c.l.bf16 %v8731_v30 }
 0x4ac   : > { %v12502_v19 = vshrl.u32 %v1806_v56, 7  ;;  %v8732_v56 = vld [vmem:[%s16222_s3 + $0xd0] sm:$0xff]  }
 0x4ad   : > { %v12486_v9 = vpop.f32.mrb[16].mxu1  ;;  %v12488_v1 = vpop.f32.mrb[48].mxu0  ;;  %16962 = vst [vmem:[#allocation516_spill] sm:$0xff] %v12498_v29  ;;  %v12542_v48 = vunpack.c.l.bf16 %v8732_v56 }
 0x4ae   : > { %16958 = vst [vmem:[#allocation512_spill] sm:$0xff] %v12486_v9  ;;  %16959 = vst [vmem:[#allocation513_spill] sm:$0xff] %v12488_v1  ;;  %v12490_v34 = vpop.f32.mrb[17].mxu1  ;;  %v12492_v40 = vpop.f32.mrb[49].mxu0  ;;  %8350 = vmatmul.mubr.msk.f32.gmra.mrb[122].mxu1 %vm3979_vm9, %v12479_v17  ;;  %8416 = vmatmul.mubr.msk.f32.gmra.mrb[154].mxu0 %vm3979_vm9, %v12479_v17  ;;  %v12516_v17 = vunpack.c.h.bf16 %v8731_v30  ;;  %v1820_v32 = vsub.s32 3, %v12502_v19 }
 0x4af   : > { %16960 = vst [vmem:[#allocation514_spill] sm:$0xff] %v12490_v34  ;;  %16961 = vst [vmem:[#allocation515_spill] sm:$0xff] %v12492_v40  ;;  %4560 = vmatprep.mubr.f32.mxu1 %v16425_v13  ;;  %5009 = vmatprep.mubr.f32.mxu0 %v16425_v13 }
 0x4b0   : > { %16963 = vst [vmem:[#allocation517_spill] sm:$0xff] %v12502_v19  ;;  %16968 = vst [vmem:[#allocation522_spill] sm:$0xff] %v12516_v17 }
 0x4b1   : > { %v12504_v9 = vpop.f32.mrb[18].mxu1  ;;  %v12506_v1 = vpop.f32.mrb[50].mxu0  ;;  %16973 = vst [vmem:[#allocation527_spill] sm:$0xff] %v12542_v48 }
 0x4b2   : > { %16964 = vst [vmem:[#allocation518_spill] sm:$0xff] %v12504_v9  ;;  %16965 = vst [vmem:[#allocation519_spill] sm:$0xff] %v12506_v1  ;;  %v12508_v34 = vpop.f32.mrb[19].mxu1  ;;  %v12510_v40 = vpop.f32.mrb[51].mxu0  ;;  %8351 = vmatmul.mubr.msk.f32.gmra.mrb[124].mxu1 %vm3979_vm9, %v12498_v29  ;;  %8417 = vmatmul.mubr.msk.f32.gmra.mrb[156].mxu0 %vm3979_vm9, %v12498_v29  ;;  %v1804_v1 = vld [vmem:[%s16228_s9] sm:$0xff]  ;;  %v1812_v9 = vsub.s32 1, %v12502_v19 }
 0x4b3   : > { %16966 = vst [vmem:[#allocation520_spill] sm:$0xff] %v12508_v34  ;;  %16967 = vst [vmem:[#allocation521_spill] sm:$0xff] %v12510_v40  ;;  %4566 = vmatprep.mubr.f32.mxu1 %v16425_v13  ;;  %5015 = vmatprep.mubr.f32.mxu0 %v16425_v13  ;;  %v1808_v34 = vsub.s32 0, %v12502_v19  ;;  %v1816_v40 = vsub.s32 2, %v12502_v19  ;;  %v12556_v45 = vrot.slane %v1804_v1, %v1820_v32  ;;  %v8733_v32 = vld [vmem:[%s16222_s3 + $0xd8] sm:$0xff]  }
 0x4b4   : > { %v12550_v19 = vrot.slane %v1804_v1, %v1812_v9  ;;  %v16979_v9 = vld [vmem:[#allocation20_spill] sm:$0xff] }
 0x4b5   : > { %v12529_v30 = vpop.f32.mrb[20].mxu1  ;;  %v12531_v29 = vpop.f32.mrb[52].mxu0 }
 0x4b6   : > { %16969 = vst [vmem:[#allocation523_spill] sm:$0xff] %v12529_v30  ;;  %16970 = vst [vmem:[#allocation524_spill] sm:$0xff] %v12531_v29  ;;  %v12534_v33 = vpop.f32.mrb[21].mxu1  ;;  %v12536_v49 = vpop.f32.mrb[53].mxu0  ;;  %8352 = vmatmul.mubr.msk.f32.gmra.mrb[126].mxu1 %vm3979_vm9, %v12516_v17  ;;  %8418 = vmatmul.mubr.msk.f32.gmra.mrb[158].mxu0 %vm3979_vm9, %v12516_v17  ;;  %v12546_v30 = vrot.slane %v1804_v1, %v1808_v34  ;;  %v12548_v29 = vrot.slane %v1804_v1, %v1816_v40  ;;  %v12566_v34 = vunpack.c.h.bf16 %v8732_v56  ;;  %v16980_v40 = vld [vmem:[#allocation21_spill] sm:$0xff] }
 0x4b7   : > { %16971 = vst [vmem:[#allocation525_spill] sm:$0xff] %v12534_v33  ;;  %16972 = vst [vmem:[#allocation526_spill] sm:$0xff] %v12536_v49  ;;  %4572 = vmatprep.mubr.f32.mxu1 %v16425_v13  ;;  %5021 = vmatprep.mubr.f32.mxu0 %v16425_v13 }
 0x4b8   : > { %16978 = vst [vmem:[#allocation532_spill] sm:$0xff] %v12566_v34  ;;  %v2106_v1 = vadd.f32 %v16979_v9, %v12546_v30 }
 0x4b9   : > { %v12552_v33 = vpop.f32.mrb[22].mxu1  ;;  %v12554_v49 = vpop.f32.mrb[54].mxu0 }
 0x4ba   : > { %16974 = vst [vmem:[#allocation528_spill] sm:$0xff] %v12552_v33  ;;  %16975 = vst [vmem:[#allocation529_spill] sm:$0xff] %v12554_v49  ;;  %v12558_v38 = vpop.f32.mrb[23].mxu1  ;;  %v12560_v17 = vpop.f32.mrb[55].mxu0  ;;  %8353 = vmatmul.mubr.msk.f32.gmra.mrb[128].mxu1 %vm3979_vm9, %v12542_v48  ;;  %8419 = vmatmul.mubr.msk.f32.gmra.mrb[160].mxu0 %vm3979_vm9, %v12542_v48  ;;  %v16982_v48 = vld [vmem:[#allocation23_spill] sm:$0xff] }
 0x4bb   : > { %16976 = vst [vmem:[#allocation530_spill] sm:$0xff] %v12558_v38  ;;  %16977 = vst [vmem:[#allocation531_spill] sm:$0xff] %v12560_v17  ;;  %4578 = vmatprep.mubr.f32.mxu1 %v16425_v13  ;;  %5027 = vmatprep.mubr.f32.mxu0 %v16425_v13  ;;  %v2555_v38 = vadd.f32 %v16980_v40, %v12548_v29  ;;  %v16981_v17 = vld [vmem:[#allocation22_spill] sm:$0xff]  ;;  %v2557_v35 = vadd.f32 %v16982_v48, %v12556_v45  ;;  %v12589_v40 = vunpack.c.l.bf16 %v8733_v32  ;;  %v16989_v48 = vld [vmem:[#allocation25_spill] sm:$0xff] }
 0x4bc   : > { %v2108_v33 = vadd.f32 %v16981_v17, %v12550_v19 }
 0x4bd   : > { %v4262_v49 = vpop.f32.mrb[24].mxu1  ;;  %v4711_v56 = vpop.f32.mrb[56].mxu0  ;;  %16985 = vst [vmem:[#allocation22_spill] sm:$0xff] %v12589_v40 }
 0x4be   : > { %v12581_v0 = vmul.f32 %v4262_v49, %v2106_v1  ;;  %v12583_v46 = vmul.f32 %v4711_v56, %v2555_v38  ;;  %v4264_v23 = vpop.f32.mrb[25].mxu1  ;;  %8354 = vmatmul.mubr.msk.f32.gmra.mrb[130].mxu1 %vm3979_vm9, %v12566_v34  ;;  %v4713_v9 = vpop.f32.mrb[57].mxu0  ;;  %8420 = vmatmul.mubr.msk.f32.gmra.mrb[162].mxu0 %vm3979_vm9, %v12566_v34  ;;  %v16988_v49 = vld [vmem:[#allocation24_spill] sm:$0xff]  ;;  %v2561_v1 = vadd.f32 %v16989_v48, %v12548_v29  ;;  %v16990_v56 = vld [vmem:[#allocation26_spill] sm:$0xff]  ;;  %v12613_v48 = vunpack.c.h.bf16 %v8733_v32 }
 0x4bf   : > { %v12591_v17 = vmul.f32 %v4264_v23, %v2108_v33  ;;  %v12593_v8 = vmul.f32 %v4713_v9, %v2557_v35  ;;  %4584 = vmatprep.mubr.f32.mxu1 %v16425_v13  ;;  %5033 = vmatprep.mubr.f32.mxu0 %v16425_v13  ;;  %v2112_v38 = vadd.f32 %v16988_v49, %v12546_v30  ;;  %v16991_v23 = vld [vmem:[#allocation27_spill] sm:$0xff]  ;;  %v16999_v32 = vld [vmem:[#allocation30_spill] sm:$0xff] }
 0x4c0   : > { %16983 = vst [vmem:[#allocation20_spill] sm:$0xff] %v12581_v0  ;;  %16984 = vst [vmem:[#allocation21_spill] sm:$0xff] %v12583_v46  ;;  %v2114_v46 = vadd.f32 %v16990_v56, %v12550_v19  ;;  %v2563_v33 = vadd.f32 %v16991_v23, %v12556_v45 }
 0x4c1   : > { %16986 = vst [vmem:[#allocation23_spill] sm:$0xff] %v12591_v17  ;;  %16987 = vst [vmem:[#allocation533_spill] sm:$0xff] %v12593_v8  ;;  %v4268_v0 = vpop.f32.mrb[26].mxu1  ;;  %v4717_v34 = vpop.f32.mrb[58].mxu0 }
 0x4c2   : > { %v12605_v35 = vmul.f32 %v4268_v0, %v2112_v38  ;;  %v12607_v9 = vmul.f32 %v4717_v34, %v2561_v1  ;;  %v4270_v8 = vpop.f32.mrb[27].mxu1  ;;  %8355 = vmatmul.mubr.msk.f32.gmra.mrb[132].mxu1 %vm3979_vm9, %v12589_v40  ;;  %v4719_v49 = vpop.f32.mrb[59].mxu0  ;;  %8421 = vmatmul.mubr.msk.f32.gmra.mrb[164].mxu0 %vm3979_vm9, %v12589_v40  ;;  %16994 = vst [vmem:[#allocation26_spill] sm:$0xff] %v12613_v48  ;;  %v8734_v0 = vld [vmem:[%s16222_s3 + $0xe0] sm:$0xff]   ;;  %v16997_v34 = vld [vmem:[#allocation28_spill] sm:$0xff]  ;;  %v16998_v1 = vld [vmem:[#allocation29_spill] sm:$0xff] }
 0x4c3   : > { %v12615_v56 = vmul.f32 %v4270_v8, %v2114_v46  ;;  %v12617_v17 = vmul.f32 %v4719_v49, %v2563_v33  ;;  %4590 = vmatprep.mubr.f32.mxu1 %v16425_v13  ;;  %5039 = vmatprep.mubr.f32.mxu0 %v16425_v13  ;;  %v2118_v38 = vadd.f32 %v16997_v34, %v12546_v30  ;;  %v17000_v49 = vld [vmem:[#allocation31_spill] sm:$0xff] }
 0x4c4   : > { %16992 = vst [vmem:[#allocation24_spill] sm:$0xff] %v12605_v35  ;;  %16993 = vst [vmem:[#allocation25_spill] sm:$0xff] %v12607_v9  ;;  %v2567_v23 = vadd.f32 %v16998_v1, %v12548_v29  ;;  %v2120_v46 = vadd.f32 %v16999_v32, %v12550_v19  ;;  %v12640_v1 = vunpack.c.l.bf16 %v8734_v0 }
 0x4c5   : > { %16995 = vst [vmem:[#allocation27_spill] sm:$0xff] %v12615_v56  ;;  %16996 = vst [vmem:[#allocation534_spill] sm:$0xff] %v12617_v17  ;;  %v4274_v8 = vpop.f32.mrb[28].mxu1  ;;  %v4723_v33 = vpop.f32.mrb[60].mxu0  ;;  %v2569_v17 = vadd.f32 %v17000_v49, %v12556_v45  ;;  %v17008_v49 = vld [vmem:[#allocation34_spill] sm:$0xff] }
 0x4c6   : > { %v12632_v56 = vmul.f32 %v4274_v8, %v2118_v38  ;;  %v12634_v9 = vmul.f32 %v4723_v33, %v2567_v23  ;;  %v4276_v35 = vpop.f32.mrb[29].mxu1  ;;  %8356 = vmatmul.mubr.msk.f32.gmra.mrb[134].mxu1 %vm3979_vm9, %v12613_v48  ;;  %v4725_v34 = vpop.f32.mrb[61].mxu0  ;;  %8422 = vmatmul.mubr.msk.f32.gmra.mrb[166].mxu0 %vm3979_vm9, %v12613_v48  ;;  %17003 = vst [vmem:[#allocation30_spill] sm:$0xff] %v12640_v1  ;;  %v17006_v38 = vld [vmem:[#allocation32_spill] sm:$0xff]  ;;  %v17007_v8 = vld [vmem:[#allocation33_spill] sm:$0xff] }
 0x4c7   : > { %v12642_v32 = vmul.f32 %v4276_v35, %v2120_v46  ;;  %v12644_v40 = vmul.f32 %v4725_v34, %v2569_v17  ;;  %4596 = vmatprep.mubr.f32.mxu1 %v16425_v13  ;;  %5045 = vmatprep.mubr.f32.mxu0 %v16425_v13  ;;  %v2124_v23 = vadd.f32 %v17006_v38, %v12546_v30  ;;  %v17009_v35 = vld [vmem:[#allocation35_spill] sm:$0xff] }
 0x4c8   : > { %17001 = vst [vmem:[#allocation28_spill] sm:$0xff] %v12632_v56  ;;  %17002 = vst [vmem:[#allocation29_spill] sm:$0xff] %v12634_v9  ;;  %v2573_v33 = vadd.f32 %v17007_v8, %v12548_v29  ;;  %v2126_v9 = vadd.f32 %v17008_v49, %v12550_v19  ;;  %v2575_v46 = vadd.f32 %v17009_v35, %v12556_v45  ;;  %v12664_v8 = vunpack.c.h.bf16 %v8734_v0  ;;  %v17017_v0 = vld [vmem:[#allocation39_spill] sm:$0xff] }
 0x4c9   : > { %17004 = vst [vmem:[#allocation31_spill] sm:$0xff] %v12642_v32  ;;  %17005 = vst [vmem:[#allocation535_spill] sm:$0xff] %v12644_v40  ;;  %v4280_v56 = vpop.f32.mrb[30].mxu1  ;;  %v4729_v48 = vpop.f32.mrb[62].mxu0 }
 0x4ca   : > { %v12656_v17 = vmul.f32 %v4280_v56, %v2124_v23  ;;  %v12658_v34 = vmul.f32 %v4729_v48, %v2573_v33  ;;  %v4282_v40 = vpop.f32.mrb[31].mxu1  ;;  %8357 = vmatmul.mubr.msk.f32.gmra.mrb[136].mxu1 %vm3979_vm9, %v12640_v1  ;;  %v4731_v38 = vpop.f32.mrb[63].mxu0  ;;  %8423 = vmatmul.mubr.msk.f32.gmra.mrb[168].mxu0 %vm3979_vm9, %v12640_v1  ;;  %17012 = vst [vmem:[#allocation34_spill] sm:$0xff] %v12664_v8  ;;  %v8735_v48 = vld [vmem:[%s16222_s3 + $0xe8] sm:$0xff]   ;;  %v17015_v56 = vld [vmem:[#allocation37_spill] sm:$0xff]  ;;  %v17016_v33 = vld [vmem:[#allocation38_spill] sm:$0xff] }
 0x4cb   : > { %v12666_v49 = vmul.f32 %v4282_v40, %v2126_v9  ;;  %v12668_v32 = vmul.f32 %v4731_v38, %v2575_v46  ;;  %4602 = vmatprep.mubr.f32.mxu1 %v16425_v13  ;;  %5051 = vmatprep.mubr.f32.mxu0 %v16425_v13  ;;  %v2130_v23 = vadd.f32 %v17015_v56, %v12546_v30  ;;  %v17018_v38 = vld [vmem:[#allocation40_spill] sm:$0xff] }
 0x4cc   : > { %17010 = vst [vmem:[#allocation32_spill] sm:$0xff] %v12656_v17  ;;  %17011 = vst [vmem:[#allocation33_spill] sm:$0xff] %v12658_v34  ;;  %v2579_v35 = vadd.f32 %v17016_v33, %v12548_v29  ;;  %v2132_v40 = vadd.f32 %v17017_v0, %v12550_v19  ;;  %v12691_v33 = vunpack.c.l.bf16 %v8735_v48 }
 0x4cd   : > { %17013 = vst [vmem:[#allocation35_spill] sm:$0xff] %v12666_v49  ;;  %17014 = vst [vmem:[#allocation536_spill] sm:$0xff] %v12668_v32  ;;  %v4286_v9 = vpop.f32.mrb[32].mxu1  ;;  %v4735_v46 = vpop.f32.mrb[64].mxu0  ;;  %v2581_v32 = vadd.f32 %v17018_v38, %v12556_v45  ;;  %v17026_v38 = vld [vmem:[#allocation44_spill] sm:$0xff] }
 0x4ce   : > { %v12683_v49 = vmul.f32 %v4286_v9, %v2130_v23  ;;  %v12685_v34 = vmul.f32 %v4735_v46, %v2579_v35  ;;  %v4288_v17 = vpop.f32.mrb[33].mxu1  ;;  %8358 = vmatmul.mubr.msk.f32.gmra.mrb[138].mxu1 %vm3979_vm9, %v12664_v8  ;;  %v4737_v56 = vpop.f32.mrb[65].mxu0  ;;  %8424 = vmatmul.mubr.msk.f32.gmra.mrb[170].mxu0 %vm3979_vm9, %v12664_v8  ;;  %17021 = vst [vmem:[#allocation39_spill] sm:$0xff] %v12691_v33  ;;  %v17024_v23 = vld [vmem:[#allocation42_spill] sm:$0xff]  ;;  %v17025_v9 = vld [vmem:[#allocation43_spill] sm:$0xff] }
 0x4cf   : > { %v12693_v0 = vmul.f32 %v4288_v17, %v2132_v40  ;;  %v12695_v1 = vmul.f32 %v4737_v56, %v2581_v32  ;;  %4608 = vmatprep.mubr.f32.mxu1 %v16425_v13  ;;  %5057 = vmatprep.mubr.f32.mxu0 %v16425_v13  ;;  %v2136_v35 = vadd.f32 %v17024_v23, %v12546_v30  ;;  %v17027_v17 = vld [vmem:[#allocation45_spill] sm:$0xff] }
 0x4d0   : > { %17019 = vst [vmem:[#allocation37_spill] sm:$0xff] %v12683_v49  ;;  %17020 = vst [vmem:[#allocation38_spill] sm:$0xff] %v12685_v34  ;;  %v2585_v46 = vadd.f32 %v17025_v9, %v12548_v29  ;;  %v2138_v34 = vadd.f32 %v17026_v38, %v12550_v19  ;;  %v2587_v40 = vadd.f32 %v17027_v17, %v12556_v45  ;;  %v12715_v9 = vunpack.c.h.bf16 %v8735_v48  ;;  %v17035_v48 = vld [vmem:[#allocation49_spill] sm:$0xff] }
 0x4d1   : > { %17022 = vst [vmem:[#allocation40_spill] sm:$0xff] %v12693_v0  ;;  %17023 = vst [vmem:[#allocation537_spill] sm:$0xff] %v12695_v1  ;;  %v4292_v49 = vpop.f32.mrb[34].mxu1  ;;  %v4741_v8 = vpop.f32.mrb[66].mxu0 }
 0x4d2   : > { %v12707_v32 = vmul.f32 %v4292_v49, %v2136_v35  ;;  %v12709_v56 = vmul.f32 %v4741_v8, %v2585_v46  ;;  %v4294_v1 = vpop.f32.mrb[35].mxu1  ;;  %8359 = vmatmul.mubr.msk.f32.gmra.mrb[140].mxu1 %vm3979_vm9, %v12691_v33  ;;  %v4743_v23 = vpop.f32.mrb[67].mxu0  ;;  %8425 = vmatmul.mubr.msk.f32.gmra.mrb[172].mxu0 %vm3979_vm9, %v12691_v33  ;;  %17030 = vst [vmem:[#allocation44_spill] sm:$0xff] %v12715_v9  ;;  %v8736_v8 = vld [vmem:[%s16222_s3 + $0xf0] sm:$0xff]   ;;  %v17033_v49 = vld [vmem:[#allocation47_spill] sm:$0xff]  ;;  %v17034_v46 = vld [vmem:[#allocation48_spill] sm:$0xff] }
 0x4d3   : > { %v12717_v38 = vmul.f32 %v4294_v1, %v2138_v34  ;;  %v12719_v0 = vmul.f32 %v4743_v23, %v2587_v40  ;;  %4614 = vmatprep.mubr.f32.mxu1 %v16425_v13  ;;  %5063 = vmatprep.mubr.f32.mxu0 %v16425_v13  ;;  %v2142_v35 = vadd.f32 %v17033_v49, %v12546_v30  ;;  %v17036_v23 = vld [vmem:[#allocation50_spill] sm:$0xff] }
 0x4d4   : > { %17028 = vst [vmem:[#allocation42_spill] sm:$0xff] %v12707_v32  ;;  %17029 = vst [vmem:[#allocation43_spill] sm:$0xff] %v12709_v56  ;;  %v2591_v17 = vadd.f32 %v17034_v46, %v12548_v29  ;;  %v2144_v1 = vadd.f32 %v17035_v48, %v12550_v19  ;;  %v12742_v46 = vunpack.c.l.bf16 %v8736_v8 }
 0x4d5   : > { %17031 = vst [vmem:[#allocation45_spill] sm:$0xff] %v12717_v38  ;;  %17032 = vst [vmem:[#allocation538_spill] sm:$0xff] %v12719_v0  ;;  %v4298_v34 = vpop.f32.mrb[36].mxu1  ;;  %v4747_v40 = vpop.f32.mrb[68].mxu0  ;;  %v2593_v0 = vadd.f32 %v17036_v23, %v12556_v45 }
 0x4d6   : > { %v12734_v38 = vmul.f32 %v4298_v34, %v2142_v35  ;;  %v12736_v56 = vmul.f32 %v4747_v40, %v2591_v17  ;;  %v4300_v32 = vpop.f32.mrb[37].mxu1  ;;  %8360 = vmatmul.mubr.msk.f32.gmra.mrb[142].mxu1 %vm3979_vm9, %v12715_v9  ;;  %v4749_v49 = vpop.f32.mrb[69].mxu0  ;;  %8426 = vmatmul.mubr.msk.f32.gmra.mrb[174].mxu0 %vm3979_vm9, %v12715_v9  ;;  %17039 = vst [vmem:[#allocation49_spill] sm:$0xff] %v12742_v46  ;;  %v17042_v35 = vld [vmem:[#allocation52_spill] sm:$0xff]  ;;  %v17043_v34 = vld [vmem:[#allocation53_spill] sm:$0xff] }
 0x4d7   : > { %v12744_v48 = vmul.f32 %v4300_v32, %v2144_v1  ;;  %v12746_v33 = vmul.f32 %v4749_v49, %v2593_v0  ;;  %4620 = vmatprep.mubr.f32.mxu1 %v16425_v13  ;;  %5069 = vmatprep.mubr.f32.mxu0 %v16425_v13  ;;  %v2148_v17 = vadd.f32 %v17042_v35, %v12546_v30  ;;  %v17045_v32 = vld [vmem:[#allocation55_spill] sm:$0xff] }
 0x4d8   : > { %17037 = vst [vmem:[#allocation47_spill] sm:$0xff] %v12734_v38  ;;  %17038 = vst [vmem:[#allocation48_spill] sm:$0xff] %v12736_v56  ;;  %v2597_v40 = vadd.f32 %v17043_v34, %v12548_v29  ;;  %v17044_v38 = vld [vmem:[#allocation54_spill] sm:$0xff]  ;;  %v2599_v1 = vadd.f32 %v17045_v32, %v12556_v45  ;;  %v12766_v34 = vunpack.c.h.bf16 %v8736_v8 }
 0x4d9   : > { %17040 = vst [vmem:[#allocation50_spill] sm:$0xff] %v12744_v48  ;;  %17041 = vst [vmem:[#allocation539_spill] sm:$0xff] %v12746_v33  ;;  %v4304_v23 = vpop.f32.mrb[38].mxu1  ;;  %v4753_v56 = vpop.f32.mrb[70].mxu0  ;;  %v2150_v9 = vadd.f32 %v17044_v38, %v12550_v19 }
 0x4da   : > { %v12758_v0 = vmul.f32 %v4304_v23, %v2148_v17  ;;  %v12760_v49 = vmul.f32 %v4753_v56, %v2597_v40  ;;  %v4306_v33 = vpop.f32.mrb[39].mxu1  ;;  %8361 = vmatmul.mubr.msk.f32.gmra.mrb[144].mxu1 %vm3979_vm9, %v12742_v46  ;;  %v4755_v35 = vpop.f32.mrb[71].mxu0  ;;  %8427 = vmatmul.mubr.msk.f32.gmra.mrb[176].mxu0 %vm3979_vm9, %v12742_v46  ;;  %17048 = vst [vmem:[#allocation54_spill] sm:$0xff] %v12766_v34  ;;  %v8737_v56 = vld [vmem:[%s16222_s3 + $0xf8] sm:$0xff]   ;;  %v17051_v17 = vld [vmem:[#allocation57_spill] sm:$0xff] }
 0x4db   : > { %v12768_v48 = vmul.f32 %v4306_v33, %v2150_v9  ;;  %v12770_v38 = vmul.f32 %v4755_v35, %v2599_v1  ;;  %4626 = vmatprep.mubr.f32.mxu1 %v16425_v13  ;;  %5075 = vmatprep.mubr.f32.mxu0 %v16425_v13  ;;  %v2154_v40 = vadd.f32 %v17051_v17, %v12546_v30  ;;  %v17052_v23 = vld [vmem:[#allocation58_spill] sm:$0xff]  ;;  %v17053_v33 = vld [vmem:[#allocation59_spill] sm:$0xff]  ;;  %v17054_v1 = vld [vmem:[#allocation60_spill] sm:$0xff] }
 0x4dc   : > { %17046 = vst [vmem:[#allocation52_spill] sm:$0xff] %v12758_v0  ;;  %17047 = vst [vmem:[#allocation53_spill] sm:$0xff] %v12760_v49  ;;  %v2603_v32 = vadd.f32 %v17052_v23, %v12548_v29  ;;  %v2156_v9 = vadd.f32 %v17053_v33, %v12550_v19  ;;  %v2605_v35 = vadd.f32 %v17054_v1, %v12556_v45  ;;  %v12793_v23 = vunpack.c.l.bf16 %v8737_v56 }
 0x4dd   : > { %17049 = vst [vmem:[#allocation55_spill] sm:$0xff] %v12768_v48  ;;  %17050 = vst [vmem:[#allocation540_spill] sm:$0xff] %v12770_v38  ;;  %v4310_v8 = vpop.f32.mrb[40].mxu1  ;;  %v4759_v49 = vpop.f32.mrb[72].mxu0 }
 0x4de   : > { %v12785_v38 = vmul.f32 %v4310_v8, %v2154_v40  ;;  %v12787_v48 = vmul.f32 %v4759_v49, %v2603_v32  ;;  %v4312_v0 = vpop.f32.mrb[41].mxu1  ;;  %8362 = vmatmul.mubr.msk.f32.gmra.mrb[146].mxu1 %vm3979_vm9, %v12766_v34  ;;  %v4761_v17 = vpop.f32.mrb[73].mxu0  ;;  %8428 = vmatmul.mubr.msk.f32.gmra.mrb[178].mxu0 %vm3979_vm9, %v12766_v34  ;;  %v17059_v49 = vld [vmem:[#allocation62_spill] sm:$0xff]  ;;  %v17060_v32 = vld [vmem:[#allocation63_spill] sm:$0xff] }
 0x4df   : > { %v12795_v46 = vmul.f32 %v4312_v0, %v2156_v9  ;;  %v12797_v33 = vmul.f32 %v4761_v17, %v2605_v35  ;;  %4632 = vmatprep.mubr.f32.mxu1 %v16425_v13  ;;  %5081 = vmatprep.mubr.f32.mxu0 %v16425_v13  ;;  %v2160_v40 = vadd.f32 %v17059_v49, %v12546_v30  ;;  %v17062_v0 = vld [vmem:[#allocation65_spill] sm:$0xff] }
 0x4e0   : > { %17055 = vst [vmem:[#allocation57_spill] sm:$0xff] %v12785_v38  ;;  %17056 = vst [vmem:[#allocation58_spill] sm:$0xff] %v12787_v48  ;;  %v2609_v8 = vadd.f32 %v17060_v32, %v12548_v29  ;;  %v17061_v38 = vld [vmem:[#allocation64_spill] sm:$0xff]  ;;  %v2611_v9 = vadd.f32 %v17062_v0, %v12556_v45  ;;  %v12817_v32 = vunpack.c.h.bf16 %v8737_v56 }
 0x4e1   : > { %17057 = vst [vmem:[#allocation59_spill] sm:$0xff] %v12795_v46  ;;  %17058 = vst [vmem:[#allocation60_spill] sm:$0xff] %v12797_v33  ;;  %v4316_v1 = vpop.f32.mrb[42].mxu1  ;;  %v4765_v48 = vpop.f32.mrb[74].mxu0  ;;  %v2162_v34 = vadd.f32 %v17061_v38, %v12550_v19 }
 0x4e2   : > { %v12809_v35 = vmul.f32 %v4316_v1, %v2160_v40  ;;  %v12811_v17 = vmul.f32 %v4765_v48, %v2609_v8  ;;  %v4318_v33 = vpop.f32.mrb[43].mxu1  ;;  %8363 = vmatmul.mubr.msk.f32.gmra.mrb[148].mxu1 %vm3979_vm9, %v12793_v23  ;;  %v4767_v49 = vpop.f32.mrb[75].mxu0  ;;  %8429 = vmatmul.mubr.msk.f32.gmra.mrb[180].mxu0 %vm3979_vm9, %v12793_v23  ;;  %v17067_v48 = vld [vmem:[#allocation67_spill] sm:$0xff]  ;;  %v17068_v8 = vld [vmem:[#allocation68_spill] sm:$0xff] }
 0x4e3   : > { %v12819_v46 = vmul.f32 %v4318_v33, %v2162_v34  ;;  %v12821_v38 = vmul.f32 %v4767_v49, %v2611_v9  ;;  %4638 = vmatprep.mubr.f32.mxu1 %v16425_v13  ;;  %5087 = vmatprep.mubr.f32.mxu0 %v16425_v13  ;;  %v2166_v40 = vadd.f32 %v17067_v48, %v12546_v30  ;;  %v17070_v34 = vld [vmem:[#allocation70_spill] sm:$0xff] }
 0x4e4   : > { %17063 = vst [vmem:[#allocation62_spill] sm:$0xff] %v12809_v35  ;;  %17064 = vst [vmem:[#allocation63_spill] sm:$0xff] %v12811_v17  ;;  %v2615_v1 = vadd.f32 %v17068_v8, %v12548_v29  ;;  %v17069_v35 = vld [vmem:[#allocation69_spill] sm:$0xff]  ;;  %v2617_v33 = vadd.f32 %v17070_v34, %v12556_v45 }
 0x4e5   : > { %17065 = vst [vmem:[#allocation64_spill] sm:$0xff] %v12819_v46  ;;  %17066 = vst [vmem:[#allocation65_spill] sm:$0xff] %v12821_v38  ;;  %v4322_v0 = vpop.f32.mrb[44].mxu1  ;;  %v4771_v17 = vpop.f32.mrb[76].mxu0  ;;  %v2168_v56 = vadd.f32 %v17069_v35, %v12550_v19  ;;  %v2172_v35 = vadd.f32 %v10712_v42, %v12546_v30 }
 0x4e6   : > { %v12833_v9 = vmul.f32 %v4322_v0, %v2166_v40  ;;  %v12835_v49 = vmul.f32 %v4771_v17, %v2615_v1  ;;  %v4324_v38 = vpop.f32.mrb[45].mxu1  ;;  %8364 = vmatmul.mubr.msk.f32.gmra.mrb[150].mxu1 %vm3979_vm9, %v12817_v32  ;;  %v4773_v48 = vpop.f32.mrb[77].mxu0  ;;  %8430 = vmatmul.mubr.msk.f32.gmra.mrb[182].mxu0 %vm3979_vm9, %v12817_v32  ;;  %v2621_v17 = vadd.f32 %v10714_v58, %v12548_v29 }
 0x4e7   : > { %v12841_v8 = vmul.f32 %v4324_v38, %v2168_v56  ;;  %v12843_v46 = vmul.f32 %v4773_v48, %v2617_v33  ;;  %5158 = vmatprep.mubr.f32.mxu1 %v16425_v13  ;;  %5607 = vmatprep.mubr.f32.mxu0 %v16425_v13  ;;  %v2174_v0 = vadd.f32 %v10717_v27, %v12550_v19 }
 0x4e8   : > { %v2623_v38 = vadd.f32 %v10719_v26, %v12556_v45  ;;  %v2178_v27 = vadd.f32 %v10734_v4, %v12546_v30  ;;  %v2627_v26 = vadd.f32 %v10736_v61, %v12548_v29 }
 0x4e9   : > { %v4328_v40 = vpop.f32.mrb[46].mxu1  ;;  %v4777_v1 = vpop.f32.mrb[78].mxu0 }
 0x4ea   : > { %v12855_v56 = vmul.f32 %v4328_v40, %v2172_v35  ;;  %v12857_v34 = vmul.f32 %v4777_v1, %v2621_v17  ;;  %v4330_v33 = vpop.f32.mrb[47].mxu1  ;;  %v4779_v48 = vpop.f32.mrb[79].mxu0  ;;  %8433 = vmatmul.mubr.msk.f32.vlgmr.msra.gmra.mrb[152].mxu1 %vm3979_vm9, %v11619_v7  ;;  %8499 = vmatmul.mubr.msk.f32.vlgmr.msra.gmra.mrb[184].mxu0 %vm3979_vm9, %v11619_v7  ;;  %v2180_v40 = vadd.f32 %v10740_v37, %v12550_v19 }
 0x4eb   : > { %v12863_v58 = vmul.f32 %v4330_v33, %v2174_v0  ;;  %v12865_v42 = vmul.f32 %v4779_v48, %v2623_v38  ;;  %5164 = vmatprep.mubr.f32.mxu1 %v16425_v13  ;;  %5613 = vmatprep.mubr.f32.mxu0 %v16425_v13  ;;  %v2629_v7 = vadd.f32 %v10742_v20, %v12556_v45 }
 0x4ec   : > { %v2184_v37 = vadd.f32 %v10750_v51, %v12546_v30  ;;  %v2633_v20 = vadd.f32 %v10752_v21, %v12548_v29 }
 0x4ed   : > { %v4334_v35 = vpop.f32.mrb[48].mxu1  ;;  %v4783_v17 = vpop.f32.mrb[80].mxu0 }
 0x4ee   : > { %v12877_v1 = vmul.f32 %v4334_v35, %v2178_v27  ;;  %v12879_v0 = vmul.f32 %v4783_v17, %v2627_v26  ;;  %v4336_v38 = vpop.f32.mrb[49].mxu1  ;;  %v4785_v33 = vpop.f32.mrb[81].mxu0  ;;  %8434 = vmatmul.mubr.msk.f32.gmra.mrb[154].mxu1 %vm3979_vm9, %v11635_v31  ;;  %8500 = vmatmul.mubr.msk.f32.gmra.mrb[186].mxu0 %vm3979_vm9, %v11635_v31  ;;  %v2186_v26 = vadd.f32 %v10754_v15, %v12550_v19 }
 0x4ef   : > { %v12885_v4 = vmul.f32 %v4336_v38, %v2180_v40  ;;  %v12887_v61 = vmul.f32 %v4785_v33, %v2629_v7  ;;  %5170 = vmatprep.mubr.f32.mxu1 %v16425_v13  ;;  %5619 = vmatprep.mubr.f32.mxu0 %v16425_v13  ;;  %v2635_v31 = vadd.f32 %v10756_v22, %v12556_v45  ;;  %v17071_v22 = vld [vmem:[#allocation71_spill] sm:$0xff] }
 0x4f0   : > { %v2190_v15 = vadd.f32 %v10764_v44, %v12546_v30  ;;  %v2639_v38 = vadd.f32 %v17071_v22, %v12548_v29  ;;  %v17075_v22 = vld [vmem:[#allocation74_spill] sm:$0xff] }
 0x4f1   : > { %v4340_v48 = vpop.f32.mrb[50].mxu1  ;;  %v4789_v27 = vpop.f32.mrb[82].mxu0 }
 0x4f2   : > { %v12899_v35 = vmul.f32 %v4340_v48, %v2184_v37  ;;  %v12901_v17 = vmul.f32 %v4789_v27, %v2633_v20  ;;  %v4342_v40 = vpop.f32.mrb[51].mxu1  ;;  %v4791_v7 = vpop.f32.mrb[83].mxu0  ;;  %8435 = vmatmul.mubr.msk.f32.gmra.mrb[156].mxu1 %vm3979_vm9, %v11658_v39  ;;  %8501 = vmatmul.mubr.msk.f32.gmra.mrb[188].mxu0 %vm3979_vm9, %v11658_v39  ;;  %v2192_v20 = vadd.f32 %v10768_v53, %v12550_v19  ;;  %v17072_v39 = vld [vmem:[#allocation72_spill] sm:$0xff]  ;;  %v17074_v53 = vld [vmem:[#allocation73_spill] sm:$0xff] }
 0x4f3   : > { %v12907_v51 = vmul.f32 %v4342_v40, %v2186_v26  ;;  %v12909_v21 = vmul.f32 %v4791_v7, %v2635_v31  ;;  %5176 = vmatprep.mubr.f32.mxu1 %v16425_v13  ;;  %5625 = vmatprep.mubr.f32.mxu0 %v16425_v13  ;;  %v2641_v48 = vadd.f32 %v17072_v39, %v12556_v45 }
 0x4f4   : > { %v2198_v39 = vadd.f32 %v10782_v36, %v12550_v19  ;;  %v17081_v36 = vld [vmem:[#allocation76_spill] sm:$0xff] }
 0x4f5   : > { %v4346_v33 = vpop.f32.mrb[52].mxu1  ;;  %v4795_v37 = vpop.f32.mrb[84].mxu0 }
 0x4f6   : > { %v12921_v27 = vmul.f32 %v4346_v33, %v2190_v15  ;;  %v12923_v26 = vmul.f32 %v4795_v37, %v2639_v38  ;;  %v4348_v31 = vpop.f32.mrb[53].mxu1  ;;  %v4797_v40 = vpop.f32.mrb[85].mxu0  ;;  %8436 = vmatmul.mubr.msk.f32.gmra.mrb[158].mxu1 %vm3979_vm9, %v11674_v50  ;;  %8502 = vmatmul.mubr.msk.f32.gmra.mrb[190].mxu0 %vm3979_vm9, %v11674_v50  ;;  %v2196_v15 = vadd.f32 %v17074_v53, %v12546_v30  ;;  %v17076_v50 = vld [vmem:[#allocation75_spill] sm:$0xff] }
 0x4f7   : > { %v12929_v44 = vmul.f32 %v4348_v31, %v2192_v20  ;;  %v12931_v7 = vmul.f32 %v4797_v40, %v2641_v48  ;;  %5182 = vmatprep.mubr.f32.mxu1 %v16425_v13  ;;  %5631 = vmatprep.mubr.f32.mxu0 %v16425_v13  ;;  %v2645_v38 = vadd.f32 %v17075_v22, %v12548_v29 }
 0x4f8   : > { %v2647_v20 = vadd.f32 %v17076_v50, %v12556_v45 }
 0x4f9   : > { %17073 = vst [vmem:[#allocation67_spill] sm:$0xff] %v12931_v7  ;;  %v4352_v33 = vpop.f32.mrb[54].mxu1  ;;  %v4801_v37 = vpop.f32.mrb[86].mxu0 }
 0x4fa   : > { %v12943_v48 = vmul.f32 %v4352_v33, %v2196_v15  ;;  %v12945_v31 = vmul.f32 %v4801_v37, %v2645_v38  ;;  %v4354_v40 = vpop.f32.mrb[55].mxu1  ;;  %v4803_v7 = vpop.f32.mrb[87].mxu0  ;;  %8437 = vmatmul.mubr.msk.f32.gmra.mrb[160].mxu1 %vm3979_vm9, %v11693_v2  ;;  %8503 = vmatmul.mubr.msk.f32.gmra.mrb[192].mxu0 %vm3979_vm9, %v11693_v2  ;;  %v2202_v15 = vadd.f32 %v17081_v36, %v12546_v30  ;;  %v17082_v38 = vld [vmem:[#allocation77_spill] sm:$0xff]  ;;  %v17083_v2 = vld [vmem:[#allocation78_spill] sm:$0xff] }
 0x4fb   : > { %v12951_v53 = vmul.f32 %v4354_v40, %v2198_v39  ;;  %v12953_v22 = vmul.f32 %v4803_v7, %v2647_v20  ;;  %5188 = vmatprep.mubr.f32.mxu1 %v16425_v13  ;;  %5637 = vmatprep.mubr.f32.mxu0 %v16425_v13  ;;  %v2651_v33 = vadd.f32 %v17082_v38, %v12548_v29 }
 0x4fc   : > { %17077 = vst [vmem:[#allocation68_spill] sm:$0xff] %v12943_v48  ;;  %17078 = vst [vmem:[#allocation69_spill] sm:$0xff] %v12945_v31  ;;  %v2204_v31 = vadd.f32 %v10796_v47, %v12550_v19  ;;  %v2653_v39 = vadd.f32 %v17083_v2, %v12556_v45  ;;  %v17088_v47 = vld [vmem:[#allocation79_spill] sm:$0xff] }
 0x4fd   : > { %17079 = vst [vmem:[#allocation70_spill] sm:$0xff] %v12951_v53  ;;  %17080 = vst [vmem:[#allocation71_spill] sm:$0xff] %v12953_v22  ;;  %v4358_v37 = vpop.f32.mrb[56].mxu1  ;;  %v4807_v50 = vpop.f32.mrb[88].mxu0  ;;  %v17523_v53 = vld [vmem:[#allocation271_spill] sm:$0xff] }
 0x4fe   : > { %v12965_v7 = vmul.f32 %v4358_v37, %v2202_v15  ;;  %v12967_v20 = vmul.f32 %v4807_v50, %v2651_v33  ;;  %v4360_v40 = vpop.f32.mrb[57].mxu1  ;;  %v4809_v22 = vpop.f32.mrb[89].mxu0  ;;  %8438 = vmatmul.mubr.msk.f32.gmra.mrb[162].mxu1 %vm3979_vm9, %v11709_v43  ;;  %8504 = vmatmul.mubr.msk.f32.gmra.mrb[194].mxu0 %vm3979_vm9, %v11709_v43  ;;  %v2208_v15 = vadd.f32 %v17088_v47, %v12546_v30  ;;  %v17089_v33 = vld [vmem:[#allocation80_spill] sm:$0xff]  ;;  %v17090_v43 = vld [vmem:[#allocation81_spill] sm:$0xff] }
 0x4ff   : > { %v12973_v36 = vmul.f32 %v4360_v40, %v2204_v31  ;;  %v12975_v38 = vmul.f32 %v4809_v22, %v2653_v39  ;;  %5194 = vmatprep.mubr.f32.mxu1 %v16425_v13  ;;  %5643 = vmatprep.mubr.f32.mxu0 %v16425_v13  ;;  %v2657_v37 = vadd.f32 %v17089_v33, %v12548_v29 }
 0x500   : > { %17084 = vst [vmem:[#allocation72_spill] sm:$0xff] %v12965_v7  ;;  %17085 = vst [vmem:[#allocation73_spill] sm:$0xff] %v12967_v20  ;;  %v2210_v20 = vadd.f32 %v10810_v52, %v12550_v19  ;;  %v2659_v31 = vadd.f32 %v17090_v43, %v12556_v45  ;;  %v17095_v52 = vld [vmem:[#allocation82_spill] sm:$0xff] }
 0x501   : > { %17086 = vst [vmem:[#allocation74_spill] sm:$0xff] %v12973_v36  ;;  %17087 = vst [vmem:[#allocation75_spill] sm:$0xff] %v12975_v38  ;;  %v4364_v50 = vpop.f32.mrb[58].mxu1  ;;  %v4813_v2 = vpop.f32.mrb[90].mxu0  ;;  %v17519_v7 = vld [vmem:[#allocation22_spill] sm:$0xff] }
 0x502   : > { %v12987_v22 = vmul.f32 %v4364_v50, %v2208_v15  ;;  %v12989_v39 = vmul.f32 %v4813_v2, %v2657_v37  ;;  %v4366_v40 = vpop.f32.mrb[59].mxu1  ;;  %v4815_v38 = vpop.f32.mrb[91].mxu0  ;;  %8439 = vmatmul.mubr.msk.f32.gmra.mrb[164].mxu1 %vm3979_vm9, %v11728_v14  ;;  %8505 = vmatmul.mubr.msk.f32.gmra.mrb[196].mxu0 %vm3979_vm9, %v11728_v14  ;;  %v2214_v15 = vadd.f32 %v17095_v52, %v12546_v30  ;;  %v17096_v37 = vld [vmem:[#allocation83_spill] sm:$0xff]  ;;  %v17097_v14 = vld [vmem:[#allocation84_spill] sm:$0xff] }
 0x503   : > { %v12995_v47 = vmul.f32 %v4366_v40, %v2210_v20  ;;  %v12997_v33 = vmul.f32 %v4815_v38, %v2659_v31  ;;  %5200 = vmatprep.mubr.f32.mxu1 %v16425_v13  ;;  %5649 = vmatprep.mubr.f32.mxu0 %v16425_v13  ;;  %v2663_v50 = vadd.f32 %v17096_v37, %v12548_v29 }
 0x504   : > { %17091 = vst [vmem:[#allocation76_spill] sm:$0xff] %v12987_v22  ;;  %17092 = vst [vmem:[#allocation77_spill] sm:$0xff] %v12989_v39  ;;  %v2216_v39 = vadd.f32 %v10824_v55, %v12550_v19  ;;  %v2665_v20 = vadd.f32 %v17097_v14, %v12556_v45  ;;  %v17102_v55 = vld [vmem:[#allocation85_spill] sm:$0xff] }
 0x505   : > { %17093 = vst [vmem:[#allocation78_spill] sm:$0xff] %v12995_v47  ;;  %17094 = vst [vmem:[#allocation79_spill] sm:$0xff] %v12997_v33  ;;  %v4370_v2 = vpop.f32.mrb[60].mxu1  ;;  %v4819_v43 = vpop.f32.mrb[92].mxu0 }
 0x506   : > { %v13009_v38 = vmul.f32 %v4370_v2, %v2214_v15  ;;  %v13011_v31 = vmul.f32 %v4819_v43, %v2663_v50  ;;  %v4372_v40 = vpop.f32.mrb[61].mxu1  ;;  %v4821_v33 = vpop.f32.mrb[93].mxu0  ;;  %8440 = vmatmul.mubr.msk.f32.gmra.mrb[166].mxu1 %vm3979_vm9, %v11744_v11  ;;  %8506 = vmatmul.mubr.msk.f32.gmra.mrb[198].mxu0 %vm3979_vm9, %v11744_v11  ;;  %v2220_v15 = vadd.f32 %v17102_v55, %v12546_v30  ;;  %v17103_v50 = vld [vmem:[#allocation86_spill] sm:$0xff]  ;;  %v17104_v11 = vld [vmem:[#allocation87_spill] sm:$0xff] }
 0x507   : > { %v13017_v52 = vmul.f32 %v4372_v40, %v2216_v39  ;;  %v13019_v37 = vmul.f32 %v4821_v33, %v2665_v20  ;;  %5206 = vmatprep.mubr.f32.mxu1 %v16425_v13  ;;  %5655 = vmatprep.mubr.f32.mxu0 %v16425_v13  ;;  %v2669_v2 = vadd.f32 %v17103_v50, %v12548_v29 }
 0x508   : > { %17098 = vst [vmem:[#allocation80_spill] sm:$0xff] %v13009_v38  ;;  %17099 = vst [vmem:[#allocation81_spill] sm:$0xff] %v13011_v31  ;;  %v2222_v31 = vadd.f32 %v10838_v60, %v12550_v19  ;;  %v2671_v39 = vadd.f32 %v17104_v11, %v12556_v45  ;;  %v17109_v60 = vld [vmem:[#allocation88_spill] sm:$0xff] }
 0x509   : > { %17100 = vst [vmem:[#allocation82_spill] sm:$0xff] %v13017_v52  ;;  %17101 = vst [vmem:[#allocation83_spill] sm:$0xff] %v13019_v37  ;;  %v4376_v43 = vpop.f32.mrb[62].mxu1  ;;  %v4825_v14 = vpop.f32.mrb[94].mxu0 }
 0x50a   : > { %v13031_v33 = vmul.f32 %v4376_v43, %v2220_v15  ;;  %v13033_v20 = vmul.f32 %v4825_v14, %v2669_v2  ;;  %v4378_v40 = vpop.f32.mrb[63].mxu1  ;;  %v4827_v37 = vpop.f32.mrb[95].mxu0  ;;  %8441 = vmatmul.mubr.msk.f32.gmra.mrb[168].mxu1 %vm3979_vm9, %v11763_v24  ;;  %8507 = vmatmul.mubr.msk.f32.gmra.mrb[200].mxu0 %vm3979_vm9, %v11763_v24  ;;  %v2226_v15 = vadd.f32 %v17109_v60, %v12546_v30  ;;  %v17110_v2 = vld [vmem:[#allocation89_spill] sm:$0xff]  ;;  %v17111_v24 = vld [vmem:[#allocation90_spill] sm:$0xff] }
 0x50b   : > { %v13039_v55 = vmul.f32 %v4378_v40, %v2222_v31  ;;  %v13041_v50 = vmul.f32 %v4827_v37, %v2671_v39  ;;  %5212 = vmatprep.mubr.f32.mxu1 %v16425_v13  ;;  %5661 = vmatprep.mubr.f32.mxu0 %v16425_v13  ;;  %v2675_v43 = vadd.f32 %v17110_v2, %v12548_v29 }
 0x50c   : > { %17105 = vst [vmem:[#allocation84_spill] sm:$0xff] %v13031_v33  ;;  %17106 = vst [vmem:[#allocation85_spill] sm:$0xff] %v13033_v20  ;;  %v2228_v20 = vadd.f32 %v10852_v63, %v12550_v19  ;;  %v2677_v31 = vadd.f32 %v17111_v24, %v12556_v45  ;;  %v17116_v63 = vld [vmem:[#allocation91_spill] sm:$0xff] }
 0x50d   : > { %17107 = vst [vmem:[#allocation86_spill] sm:$0xff] %v13039_v55  ;;  %17108 = vst [vmem:[#allocation87_spill] sm:$0xff] %v13041_v50  ;;  %v4382_v14 = vpop.f32.mrb[64].mxu1  ;;  %v4831_v11 = vpop.f32.mrb[96].mxu0 }
 0x50e   : > { %v13053_v37 = vmul.f32 %v4382_v14, %v2226_v15  ;;  %v13055_v39 = vmul.f32 %v4831_v11, %v2675_v43  ;;  %v4384_v40 = vpop.f32.mrb[65].mxu1  ;;  %v4833_v50 = vpop.f32.mrb[97].mxu0  ;;  %8442 = vmatmul.mubr.msk.f32.gmra.mrb[170].mxu1 %vm3979_vm9, %v11779_v59  ;;  %8508 = vmatmul.mubr.msk.f32.gmra.mrb[202].mxu0 %vm3979_vm9, %v11779_v59  ;;  %v2232_v15 = vadd.f32 %v17116_v63, %v12546_v30  ;;  %v17117_v43 = vld [vmem:[#allocation92_spill] sm:$0xff]  ;;  %v17118_v59 = vld [vmem:[#allocation93_spill] sm:$0xff] }
 0x50f   : > { %v13061_v60 = vmul.f32 %v4384_v40, %v2228_v20  ;;  %v13063_v2 = vmul.f32 %v4833_v50, %v2677_v31  ;;  %5218 = vmatprep.mubr.f32.mxu1 %v16425_v13  ;;  %5667 = vmatprep.mubr.f32.mxu0 %v16425_v13  ;;  %v2681_v14 = vadd.f32 %v17117_v43, %v12548_v29 }
 0x510   : > { %17112 = vst [vmem:[#allocation88_spill] sm:$0xff] %v13053_v37  ;;  %17113 = vst [vmem:[#allocation89_spill] sm:$0xff] %v13055_v39  ;;  %v2234_v39 = vadd.f32 %v10866_v5, %v12550_v19  ;;  %v2683_v20 = vadd.f32 %v17118_v59, %v12556_v45  ;;  %v17123_v5 = vld [vmem:[#allocation94_spill] sm:$0xff] }
 0x511   : > { %17114 = vst [vmem:[#allocation90_spill] sm:$0xff] %v13061_v60  ;;  %17115 = vst [vmem:[#allocation541_spill] sm:$0xff] %v13063_v2  ;;  %v4388_v11 = vpop.f32.mrb[66].mxu1  ;;  %v4837_v24 = vpop.f32.mrb[98].mxu0  ;;  %v17508_v60 = vld [vmem:[#allocation532_spill] sm:$0xff] }
 0x512   : > { %v13075_v50 = vmul.f32 %v4388_v11, %v2232_v15  ;;  %v13077_v31 = vmul.f32 %v4837_v24, %v2681_v14  ;;  %v4390_v40 = vpop.f32.mrb[67].mxu1  ;;  %v4839_v2 = vpop.f32.mrb[99].mxu0  ;;  %8443 = vmatmul.mubr.msk.f32.gmra.mrb[172].mxu1 %vm3979_vm9, %v11798_v6  ;;  %8509 = vmatmul.mubr.msk.f32.gmra.mrb[204].mxu0 %vm3979_vm9, %v11798_v6  ;;  %v2238_v15 = vadd.f32 %v17123_v5, %v12546_v30  ;;  %v17124_v14 = vld [vmem:[#allocation95_spill] sm:$0xff]  ;;  %v17125_v6 = vld [vmem:[#allocation96_spill] sm:$0xff] }
 0x513   : > { %v13083_v63 = vmul.f32 %v4390_v40, %v2234_v39  ;;  %v13085_v43 = vmul.f32 %v4839_v2, %v2683_v20  ;;  %5224 = vmatprep.mubr.f32.mxu1 %v16425_v13  ;;  %5673 = vmatprep.mubr.f32.mxu0 %v16425_v13  ;;  %v2687_v11 = vadd.f32 %v17124_v14, %v12548_v29 }
 0x514   : > { %17119 = vst [vmem:[#allocation91_spill] sm:$0xff] %v13075_v50  ;;  %17120 = vst [vmem:[#allocation92_spill] sm:$0xff] %v13077_v31  ;;  %v2240_v31 = vadd.f32 %v10880_v10, %v12550_v19  ;;  %v2689_v39 = vadd.f32 %v17125_v6, %v12556_v45  ;;  %v17130_v10 = vld [vmem:[#allocation97_spill] sm:$0xff] }
 0x515   : > { %17121 = vst [vmem:[#allocation93_spill] sm:$0xff] %v13083_v63  ;;  %17122 = vst [vmem:[#allocation542_spill] sm:$0xff] %v13085_v43  ;;  %v4394_v24 = vpop.f32.mrb[68].mxu1  ;;  %v4843_v59 = vpop.f32.mrb[100].mxu0 }
 0x516   : > { %v13097_v2 = vmul.f32 %v4394_v24, %v2238_v15  ;;  %v13099_v20 = vmul.f32 %v4843_v59, %v2687_v11  ;;  %v4396_v40 = vpop.f32.mrb[69].mxu1  ;;  %v4845_v43 = vpop.f32.mrb[101].mxu0  ;;  %8444 = vmatmul.mubr.msk.f32.gmra.mrb[174].mxu1 %vm3979_vm9, %v11814_v25  ;;  %8510 = vmatmul.mubr.msk.f32.gmra.mrb[206].mxu0 %vm3979_vm9, %v11814_v25  ;;  %v2244_v15 = vadd.f32 %v17130_v10, %v12546_v30  ;;  %v17131_v11 = vld [vmem:[#allocation98_spill] sm:$0xff]  ;;  %v17132_v25 = vld [vmem:[#allocation99_spill] sm:$0xff] }
 0x517   : > { %v13105_v5 = vmul.f32 %v4396_v40, %v2240_v31  ;;  %v13107_v14 = vmul.f32 %v4845_v43, %v2689_v39  ;;  %5230 = vmatprep.mubr.f32.mxu1 %v16425_v13  ;;  %5679 = vmatprep.mubr.f32.mxu0 %v16425_v13  ;;  %v2693_v24 = vadd.f32 %v17131_v11, %v12548_v29 }
 0x518   : > { %17126 = vst [vmem:[#allocation94_spill] sm:$0xff] %v13097_v2  ;;  %17127 = vst [vmem:[#allocation95_spill] sm:$0xff] %v13099_v20  ;;  %v2246_v20 = vadd.f32 %v10894_v18, %v12550_v19  ;;  %v2695_v31 = vadd.f32 %v17132_v25, %v12556_v45  ;;  %v17137_v18 = vld [vmem:[#allocation100_spill] sm:$0xff] }
 0x519   : > { %17128 = vst [vmem:[#allocation96_spill] sm:$0xff] %v13105_v5  ;;  %17129 = vst [vmem:[#allocation543_spill] sm:$0xff] %v13107_v14  ;;  %v4400_v59 = vpop.f32.mrb[70].mxu1  ;;  %v4849_v6 = vpop.f32.mrb[102].mxu0 }
 0x51a   : > { %v13119_v43 = vmul.f32 %v4400_v59, %v2244_v15  ;;  %v13121_v39 = vmul.f32 %v4849_v6, %v2693_v24  ;;  %v4402_v40 = vpop.f32.mrb[71].mxu1  ;;  %v4851_v14 = vpop.f32.mrb[103].mxu0  ;;  %8445 = vmatmul.mubr.msk.f32.gmra.mrb[176].mxu1 %vm3979_vm9, %v11833_v41  ;;  %8511 = vmatmul.mubr.msk.f32.gmra.mrb[208].mxu0 %vm3979_vm9, %v11833_v41  ;;  %v2250_v15 = vadd.f32 %v17137_v18, %v12546_v30  ;;  %v17138_v24 = vld [vmem:[#allocation101_spill] sm:$0xff]  ;;  %v17140_v41 = vld [vmem:[#allocation103_spill] sm:$0xff] }
 0x51b   : > { %v13127_v10 = vmul.f32 %v4402_v40, %v2246_v20  ;;  %v13129_v11 = vmul.f32 %v4851_v14, %v2695_v31  ;;  %5236 = vmatprep.mubr.f32.mxu1 %v16425_v13  ;;  %5685 = vmatprep.mubr.f32.mxu0 %v16425_v13  ;;  %v2699_v59 = vadd.f32 %v17138_v24, %v12548_v29 }
 0x51c   : > { %17133 = vst [vmem:[#allocation97_spill] sm:$0xff] %v13119_v43  ;;  %17134 = vst [vmem:[#allocation98_spill] sm:$0xff] %v13121_v39  ;;  %v17139_v39 = vld [vmem:[#allocation102_spill] sm:$0xff]  ;;  %v2701_v20 = vadd.f32 %v17140_v41, %v12556_v45 }
 0x51d   : > { %17135 = vst [vmem:[#allocation99_spill] sm:$0xff] %v13127_v10  ;;  %17136 = vst [vmem:[#allocation544_spill] sm:$0xff] %v13129_v11  ;;  %v4406_v6 = vpop.f32.mrb[72].mxu1  ;;  %v4855_v25 = vpop.f32.mrb[104].mxu0  ;;  %v2252_v43 = vadd.f32 %v17139_v39, %v12550_v19  ;;  %v17145_v39 = vld [vmem:[#allocation104_spill] sm:$0xff] }
 0x51e   : > { %v13141_v14 = vmul.f32 %v4406_v6, %v2250_v15  ;;  %v13143_v31 = vmul.f32 %v4855_v25, %v2699_v59  ;;  %v4408_v40 = vpop.f32.mrb[73].mxu1  ;;  %v4857_v11 = vpop.f32.mrb[105].mxu0  ;;  %8446 = vmatmul.mubr.msk.f32.gmra.mrb[178].mxu1 %vm3979_vm9, %v11849_v12  ;;  %8512 = vmatmul.mubr.msk.f32.gmra.mrb[210].mxu0 %vm3979_vm9, %v11849_v12  ;;  %v2256_v15 = vadd.f32 %v17145_v39, %v12546_v30  ;;  %v17146_v59 = vld [vmem:[#allocation105_spill] sm:$0xff]  ;;  %v17148_v12 = vld [vmem:[#allocation107_spill] sm:$0xff] }
 0x51f   : > { %v13149_v18 = vmul.f32 %v4408_v40, %v2252_v43  ;;  %v13151_v24 = vmul.f32 %v4857_v11, %v2701_v20  ;;  %5242 = vmatprep.mubr.f32.mxu1 %v16425_v13  ;;  %5691 = vmatprep.mubr.f32.mxu0 %v16425_v13  ;;  %v2705_v6 = vadd.f32 %v17146_v59, %v12548_v29 }
 0x520   : > { %17141 = vst [vmem:[#allocation100_spill] sm:$0xff] %v13141_v14  ;;  %17142 = vst [vmem:[#allocation101_spill] sm:$0xff] %v13143_v31  ;;  %v17147_v31 = vld [vmem:[#allocation106_spill] sm:$0xff]  ;;  %v2707_v43 = vadd.f32 %v17148_v12, %v12556_v45 }
 0x521   : > { %17143 = vst [vmem:[#allocation102_spill] sm:$0xff] %v13149_v18  ;;  %17144 = vst [vmem:[#allocation103_spill] sm:$0xff] %v13151_v24  ;;  %v4412_v25 = vpop.f32.mrb[74].mxu1  ;;  %v4861_v41 = vpop.f32.mrb[106].mxu0  ;;  %v2258_v14 = vadd.f32 %v17147_v31, %v12550_v19  ;;  %v17153_v31 = vld [vmem:[#allocation9_spill] sm:$0xff]  ;;  %v17480_v18 = vld [vmem:[#allocation522_spill] sm:$0xff] }
 0x522   : > { %v13163_v11 = vmul.f32 %v4412_v25, %v2256_v15  ;;  %v13165_v20 = vmul.f32 %v4861_v41, %v2705_v6  ;;  %v4414_v40 = vpop.f32.mrb[75].mxu1  ;;  %v4863_v24 = vpop.f32.mrb[107].mxu0  ;;  %8447 = vmatmul.mubr.msk.f32.gmra.mrb[180].mxu1 %vm3979_vm9, %v11868_v57  ;;  %8513 = vmatmul.mubr.msk.f32.gmra.mrb[212].mxu0 %vm3979_vm9, %v11868_v57  ;;  %v2262_v15 = vadd.f32 %v17153_v31, %v12546_v30  ;;  %v17154_v6 = vld [vmem:[#allocation108_spill] sm:$0xff]  ;;  %v17156_v57 = vld [vmem:[#allocation110_spill] sm:$0xff] }
 0x523   : > { %v13171_v39 = vmul.f32 %v4414_v40, %v2258_v14  ;;  %v13173_v59 = vmul.f32 %v4863_v24, %v2707_v43  ;;  %5248 = vmatprep.mubr.f32.mxu1 %v16425_v13  ;;  %5697 = vmatprep.mubr.f32.mxu0 %v16425_v13  ;;  %v2711_v25 = vadd.f32 %v17154_v6, %v12548_v29 }
 0x524   : > { %17149 = vst [vmem:[#allocation104_spill] sm:$0xff] %v13163_v11  ;;  %17150 = vst [vmem:[#allocation105_spill] sm:$0xff] %v13165_v20  ;;  %v17155_v20 = vld [vmem:[#allocation109_spill] sm:$0xff]  ;;  %v2713_v14 = vadd.f32 %v17156_v57, %v12556_v45 }
 0x525   : > { %17151 = vst [vmem:[#allocation106_spill] sm:$0xff] %v13171_v39  ;;  %17152 = vst [vmem:[#allocation107_spill] sm:$0xff] %v13173_v59  ;;  %v4418_v41 = vpop.f32.mrb[76].mxu1  ;;  %v4867_v12 = vpop.f32.mrb[108].mxu0  ;;  %v2264_v11 = vadd.f32 %v17155_v20, %v12550_v19  ;;  %v17161_v20 = vld [vmem:[#allocation10_spill] sm:$0xff] }
 0x526   : > { %v13185_v24 = vmul.f32 %v4418_v41, %v2262_v15  ;;  %v13187_v43 = vmul.f32 %v4867_v12, %v2711_v25  ;;  %v4420_v40 = vpop.f32.mrb[77].mxu1  ;;  %v4869_v59 = vpop.f32.mrb[109].mxu0  ;;  %8448 = vmatmul.mubr.msk.f32.gmra.mrb[182].mxu1 %vm3979_vm9, %v11884_v3  ;;  %8514 = vmatmul.mubr.msk.f32.gmra.mrb[214].mxu0 %vm3979_vm9, %v11884_v3  ;;  %v2268_v15 = vadd.f32 %v17161_v20, %v12546_v30  ;;  %v17162_v25 = vld [vmem:[#allocation111_spill] sm:$0xff]  ;;  %v17164_v3 = vld [vmem:[#allocation113_spill] sm:$0xff] }
 0x527   : > { %v13193_v31 = vmul.f32 %v4420_v40, %v2264_v11  ;;  %v13195_v6 = vmul.f32 %v4869_v59, %v2713_v14  ;;  %5254 = vmatprep.mubr.f32.mxu1 %v16425_v13  ;;  %5703 = vmatprep.mubr.f32.mxu0 %v16425_v13  ;;  %v2717_v41 = vadd.f32 %v17162_v25, %v12548_v29 }
 0x528   : > { %17157 = vst [vmem:[#allocation9_spill] sm:$0xff] %v13185_v24  ;;  %17158 = vst [vmem:[#allocation108_spill] sm:$0xff] %v13187_v43  ;;  %v17163_v43 = vld [vmem:[#allocation112_spill] sm:$0xff]  ;;  %v2719_v11 = vadd.f32 %v17164_v3, %v12556_v45 }
 0x529   : > { %17159 = vst [vmem:[#allocation109_spill] sm:$0xff] %v13193_v31  ;;  %17160 = vst [vmem:[#allocation110_spill] sm:$0xff] %v13195_v6  ;;  %v4424_v12 = vpop.f32.mrb[78].mxu1  ;;  %v4873_v57 = vpop.f32.mrb[110].mxu0  ;;  %v2270_v24 = vadd.f32 %v17163_v43, %v12550_v19  ;;  %v17169_v43 = vld [vmem:[#allocation11_spill] sm:$0xff] }
 0x52a   : > { %v13207_v59 = vmul.f32 %v4424_v12, %v2268_v15  ;;  %v13209_v14 = vmul.f32 %v4873_v57, %v2717_v41  ;;  %v4426_v40 = vpop.f32.mrb[79].mxu1  ;;  %v4875_v6 = vpop.f32.mrb[111].mxu0  ;;  %8449 = vmatmul.mubr.msk.f32.gmra.mrb[184].mxu1 %vm3979_vm9, %v11903_v28  ;;  %8515 = vmatmul.mubr.msk.f32.gmra.mrb[216].mxu0 %vm3979_vm9, %v11903_v28  ;;  %v2274_v15 = vadd.f32 %v17169_v43, %v12546_v30  ;;  %v17170_v41 = vld [vmem:[#allocation114_spill] sm:$0xff]  ;;  %v17172_v28 = vld [vmem:[#allocation116_spill] sm:$0xff] }
 0x52b   : > { %v13215_v20 = vmul.f32 %v4426_v40, %v2270_v24  ;;  %v13217_v25 = vmul.f32 %v4875_v6, %v2719_v11  ;;  %5260 = vmatprep.mubr.f32.mxu1 %v16425_v13  ;;  %5709 = vmatprep.mubr.f32.mxu0 %v16425_v13  ;;  %v2723_v12 = vadd.f32 %v17170_v41, %v12548_v29 }
 0x52c   : > { %17165 = vst [vmem:[#allocation10_spill] sm:$0xff] %v13207_v59  ;;  %17166 = vst [vmem:[#allocation111_spill] sm:$0xff] %v13209_v14  ;;  %v17171_v14 = vld [vmem:[#allocation115_spill] sm:$0xff]  ;;  %v2725_v24 = vadd.f32 %v17172_v28, %v12556_v45 }
 0x52d   : > { %17167 = vst [vmem:[#allocation112_spill] sm:$0xff] %v13215_v20  ;;  %17168 = vst [vmem:[#allocation113_spill] sm:$0xff] %v13217_v25  ;;  %v4430_v57 = vpop.f32.mrb[80].mxu1  ;;  %v4879_v3 = vpop.f32.mrb[112].mxu0  ;;  %v2276_v59 = vadd.f32 %v17171_v14, %v12550_v19  ;;  %v17177_v14 = vld [vmem:[#allocation12_spill] sm:$0xff] }
 0x52e   : > { %v13229_v6 = vmul.f32 %v4430_v57, %v2274_v15  ;;  %v13231_v11 = vmul.f32 %v4879_v3, %v2723_v12  ;;  %v4432_v40 = vpop.f32.mrb[81].mxu1  ;;  %v4881_v25 = vpop.f32.mrb[113].mxu0  ;;  %8450 = vmatmul.mubr.msk.f32.gmra.mrb[186].mxu1 %vm3979_vm9, %v11919_v62  ;;  %8516 = vmatmul.mubr.msk.f32.gmra.mrb[218].mxu0 %vm3979_vm9, %v11919_v62  ;;  %v2280_v15 = vadd.f32 %v17177_v14, %v12546_v30  ;;  %v17178_v12 = vld [vmem:[#allocation117_spill] sm:$0xff]  ;;  %v17180_v62 = vld [vmem:[#allocation119_spill] sm:$0xff]  ;;  %v17470_v20 = vld [vmem:[#allocation516_spill] sm:$0xff] }
 0x52f   : > { %v13237_v43 = vmul.f32 %v4432_v40, %v2276_v59  ;;  %v13239_v41 = vmul.f32 %v4881_v25, %v2725_v24  ;;  %5266 = vmatprep.mubr.f32.mxu1 %v16425_v13  ;;  %5715 = vmatprep.mubr.f32.mxu0 %v16425_v13  ;;  %v2729_v57 = vadd.f32 %v17178_v12, %v12548_v29 }
 0x530   : > { %17173 = vst [vmem:[#allocation11_spill] sm:$0xff] %v13229_v6  ;;  %17174 = vst [vmem:[#allocation114_spill] sm:$0xff] %v13231_v11  ;;  %v17179_v11 = vld [vmem:[#allocation118_spill] sm:$0xff]  ;;  %v2731_v59 = vadd.f32 %v17180_v62, %v12556_v45 }
 0x531   : > { %17175 = vst [vmem:[#allocation115_spill] sm:$0xff] %v13237_v43  ;;  %17176 = vst [vmem:[#allocation116_spill] sm:$0xff] %v13239_v41  ;;  %v4436_v3 = vpop.f32.mrb[82].mxu1  ;;  %v4885_v28 = vpop.f32.mrb[114].mxu0  ;;  %v2282_v6 = vadd.f32 %v17179_v11, %v12550_v19  ;;  %v17185_v11 = vld [vmem:[#allocation13_spill] sm:$0xff] }
 0x532   : > { %v13251_v25 = vmul.f32 %v4436_v3, %v2280_v15  ;;  %v13253_v24 = vmul.f32 %v4885_v28, %v2729_v57  ;;  %v4438_v40 = vpop.f32.mrb[83].mxu1  ;;  %v4887_v41 = vpop.f32.mrb[115].mxu0  ;;  %8451 = vmatmul.mubr.msk.f32.gmra.mrb[188].mxu1 %vm3979_vm9, %v11938_v16  ;;  %8517 = vmatmul.mubr.msk.f32.gmra.mrb[220].mxu0 %vm3979_vm9, %v11938_v16  ;;  %v2286_v15 = vadd.f32 %v17185_v11, %v12546_v30  ;;  %v17186_v57 = vld [vmem:[#allocation120_spill] sm:$0xff]  ;;  %v17188_v16 = vld [vmem:[#allocation122_spill] sm:$0xff] }
 0x533   : > { %v13259_v14 = vmul.f32 %v4438_v40, %v2282_v6  ;;  %v13261_v12 = vmul.f32 %v4887_v41, %v2731_v59  ;;  %5272 = vmatprep.mubr.f32.mxu1 %v16425_v13  ;;  %5721 = vmatprep.mubr.f32.mxu0 %v16425_v13  ;;  %v2735_v3 = vadd.f32 %v17186_v57, %v12548_v29 }
 0x534   : > { %17181 = vst [vmem:[#allocation12_spill] sm:$0xff] %v13251_v25  ;;  %17182 = vst [vmem:[#allocation117_spill] sm:$0xff] %v13253_v24  ;;  %v17187_v24 = vld [vmem:[#allocation121_spill] sm:$0xff]  ;;  %v2737_v6 = vadd.f32 %v17188_v16, %v12556_v45 }
 0x535   : > { %17183 = vst [vmem:[#allocation118_spill] sm:$0xff] %v13259_v14  ;;  %17184 = vst [vmem:[#allocation119_spill] sm:$0xff] %v13261_v12  ;;  %v4442_v28 = vpop.f32.mrb[84].mxu1  ;;  %v4891_v62 = vpop.f32.mrb[116].mxu0  ;;  %v2288_v25 = vadd.f32 %v17187_v24, %v12550_v19  ;;  %v17193_v24 = vld [vmem:[#allocation14_spill] sm:$0xff] }
 0x536   : > { %v13273_v41 = vmul.f32 %v4442_v28, %v2286_v15  ;;  %v13275_v59 = vmul.f32 %v4891_v62, %v2735_v3  ;;  %v4444_v40 = vpop.f32.mrb[85].mxu1  ;;  %v4893_v12 = vpop.f32.mrb[117].mxu0  ;;  %8452 = vmatmul.mubr.msk.f32.gmra.mrb[190].mxu1 %vm3979_vm9, %v11954_v54  ;;  %8518 = vmatmul.mubr.msk.f32.gmra.mrb[222].mxu0 %vm3979_vm9, %v11954_v54  ;;  %v2292_v15 = vadd.f32 %v17193_v24, %v12546_v30  ;;  %v17194_v3 = vld [vmem:[#allocation123_spill] sm:$0xff]  ;;  %v17196_v54 = vld [vmem:[#allocation125_spill] sm:$0xff] }
 0x537   : > { %v13281_v11 = vmul.f32 %v4444_v40, %v2288_v25  ;;  %v13283_v57 = vmul.f32 %v4893_v12, %v2737_v6  ;;  %5278 = vmatprep.mubr.f32.mxu1 %v16425_v13  ;;  %5727 = vmatprep.mubr.f32.mxu0 %v16425_v13  ;;  %v2741_v28 = vadd.f32 %v17194_v3, %v12548_v29 }
 0x538   : > { %17189 = vst [vmem:[#allocation13_spill] sm:$0xff] %v13273_v41  ;;  %17190 = vst [vmem:[#allocation120_spill] sm:$0xff] %v13275_v59  ;;  %v17195_v59 = vld [vmem:[#allocation124_spill] sm:$0xff]  ;;  %v2743_v25 = vadd.f32 %v17196_v54, %v12556_v45 }
 0x539   : > { %17191 = vst [vmem:[#allocation121_spill] sm:$0xff] %v13281_v11  ;;  %17192 = vst [vmem:[#allocation122_spill] sm:$0xff] %v13283_v57  ;;  %v4448_v62 = vpop.f32.mrb[86].mxu1  ;;  %v4897_v16 = vpop.f32.mrb[118].mxu0  ;;  %v2294_v41 = vadd.f32 %v17195_v59, %v12550_v19  ;;  %v17199_v11 = vld [vmem:[#allocation366_spill] sm:$0xff]  ;;  %v17202_v59 = vld [vmem:[#allocation15_spill] sm:$0xff] }
 0x53a   : > { %v13295_v12 = vmul.f32 %v4448_v62, %v2292_v15  ;;  %v13297_v6 = vmul.f32 %v4897_v16, %v2741_v28  ;;  %v4450_v40 = vpop.f32.mrb[87].mxu1  ;;  %v4899_v57 = vpop.f32.mrb[119].mxu0  ;;  %8453 = vmatmul.mubr.msk.f32.gmra.mrb[192].mxu1 %vm3979_vm9, %v17199_v11  ;;  %8519 = vmatmul.mubr.msk.f32.gmra.mrb[224].mxu0 %vm3979_vm9, %v17199_v11  ;;  %v2298_v15 = vadd.f32 %v17202_v59, %v12546_v30  ;;  %v17203_v28 = vld [vmem:[#allocation126_spill] sm:$0xff] }
 0x53b   : > { %v13303_v24 = vmul.f32 %v4450_v40, %v2294_v41  ;;  %v13305_v3 = vmul.f32 %v4899_v57, %v2743_v25  ;;  %5284 = vmatprep.mubr.f32.mxu1 %v16425_v13  ;;  %5733 = vmatprep.mubr.f32.mxu0 %v16425_v13  ;;  %v2747_v62 = vadd.f32 %v17203_v28, %v12548_v29  ;;  %v17205_v41 = vld [vmem:[#allocation128_spill] sm:$0xff] }
 0x53c   : > { %17197 = vst [vmem:[#allocation14_spill] sm:$0xff] %v13295_v12  ;;  %17198 = vst [vmem:[#allocation123_spill] sm:$0xff] %v13297_v6  ;;  %v17204_v12 = vld [vmem:[#allocation127_spill] sm:$0xff]  ;;  %v2749_v11 = vadd.f32 %v17205_v41, %v12556_v45 }
 0x53d   : > { %17200 = vst [vmem:[#allocation124_spill] sm:$0xff] %v13303_v24  ;;  %17201 = vst [vmem:[#allocation125_spill] sm:$0xff] %v13305_v3  ;;  %v4454_v16 = vpop.f32.mrb[88].mxu1  ;;  %v4903_v54 = vpop.f32.mrb[120].mxu0  ;;  %v2300_v6 = vadd.f32 %v17204_v12, %v12550_v19  ;;  %v17208_v3 = vld [vmem:[#allocation371_spill] sm:$0xff]  ;;  %v17211_v12 = vld [vmem:[#allocation16_spill] sm:$0xff] }
 0x53e   : > { %v13317_v57 = vmul.f32 %v4454_v16, %v2298_v15  ;;  %v13319_v25 = vmul.f32 %v4903_v54, %v2747_v62  ;;  %v4456_v40 = vpop.f32.mrb[89].mxu1  ;;  %v4905_v24 = vpop.f32.mrb[121].mxu0  ;;  %8454 = vmatmul.mubr.msk.f32.gmra.mrb[194].mxu1 %vm3979_vm9, %v17208_v3  ;;  %8520 = vmatmul.mubr.msk.f32.gmra.mrb[226].mxu0 %vm3979_vm9, %v17208_v3  ;;  %v2304_v15 = vadd.f32 %v17211_v12, %v12546_v30  ;;  %v17212_v62 = vld [vmem:[#allocation129_spill] sm:$0xff] }
 0x53f   : > { %v13325_v59 = vmul.f32 %v4456_v40, %v2300_v6  ;;  %v13327_v28 = vmul.f32 %v4905_v24, %v2749_v11  ;;  %5290 = vmatprep.mubr.f32.mxu1 %v16425_v13  ;;  %5739 = vmatprep.mubr.f32.mxu0 %v16425_v13  ;;  %v2753_v16 = vadd.f32 %v17212_v62, %v12548_v29  ;;  %v17214_v6 = vld [vmem:[#allocation131_spill] sm:$0xff] }
 0x540   : > { %17206 = vst [vmem:[#allocation366_spill] sm:$0xff] %v13317_v57  ;;  %17207 = vst [vmem:[#allocation15_spill] sm:$0xff] %v13319_v25  ;;  %v17213_v57 = vld [vmem:[#allocation130_spill] sm:$0xff]  ;;  %v2755_v3 = vadd.f32 %v17214_v6, %v12556_v45 }
 0x541   : > { %17209 = vst [vmem:[#allocation126_spill] sm:$0xff] %v13325_v59  ;;  %17210 = vst [vmem:[#allocation127_spill] sm:$0xff] %v13327_v28  ;;  %v4460_v54 = vpop.f32.mrb[90].mxu1  ;;  %v4909_v41 = vpop.f32.mrb[122].mxu0  ;;  %v2306_v25 = vadd.f32 %v17213_v57, %v12550_v19  ;;  %v17217_v28 = vld [vmem:[#allocation376_spill] sm:$0xff] }
 0x542   : > { %v13339_v24 = vmul.f32 %v4460_v54, %v2304_v15  ;;  %v13341_v11 = vmul.f32 %v4909_v41, %v2753_v16  ;;  %v4462_v40 = vpop.f32.mrb[91].mxu1  ;;  %v4911_v59 = vpop.f32.mrb[123].mxu0  ;;  %8455 = vmatmul.mubr.msk.f32.gmra.mrb[196].mxu1 %vm3979_vm9, %v17217_v28  ;;  %8521 = vmatmul.mubr.msk.f32.gmra.mrb[228].mxu0 %vm3979_vm9, %v17217_v28  ;;  %v17220_v57 = vld [vmem:[#allocation132_spill] sm:$0xff]  ;;  %v17221_v16 = vld [vmem:[#allocation133_spill] sm:$0xff] }
 0x543   : > { %v13347_v12 = vmul.f32 %v4462_v40, %v2306_v25  ;;  %v13349_v62 = vmul.f32 %v4911_v59, %v2755_v3  ;;  %5296 = vmatprep.mubr.f32.mxu1 %v16425_v13  ;;  %5745 = vmatprep.mubr.f32.mxu0 %v16425_v13  ;;  %v2310_v15 = vadd.f32 %v17220_v57, %v12546_v30  ;;  %v17223_v25 = vld [vmem:[#allocation135_spill] sm:$0xff] }
 0x544   : > { %17215 = vst [vmem:[#allocation128_spill] sm:$0xff] %v13339_v24  ;;  %17216 = vst [vmem:[#allocation371_spill] sm:$0xff] %v13341_v11  ;;  %v2759_v54 = vadd.f32 %v17221_v16, %v12548_v29  ;;  %v17222_v24 = vld [vmem:[#allocation134_spill] sm:$0xff]  ;;  %v2761_v28 = vadd.f32 %v17223_v25, %v12556_v45 }
 0x545   : > { %17218 = vst [vmem:[#allocation16_spill] sm:$0xff] %v13347_v12  ;;  %17219 = vst [vmem:[#allocation129_spill] sm:$0xff] %v13349_v62  ;;  %v4466_v41 = vpop.f32.mrb[92].mxu1  ;;  %v4915_v6 = vpop.f32.mrb[124].mxu0  ;;  %v2312_v11 = vadd.f32 %v17222_v24, %v12550_v19  ;;  %v17226_v62 = vld [vmem:[#allocation381_spill] sm:$0xff] }
 0x546   : > { %v13361_v59 = vmul.f32 %v4466_v41, %v2310_v15  ;;  %v13363_v3 = vmul.f32 %v4915_v6, %v2759_v54  ;;  %v4468_v40 = vpop.f32.mrb[93].mxu1  ;;  %v4917_v12 = vpop.f32.mrb[125].mxu0  ;;  %8456 = vmatmul.mubr.msk.f32.gmra.mrb[198].mxu1 %vm3979_vm9, %v17226_v62  ;;  %8522 = vmatmul.mubr.msk.f32.gmra.mrb[230].mxu0 %vm3979_vm9, %v17226_v62  ;;  %v17229_v24 = vld [vmem:[#allocation17_spill] sm:$0xff]  ;;  %v17230_v54 = vld [vmem:[#allocation136_spill] sm:$0xff] }
 0x547   : > { %v13369_v57 = vmul.f32 %v4468_v40, %v2312_v11  ;;  %v13371_v16 = vmul.f32 %v4917_v12, %v2761_v28  ;;  %5302 = vmatprep.mubr.f32.mxu1 %v16425_v13  ;;  %5751 = vmatprep.mubr.f32.mxu0 %v16425_v13  ;;  %v2316_v15 = vadd.f32 %v17229_v24, %v12546_v30  ;;  %v17232_v11 = vld [vmem:[#allocation138_spill] sm:$0xff] }
 0x548   : > { %17224 = vst [vmem:[#allocation130_spill] sm:$0xff] %v13361_v59  ;;  %17225 = vst [vmem:[#allocation131_spill] sm:$0xff] %v13363_v3  ;;  %v2765_v41 = vadd.f32 %v17230_v54, %v12548_v29  ;;  %v17231_v59 = vld [vmem:[#allocation137_spill] sm:$0xff]  ;;  %v2767_v62 = vadd.f32 %v17232_v11, %v12556_v45 }
 0x549   : > { %17227 = vst [vmem:[#allocation376_spill] sm:$0xff] %v13369_v57  ;;  %17228 = vst [vmem:[#allocation132_spill] sm:$0xff] %v13371_v16  ;;  %v4472_v6 = vpop.f32.mrb[94].mxu1  ;;  %v4921_v25 = vpop.f32.mrb[126].mxu0  ;;  %v2318_v3 = vadd.f32 %v17231_v59, %v12550_v19  ;;  %v17235_v16 = vld [vmem:[#allocation386_spill] sm:$0xff]  ;;  %v17238_v59 = vld [vmem:[#allocation139_spill] sm:$0xff] }
 0x54a   : > { %v13383_v12 = vmul.f32 %v4472_v6, %v2316_v15  ;;  %v13385_v28 = vmul.f32 %v4921_v25, %v2765_v41  ;;  %v4474_v40 = vpop.f32.mrb[95].mxu1  ;;  %v4923_v57 = vpop.f32.mrb[127].mxu0  ;;  %8457 = vmatmul.mubr.msk.f32.gmra.mrb[200].mxu1 %vm3979_vm9, %v17235_v16  ;;  %8523 = vmatmul.mubr.msk.f32.gmra.mrb[232].mxu0 %vm3979_vm9, %v17235_v16  ;;  %v2322_v15 = vadd.f32 %v17238_v59, %v12546_v30  ;;  %v17239_v41 = vld [vmem:[#allocation140_spill] sm:$0xff] }
 0x54b   : > { %v13391_v24 = vmul.f32 %v4474_v40, %v2318_v3  ;;  %v13393_v54 = vmul.f32 %v4923_v57, %v2767_v62  ;;  %5308 = vmatprep.mubr.f32.mxu1 %v16425_v13  ;;  %5757 = vmatprep.mubr.f32.mxu0 %v16425_v13  ;;  %v2771_v6 = vadd.f32 %v17239_v41, %v12548_v29  ;;  %v17241_v3 = vld [vmem:[#allocation142_spill] sm:$0xff] }
 0x54c   : > { %17233 = vst [vmem:[#allocation133_spill] sm:$0xff] %v13383_v12  ;;  %17234 = vst [vmem:[#allocation134_spill] sm:$0xff] %v13385_v28  ;;  %v17240_v12 = vld [vmem:[#allocation141_spill] sm:$0xff]  ;;  %v2773_v16 = vadd.f32 %v17241_v3, %v12556_v45 }
 0x54d   : > { %17236 = vst [vmem:[#allocation135_spill] sm:$0xff] %v13391_v24  ;;  %17237 = vst [vmem:[#allocation381_spill] sm:$0xff] %v13393_v54  ;;  %v4478_v25 = vpop.f32.mrb[96].mxu1  ;;  %v4927_v11 = vpop.f32.mrb[128].mxu0  ;;  %v2324_v28 = vadd.f32 %v17240_v12, %v12550_v19  ;;  %v17244_v54 = vld [vmem:[#allocation391_spill] sm:$0xff] }
 0x54e   : > { %v13405_v57 = vmul.f32 %v4478_v25, %v2322_v15  ;;  %v13407_v62 = vmul.f32 %v4927_v11, %v2771_v6  ;;  %v4480_v40 = vpop.f32.mrb[97].mxu1  ;;  %v4929_v24 = vpop.f32.mrb[129].mxu0  ;;  %8458 = vmatmul.mubr.msk.f32.gmra.mrb[202].mxu1 %vm3979_vm9, %v17244_v54  ;;  %8524 = vmatmul.mubr.msk.f32.gmra.mrb[234].mxu0 %vm3979_vm9, %v17244_v54  ;;  %v17247_v12 = vld [vmem:[#allocation143_spill] sm:$0xff]  ;;  %v17248_v6 = vld [vmem:[#allocation144_spill] sm:$0xff] }
 0x54f   : > { %v13413_v59 = vmul.f32 %v4480_v40, %v2324_v28  ;;  %v13415_v41 = vmul.f32 %v4929_v24, %v2773_v16  ;;  %5314 = vmatprep.mubr.f32.mxu1 %v16425_v13  ;;  %5763 = vmatprep.mubr.f32.mxu0 %v16425_v13  ;;  %v2328_v15 = vadd.f32 %v17247_v12, %v12546_v30  ;;  %v17250_v28 = vld [vmem:[#allocation146_spill] sm:$0xff] }
 0x550   : > { %17242 = vst [vmem:[#allocation17_spill] sm:$0xff] %v13405_v57  ;;  %17243 = vst [vmem:[#allocation136_spill] sm:$0xff] %v13407_v62  ;;  %v2777_v25 = vadd.f32 %v17248_v6, %v12548_v29  ;;  %v17249_v57 = vld [vmem:[#allocation145_spill] sm:$0xff]  ;;  %v2779_v54 = vadd.f32 %v17250_v28, %v12556_v45 }
 0x551   : > { %17245 = vst [vmem:[#allocation137_spill] sm:$0xff] %v13413_v59  ;;  %17246 = vst [vmem:[#allocation138_spill] sm:$0xff] %v13415_v41  ;;  %v4484_v11 = vpop.f32.mrb[98].mxu1  ;;  %v4933_v3 = vpop.f32.mrb[130].mxu0  ;;  %v2330_v62 = vadd.f32 %v17249_v57, %v12550_v19  ;;  %v17253_v41 = vld [vmem:[#allocation396_spill] sm:$0xff]  ;;  %v17256_v57 = vld [vmem:[#allocation147_spill] sm:$0xff] }
 0x552   : > { %v13427_v24 = vmul.f32 %v4484_v11, %v2328_v15  ;;  %v13429_v16 = vmul.f32 %v4933_v3, %v2777_v25  ;;  %v4486_v40 = vpop.f32.mrb[99].mxu1  ;;  %v4935_v59 = vpop.f32.mrb[131].mxu0  ;;  %8459 = vmatmul.mubr.msk.f32.gmra.mrb[204].mxu1 %vm3979_vm9, %v17253_v41  ;;  %8525 = vmatmul.mubr.msk.f32.gmra.mrb[236].mxu0 %vm3979_vm9, %v17253_v41  ;;  %v2334_v15 = vadd.f32 %v17256_v57, %v12546_v30  ;;  %v17257_v25 = vld [vmem:[#allocation148_spill] sm:$0xff] }
 0x553   : > { %v13435_v12 = vmul.f32 %v4486_v40, %v2330_v62  ;;  %v13437_v6 = vmul.f32 %v4935_v59, %v2779_v54  ;;  %5320 = vmatprep.mubr.f32.mxu1 %v16425_v13  ;;  %5769 = vmatprep.mubr.f32.mxu0 %v16425_v13  ;;  %v2783_v11 = vadd.f32 %v17257_v25, %v12548_v29  ;;  %v17259_v62 = vld [vmem:[#allocation150_spill] sm:$0xff] }
 0x554   : > { %17251 = vst [vmem:[#allocation386_spill] sm:$0xff] %v13427_v24  ;;  %17252 = vst [vmem:[#allocation139_spill] sm:$0xff] %v13429_v16  ;;  %v17258_v24 = vld [vmem:[#allocation149_spill] sm:$0xff]  ;;  %v2785_v41 = vadd.f32 %v17259_v62, %v12556_v45 }
 0x555   : > { %17254 = vst [vmem:[#allocation140_spill] sm:$0xff] %v13435_v12  ;;  %17255 = vst [vmem:[#allocation141_spill] sm:$0xff] %v13437_v6  ;;  %v4490_v3 = vpop.f32.mrb[100].mxu1  ;;  %v4939_v28 = vpop.f32.mrb[132].mxu0  ;;  %v2336_v16 = vadd.f32 %v17258_v24, %v12550_v19  ;;  %v17262_v6 = vld [vmem:[#allocation401_spill] sm:$0xff]  ;;  %v17265_v24 = vld [vmem:[#allocation151_spill] sm:$0xff] }
 0x556   : > { %v13449_v59 = vmul.f32 %v4490_v3, %v2334_v15  ;;  %v13451_v54 = vmul.f32 %v4939_v28, %v2783_v11  ;;  %v4492_v40 = vpop.f32.mrb[101].mxu1  ;;  %v4941_v12 = vpop.f32.mrb[133].mxu0  ;;  %8460 = vmatmul.mubr.msk.f32.gmra.mrb[206].mxu1 %vm3979_vm9, %v17262_v6  ;;  %8526 = vmatmul.mubr.msk.f32.gmra.mrb[238].mxu0 %vm3979_vm9, %v17262_v6  ;;  %v2340_v15 = vadd.f32 %v17265_v24, %v12546_v30  ;;  %v17266_v11 = vld [vmem:[#allocation152_spill] sm:$0xff] }
 0x557   : > { %v13457_v57 = vmul.f32 %v4492_v40, %v2336_v16  ;;  %v13459_v25 = vmul.f32 %v4941_v12, %v2785_v41  ;;  %5326 = vmatprep.mubr.f32.mxu1 %v16425_v13  ;;  %5775 = vmatprep.mubr.f32.mxu0 %v16425_v13  ;;  %v2789_v3 = vadd.f32 %v17266_v11, %v12548_v29  ;;  %v17268_v16 = vld [vmem:[#allocation154_spill] sm:$0xff] }
 0x558   : > { %17260 = vst [vmem:[#allocation142_spill] sm:$0xff] %v13449_v59  ;;  %17261 = vst [vmem:[#allocation391_spill] sm:$0xff] %v13451_v54  ;;  %v17267_v59 = vld [vmem:[#allocation153_spill] sm:$0xff]  ;;  %v2791_v6 = vadd.f32 %v17268_v16, %v12556_v45 }
 0x559   : > { %17263 = vst [vmem:[#allocation143_spill] sm:$0xff] %v13457_v57  ;;  %17264 = vst [vmem:[#allocation144_spill] sm:$0xff] %v13459_v25  ;;  %v4496_v28 = vpop.f32.mrb[102].mxu1  ;;  %v4945_v62 = vpop.f32.mrb[134].mxu0  ;;  %v2342_v54 = vadd.f32 %v17267_v59, %v12550_v19  ;;  %v17271_v25 = vld [vmem:[#allocation406_spill] sm:$0xff]  ;;  %v17274_v59 = vld [vmem:[#allocation155_spill] sm:$0xff] }
 0x55a   : > { %v13471_v12 = vmul.f32 %v4496_v28, %v2340_v15  ;;  %v13473_v41 = vmul.f32 %v4945_v62, %v2789_v3  ;;  %v4498_v40 = vpop.f32.mrb[103].mxu1  ;;  %v4947_v57 = vpop.f32.mrb[135].mxu0  ;;  %8461 = vmatmul.mubr.msk.f32.gmra.mrb[208].mxu1 %vm3979_vm9, %v17271_v25  ;;  %8527 = vmatmul.mubr.msk.f32.gmra.mrb[240].mxu0 %vm3979_vm9, %v17271_v25  ;;  %v2346_v15 = vadd.f32 %v17274_v59, %v12546_v30  ;;  %v17275_v3 = vld [vmem:[#allocation156_spill] sm:$0xff] }
 0x55b   : > { %v13479_v24 = vmul.f32 %v4498_v40, %v2342_v54  ;;  %v13481_v11 = vmul.f32 %v4947_v57, %v2791_v6  ;;  %5332 = vmatprep.mubr.f32.mxu1 %v16425_v13  ;;  %5781 = vmatprep.mubr.f32.mxu0 %v16425_v13  ;;  %v2795_v28 = vadd.f32 %v17275_v3, %v12548_v29  ;;  %v17277_v54 = vld [vmem:[#allocation158_spill] sm:$0xff] }
 0x55c   : > { %17269 = vst [vmem:[#allocation145_spill] sm:$0xff] %v13471_v12  ;;  %17270 = vst [vmem:[#allocation146_spill] sm:$0xff] %v13473_v41  ;;  %v17276_v12 = vld [vmem:[#allocation157_spill] sm:$0xff]  ;;  %v2797_v25 = vadd.f32 %v17277_v54, %v12556_v45 }
 0x55d   : > { %17272 = vst [vmem:[#allocation396_spill] sm:$0xff] %v13479_v24  ;;  %17273 = vst [vmem:[#allocation147_spill] sm:$0xff] %v13481_v11  ;;  %v4502_v62 = vpop.f32.mrb[104].mxu1  ;;  %v4951_v16 = vpop.f32.mrb[136].mxu0  ;;  %v2348_v41 = vadd.f32 %v17276_v12, %v12550_v19  ;;  %v17280_v11 = vld [vmem:[#allocation411_spill] sm:$0xff] }
 0x55e   : > { %v13493_v57 = vmul.f32 %v4502_v62, %v2346_v15  ;;  %v13495_v6 = vmul.f32 %v4951_v16, %v2795_v28  ;;  %v4504_v40 = vpop.f32.mrb[105].mxu1  ;;  %v4953_v24 = vpop.f32.mrb[137].mxu0  ;;  %8462 = vmatmul.mubr.msk.f32.gmra.mrb[210].mxu1 %vm3979_vm9, %v17280_v11  ;;  %8528 = vmatmul.mubr.msk.f32.gmra.mrb[242].mxu0 %vm3979_vm9, %v17280_v11  ;;  %v17283_v12 = vld [vmem:[#allocation159_spill] sm:$0xff]  ;;  %v17284_v28 = vld [vmem:[#allocation160_spill] sm:$0xff] }
 0x55f   : > { %v13501_v59 = vmul.f32 %v4504_v40, %v2348_v41  ;;  %v13503_v3 = vmul.f32 %v4953_v24, %v2797_v25  ;;  %5338 = vmatprep.mubr.f32.mxu1 %v16425_v13  ;;  %5787 = vmatprep.mubr.f32.mxu0 %v16425_v13  ;;  %v2352_v15 = vadd.f32 %v17283_v12, %v12546_v30  ;;  %v17286_v41 = vld [vmem:[#allocation162_spill] sm:$0xff] }
 0x560   : > { %17278 = vst [vmem:[#allocation148_spill] sm:$0xff] %v13493_v57  ;;  %17279 = vst [vmem:[#allocation149_spill] sm:$0xff] %v13495_v6  ;;  %v2801_v62 = vadd.f32 %v17284_v28, %v12548_v29  ;;  %v17285_v57 = vld [vmem:[#allocation161_spill] sm:$0xff]  ;;  %v2803_v11 = vadd.f32 %v17286_v41, %v12556_v45 }
 0x561   : > { %17281 = vst [vmem:[#allocation150_spill] sm:$0xff] %v13501_v59  ;;  %17282 = vst [vmem:[#allocation401_spill] sm:$0xff] %v13503_v3  ;;  %v4508_v16 = vpop.f32.mrb[106].mxu1  ;;  %v4957_v54 = vpop.f32.mrb[138].mxu0  ;;  %v2354_v6 = vadd.f32 %v17285_v57, %v12550_v19  ;;  %v17289_v3 = vld [vmem:[#allocation416_spill] sm:$0xff]  ;;  %v17292_v57 = vld [vmem:[#allocation163_spill] sm:$0xff] }
 0x562   : > { %v13515_v24 = vmul.f32 %v4508_v16, %v2352_v15  ;;  %v13517_v25 = vmul.f32 %v4957_v54, %v2801_v62  ;;  %v4510_v40 = vpop.f32.mrb[107].mxu1  ;;  %v4959_v59 = vpop.f32.mrb[139].mxu0  ;;  %8463 = vmatmul.mubr.msk.f32.gmra.mrb[212].mxu1 %vm3979_vm9, %v17289_v3  ;;  %8529 = vmatmul.mubr.msk.f32.gmra.mrb[244].mxu0 %vm3979_vm9, %v17289_v3  ;;  %v2358_v15 = vadd.f32 %v17292_v57, %v12546_v30  ;;  %v17293_v62 = vld [vmem:[#allocation164_spill] sm:$0xff] }
 0x563   : > { %v13523_v12 = vmul.f32 %v4510_v40, %v2354_v6  ;;  %v13525_v28 = vmul.f32 %v4959_v59, %v2803_v11  ;;  %5344 = vmatprep.mubr.f32.mxu1 %v16425_v13  ;;  %5793 = vmatprep.mubr.f32.mxu0 %v16425_v13  ;;  %v2807_v16 = vadd.f32 %v17293_v62, %v12548_v29  ;;  %v17295_v6 = vld [vmem:[#allocation166_spill] sm:$0xff] }
 0x564   : > { %17287 = vst [vmem:[#allocation151_spill] sm:$0xff] %v13515_v24  ;;  %17288 = vst [vmem:[#allocation152_spill] sm:$0xff] %v13517_v25  ;;  %v17294_v24 = vld [vmem:[#allocation165_spill] sm:$0xff]  ;;  %v2809_v3 = vadd.f32 %v17295_v6, %v12556_v45 }
 0x565   : > { %17290 = vst [vmem:[#allocation153_spill] sm:$0xff] %v13523_v12  ;;  %17291 = vst [vmem:[#allocation154_spill] sm:$0xff] %v13525_v28  ;;  %v4514_v54 = vpop.f32.mrb[108].mxu1  ;;  %v4963_v41 = vpop.f32.mrb[140].mxu0  ;;  %v2360_v25 = vadd.f32 %v17294_v24, %v12550_v19  ;;  %v17298_v28 = vld [vmem:[#allocation421_spill] sm:$0xff]  ;;  %v17301_v24 = vld [vmem:[#allocation167_spill] sm:$0xff] }
 0x566   : > { %v13537_v59 = vmul.f32 %v4514_v54, %v2358_v15  ;;  %v13539_v11 = vmul.f32 %v4963_v41, %v2807_v16  ;;  %v4516_v40 = vpop.f32.mrb[109].mxu1  ;;  %v4965_v12 = vpop.f32.mrb[141].mxu0  ;;  %8464 = vmatmul.mubr.msk.f32.gmra.mrb[214].mxu1 %vm3979_vm9, %v17298_v28  ;;  %8530 = vmatmul.mubr.msk.f32.gmra.mrb[246].mxu0 %vm3979_vm9, %v17298_v28  ;;  %v2364_v15 = vadd.f32 %v17301_v24, %v12546_v30  ;;  %v17302_v16 = vld [vmem:[#allocation168_spill] sm:$0xff] }
 0x567   : > { %v13545_v57 = vmul.f32 %v4516_v40, %v2360_v25  ;;  %v13547_v62 = vmul.f32 %v4965_v12, %v2809_v3  ;;  %5350 = vmatprep.mubr.f32.mxu1 %v16425_v13  ;;  %5799 = vmatprep.mubr.f32.mxu0 %v16425_v13  ;;  %v2813_v54 = vadd.f32 %v17302_v16, %v12548_v29  ;;  %v17304_v25 = vld [vmem:[#allocation170_spill] sm:$0xff] }
 0x568   : > { %17296 = vst [vmem:[#allocation406_spill] sm:$0xff] %v13537_v59  ;;  %17297 = vst [vmem:[#allocation155_spill] sm:$0xff] %v13539_v11  ;;  %v17303_v59 = vld [vmem:[#allocation169_spill] sm:$0xff]  ;;  %v2815_v28 = vadd.f32 %v17304_v25, %v12556_v45 }
 0x569   : > { %17299 = vst [vmem:[#allocation156_spill] sm:$0xff] %v13545_v57  ;;  %17300 = vst [vmem:[#allocation157_spill] sm:$0xff] %v13547_v62  ;;  %v4520_v41 = vpop.f32.mrb[110].mxu1  ;;  %v4969_v6 = vpop.f32.mrb[142].mxu0  ;;  %v2366_v11 = vadd.f32 %v17303_v59, %v12550_v19  ;;  %v17307_v62 = vld [vmem:[#allocation426_spill] sm:$0xff]  ;;  %v17310_v59 = vld [vmem:[#allocation171_spill] sm:$0xff] }
 0x56a   : > { %v13559_v12 = vmul.f32 %v4520_v41, %v2364_v15  ;;  %v13561_v3 = vmul.f32 %v4969_v6, %v2813_v54  ;;  %v4522_v40 = vpop.f32.mrb[111].mxu1  ;;  %v4971_v57 = vpop.f32.mrb[143].mxu0  ;;  %8465 = vmatmul.mubr.msk.f32.gmra.mrb[216].mxu1 %vm3979_vm9, %v17307_v62  ;;  %8531 = vmatmul.mubr.msk.f32.gmra.mrb[248].mxu0 %vm3979_vm9, %v17307_v62  ;;  %v2370_v15 = vadd.f32 %v17310_v59, %v12546_v30  ;;  %v17311_v54 = vld [vmem:[#allocation172_spill] sm:$0xff] }
 0x56b   : > { %v13567_v24 = vmul.f32 %v4522_v40, %v2366_v11  ;;  %v13569_v16 = vmul.f32 %v4971_v57, %v2815_v28  ;;  %5356 = vmatprep.mubr.f32.mxu1 %v16425_v13  ;;  %5805 = vmatprep.mubr.f32.mxu0 %v16425_v13  ;;  %v2819_v41 = vadd.f32 %v17311_v54, %v12548_v29  ;;  %v17313_v11 = vld [vmem:[#allocation174_spill] sm:$0xff] }
 0x56c   : > { %17305 = vst [vmem:[#allocation158_spill] sm:$0xff] %v13559_v12  ;;  %17306 = vst [vmem:[#allocation411_spill] sm:$0xff] %v13561_v3  ;;  %v17312_v12 = vld [vmem:[#allocation173_spill] sm:$0xff]  ;;  %v2821_v62 = vadd.f32 %v17313_v11, %v12556_v45 }
 0x56d   : > { %17308 = vst [vmem:[#allocation159_spill] sm:$0xff] %v13567_v24  ;;  %17309 = vst [vmem:[#allocation160_spill] sm:$0xff] %v13569_v16  ;;  %v4526_v6 = vpop.f32.mrb[112].mxu1  ;;  %v4975_v25 = vpop.f32.mrb[144].mxu0  ;;  %v2372_v3 = vadd.f32 %v17312_v12, %v12550_v19  ;;  %v17316_v16 = vld [vmem:[#allocation431_spill] sm:$0xff] }
 0x56e   : > { %v13581_v57 = vmul.f32 %v4526_v6, %v2370_v15  ;;  %v13583_v28 = vmul.f32 %v4975_v25, %v2819_v41  ;;  %v4528_v40 = vpop.f32.mrb[113].mxu1  ;;  %v4977_v24 = vpop.f32.mrb[145].mxu0  ;;  %8466 = vmatmul.mubr.msk.f32.gmra.mrb[218].mxu1 %vm3979_vm9, %v17316_v16  ;;  %8532 = vmatmul.mubr.msk.f32.gmra.mrb[250].mxu0 %vm3979_vm9, %v17316_v16  ;;  %v17319_v12 = vld [vmem:[#allocation175_spill] sm:$0xff]  ;;  %v17320_v41 = vld [vmem:[#allocation176_spill] sm:$0xff] }
 0x56f   : > { %v13589_v59 = vmul.f32 %v4528_v40, %v2372_v3  ;;  %v13591_v54 = vmul.f32 %v4977_v24, %v2821_v62  ;;  %5362 = vmatprep.mubr.f32.mxu1 %v16425_v13  ;;  %5811 = vmatprep.mubr.f32.mxu0 %v16425_v13  ;;  %v2376_v15 = vadd.f32 %v17319_v12, %v12546_v30  ;;  %v17322_v3 = vld [vmem:[#allocation178_spill] sm:$0xff] }
 0x570   : > { %17314 = vst [vmem:[#allocation161_spill] sm:$0xff] %v13581_v57  ;;  %17315 = vst [vmem:[#allocation162_spill] sm:$0xff] %v13583_v28  ;;  %v2825_v6 = vadd.f32 %v17320_v41, %v12548_v29  ;;  %v17321_v57 = vld [vmem:[#allocation177_spill] sm:$0xff]  ;;  %v2827_v16 = vadd.f32 %v17322_v3, %v12556_v45 }
 0x571   : > { %17317 = vst [vmem:[#allocation416_spill] sm:$0xff] %v13589_v59  ;;  %17318 = vst [vmem:[#allocation163_spill] sm:$0xff] %v13591_v54  ;;  %v4532_v25 = vpop.f32.mrb[114].mxu1  ;;  %v4981_v11 = vpop.f32.mrb[146].mxu0  ;;  %v2378_v28 = vadd.f32 %v17321_v57, %v12550_v19  ;;  %v17325_v54 = vld [vmem:[#allocation436_spill] sm:$0xff]  ;;  %v17328_v57 = vld [vmem:[#allocation179_spill] sm:$0xff] }
 0x572   : > { %v13603_v24 = vmul.f32 %v4532_v25, %v2376_v15  ;;  %v13605_v62 = vmul.f32 %v4981_v11, %v2825_v6  ;;  %v4534_v40 = vpop.f32.mrb[115].mxu1  ;;  %v4983_v59 = vpop.f32.mrb[147].mxu0  ;;  %8467 = vmatmul.mubr.msk.f32.gmra.mrb[220].mxu1 %vm3979_vm9, %v17325_v54  ;;  %8533 = vmatmul.mubr.msk.f32.gmra.mrb[252].mxu0 %vm3979_vm9, %v17325_v54  ;;  %v2382_v15 = vadd.f32 %v17328_v57, %v12546_v30  ;;  %v17329_v6 = vld [vmem:[#allocation180_spill] sm:$0xff] }
 0x573   : > { %v13611_v12 = vmul.f32 %v4534_v40, %v2378_v28  ;;  %v13613_v41 = vmul.f32 %v4983_v59, %v2827_v16  ;;  %5368 = vmatprep.mubr.f32.mxu1 %v16425_v13  ;;  %5817 = vmatprep.mubr.f32.mxu0 %v16425_v13  ;;  %v2831_v25 = vadd.f32 %v17329_v6, %v12548_v29  ;;  %v17331_v28 = vld [vmem:[#allocation182_spill] sm:$0xff] }
 0x574   : > { %17323 = vst [vmem:[#allocation164_spill] sm:$0xff] %v13603_v24  ;;  %17324 = vst [vmem:[#allocation165_spill] sm:$0xff] %v13605_v62  ;;  %v17330_v24 = vld [vmem:[#allocation181_spill] sm:$0xff]  ;;  %v2833_v54 = vadd.f32 %v17331_v28, %v12556_v45 }
 0x575   : > { %17326 = vst [vmem:[#allocation166_spill] sm:$0xff] %v13611_v12  ;;  %17327 = vst [vmem:[#allocation421_spill] sm:$0xff] %v13613_v41  ;;  %v4538_v11 = vpop.f32.mrb[116].mxu1  ;;  %v4987_v3 = vpop.f32.mrb[148].mxu0  ;;  %v2384_v62 = vadd.f32 %v17330_v24, %v12550_v19  ;;  %v17334_v41 = vld [vmem:[#allocation441_spill] sm:$0xff]  ;;  %v17337_v24 = vld [vmem:[#allocation183_spill] sm:$0xff] }
 0x576   : > { %v13625_v59 = vmul.f32 %v4538_v11, %v2382_v15  ;;  %v13627_v16 = vmul.f32 %v4987_v3, %v2831_v25  ;;  %v4540_v40 = vpop.f32.mrb[117].mxu1  ;;  %v4989_v12 = vpop.f32.mrb[149].mxu0  ;;  %8468 = vmatmul.mubr.msk.f32.gmra.mrb[222].mxu1 %vm3979_vm9, %v17334_v41  ;;  %8534 = vmatmul.mubr.msk.f32.gmra.mrb[254].mxu0 %vm3979_vm9, %v17334_v41  ;;  %v2388_v15 = vadd.f32 %v17337_v24, %v12546_v30  ;;  %v17338_v25 = vld [vmem:[#allocation184_spill] sm:$0xff] }
 0x577   : > { %v13633_v57 = vmul.f32 %v4540_v40, %v2384_v62  ;;  %v13635_v6 = vmul.f32 %v4989_v12, %v2833_v54  ;;  %5374 = vmatprep.mubr.f32.mxu1 %v16425_v13  ;;  %5823 = vmatprep.mubr.f32.mxu0 %v16425_v13  ;;  %v2837_v11 = vadd.f32 %v17338_v25, %v12548_v29  ;;  %v17340_v62 = vld [vmem:[#allocation186_spill] sm:$0xff] }
 0x578   : > { %17332 = vst [vmem:[#allocation167_spill] sm:$0xff] %v13625_v59  ;;  %17333 = vst [vmem:[#allocation168_spill] sm:$0xff] %v13627_v16  ;;  %v17339_v59 = vld [vmem:[#allocation185_spill] sm:$0xff]  ;;  %v2839_v41 = vadd.f32 %v17340_v62, %v12556_v45 }
 0x579   : > { %17335 = vst [vmem:[#allocation169_spill] sm:$0xff] %v13633_v57  ;;  %17336 = vst [vmem:[#allocation170_spill] sm:$0xff] %v13635_v6  ;;  %v4544_v3 = vpop.f32.mrb[118].mxu1  ;;  %v4993_v28 = vpop.f32.mrb[150].mxu0  ;;  %v2390_v16 = vadd.f32 %v17339_v59, %v12550_v19  ;;  %v17343_v6 = vld [vmem:[#allocation446_spill] sm:$0xff]  ;;  %v17346_v59 = vld [vmem:[#allocation187_spill] sm:$0xff] }
 0x57a   : > { %v13647_v12 = vmul.f32 %v4544_v3, %v2388_v15  ;;  %v13649_v54 = vmul.f32 %v4993_v28, %v2837_v11  ;;  %v4546_v40 = vpop.f32.mrb[119].mxu1  ;;  %v4995_v57 = vpop.f32.mrb[151].mxu0  ;;  %8469 = vmatmul.mubr.msk.f32.gmra.mrb[224].mxu1 %vm3979_vm9, %v17343_v6  ;;  %8535 = vmatmul.mubr.msk.f32.gmra.mrb[0].mxu0 %vm3979_vm9, %v17343_v6  ;;  %v2394_v15 = vadd.f32 %v17346_v59, %v12546_v30  ;;  %v17347_v11 = vld [vmem:[#allocation188_spill] sm:$0xff] }
 0x57b   : > { %v13655_v24 = vmul.f32 %v4546_v40, %v2390_v16  ;;  %v13657_v25 = vmul.f32 %v4995_v57, %v2839_v41  ;;  %5380 = vmatprep.mubr.f32.mxu1 %v16425_v13  ;;  %5829 = vmatprep.mubr.f32.mxu0 %v16425_v13  ;;  %v2843_v3 = vadd.f32 %v17347_v11, %v12548_v29  ;;  %v17349_v16 = vld [vmem:[#allocation190_spill] sm:$0xff] }
 0x57c   : > { %17341 = vst [vmem:[#allocation426_spill] sm:$0xff] %v13647_v12  ;;  %17342 = vst [vmem:[#allocation171_spill] sm:$0xff] %v13649_v54  ;;  %v17348_v12 = vld [vmem:[#allocation189_spill] sm:$0xff]  ;;  %v2845_v6 = vadd.f32 %v17349_v16, %v12556_v45 }
 0x57d   : > { %17344 = vst [vmem:[#allocation172_spill] sm:$0xff] %v13655_v24  ;;  %17345 = vst [vmem:[#allocation173_spill] sm:$0xff] %v13657_v25  ;;  %v4550_v28 = vpop.f32.mrb[120].mxu1  ;;  %v4999_v62 = vpop.f32.mrb[152].mxu0  ;;  %v2396_v54 = vadd.f32 %v17348_v12, %v12550_v19  ;;  %v17352_v25 = vld [vmem:[#allocation451_spill] sm:$0xff] }
 0x57e   : > { %v13669_v57 = vmul.f32 %v4550_v28, %v2394_v15  ;;  %v13671_v41 = vmul.f32 %v4999_v62, %v2843_v3  ;;  %v4552_v40 = vpop.f32.mrb[121].mxu1  ;;  %v5001_v24 = vpop.f32.mrb[153].mxu0  ;;  %8470 = vmatmul.mubr.msk.f32.gmra.mrb[226].mxu1 %vm3979_vm9, %v17352_v25  ;;  %8536 = vmatmul.mubr.msk.f32.gmra.mrb[2].mxu0 %vm3979_vm9, %v17352_v25  ;;  %v17355_v12 = vld [vmem:[#allocation191_spill] sm:$0xff]  ;;  %v17356_v3 = vld [vmem:[#allocation192_spill] sm:$0xff] }
 0x57f   : > { %v13677_v59 = vmul.f32 %v4552_v40, %v2396_v54  ;;  %v13679_v11 = vmul.f32 %v5001_v24, %v2845_v6  ;;  %5386 = vmatprep.mubr.f32.mxu1 %v16425_v13  ;;  %5835 = vmatprep.mubr.f32.mxu0 %v16425_v13  ;;  %v2400_v15 = vadd.f32 %v17355_v12, %v12546_v30  ;;  %v17358_v54 = vld [vmem:[#allocation194_spill] sm:$0xff] }
 0x580   : > { %17350 = vst [vmem:[#allocation174_spill] sm:$0xff] %v13669_v57  ;;  %17351 = vst [vmem:[#allocation431_spill] sm:$0xff] %v13671_v41  ;;  %v2849_v28 = vadd.f32 %v17356_v3, %v12548_v29  ;;  %v17357_v57 = vld [vmem:[#allocation193_spill] sm:$0xff]  ;;  %v2851_v25 = vadd.f32 %v17358_v54, %v12556_v45 }
 0x581   : > { %17353 = vst [vmem:[#allocation175_spill] sm:$0xff] %v13677_v59  ;;  %17354 = vst [vmem:[#allocation176_spill] sm:$0xff] %v13679_v11  ;;  %v4556_v62 = vpop.f32.mrb[122].mxu1  ;;  %v5005_v16 = vpop.f32.mrb[154].mxu0  ;;  %v2402_v41 = vadd.f32 %v17357_v57, %v12550_v19  ;;  %v17361_v11 = vld [vmem:[#allocation456_spill] sm:$0xff]  ;;  %v17364_v57 = vld [vmem:[#allocation195_spill] sm:$0xff] }
 0x582   : > { %v13691_v24 = vmul.f32 %v4556_v62, %v2400_v15  ;;  %v13693_v6 = vmul.f32 %v5005_v16, %v2849_v28  ;;  %v4558_v40 = vpop.f32.mrb[123].mxu1  ;;  %v5007_v59 = vpop.f32.mrb[155].mxu0  ;;  %8471 = vmatmul.mubr.msk.f32.gmra.mrb[228].mxu1 %vm3979_vm9, %v17361_v11  ;;  %8537 = vmatmul.mubr.msk.f32.gmra.mrb[4].mxu0 %vm3979_vm9, %v17361_v11  ;;  %v2406_v15 = vadd.f32 %v17364_v57, %v12546_v30  ;;  %v17365_v28 = vld [vmem:[#allocation196_spill] sm:$0xff] }
 0x583   : > { %v13699_v12 = vmul.f32 %v4558_v40, %v2402_v41  ;;  %v13701_v3 = vmul.f32 %v5007_v59, %v2851_v25  ;;  %5392 = vmatprep.mubr.f32.mxu1 %v16425_v13  ;;  %5841 = vmatprep.mubr.f32.mxu0 %v16425_v13  ;;  %v2855_v62 = vadd.f32 %v17365_v28, %v12548_v29  ;;  %v17367_v41 = vld [vmem:[#allocation198_spill] sm:$0xff] }
 0x584   : > { %17359 = vst [vmem:[#allocation177_spill] sm:$0xff] %v13691_v24  ;;  %17360 = vst [vmem:[#allocation178_spill] sm:$0xff] %v13693_v6  ;;  %v17366_v24 = vld [vmem:[#allocation197_spill] sm:$0xff]  ;;  %v2857_v11 = vadd.f32 %v17367_v41, %v12556_v45 }
 0x585   : > { %17362 = vst [vmem:[#allocation436_spill] sm:$0xff] %v13699_v12  ;;  %17363 = vst [vmem:[#allocation179_spill] sm:$0xff] %v13701_v3  ;;  %v4562_v16 = vpop.f32.mrb[124].mxu1  ;;  %v5011_v54 = vpop.f32.mrb[156].mxu0  ;;  %v2408_v6 = vadd.f32 %v17366_v24, %v12550_v19  ;;  %v17370_v3 = vld [vmem:[#allocation461_spill] sm:$0xff]  ;;  %v17373_v24 = vld [vmem:[#allocation199_spill] sm:$0xff] }
 0x586   : > { %v13713_v59 = vmul.f32 %v4562_v16, %v2406_v15  ;;  %v13715_v25 = vmul.f32 %v5011_v54, %v2855_v62  ;;  %v4564_v40 = vpop.f32.mrb[125].mxu1  ;;  %v5013_v12 = vpop.f32.mrb[157].mxu0  ;;  %8472 = vmatmul.mubr.msk.f32.gmra.mrb[230].mxu1 %vm3979_vm9, %v17370_v3  ;;  %8538 = vmatmul.mubr.msk.f32.gmra.mrb[6].mxu0 %vm3979_vm9, %v17370_v3  ;;  %v2412_v15 = vadd.f32 %v17373_v24, %v12546_v30  ;;  %v17374_v62 = vld [vmem:[#allocation200_spill] sm:$0xff] }
 0x587   : > { %v13721_v57 = vmul.f32 %v4564_v40, %v2408_v6  ;;  %v13723_v28 = vmul.f32 %v5013_v12, %v2857_v11  ;;  %5398 = vmatprep.mubr.f32.mxu1 %v16425_v13  ;;  %5847 = vmatprep.mubr.f32.mxu0 %v16425_v13  ;;  %v2861_v16 = vadd.f32 %v17374_v62, %v12548_v29  ;;  %v17376_v6 = vld [vmem:[#allocation202_spill] sm:$0xff] }
 0x588   : > { %17368 = vst [vmem:[#allocation180_spill] sm:$0xff] %v13713_v59  ;;  %17369 = vst [vmem:[#allocation181_spill] sm:$0xff] %v13715_v25  ;;  %v17375_v59 = vld [vmem:[#allocation201_spill] sm:$0xff]  ;;  %v2863_v3 = vadd.f32 %v17376_v6, %v12556_v45 }
 0x589   : > { %17371 = vst [vmem:[#allocation182_spill] sm:$0xff] %v13721_v57  ;;  %17372 = vst [vmem:[#allocation441_spill] sm:$0xff] %v13723_v28  ;;  %v4568_v54 = vpop.f32.mrb[126].mxu1  ;;  %v5017_v41 = vpop.f32.mrb[158].mxu0  ;;  %v2414_v25 = vadd.f32 %v17375_v59, %v12550_v19  ;;  %v17379_v28 = vld [vmem:[#allocation466_spill] sm:$0xff]  ;;  %v17382_v59 = vld [vmem:[#allocation203_spill] sm:$0xff] }
 0x58a   : > { %v13735_v12 = vmul.f32 %v4568_v54, %v2412_v15  ;;  %v13737_v11 = vmul.f32 %v5017_v41, %v2861_v16  ;;  %v4570_v40 = vpop.f32.mrb[127].mxu1  ;;  %v5019_v57 = vpop.f32.mrb[159].mxu0  ;;  %8473 = vmatmul.mubr.msk.f32.gmra.mrb[232].mxu1 %vm3979_vm9, %v17379_v28  ;;  %8539 = vmatmul.mubr.msk.f32.gmra.mrb[8].mxu0 %vm3979_vm9, %v17379_v28  ;;  %v2418_v15 = vadd.f32 %v17382_v59, %v12546_v30  ;;  %v17383_v16 = vld [vmem:[#allocation204_spill] sm:$0xff] }
 0x58b   : > { %v13743_v24 = vmul.f32 %v4570_v40, %v2414_v25  ;;  %v13745_v62 = vmul.f32 %v5019_v57, %v2863_v3  ;;  %5404 = vmatprep.mubr.f32.mxu1 %v16425_v13  ;;  %5853 = vmatprep.mubr.f32.mxu0 %v16425_v13  ;;  %v2867_v54 = vadd.f32 %v17383_v16, %v12548_v29  ;;  %v17385_v25 = vld [vmem:[#allocation206_spill] sm:$0xff] }
 0x58c   : > { %17377 = vst [vmem:[#allocation183_spill] sm:$0xff] %v13735_v12  ;;  %17378 = vst [vmem:[#allocation184_spill] sm:$0xff] %v13737_v11  ;;  %v17384_v12 = vld [vmem:[#allocation205_spill] sm:$0xff]  ;;  %v2869_v28 = vadd.f32 %v17385_v25, %v12556_v45 }
 0x58d   : > { %17380 = vst [vmem:[#allocation185_spill] sm:$0xff] %v13743_v24  ;;  %17381 = vst [vmem:[#allocation186_spill] sm:$0xff] %v13745_v62  ;;  %v4574_v41 = vpop.f32.mrb[128].mxu1  ;;  %v5023_v6 = vpop.f32.mrb[160].mxu0  ;;  %v2420_v11 = vadd.f32 %v17384_v12, %v12550_v19  ;;  %v17388_v62 = vld [vmem:[#allocation471_spill] sm:$0xff] }
 0x58e   : > { %v13757_v57 = vmul.f32 %v4574_v41, %v2418_v15  ;;  %v13759_v3 = vmul.f32 %v5023_v6, %v2867_v54  ;;  %v4576_v40 = vpop.f32.mrb[129].mxu1  ;;  %v5025_v24 = vpop.f32.mrb[161].mxu0  ;;  %8474 = vmatmul.mubr.msk.f32.gmra.mrb[234].mxu1 %vm3979_vm9, %v17388_v62  ;;  %8540 = vmatmul.mubr.msk.f32.gmra.mrb[10].mxu0 %vm3979_vm9, %v17388_v62  ;;  %v17391_v12 = vld [vmem:[#allocation207_spill] sm:$0xff]  ;;  %v17392_v54 = vld [vmem:[#allocation208_spill] sm:$0xff] }
 0x58f   : > { %v13765_v59 = vmul.f32 %v4576_v40, %v2420_v11  ;;  %v13767_v16 = vmul.f32 %v5025_v24, %v2869_v28  ;;  %5410 = vmatprep.mubr.f32.mxu1 %v16425_v13  ;;  %5859 = vmatprep.mubr.f32.mxu0 %v16425_v13  ;;  %v2424_v15 = vadd.f32 %v17391_v12, %v12546_v30  ;;  %v17394_v11 = vld [vmem:[#allocation210_spill] sm:$0xff] }
 0x590   : > { %17386 = vst [vmem:[#allocation446_spill] sm:$0xff] %v13757_v57  ;;  %17387 = vst [vmem:[#allocation187_spill] sm:$0xff] %v13759_v3  ;;  %v2873_v41 = vadd.f32 %v17392_v54, %v12548_v29  ;;  %v17393_v57 = vld [vmem:[#allocation209_spill] sm:$0xff]  ;;  %v2875_v62 = vadd.f32 %v17394_v11, %v12556_v45 }
 0x591   : > { %17389 = vst [vmem:[#allocation188_spill] sm:$0xff] %v13765_v59  ;;  %17390 = vst [vmem:[#allocation189_spill] sm:$0xff] %v13767_v16  ;;  %v4580_v6 = vpop.f32.mrb[130].mxu1  ;;  %v5029_v25 = vpop.f32.mrb[162].mxu0  ;;  %v2426_v3 = vadd.f32 %v17393_v57, %v12550_v19  ;;  %v17397_v16 = vld [vmem:[#allocation476_spill] sm:$0xff]  ;;  %v17400_v57 = vld [vmem:[#allocation211_spill] sm:$0xff] }
 0x592   : > { %v13779_v24 = vmul.f32 %v4580_v6, %v2424_v15  ;;  %v13781_v28 = vmul.f32 %v5029_v25, %v2873_v41  ;;  %v4582_v40 = vpop.f32.mrb[131].mxu1  ;;  %v5031_v59 = vpop.f32.mrb[163].mxu0  ;;  %8475 = vmatmul.mubr.msk.f32.gmra.mrb[236].mxu1 %vm3979_vm9, %v17397_v16  ;;  %8541 = vmatmul.mubr.msk.f32.gmra.mrb[12].mxu0 %vm3979_vm9, %v17397_v16  ;;  %v2430_v15 = vadd.f32 %v17400_v57, %v12546_v30  ;;  %v17401_v41 = vld [vmem:[#allocation212_spill] sm:$0xff] }
 0x593   : > { %v13787_v12 = vmul.f32 %v4582_v40, %v2426_v3  ;;  %v13789_v54 = vmul.f32 %v5031_v59, %v2875_v62  ;;  %5416 = vmatprep.mubr.f32.mxu1 %v16425_v13  ;;  %5865 = vmatprep.mubr.f32.mxu0 %v16425_v13  ;;  %v2879_v6 = vadd.f32 %v17401_v41, %v12548_v29  ;;  %v17403_v3 = vld [vmem:[#allocation214_spill] sm:$0xff] }
 0x594   : > { %17395 = vst [vmem:[#allocation190_spill] sm:$0xff] %v13779_v24  ;;  %17396 = vst [vmem:[#allocation451_spill] sm:$0xff] %v13781_v28  ;;  %v17402_v24 = vld [vmem:[#allocation213_spill] sm:$0xff]  ;;  %v2881_v16 = vadd.f32 %v17403_v3, %v12556_v45 }
 0x595   : > { %17398 = vst [vmem:[#allocation191_spill] sm:$0xff] %v13787_v12  ;;  %17399 = vst [vmem:[#allocation192_spill] sm:$0xff] %v13789_v54  ;;  %v4586_v25 = vpop.f32.mrb[132].mxu1  ;;  %v5035_v11 = vpop.f32.mrb[164].mxu0  ;;  %v2432_v28 = vadd.f32 %v17402_v24, %v12550_v19  ;;  %v17406_v54 = vld [vmem:[#allocation481_spill] sm:$0xff]  ;;  %v17409_v24 = vld [vmem:[#allocation215_spill] sm:$0xff] }
 0x596   : > { %v13801_v59 = vmul.f32 %v4586_v25, %v2430_v15  ;;  %v13803_v62 = vmul.f32 %v5035_v11, %v2879_v6  ;;  %v4588_v40 = vpop.f32.mrb[133].mxu1  ;;  %v5037_v12 = vpop.f32.mrb[165].mxu0  ;;  %8476 = vmatmul.mubr.msk.f32.gmra.mrb[238].mxu1 %vm3979_vm9, %v17406_v54  ;;  %8542 = vmatmul.mubr.msk.f32.gmra.mrb[14].mxu0 %vm3979_vm9, %v17406_v54  ;;  %v2436_v15 = vadd.f32 %v17409_v24, %v12546_v30  ;;  %v17410_v6 = vld [vmem:[#allocation216_spill] sm:$0xff] }
 0x597   : > { %v13809_v57 = vmul.f32 %v4588_v40, %v2432_v28  ;;  %v13811_v41 = vmul.f32 %v5037_v12, %v2881_v16  ;;  %5422 = vmatprep.mubr.f32.mxu1 %v16425_v13  ;;  %5871 = vmatprep.mubr.f32.mxu0 %v16425_v13  ;;  %v2885_v25 = vadd.f32 %v17410_v6, %v12548_v29  ;;  %v17412_v28 = vld [vmem:[#allocation218_spill] sm:$0xff] }
 0x598   : > { %17404 = vst [vmem:[#allocation193_spill] sm:$0xff] %v13801_v59  ;;  %17405 = vst [vmem:[#allocation194_spill] sm:$0xff] %v13803_v62  ;;  %v17411_v59 = vld [vmem:[#allocation217_spill] sm:$0xff]  ;;  %v2887_v54 = vadd.f32 %v17412_v28, %v12556_v45 }
 0x599   : > { %17407 = vst [vmem:[#allocation456_spill] sm:$0xff] %v13809_v57  ;;  %17408 = vst [vmem:[#allocation195_spill] sm:$0xff] %v13811_v41  ;;  %v4592_v11 = vpop.f32.mrb[134].mxu1  ;;  %v5041_v3 = vpop.f32.mrb[166].mxu0  ;;  %v2438_v62 = vadd.f32 %v17411_v59, %v12550_v19  ;;  %v17415_v41 = vld [vmem:[#allocation486_spill] sm:$0xff]  ;;  %v17418_v59 = vld [vmem:[#allocation219_spill] sm:$0xff] }
 0x59a   : > { %v13823_v12 = vmul.f32 %v4592_v11, %v2436_v15  ;;  %v13825_v16 = vmul.f32 %v5041_v3, %v2885_v25  ;;  %v4594_v40 = vpop.f32.mrb[135].mxu1  ;;  %v5043_v57 = vpop.f32.mrb[167].mxu0  ;;  %8477 = vmatmul.mubr.msk.f32.gmra.mrb[240].mxu1 %vm3979_vm9, %v17415_v41  ;;  %8543 = vmatmul.mubr.msk.f32.gmra.mrb[16].mxu0 %vm3979_vm9, %v17415_v41  ;;  %v2442_v15 = vadd.f32 %v17418_v59, %v12546_v30  ;;  %v17419_v25 = vld [vmem:[#allocation220_spill] sm:$0xff] }
 0x59b   : > { %v13831_v24 = vmul.f32 %v4594_v40, %v2438_v62  ;;  %v13833_v6 = vmul.f32 %v5043_v57, %v2887_v54  ;;  %5428 = vmatprep.mubr.f32.mxu1 %v16425_v13  ;;  %5877 = vmatprep.mubr.f32.mxu0 %v16425_v13  ;;  %v2891_v11 = vadd.f32 %v17419_v25, %v12548_v29  ;;  %v17421_v62 = vld [vmem:[#allocation222_spill] sm:$0xff] }
 0x59c   : > { %17413 = vst [vmem:[#allocation196_spill] sm:$0xff] %v13823_v12  ;;  %17414 = vst [vmem:[#allocation197_spill] sm:$0xff] %v13825_v16  ;;  %v17420_v12 = vld [vmem:[#allocation221_spill] sm:$0xff]  ;;  %v2893_v41 = vadd.f32 %v17421_v62, %v12556_v45 }
 0x59d   : > { %17416 = vst [vmem:[#allocation198_spill] sm:$0xff] %v13831_v24  ;;  %17417 = vst [vmem:[#allocation461_spill] sm:$0xff] %v13833_v6  ;;  %v4598_v3 = vpop.f32.mrb[136].mxu1  ;;  %v5047_v28 = vpop.f32.mrb[168].mxu0  ;;  %v2444_v16 = vadd.f32 %v17420_v12, %v12550_v19  ;;  %v17424_v6 = vld [vmem:[#allocation491_spill] sm:$0xff] }
 0x59e   : > { %v13845_v57 = vmul.f32 %v4598_v3, %v2442_v15  ;;  %v13847_v54 = vmul.f32 %v5047_v28, %v2891_v11  ;;  %v4600_v40 = vpop.f32.mrb[137].mxu1  ;;  %v5049_v24 = vpop.f32.mrb[169].mxu0  ;;  %8478 = vmatmul.mubr.msk.f32.gmra.mrb[242].mxu1 %vm3979_vm9, %v17424_v6  ;;  %8544 = vmatmul.mubr.msk.f32.gmra.mrb[18].mxu0 %vm3979_vm9, %v17424_v6  ;;  %v17427_v12 = vld [vmem:[#allocation223_spill] sm:$0xff]  ;;  %v17428_v11 = vld [vmem:[#allocation224_spill] sm:$0xff] }
 0x59f   : > { %v13853_v59 = vmul.f32 %v4600_v40, %v2444_v16  ;;  %v13855_v25 = vmul.f32 %v5049_v24, %v2893_v41  ;;  %5434 = vmatprep.mubr.f32.mxu1 %v16425_v13  ;;  %5883 = vmatprep.mubr.f32.mxu0 %v16425_v13  ;;  %v2448_v15 = vadd.f32 %v17427_v12, %v12546_v30  ;;  %v17430_v16 = vld [vmem:[#allocation226_spill] sm:$0xff] }
 0x5a0   : > { %17422 = vst [vmem:[#allocation199_spill] sm:$0xff] %v13845_v57  ;;  %17423 = vst [vmem:[#allocation200_spill] sm:$0xff] %v13847_v54  ;;  %v2897_v3 = vadd.f32 %v17428_v11, %v12548_v29  ;;  %v17429_v57 = vld [vmem:[#allocation225_spill] sm:$0xff]  ;;  %v2899_v6 = vadd.f32 %v17430_v16, %v12556_v45 }
 0x5a1   : > { %17425 = vst [vmem:[#allocation201_spill] sm:$0xff] %v13853_v59  ;;  %17426 = vst [vmem:[#allocation202_spill] sm:$0xff] %v13855_v25  ;;  %v4604_v28 = vpop.f32.mrb[138].mxu1  ;;  %v5053_v62 = vpop.f32.mrb[170].mxu0  ;;  %v2450_v54 = vadd.f32 %v17429_v57, %v12550_v19  ;;  %v17433_v25 = vld [vmem:[#allocation496_spill] sm:$0xff]  ;;  %v17436_v57 = vld [vmem:[#allocation227_spill] sm:$0xff] }
 0x5a2   : > { %v13867_v24 = vmul.f32 %v4604_v28, %v2448_v15  ;;  %v13869_v41 = vmul.f32 %v5053_v62, %v2897_v3  ;;  %v4606_v40 = vpop.f32.mrb[139].mxu1  ;;  %v5055_v59 = vpop.f32.mrb[171].mxu0  ;;  %8479 = vmatmul.mubr.msk.f32.gmra.mrb[244].mxu1 %vm3979_vm9, %v17433_v25  ;;  %8545 = vmatmul.mubr.msk.f32.gmra.mrb[20].mxu0 %vm3979_vm9, %v17433_v25  ;;  %v2454_v15 = vadd.f32 %v17436_v57, %v12546_v30  ;;  %v17437_v3 = vld [vmem:[#allocation228_spill] sm:$0xff] }
 0x5a3   : > { %v13875_v12 = vmul.f32 %v4606_v40, %v2450_v54  ;;  %v13877_v11 = vmul.f32 %v5055_v59, %v2899_v6  ;;  %5440 = vmatprep.mubr.f32.mxu1 %v16425_v13  ;;  %5889 = vmatprep.mubr.f32.mxu0 %v16425_v13  ;;  %v2903_v28 = vadd.f32 %v17437_v3, %v12548_v29  ;;  %v17439_v54 = vld [vmem:[#allocation230_spill] sm:$0xff] }
 0x5a4   : > { %17431 = vst [vmem:[#allocation466_spill] sm:$0xff] %v13867_v24  ;;  %17432 = vst [vmem:[#allocation203_spill] sm:$0xff] %v13869_v41  ;;  %v17438_v24 = vld [vmem:[#allocation229_spill] sm:$0xff]  ;;  %v2905_v25 = vadd.f32 %v17439_v54, %v12556_v45 }
 0x5a5   : > { %17434 = vst [vmem:[#allocation204_spill] sm:$0xff] %v13875_v12  ;;  %17435 = vst [vmem:[#allocation205_spill] sm:$0xff] %v13877_v11  ;;  %v4610_v62 = vpop.f32.mrb[140].mxu1  ;;  %v5059_v16 = vpop.f32.mrb[172].mxu0  ;;  %v2456_v41 = vadd.f32 %v17438_v24, %v12550_v19  ;;  %v17442_v11 = vld [vmem:[#allocation501_spill] sm:$0xff]  ;;  %v17445_v24 = vld [vmem:[#allocation231_spill] sm:$0xff] }
 0x5a6   : > { %v13889_v59 = vmul.f32 %v4610_v62, %v2454_v15  ;;  %v13891_v6 = vmul.f32 %v5059_v16, %v2903_v28  ;;  %v4612_v40 = vpop.f32.mrb[141].mxu1  ;;  %v5061_v12 = vpop.f32.mrb[173].mxu0  ;;  %8480 = vmatmul.mubr.msk.f32.gmra.mrb[246].mxu1 %vm3979_vm9, %v17442_v11  ;;  %8546 = vmatmul.mubr.msk.f32.gmra.mrb[22].mxu0 %vm3979_vm9, %v17442_v11  ;;  %v2460_v15 = vadd.f32 %v17445_v24, %v12546_v30  ;;  %v17446_v28 = vld [vmem:[#allocation232_spill] sm:$0xff] }
 0x5a7   : > { %v13897_v57 = vmul.f32 %v4612_v40, %v2456_v41  ;;  %v13899_v3 = vmul.f32 %v5061_v12, %v2905_v25  ;;  %5446 = vmatprep.mubr.f32.mxu1 %v16425_v13  ;;  %5895 = vmatprep.mubr.f32.mxu0 %v16425_v13  ;;  %v2909_v62 = vadd.f32 %v17446_v28, %v12548_v29  ;;  %v17448_v41 = vld [vmem:[#allocation234_spill] sm:$0xff] }
 0x5a8   : > { %17440 = vst [vmem:[#allocation206_spill] sm:$0xff] %v13889_v59  ;;  %17441 = vst [vmem:[#allocation471_spill] sm:$0xff] %v13891_v6  ;;  %v17447_v59 = vld [vmem:[#allocation233_spill] sm:$0xff]  ;;  %v2911_v11 = vadd.f32 %v17448_v41, %v12556_v45 }
 0x5a9   : > { %17443 = vst [vmem:[#allocation207_spill] sm:$0xff] %v13897_v57  ;;  %17444 = vst [vmem:[#allocation208_spill] sm:$0xff] %v13899_v3  ;;  %v4616_v16 = vpop.f32.mrb[142].mxu1  ;;  %v5065_v54 = vpop.f32.mrb[174].mxu0  ;;  %v2462_v6 = vadd.f32 %v17447_v59, %v12550_v19  ;;  %v17451_v3 = vld [vmem:[#allocation506_spill] sm:$0xff]  ;;  %v17454_v59 = vld [vmem:[#allocation235_spill] sm:$0xff] }
 0x5aa   : > { %v13911_v12 = vmul.f32 %v4616_v16, %v2460_v15  ;;  %v13913_v25 = vmul.f32 %v5065_v54, %v2909_v62  ;;  %v4618_v40 = vpop.f32.mrb[143].mxu1  ;;  %v5067_v57 = vpop.f32.mrb[175].mxu0  ;;  %8481 = vmatmul.mubr.msk.f32.gmra.mrb[248].mxu1 %vm3979_vm9, %v17451_v3  ;;  %8547 = vmatmul.mubr.msk.f32.gmra.mrb[24].mxu0 %vm3979_vm9, %v17451_v3  ;;  %v2466_v15 = vadd.f32 %v17454_v59, %v12546_v30  ;;  %v17455_v62 = vld [vmem:[#allocation236_spill] sm:$0xff] }
 0x5ab   : > { %v13919_v24 = vmul.f32 %v4618_v40, %v2462_v6  ;;  %v13921_v28 = vmul.f32 %v5067_v57, %v2911_v11  ;;  %5452 = vmatprep.mubr.f32.mxu1 %v16425_v13  ;;  %5901 = vmatprep.mubr.f32.mxu0 %v16425_v13  ;;  %v2915_v16 = vadd.f32 %v17455_v62, %v12548_v29  ;;  %v17457_v6 = vld [vmem:[#allocation238_spill] sm:$0xff] }
 0x5ac   : > { %17449 = vst [vmem:[#allocation209_spill] sm:$0xff] %v13911_v12  ;;  %17450 = vst [vmem:[#allocation210_spill] sm:$0xff] %v13913_v25  ;;  %v17456_v12 = vld [vmem:[#allocation237_spill] sm:$0xff]  ;;  %v2917_v3 = vadd.f32 %v17457_v6, %v12556_v45 }
 0x5ad   : > { %17452 = vst [vmem:[#allocation476_spill] sm:$0xff] %v13919_v24  ;;  %17453 = vst [vmem:[#allocation211_spill] sm:$0xff] %v13921_v28  ;;  %v4622_v54 = vpop.f32.mrb[144].mxu1  ;;  %v5071_v41 = vpop.f32.mrb[176].mxu0  ;;  %v2468_v25 = vadd.f32 %v17456_v12, %v12550_v19  ;;  %v17460_v28 = vld [vmem:[#allocation511_spill] sm:$0xff]  ;;  %v17463_v12 = vld [vmem:[#allocation517_spill] sm:$0xff] }
 0x5ae   : > { %v13933_v57 = vmul.f32 %v4622_v54, %v2466_v15  ;;  %v13935_v11 = vmul.f32 %v5071_v41, %v2915_v16  ;;  %v4624_v40 = vpop.f32.mrb[145].mxu1  ;;  %v5073_v24 = vpop.f32.mrb[177].mxu0  ;;  %8482 = vmatmul.mubr.msk.f32.gmra.mrb[250].mxu1 %vm3979_vm9, %v17460_v28  ;;  %8548 = vmatmul.mubr.msk.f32.gmra.mrb[26].mxu0 %vm3979_vm9, %v17460_v28  ;;  %v1824_v15 = vsub.s32 4, %v17463_v12  ;;  %v17464_v16 = vld [vmem:[#allocation239_spill] sm:$0xff]  ;;  %v17465_v41 = vld [vmem:[#allocation240_spill] sm:$0xff]  ;;  %v1828_v28 = vsub.s32 5, %v17463_v12 }
 0x5af   : > { %v13941_v59 = vmul.f32 %v4624_v40, %v2468_v25  ;;  %v13943_v62 = vmul.f32 %v5073_v24, %v2917_v3  ;;  %5458 = vmatprep.mubr.f32.mxu1 %v16425_v13  ;;  %5907 = vmatprep.mubr.f32.mxu0 %v16425_v13  ;;  %v2472_v54 = vadd.f32 %v17464_v16, %v12546_v30  ;;  %v17466_v24 = vld [vmem:[#allocation241_spill] sm:$0xff] }
 0x5b0   : > { %17458 = vst [vmem:[#allocation212_spill] sm:$0xff] %v13933_v57  ;;  %17459 = vst [vmem:[#allocation213_spill] sm:$0xff] %v13935_v11  ;;  %v2921_v6 = vadd.f32 %v17465_v41, %v12548_v29  ;;  %v1832_v57 = vsub.s32 6, %v17463_v12  ;;  %v2474_v3 = vadd.f32 %v17466_v24, %v12550_v19  ;;  %v1836_v11 = vsub.s32 7, %v17463_v12 }
 0x5b1   : > { %17461 = vst [vmem:[#allocation214_spill] sm:$0xff] %v13941_v59  ;;  %17462 = vst [vmem:[#allocation481_spill] sm:$0xff] %v13943_v62  ;;  %v4628_v25 = vpop.f32.mrb[146].mxu1  ;;  %v5077_v40 = vpop.f32.mrb[178].mxu0  ;;  %v17467_v59 = vld [vmem:[#allocation242_spill] sm:$0xff] }
 0x5b2   : > { %v2923_v62 = vadd.f32 %v17467_v59, %v12556_v45  ;;  %v13959_v14 = vmul.f32 %v4628_v25, %v2472_v54  ;;  %v13961_v16 = vmul.f32 %v5077_v40, %v2921_v6  ;;  %v4630_v43 = vpop.f32.mrb[147].mxu1  ;;  %v5079_v41 = vpop.f32.mrb[179].mxu0  ;;  %8483 = vmatmul.mubr.msk.f32.gmra.mrb[252].mxu1 %vm3979_vm9, %v17470_v20  ;;  %8549 = vmatmul.mubr.msk.f32.gmra.mrb[28].mxu0 %vm3979_vm9, %v17470_v20  ;;  %v9248_v59 = vld [vmem:[%s16228_s9] sm:$0xff]  ;;  %v17473_v54 = vld [vmem:[#allocation18_spill] sm:$0xff] }
 0x5b3   : > { %v13967_v31 = vmul.f32 %v4630_v43, %v2474_v3  ;;  %5464 = vmatprep.mubr.f32.mxu1 %v16425_v13  ;;  %5913 = vmatprep.mubr.f32.mxu0 %v16425_v13  ;;  %v13976_v12 = vrot.slane %v9248_v59, %v1824_v15  ;;  %v2478_v6 = vadd.f32 %v17473_v54, %v12546_v30  ;;  %v17474_v25 = vld [vmem:[#allocation243_spill] sm:$0xff] }
 0x5b4   : > { %17468 = vst [vmem:[#allocation215_spill] sm:$0xff] %v13959_v14  ;;  %17469 = vst [vmem:[#allocation216_spill] sm:$0xff] %v13961_v16  ;;  %v13969_v24 = vmul.f32 %v5079_v41, %v2923_v62  ;;  %v2927_v20 = vadd.f32 %v17474_v25, %v12548_v29  ;;  %v13982_v43 = vrot.slane %v9248_v59, %v1832_v57  ;;  %v17475_v41 = vld [vmem:[#allocation244_spill] sm:$0xff]  ;;  %v17477_v15 = vld [vmem:[#allocation19_spill] sm:$0xff] }
 0x5b5   : > { %17471 = vst [vmem:[#allocation217_spill] sm:$0xff] %v13967_v31  ;;  %v13984_v62 = vrot.slane %v9248_v59, %v1828_v28  ;;  %v4634_v40 = vpop.f32.mrb[148].mxu1  ;;  %v5083_v3 = vpop.f32.mrb[180].mxu0  ;;  %v2480_v31 = vadd.f32 %v17475_v41, %v12550_v19  ;;  %v2484_v14 = vadd.f32 %v17477_v15, %v12546_v30  ;;  %v13992_v39 = vrot.slane %v9248_v59, %v1836_v11  ;;  %v17481_v41 = vld [vmem:[#allocation246_spill] sm:$0xff]  ;;  %v17484_v11 = vld [vmem:[#allocation247_spill] sm:$0xff] }
 0x5b6   : > { %17472 = vst [vmem:[#allocation218_spill] sm:$0xff] %v13969_v24  ;;  %v17476_v24 = vld [vmem:[#allocation245_spill] sm:$0xff]  ;;  %v13994_v54 = vmul.f32 %v4634_v40, %v2478_v6  ;;  %v13996_v25 = vmul.f32 %v5083_v3, %v2927_v20  ;;  %v4636_v57 = vpop.f32.mrb[149].mxu1  ;;  %v5085_v28 = vpop.f32.mrb[181].mxu0  ;;  %8484 = vmatmul.mubr.msk.f32.gmra.mrb[254].mxu1 %vm3979_vm9, %v17480_v18  ;;  %8550 = vmatmul.mubr.msk.f32.gmra.mrb[30].mxu0 %vm3979_vm9, %v17480_v18  ;;  %v17485_v6 = vld [vmem:[#allocation248_spill] sm:$0xff]  ;;  %v17487_v3 = vld [vmem:[#allocation250_spill] sm:$0xff] }
 0x5b7   : > { %v2929_v16 = vadd.f32 %v17476_v24, %v12556_v45  ;;  %v2933_v24 = vadd.f32 %v17481_v41, %v12548_v29  ;;  %v14004_v10 = vmul.f32 %v4636_v57, %v2480_v31  ;;  %5470 = vmatprep.mubr.f32.mxu1 %v16425_v13  ;;  %5919 = vmatprep.mubr.f32.mxu0 %v16425_v13  ;;  %v17486_v40 = vld [vmem:[#allocation249_spill] sm:$0xff]  ;;  %v17488_v31 = vld [vmem:[#allocation251_spill] sm:$0xff] }
 0x5b8   : > { %17478 = vst [vmem:[#allocation486_spill] sm:$0xff] %v13994_v54  ;;  %17479 = vst [vmem:[#allocation219_spill] sm:$0xff] %v13996_v25  ;;  %v2486_v59 = vadd.f32 %v17484_v11, %v12550_v19  ;;  %v2935_v20 = vadd.f32 %v17485_v6, %v12556_v45  ;;  %v3004_v18 = vadd.f32 %v17486_v40, %v13976_v12  ;;  %v17491_v11 = vld [vmem:[#allocation254_spill] sm:$0xff]  ;;  %v17492_v6 = vld [vmem:[#allocation255_spill] sm:$0xff] }
 0x5b9   : > { %17482 = vst [vmem:[#allocation220_spill] sm:$0xff] %v14004_v10  ;;  %v14006_v30 = vmul.f32 %v5085_v28, %v2929_v16  ;;  %v3453_v29 = vadd.f32 %v17487_v3, %v13982_v43  ;;  %v3006_v16 = vadd.f32 %v17488_v31, %v13984_v62  ;;  %v4640_v15 = vpop.f32.mrb[150].mxu1  ;;  %v5089_v57 = vpop.f32.mrb[182].mxu0  ;;  %v17489_v28 = vld [vmem:[#allocation252_spill] sm:$0xff]  ;;  %v17490_v10 = vld [vmem:[#allocation253_spill] sm:$0xff]  ;;  %v3459_v45 = vadd.f32 %v17491_v11, %v13982_v43  ;;  %v17495_v25 = vld [vmem:[#allocation527_spill] sm:$0xff] }
 0x5ba   : > { %v3455_v41 = vadd.f32 %v17489_v28, %v13992_v39  ;;  %v3010_v19 = vadd.f32 %v17490_v10, %v13976_v12  ;;  %v3012_v40 = vadd.f32 %v17492_v6, %v13984_v62  ;;  %v14030_v3 = vmul.f32 %v5089_v57, %v2933_v24  ;;  %v4642_v54 = vpop.f32.mrb[151].mxu1  ;;  %v5091_v31 = vpop.f32.mrb[183].mxu0  ;;  %8485 = vmatmul.mubr.msk.f32.gmra.mrb[0].mxu1 %vm3979_vm9, %v17495_v25  ;;  %v17496_v10 = vld [vmem:[#allocation256_spill] sm:$0xff]  ;;  %v17501_v6 = vld [vmem:[#allocation259_spill] sm:$0xff] }
 0x5bb   : > { %17483 = vst [vmem:[#allocation221_spill] sm:$0xff] %v14006_v30  ;;  %v14028_v30 = vmul.f32 %v4640_v15, %v2484_v14  ;;  %8551 = vmatmul.mubr.msk.f32.gmra.mrb[32].mxu0 %vm3979_vm9, %v17495_v25  ;;  %v3461_v28 = vadd.f32 %v17496_v10, %v13992_v39  ;;  %v14038_v5 = vmul.f32 %v4642_v54, %v2486_v59  ;;  %v17499_v14 = vld [vmem:[#allocation257_spill] sm:$0xff]  ;;  %v17500_v15 = vld [vmem:[#allocation258_spill] sm:$0xff] }
 0x5bc   : > { %17494 = vst [vmem:[#allocation491_spill] sm:$0xff] %v14030_v3  ;;  %v14040_v11 = vmul.f32 %v5091_v31, %v2935_v20  ;;  %5476 = vmatprep.mubr.f32.mxu1 %v16425_v13  ;;  %5925 = vmatprep.mubr.f32.mxu0 %v16425_v13  ;;  %v3016_v24 = vadd.f32 %v17499_v14, %v13976_v12  ;;  %v17503_v54 = vld [vmem:[#allocation261_spill] sm:$0xff]  ;;  %v17505_v14 = vld [vmem:[#allocation263_spill] sm:$0xff] }
 0x5bd   : > { %17493 = vst [vmem:[#allocation222_spill] sm:$0xff] %v14028_v30  ;;  %17497 = vst [vmem:[#allocation223_spill] sm:$0xff] %v14038_v5  ;;  %v3465_v57 = vadd.f32 %v17500_v15, %v13982_v43  ;;  %v3018_v25 = vadd.f32 %v17501_v6, %v13984_v62  ;;  %v17502_v30 = vld [vmem:[#allocation260_spill] sm:$0xff]  ;;  %v14054_v59 = vadd.f32 %v17503_v54, %v13976_v12  ;;  %v5160_v20 = vpop.f32.mrb[152].mxu1  ;;  %v5609_v31 = vpop.f32.mrb[184].mxu0  ;;  %v17504_v5 = vld [vmem:[#allocation262_spill] sm:$0xff] }
 0x5be   : > { %17498 = vst [vmem:[#allocation224_spill] sm:$0xff] %v14040_v11  ;;  %v3467_v10 = vadd.f32 %v17502_v30, %v13992_v39  ;;  %v14058_v11 = vadd.f32 %v17504_v5, %v13982_v43  ;;  %v14062_v3 = vadd.f32 %v17505_v14, %v13984_v62  ;;  %v17506_v15 = vld [vmem:[#allocation264_spill] sm:$0xff]  ;;  %v17507_v30 = vld [vmem:[#allocation265_spill] sm:$0xff]  ;;  %v5996_v54 = vmul.f32 %v5160_v20, %v3004_v18  ;;  %v5162_v50 = vpop.f32.mrb[153].mxu1  ;;  %v5611_v5 = vpop.f32.mrb[185].mxu0  ;;  %v17509_v14 = vld [vmem:[#allocation266_spill] sm:$0xff] }
 0x5bf   : > { %v14066_v6 = vadd.f32 %v17506_v15, %v13992_v39  ;;  %v14070_v2 = vadd.f32 %v17507_v30, %v13976_v12  ;;  %v5998_v63 = vmul.f32 %v5609_v31, %v3453_v29  ;;  %8486 = vmatmul.mubr.msk.f32.gmra.mrb[2].mxu1 %vm3979_vm9, %v17508_v60  ;;  %8552 = vmatmul.mubr.msk.f32.gmra.mrb[34].mxu0 %vm3979_vm9, %v17508_v60  ;;  %v17510_v18 = vld [vmem:[#allocation267_spill] sm:$0xff]  ;;  %v17511_v20 = vld [vmem:[#allocation20_spill] sm:$0xff]  ;;  %v17512_v30 = vld [vmem:[#allocation21_spill] sm:$0xff] }
 0x5c0   : > { %v14078_v37 = vadd.f32 %v17509_v14, %v13982_v43  ;;  %v5997_v15 = vmul.f32 %v5162_v50, %v3006_v16  ;;  %v5999_v55 = vmul.f32 %v5611_v5, %v3455_v41  ;;  %5482 = vmatprep.mubr.f32.mxu1 %v16425_v13  ;;  %5931 = vmatprep.mubr.f32.mxu0 %v16425_v13  ;;  %v17513_v60 = vld [vmem:[#allocation36_spill] sm:$0xff]  ;;  %v17515_v16 = vld [vmem:[#allocation23_spill] sm:$0xff]  ;;  %v17516_v5 = vld [vmem:[#allocation533_spill] sm:$0xff] }
 0x5c1   : > { %v14084_v29 = vadd.f32 %v17510_v18, %v13984_v62  ;;  %v6504_v31 = vadd.f32 %v5996_v54, %v17511_v20  ;;  %v6506_v33 = vadd.f32 %v5998_v63, %v17512_v30  ;;  %v14090_v52 = vadd.f32 %v17513_v60, %v13992_v39  ;;  %v17514_v14 = vld [vmem:[#allocation268_spill] sm:$0xff]  ;;  %v5166_v47 = vpop.f32.mrb[154].mxu1  ;;  %v5615_v22 = vpop.f32.mrb[186].mxu0  ;;  %v17517_v18 = vld [vmem:[#allocation269_spill] sm:$0xff]  ;;  %v17518_v63 = vld [vmem:[#allocation270_spill] sm:$0xff] }
 0x5c2   : > { %v14094_v50 = vadd.f32 %v17514_v14, %v13976_v12  ;;  %v6505_v41 = vadd.f32 %v5997_v15, %v17515_v16  ;;  %v6507_v38 = vadd.f32 %v5999_v55, %v17516_v5  ;;  %v14100_v36 = vadd.f32 %v17517_v18, %v13982_v43  ;;  %v5168_v60 = vpop.f32.mrb[155].mxu1  ;;  %v5617_v14 = vpop.f32.mrb[187].mxu0  ;;  %v17520_v18 = vld [vmem:[#allocation24_spill] sm:$0xff] }
 0x5c3   : > { %v14104_v54 = vadd.f32 %v17518_v63, %v13984_v62  ;;  %v6004_v20 = vmul.f32 %v5166_v47, %v3010_v19  ;;  %v6006_v30 = vmul.f32 %v5615_v22, %v3459_v45  ;;  %8487 = vmatmul.mubr.msk.f32.gmra.mrb[4].mxu1 %vm3979_vm9, %v17519_v7  ;;  %8553 = vmatmul.mubr.msk.f32.gmra.mrb[36].mxu0 %vm3979_vm9, %v17519_v7  ;;  %v17521_v47 = vld [vmem:[#allocation25_spill] sm:$0xff]  ;;  %v17524_v7 = vld [vmem:[#allocation27_spill] sm:$0xff] }
 0x5c4   : > { %v6760_v55 = vadd.f32 %v6506_v33, %v6504_v31  ;;  %v6005_v15 = vmul.f32 %v5168_v60, %v3012_v40  ;;  %v6007_v16 = vmul.f32 %v5617_v14, %v3461_v28  ;;  %5488 = vmatprep.mubr.f32.mxu1 %v16425_v13  ;;  %5937 = vmatprep.mubr.f32.mxu0 %v16425_v13  ;;  %v17522_v19 = vld [vmem:[#allocation41_spill] sm:$0xff]  ;;  %v17525_v40 = vld [vmem:[#allocation534_spill] sm:$0xff] }
 0x5c5   : > { %v6761_v5 = vadd.f32 %v6507_v38, %v6505_v41  ;;  %v6508_v63 = vadd.f32 %v6004_v20, %v17520_v18  ;;  %v6510_v22 = vadd.f32 %v6006_v30, %v17521_v47  ;;  %v14116_v45 = vadd.f32 %v17522_v19, %v13992_v39  ;;  %v5172_v31 = vpop.f32.mrb[156].mxu1  ;;  %v5621_v60 = vpop.f32.mrb[188].mxu0  ;;  %v17526_v38 = vld [vmem:[#allocation272_spill] sm:$0xff]  ;;  %v17527_v19 = vld [vmem:[#allocation26_spill] sm:$0xff] }
 0x5c6   : > { %v14120_v48 = vadd.f32 %v17523_v53, %v13976_v12  ;;  %v6509_v33 = vadd.f32 %v6005_v15, %v17524_v7  ;;  %v6511_v28 = vadd.f32 %v6007_v16, %v17525_v40  ;;  %v14128_v41 = vadd.f32 %v17526_v38, %v13982_v43  ;;  %v5174_v47 = vpop.f32.mrb[157].mxu1  ;;  %v5623_v53 = vpop.f32.mrb[189].mxu0 }
 0x5c7   : > { %v14124_v14 = vadd.f32 %v6761_v5, %v6760_v55  ;;  %v6762_v20 = vadd.f32 %v6510_v22, %v6508_v63  ;;  %v6012_v30 = vmul.f32 %v5172_v31, %v3016_v24  ;;  %v6014_v18 = vmul.f32 %v5621_v60, %v3465_v57  ;;  %8488 = vmatmul.mubr.msk.f32.gmra.mrb[6].mxu1 %vm3979_vm9, %v17527_v19  ;;  %v17528_v55 = vld [vmem:[#allocation28_spill] sm:$0xff]  ;;  %v17529_v57 = vld [vmem:[#allocation29_spill] sm:$0xff] }
 0x5c8   : > { %8554 = vmatmul.mubr.msk.f32.gmra.mrb[38].mxu0 %vm3979_vm9, %v17527_v19  ;;  %v6763_v15 = vadd.f32 %v6511_v28, %v6509_v33  ;;  %v6013_v16 = vmul.f32 %v5174_v47, %v3018_v25  ;;  %v6015_v7 = vmul.f32 %v5623_v53, %v3467_v10  ;;  %5494 = vmatprep.mubr.f32.mxu1 %v16425_v13  ;;  %v17530_v63 = vld [vmem:[#allocation273_spill] sm:$0xff]  ;;  %v17531_v33 = vld [vmem:[#allocation46_spill] sm:$0xff]  ;;  %v17532_v10 = vld [vmem:[#allocation31_spill] sm:$0xff] }
 0x5c9   : > { %6952 = vrot.lane.b32.xlu1 %v14124_v14, %s9305_s20  ;;  %v6512_v24 = vadd.f32 %v6012_v30, %v17528_v55  ;;  %v6514_v5 = vadd.f32 %v6014_v18, %v17529_v57  ;;  %5943 = vmatprep.mubr.f32.mxu0 %v16425_v13  ;;  %v14142_v22 = vadd.f32 %v17530_v63, %v13984_v62  ;;  %v17533_v28 = vld [vmem:[#allocation535_spill] sm:$0xff]  ;;  %v5178_v60 = vpop.f32.mrb[158].mxu1  ;;  %v5627_v38 = vpop.f32.mrb[190].mxu0  ;;  %v17534_v30 = vld [vmem:[#allocation274_spill] sm:$0xff] }
 0x5ca   : > { %v14146_v25 = vadd.f32 %v17531_v33, %v13992_v39  ;;  %v6513_v40 = vadd.f32 %v6013_v16, %v17532_v10  ;;  %v6515_v31 = vadd.f32 %v6015_v7, %v17533_v28  ;;  %v14150_v47 = vadd.f32 %v6763_v15, %v6762_v20  ;;  %v5180_v55 = vpop.f32.mrb[159].mxu1  ;;  %v17535_v57 = vld [vmem:[#allocation30_spill] sm:$0xff]  ;;  %v5629_v63 = vpop.f32.mrb[191].mxu0  ;;  %v17537_v33 = vld [vmem:[#allocation33_spill] sm:$0xff]  ;;  %v17538_v28 = vld [vmem:[#allocation275_spill] sm:$0xff] }
 0x5cb   : > { %v14154_v18 = vadd.f32 %v17534_v30, %v13976_v12  ;;  %v6020_v19 = vmul.f32 %v5178_v60, %v14054_v59  ;;  %v6022_v53 = vmul.f32 %v5627_v38, %v14058_v11  ;;  %8489 = vmatmul.mubr.msk.f32.gmra.mrb[8].mxu1 %vm3979_vm9, %v17535_v57  ;;  %v6764_v16 = vadd.f32 %v6514_v5, %v6512_v24  ;;  %v17536_v11 = vld [vmem:[#allocation32_spill] sm:$0xff] }
 0x5cc   : > { %8555 = vmatmul.mubr.msk.f32.gmra.mrb[40].mxu0 %vm3979_vm9, %v17535_v57  ;;  %v6021_v20 = vmul.f32 %v5180_v55, %v14062_v3  ;;  %v6023_v15 = vmul.f32 %v5629_v63, %v14066_v6  ;;  %5500 = vmatprep.mubr.f32.mxu1 %v16425_v13  ;;  %v6765_v59 = vadd.f32 %v6515_v31, %v6513_v40  ;;  %v17539_v3 = vld [vmem:[#allocation276_spill] sm:$0xff]  ;;  %v17540_v6 = vld [vmem:[#allocation35_spill] sm:$0xff] }
 0x5cd   : > { %6954 = vrot.lane.b32.xlu1 %v14150_v47, %s9305_s20  ;;  %v6516_v7 = vadd.f32 %v6020_v19, %v17536_v11  ;;  %v6518_v10 = vadd.f32 %v6022_v53, %v17537_v33  ;;  %5949 = vmatprep.mubr.f32.mxu0 %v16425_v13  ;;  %v14172_v60 = vadd.f32 %v17538_v28, %v13982_v43  ;;  %v17541_v38 = vld [vmem:[#allocation536_spill] sm:$0xff]  ;;  %v5184_v55 = vpop.f32.mrb[160].mxu1  ;;  %v5633_v40 = vpop.f32.mrb[192].mxu0  ;;  %v17542_v19 = vld [vmem:[#allocation51_spill] sm:$0xff]  ;;  %v17543_v28 = vld [vmem:[#allocation34_spill] sm:$0xff] }
 0x5ce   : > { %v14176_v24 = vadd.f32 %v17539_v3, %v13984_v62  ;;  %v6517_v5 = vadd.f32 %v6021_v20, %v17540_v6  ;;  %v6519_v30 = vadd.f32 %v6023_v15, %v17541_v38  ;;  %v14180_v31 = vadd.f32 %v6765_v59, %v6764_v16  ;;  %v5186_v33 = vpop.f32.mrb[161].mxu1  ;;  %v5635_v20 = vpop.f32.mrb[193].mxu0  ;;  %v17546_v3 = vld [vmem:[#allocation277_spill] sm:$0xff] }
 0x5cf   : > { %v14184_v53 = vadd.f32 %v17542_v19, %v13992_v39  ;;  %v6766_v57 = vadd.f32 %v6518_v10, %v6516_v7  ;;  %v6028_v63 = vmul.f32 %v5184_v55, %v14070_v2  ;;  %v6030_v11 = vmul.f32 %v5633_v40, %v14078_v37  ;;  %8490 = vmatmul.mubr.msk.f32.gmra.mrb[10].mxu1 %vm3979_vm9, %v17543_v28  ;;  %v17544_v2 = vld [vmem:[#allocation37_spill] sm:$0xff]  ;;  %v17545_v7 = vld [vmem:[#allocation38_spill] sm:$0xff] }
 0x5d0   : > { %8556 = vmatmul.mubr.msk.f32.gmra.mrb[42].mxu0 %vm3979_vm9, %v17543_v28  ;;  %v6767_v15 = vadd.f32 %v6519_v30, %v6517_v5  ;;  %v6029_v16 = vmul.f32 %v5186_v33, %v14084_v29  ;;  %v6031_v59 = vmul.f32 %v5635_v20, %v14090_v52  ;;  %6956 = vrot.lane.b32.xlu0 %v14180_v31, %s9305_s20  ;;  %v17547_v5 = vld [vmem:[#allocation278_spill] sm:$0xff]  ;;  %v17548_v52 = vld [vmem:[#allocation40_spill] sm:$0xff]  ;;  %v17549_v30 = vld [vmem:[#allocation537_spill] sm:$0xff] }
 0x5d1   : > { %5506 = vmatprep.mubr.f32.mxu1 %v16425_v13  ;;  %v6520_v37 = vadd.f32 %v6028_v63, %v17544_v2  ;;  %v6522_v10 = vadd.f32 %v6030_v11, %v17545_v7  ;;  %5955 = vmatprep.mubr.f32.mxu0 %v16425_v13  ;;  %v14202_v6 = vadd.f32 %v17546_v3, %v13976_v12  ;;  %v5190_v40 = vpop.f32.mrb[162].mxu1  ;;  %v5639_v19 = vpop.f32.mrb[194].mxu0  ;;  %v17550_v63 = vld [vmem:[#allocation279_spill] sm:$0xff] }
 0x5d2   : > { %v14206_v29 = vadd.f32 %v17547_v5, %v13982_v43  ;;  %v6521_v38 = vadd.f32 %v6029_v16, %v17548_v52  ;;  %v6523_v55 = vadd.f32 %v6031_v59, %v17549_v30  ;;  %v14210_v33 = vadd.f32 %v6767_v15, %v6766_v57  ;;  %v5192_v7 = vpop.f32.mrb[163].mxu1  ;;  %v17551_v3 = vld [vmem:[#allocation39_spill] sm:$0xff]  ;;  %v5641_v16 = vpop.f32.mrb[195].mxu0  ;;  %v17554_v5 = vld [vmem:[#allocation56_spill] sm:$0xff] }
 0x5d3   : > { %v14214_v11 = vadd.f32 %v17550_v63, %v13984_v62  ;;  %v6768_v28 = vadd.f32 %v6522_v10, %v6520_v37  ;;  %v6036_v20 = vmul.f32 %v5190_v40, %v14094_v50  ;;  %v6038_v2 = vmul.f32 %v5639_v19, %v14100_v36  ;;  %8491 = vmatmul.mubr.msk.f32.gmra.mrb[12].mxu1 %vm3979_vm9, %v17551_v3  ;;  %v17552_v50 = vld [vmem:[#allocation42_spill] sm:$0xff]  ;;  %v17553_v37 = vld [vmem:[#allocation43_spill] sm:$0xff] }
 0x5d4   : > { %8557 = vmatmul.mubr.msk.f32.gmra.mrb[44].mxu0 %vm3979_vm9, %v17551_v3  ;;  %v6769_v59 = vadd.f32 %v6523_v55, %v6521_v38  ;;  %v6037_v57 = vmul.f32 %v5192_v7, %v14104_v54  ;;  %v6039_v15 = vmul.f32 %v5641_v16, %v14116_v45  ;;  %6958 = vrot.lane.b32.xlu1 %v14210_v33, %s9305_s20  ;;  %v17555_v38 = vld [vmem:[#allocation280_spill] sm:$0xff]  ;;  %v17556_v45 = vld [vmem:[#allocation45_spill] sm:$0xff]  ;;  %v17557_v55 = vld [vmem:[#allocation538_spill] sm:$0xff] }
 0x5d5   : > { %5512 = vmatprep.mubr.f32.mxu1 %v16425_v13  ;;  %v6524_v36 = vadd.f32 %v6036_v20, %v17552_v50  ;;  %v6526_v10 = vadd.f32 %v6038_v2, %v17553_v37  ;;  %5961 = vmatprep.mubr.f32.mxu0 %v16425_v13  ;;  %v14232_v52 = vadd.f32 %v17554_v5, %v13992_v39  ;;  %v5196_v19 = vpop.f32.mrb[164].mxu1  ;;  %v5645_v63 = vpop.f32.mrb[196].mxu0  ;;  %v17558_v20 = vld [vmem:[#allocation281_spill] sm:$0xff]  ;;  %v17559_v5 = vld [vmem:[#allocation44_spill] sm:$0xff] }
 0x5d6   : > { %v14236_v54 = vadd.f32 %v17555_v38, %v13976_v12  ;;  %v6525_v30 = vadd.f32 %v6037_v57, %v17556_v45  ;;  %v6527_v40 = vadd.f32 %v6039_v15, %v17557_v55  ;;  %v14240_v7 = vadd.f32 %v6769_v59, %v6768_v28  ;;  %v5198_v37 = vpop.f32.mrb[165].mxu1  ;;  %v5647_v57 = vpop.f32.mrb[197].mxu0  ;;  %v17562_v38 = vld [vmem:[#allocation282_spill] sm:$0xff] }
 0x5d7   : > { %v14244_v2 = vadd.f32 %v17558_v20, %v13982_v43  ;;  %v6770_v3 = vadd.f32 %v6526_v10, %v6524_v36  ;;  %v6044_v16 = vmul.f32 %v5196_v19, %v14120_v48  ;;  %v6046_v50 = vmul.f32 %v5645_v63, %v14128_v41  ;;  %8492 = vmatmul.mubr.msk.f32.gmra.mrb[14].mxu1 %vm3979_vm9, %v17559_v5  ;;  %v17560_v48 = vld [vmem:[#allocation47_spill] sm:$0xff]  ;;  %v17561_v36 = vld [vmem:[#allocation48_spill] sm:$0xff] }
 0x5d8   : > { %8558 = vmatmul.mubr.msk.f32.gmra.mrb[46].mxu0 %vm3979_vm9, %v17559_v5  ;;  %v6771_v15 = vadd.f32 %v6527_v40, %v6525_v30  ;;  %v6045_v28 = vmul.f32 %v5198_v37, %v14142_v22  ;;  %v6047_v59 = vmul.f32 %v5647_v57, %v14146_v25  ;;  %6960 = vrot.lane.b32.xlu0 %v14240_v7, %s9305_s20  ;;  %v17563_v30 = vld [vmem:[#allocation61_spill] sm:$0xff]  ;;  %v17564_v22 = vld [vmem:[#allocation50_spill] sm:$0xff]  ;;  %v17565_v25 = vld [vmem:[#allocation539_spill] sm:$0xff] }
 0x5d9   : > { %5518 = vmatprep.mubr.f32.mxu1 %v16425_v13  ;;  %v6528_v41 = vadd.f32 %v6044_v16, %v17560_v48  ;;  %v6530_v10 = vadd.f32 %v6046_v50, %v17561_v36  ;;  %5967 = vmatprep.mubr.f32.mxu0 %v16425_v13  ;;  %v3060_v45 = vadd.f32 %v17562_v38, %v13984_v62  ;;  %v5202_v63 = vpop.f32.mrb[166].mxu1  ;;  %v5651_v20 = vpop.f32.mrb[198].mxu0  ;;  %v17566_v16 = vld [vmem:[#allocation283_spill] sm:$0xff]  ;;  %v17567_v38 = vld [vmem:[#allocation49_spill] sm:$0xff] }
 0x5da   : > { %v3509_v55 = vadd.f32 %v17563_v30, %v13992_v39  ;;  %v6529_v40 = vadd.f32 %v6045_v28, %v17564_v22  ;;  %v6531_v19 = vadd.f32 %v6047_v59, %v17565_v25  ;;  %v14266_v37 = vadd.f32 %v6771_v15, %v6770_v3  ;;  %v5204_v36 = vpop.f32.mrb[167].mxu1  ;;  %v5653_v28 = vpop.f32.mrb[199].mxu0  ;;  %v17570_v30 = vld [vmem:[#allocation284_spill] sm:$0xff] }
 0x5db   : > { %v14270_v5 = vadd.f32 %v17566_v16, %v13976_v12  ;;  %v6772_v50 = vadd.f32 %v6530_v10, %v6528_v41  ;;  %v6052_v57 = vmul.f32 %v5202_v63, %v14154_v18  ;;  %v6054_v48 = vmul.f32 %v5651_v20, %v14172_v60  ;;  %8493 = vmatmul.mubr.msk.f32.gmra.mrb[16].mxu1 %vm3979_vm9, %v17567_v38  ;;  %v17568_v18 = vld [vmem:[#allocation52_spill] sm:$0xff]  ;;  %v17569_v41 = vld [vmem:[#allocation53_spill] sm:$0xff] }
 0x5dc   : > { %8559 = vmatmul.mubr.msk.f32.gmra.mrb[48].mxu0 %vm3979_vm9, %v17567_v38  ;;  %v6773_v59 = vadd.f32 %v6531_v19, %v6529_v40  ;;  %v6053_v3 = vmul.f32 %v5204_v36, %v14176_v24  ;;  %v6055_v15 = vmul.f32 %v5653_v28, %v14184_v53  ;;  %6962 = vrot.lane.b32.xlu1 %v14266_v37, %s9305_s20  ;;  %v17571_v40 = vld [vmem:[#allocation285_spill] sm:$0xff]  ;;  %v17572_v24 = vld [vmem:[#allocation55_spill] sm:$0xff]  ;;  %v17573_v53 = vld [vmem:[#allocation540_spill] sm:$0xff] }
 0x5dd   : > { %5524 = vmatprep.mubr.f32.mxu1 %v16425_v13  ;;  %v6532_v60 = vadd.f32 %v6052_v57, %v17568_v18  ;;  %v6534_v10 = vadd.f32 %v6054_v48, %v17569_v41  ;;  %5973 = vmatprep.mubr.f32.mxu0 %v16425_v13  ;;  %v3513_v22 = vadd.f32 %v17570_v30, %v13982_v43  ;;  %v5208_v20 = vpop.f32.mrb[168].mxu1  ;;  %v5657_v16 = vpop.f32.mrb[200].mxu0  ;;  %v17574_v57 = vld [vmem:[#allocation66_spill] sm:$0xff] }
 0x5de   : > { %v3066_v25 = vadd.f32 %v17571_v40, %v13984_v62  ;;  %v6533_v19 = vadd.f32 %v6053_v3, %v17572_v24  ;;  %v6535_v63 = vadd.f32 %v6055_v15, %v17573_v53  ;;  %v14292_v36 = vadd.f32 %v6773_v59, %v6772_v50  ;;  %v5210_v41 = vpop.f32.mrb[169].mxu1  ;;  %v17575_v30 = vld [vmem:[#allocation54_spill] sm:$0xff]  ;;  %v5659_v40 = vpop.f32.mrb[201].mxu0 }
 0x5df   : > { %v3515_v38 = vadd.f32 %v17574_v57, %v13992_v39  ;;  %v6774_v48 = vadd.f32 %v6534_v10, %v6532_v60  ;;  %v6060_v28 = vmul.f32 %v5208_v20, %v14202_v6  ;;  %v6062_v18 = vmul.f32 %v5657_v16, %v14206_v29  ;;  %8494 = vmatmul.mubr.msk.f32.gmra.mrb[18].mxu1 %vm3979_vm9, %v17575_v30  ;;  %v17576_v6 = vld [vmem:[#allocation57_spill] sm:$0xff]  ;;  %v17577_v15 = vld [vmem:[#allocation58_spill] sm:$0xff] }
 0x5e0   : > { %8560 = vmatmul.mubr.msk.f32.gmra.mrb[50].mxu0 %vm3979_vm9, %v17575_v30  ;;  %v6775_v3 = vadd.f32 %v6535_v63, %v6533_v19  ;;  %v6061_v50 = vmul.f32 %v5210_v41, %v14214_v11  ;;  %v6063_v59 = vmul.f32 %v5659_v40, %v14232_v52  ;;  %6964 = vrot.lane.b32.xlu0 %v14292_v36, %s9305_s20  ;;  %v17578_v10 = vld [vmem:[#allocation286_spill] sm:$0xff]  ;;  %v17579_v19 = vld [vmem:[#allocation287_spill] sm:$0xff]  ;;  %v17581_v52 = vld [vmem:[#allocation60_spill] sm:$0xff] }
 0x5e1   : > { %5530 = vmatprep.mubr.f32.mxu1 %v16425_v13  ;;  %v6536_v29 = vadd.f32 %v6060_v28, %v17576_v6  ;;  %v6538_v60 = vadd.f32 %v6062_v18, %v17577_v15  ;;  %5979 = vmatprep.mubr.f32.mxu0 %v16425_v13  ;;  %v3070_v24 = vadd.f32 %v17578_v10, %v13976_v12  ;;  %v17580_v11 = vld [vmem:[#allocation59_spill] sm:$0xff]  ;;  %v5214_v16 = vpop.f32.mrb[170].mxu1  ;;  %v5663_v57 = vpop.f32.mrb[202].mxu0  ;;  %v17582_v28 = vld [vmem:[#allocation288_spill] sm:$0xff] }
 0x5e2   : > { %v3519_v53 = vadd.f32 %v17579_v19, %v13982_v43  ;;  %v6537_v63 = vadd.f32 %v6061_v50, %v17580_v11  ;;  %v6539_v20 = vadd.f32 %v6063_v59, %v17581_v52  ;;  %v14316_v41 = vadd.f32 %v6775_v3, %v6774_v48  ;;  %v5216_v15 = vpop.f32.mrb[171].mxu1  ;;  %v5665_v10 = vpop.f32.mrb[203].mxu0  ;;  %v17583_v3 = vld [vmem:[#allocation62_spill] sm:$0xff] }
 0x5e3   : > { %v3072_v30 = vadd.f32 %v17582_v28, %v13984_v62  ;;  %v6776_v18 = vadd.f32 %v6538_v60, %v6536_v29  ;;  %v6068_v40 = vmul.f32 %v5214_v16, %v14236_v54  ;;  %v6070_v6 = vmul.f32 %v5663_v57, %v14244_v2  ;;  %8495 = vmatmul.mubr.msk.f32.gmra.mrb[20].mxu1 %vm3979_vm9, %v12793_v23  ;;  %v17584_v29 = vld [vmem:[#allocation63_spill] sm:$0xff]  ;;  %v17585_v60 = vld [vmem:[#allocation289_spill] sm:$0xff]  ;;  %v17586_v11 = vld [vmem:[#allocation290_spill] sm:$0xff] }
 0x5e4   : > { %8561 = vmatmul.mubr.msk.f32.gmra.mrb[52].mxu0 %vm3979_vm9, %v12793_v23  ;;  %v6777_v50 = vadd.f32 %v6539_v20, %v6537_v63  ;;  %v6069_v59 = vmul.f32 %v5216_v15, %v3060_v45  ;;  %v6071_v48 = vmul.f32 %v5665_v10, %v3509_v55  ;;  %6966 = vrot.lane.b32.xlu1 %v14316_v41, %s9305_s20  ;;  %v17587_v63 = vld [vmem:[#allocation64_spill] sm:$0xff]  ;;  %v17588_v55 = vld [vmem:[#allocation65_spill] sm:$0xff]  ;;  %v17589_v28 = vld [vmem:[#allocation291_spill] sm:$0xff] }
 0x5e5   : > { %5536 = vmatprep.mubr.f32.mxu1 %v16425_v13  ;;  %v6540_v54 = vadd.f32 %v6068_v40, %v17583_v3  ;;  %v6542_v2 = vadd.f32 %v6070_v6, %v17584_v29  ;;  %5985 = vmatprep.mubr.f32.mxu0 %v16425_v13  ;;  %v3521_v19 = vadd.f32 %v17585_v60, %v13992_v39  ;;  %v5220_v20 = vpop.f32.mrb[172].mxu1  ;;  %v5669_v16 = vpop.f32.mrb[204].mxu0 }
 0x5e6   : > { %v3076_v23 = vadd.f32 %v17586_v11, %v13976_v12  ;;  %v6541_v45 = vadd.f32 %v6069_v59, %v17587_v63  ;;  %v6543_v52 = vadd.f32 %v6071_v48, %v17588_v55  ;;  %v14338_v57 = vadd.f32 %v6777_v50, %v6776_v18  ;;  %v5222_v3 = vpop.f32.mrb[173].mxu1  ;;  %v5671_v29 = vpop.f32.mrb[205].mxu0  ;;  %v17590_v18 = vld [vmem:[#allocation292_spill] sm:$0xff]  ;;  %v17592_v11 = vld [vmem:[#allocation294_spill] sm:$0xff] }
 0x5e7   : > { %v3525_v40 = vadd.f32 %v17589_v28, %v13982_v43  ;;  %v6778_v6 = vadd.f32 %v6542_v2, %v6540_v54  ;;  %v6076_v15 = vmul.f32 %v5220_v20, %v14270_v5  ;;  %v6078_v10 = vmul.f32 %v5669_v16, %v3513_v22  ;;  %8496 = vmatmul.mubr.msk.f32.gmra.mrb[22].mxu1 %vm3979_vm9, %v12817_v32  ;;  %v17591_v54 = vld [vmem:[#allocation293_spill] sm:$0xff] }
 0x5e8   : > { %8562 = vmatmul.mubr.msk.f32.gmra.mrb[54].mxu0 %vm3979_vm9, %v12817_v32  ;;  %v6779_v59 = vadd.f32 %v6543_v52, %v6541_v45  ;;  %v6077_v48 = vmul.f32 %v5222_v3, %v3066_v25  ;;  %v6079_v60 = vmul.f32 %v5671_v29, %v3515_v38  ;;  %6968 = vrot.lane.b32.xlu0 %v14338_v57, %s9305_s20  ;;  %v17593_v52 = vld [vmem:[#allocation295_spill] sm:$0xff] }
 0x5e9   : > { %v3078_v50 = vadd.f32 %v17590_v18, %v13984_v62  ;;  %v6544_v5 = vadd.f32 %v6076_v15, %v12833_v9  ;;  %v6546_v22 = vadd.f32 %v6078_v10, %v12835_v49  ;;  %v3527_v2 = vadd.f32 %v17591_v54, %v13992_v39  ;;  %v5226_v38 = vpop.f32.mrb[174].mxu1  ;;  %v5675_v45 = vpop.f32.mrb[206].mxu0  ;;  %v17594_v10 = vld [vmem:[#allocation296_spill] sm:$0xff] }
 0x5ea   : > { %v3082_v63 = vadd.f32 %v17592_v11, %v13976_v12  ;;  %v6545_v32 = vadd.f32 %v6077_v48, %v12841_v8  ;;  %v6547_v25 = vadd.f32 %v6079_v60, %v12843_v46  ;;  %v14359_v55 = vadd.f32 %v6779_v59, %v6778_v6  ;;  %v5228_v28 = vpop.f32.mrb[175].mxu1  ;;  %v5677_v15 = vpop.f32.mrb[207].mxu0  ;;  %v17595_v46 = vld [vmem:[#allocation297_spill] sm:$0xff]  ;;  %v17597_v60 = vld [vmem:[#allocation299_spill] sm:$0xff] }
 0x5eb   : > { %v3531_v20 = vadd.f32 %v17593_v52, %v13982_v43  ;;  %v6780_v9 = vadd.f32 %v6546_v22, %v6544_v5  ;;  %v6084_v16 = vmul.f32 %v5226_v38, %v3070_v24  ;;  %v6086_v49 = vmul.f32 %v5675_v45, %v3519_v53  ;;  %v17596_v24 = vld [vmem:[#allocation298_spill] sm:$0xff] }
 0x5ec   : > { %v3084_v3 = vadd.f32 %v17594_v10, %v13984_v62  ;;  %v6781_v29 = vadd.f32 %v6547_v25, %v6545_v32  ;;  %v6085_v18 = vmul.f32 %v5228_v28, %v3072_v30  ;;  %v6087_v8 = vmul.f32 %v5677_v15, %v3521_v19  ;;  %6970 = vrot.lane.b32.xlu1 %v14359_v55, %s9305_s20  ;;  %v17599_v32 = vld [vmem:[#allocation300_spill] sm:$0xff] }
 0x5ed   : > { %v3533_v6 = vadd.f32 %v17595_v46, %v13992_v39  ;;  %v6548_v59 = vadd.f32 %v6084_v16, %v12855_v56  ;;  %v6550_v48 = vadd.f32 %v6086_v49, %v12857_v34  ;;  %v3088_v53 = vadd.f32 %v17596_v24, %v13976_v12  ;;  %v5232_v19 = vpop.f32.mrb[176].mxu1  ;;  %v5681_v54 = vpop.f32.mrb[208].mxu0  ;;  %v17600_v16 = vld [vmem:[#allocation301_spill] sm:$0xff] }
 0x5ee   : > { %v3537_v5 = vadd.f32 %v17597_v60, %v13982_v43  ;;  %v6549_v22 = vadd.f32 %v6085_v18, %v12863_v58  ;;  %v6551_v30 = vadd.f32 %v6087_v8, %v12865_v42  ;;  %v14377_v11 = vadd.f32 %v6781_v29, %v6780_v9  ;;  %v5234_v45 = vpop.f32.mrb[177].mxu1  ;;  %v5683_v52 = vpop.f32.mrb[209].mxu0  ;;  %v17601_v42 = vld [vmem:[#allocation302_spill] sm:$0xff]  ;;  %v17603_v18 = vld [vmem:[#allocation304_spill] sm:$0xff]  ;;  %v17605_v24 = vld [vmem:[#allocation305_spill] sm:$0xff] }
 0x5ef   : > { %v3090_v25 = vadd.f32 %v17599_v32, %v13984_v62  ;;  %v6782_v56 = vadd.f32 %v6550_v48, %v6548_v59  ;;  %v6092_v38 = vmul.f32 %v5232_v19, %v3076_v23  ;;  %v6094_v34 = vmul.f32 %v5681_v54, %v3525_v40  ;;  %v17602_v23 = vld [vmem:[#allocation303_spill] sm:$0xff]  ;;  %v17606_v54 = vld [vmem:[#allocation306_spill] sm:$0xff] }
 0x5f0   : > { %17598 = vst [vmem:[#allocation225_spill] sm:$0xff] %v14377_v11  ;;  %v3539_v49 = vadd.f32 %v17600_v16, %v13992_v39  ;;  %v6783_v28 = vadd.f32 %v6551_v30, %v6549_v22  ;;  %v6093_v15 = vmul.f32 %v5234_v45, %v3078_v50  ;;  %v6095_v58 = vmul.f32 %v5683_v52, %v3527_v2  ;;  %v17609_v16 = vld [vmem:[#allocation309_spill] sm:$0xff] }
 0x5f1   : > { %6972 = vrot.lane.b32.xlu0 %v14377_v11, %s9305_s20  ;;  %v3094_v9 = vadd.f32 %v17601_v42, %v13976_v12  ;;  %v6552_v10 = vadd.f32 %v6092_v38, %v12877_v1  ;;  %v6554_v29 = vadd.f32 %v6094_v34, %v12879_v0  ;;  %v3543_v40 = vadd.f32 %v17602_v23, %v13982_v43  ;;  %v5238_v2 = vpop.f32.mrb[178].mxu1  ;;  %v5687_v59 = vpop.f32.mrb[210].mxu0 }
 0x5f2   : > { %v3096_v8 = vadd.f32 %v17603_v18, %v13984_v62  ;;  %v6553_v46 = vadd.f32 %v6093_v15, %v12885_v4  ;;  %v6555_v50 = vadd.f32 %v6095_v58, %v12887_v61  ;;  %v14395_v48 = vadd.f32 %v6783_v28, %v6782_v56  ;;  %v5240_v30 = vpop.f32.mrb[179].mxu1  ;;  %v5689_v19 = vpop.f32.mrb[211].mxu0  ;;  %v17607_v61 = vld [vmem:[#allocation307_spill] sm:$0xff] }
 0x5f3   : > { %v3545_v60 = vadd.f32 %v17605_v24, %v13992_v39  ;;  %v6784_v1 = vadd.f32 %v6554_v29, %v6552_v10  ;;  %v6100_v22 = vmul.f32 %v5238_v2, %v3082_v63  ;;  %v6102_v0 = vmul.f32 %v5687_v59, %v3531_v20  ;;  %v17608_v63 = vld [vmem:[#allocation308_spill] sm:$0xff]  ;;  %v17611_v10 = vld [vmem:[#allocation310_spill] sm:$0xff] }
 0x5f4   : > { %17604 = vst [vmem:[#allocation226_spill] sm:$0xff] %v14395_v48  ;;  %v3100_v32 = vadd.f32 %v17606_v54, %v13976_v12  ;;  %v6785_v38 = vadd.f32 %v6555_v50, %v6553_v46  ;;  %v6101_v34 = vmul.f32 %v5240_v30, %v3084_v3  ;;  %v6103_v4 = vmul.f32 %v5689_v19, %v3533_v6  ;;  %v17612_v50 = vld [vmem:[#allocation311_spill] sm:$0xff]  ;;  %v17615_v30 = vld [vmem:[#allocation314_spill] sm:$0xff] }
 0x5f5   : > { %6974 = vrot.lane.b32.xlu1 %v14395_v48, %s9305_s20  ;;  %v3549_v56 = vadd.f32 %v17607_v61, %v13982_v43  ;;  %v6556_v45 = vadd.f32 %v6100_v22, %v12899_v35  ;;  %v6558_v52 = vadd.f32 %v6102_v0, %v12901_v17  ;;  %v3102_v20 = vadd.f32 %v17608_v63, %v13984_v62  ;;  %v5244_v6 = vpop.f32.mrb[180].mxu1  ;;  %v5693_v58 = vpop.f32.mrb[212].mxu0  ;;  %v17618_v61 = vld [vmem:[#allocation315_spill] sm:$0xff]  ;;  %v17769_v48 = vld [vmem:[#allocation397_spill] sm:$0xff] }
 0x5f6   : > { %v3551_v28 = vadd.f32 %v17609_v16, %v13992_v39  ;;  %v6557_v15 = vadd.f32 %v6101_v34, %v12907_v51  ;;  %v6559_v3 = vadd.f32 %v6103_v4, %v12909_v21  ;;  %v14413_v42 = vadd.f32 %v6785_v38, %v6784_v1  ;;  %v5246_v18 = vpop.f32.mrb[181].mxu1  ;;  %v5695_v46 = vpop.f32.mrb[213].mxu0  ;;  %v17613_v21 = vld [vmem:[#allocation312_spill] sm:$0xff] }
 0x5f7   : > { %v14417_v29 = vadd.f32 %v17611_v10, %v13976_v12  ;;  %v6786_v35 = vadd.f32 %v6558_v52, %v6556_v45  ;;  %v6108_v17 = vmul.f32 %v5244_v6, %v3088_v53  ;;  %v6110_v23 = vmul.f32 %v5693_v58, %v3537_v5  ;;  %v17614_v53 = vld [vmem:[#allocation313_spill] sm:$0xff] }
 0x5f8   : > { %17610 = vst [vmem:[#allocation496_spill] sm:$0xff] %v14413_v42  ;;  %v3555_v2 = vadd.f32 %v17612_v50, %v13982_v43  ;;  %v6787_v59 = vadd.f32 %v6559_v3, %v6557_v15  ;;  %v6109_v51 = vmul.f32 %v5246_v18, %v3090_v25  ;;  %v6111_v24 = vmul.f32 %v5695_v46, %v3539_v49  ;;  %v17616_v49 = vld [vmem:[#allocation67_spill] sm:$0xff]  ;;  %v17619_v15 = vld [vmem:[#allocation316_spill] sm:$0xff]  ;;  %v17620_v10 = vld [vmem:[#allocation317_spill] sm:$0xff] }
 0x5f9   : > { %6976 = vrot.lane.b32.xlu0 %v14413_v42, %s9305_s20  ;;  %v3108_v1 = vadd.f32 %v17613_v21, %v13984_v62  ;;  %v6560_v22 = vadd.f32 %v6108_v17, %v12921_v27  ;;  %v6562_v0 = vadd.f32 %v6110_v23, %v12923_v26  ;;  %v3557_v5 = vadd.f32 %v17614_v53, %v13992_v39  ;;  %v5250_v38 = vpop.f32.mrb[182].mxu1  ;;  %v5699_v34 = vpop.f32.mrb[214].mxu0  ;;  %v17621_v17 = vld [vmem:[#allocation68_spill] sm:$0xff]  ;;  %v17622_v18 = vld [vmem:[#allocation69_spill] sm:$0xff]  ;;  %v17624_v50 = vld [vmem:[#allocation319_spill] sm:$0xff] }
 0x5fa   : > { %v14431_v19 = vadd.f32 %v17615_v30, %v13976_v12  ;;  %v6561_v25 = vadd.f32 %v6109_v51, %v12929_v44  ;;  %v6563_v54 = vadd.f32 %v6111_v24, %v17616_v49  ;;  %v14435_v4 = vadd.f32 %v6787_v59, %v6786_v35  ;;  %v5252_v63 = vpop.f32.mrb[183].mxu1  ;;  %v5701_v16 = vpop.f32.mrb[215].mxu0  ;;  %v17626_v51 = vld [vmem:[#allocation71_spill] sm:$0xff]  ;;  %v17628_v53 = vld [vmem:[#allocation320_spill] sm:$0xff]  ;;  %v17759_v42 = vld [vmem:[#allocation393_spill] sm:$0xff] }
 0x5fb   : > { %v14439_v27 = vadd.f32 %v17618_v61, %v13982_v43  ;;  %v6788_v26 = vadd.f32 %v6562_v0, %v6560_v22  ;;  %v6116_v45 = vmul.f32 %v5250_v38, %v3094_v9  ;;  %v6118_v52 = vmul.f32 %v5699_v34, %v3543_v40  ;;  %v17623_v40 = vld [vmem:[#allocation318_spill] sm:$0xff]  ;;  %v17629_v61 = vld [vmem:[#allocation321_spill] sm:$0xff] }
 0x5fc   : > { %17617 = vst [vmem:[#allocation227_spill] sm:$0xff] %v14435_v4  ;;  %v14443_v3 = vadd.f32 %v17619_v15, %v13984_v62  ;;  %v6789_v44 = vadd.f32 %v6563_v54, %v6561_v25  ;;  %v6117_v6 = vmul.f32 %v5252_v63, %v3096_v8  ;;  %v6119_v58 = vmul.f32 %v5701_v16, %v3545_v60  ;;  %v17625_v8 = vld [vmem:[#allocation70_spill] sm:$0xff] }
 0x5fd   : > { %6978 = vrot.lane.b32.xlu1 %v14435_v4, %s9305_s20  ;;  %v3563_v35 = vadd.f32 %v17620_v10, %v13992_v39  ;;  %v6564_v23 = vadd.f32 %v6116_v45, %v17621_v17  ;;  %v6566_v9 = vadd.f32 %v6118_v52, %v17622_v18  ;;  %v14453_v46 = vadd.f32 %v17623_v40, %v13976_v12  ;;  %v5256_v21 = vpop.f32.mrb[184].mxu1  ;;  %v5705_v22 = vpop.f32.mrb[216].mxu0  ;;  %v17634_v17 = vld [vmem:[#allocation324_spill] sm:$0xff]  ;;  %v17636_v18 = vld [vmem:[#allocation75_spill] sm:$0xff]  ;;  %v17749_v4 = vld [vmem:[#allocation385_spill] sm:$0xff] }
 0x5fe   : > { %v14457_v59 = vadd.f32 %v17624_v50, %v13982_v43  ;;  %v6565_v60 = vadd.f32 %v6117_v6, %v17625_v8  ;;  %v6567_v24 = vadd.f32 %v6119_v58, %v17626_v51  ;;  %v14461_v0 = vadd.f32 %v6789_v44, %v6788_v26  ;;  %v5258_v38 = vpop.f32.mrb[185].mxu1  ;;  %v5707_v34 = vpop.f32.mrb[217].mxu0  ;;  %v17630_v26 = vld [vmem:[#allocation322_spill] sm:$0xff]  ;;  %v17631_v44 = vld [vmem:[#allocation72_spill] sm:$0xff]  ;;  %v17633_v58 = vld [vmem:[#allocation323_spill] sm:$0xff] }
 0x5ff   : > { %v14465_v30 = vadd.f32 %v17628_v53, %v13984_v62  ;;  %v6790_v25 = vadd.f32 %v6566_v9, %v6564_v23  ;;  %v6124_v49 = vmul.f32 %v5256_v21, %v3100_v32  ;;  %v6126_v54 = vmul.f32 %v5705_v22, %v3549_v56  ;;  %v17632_v32 = vld [vmem:[#allocation73_spill] sm:$0xff] }
 0x600   : > { %17627 = vst [vmem:[#allocation228_spill] sm:$0xff] %v14461_v0  ;;  %v14469_v45 = vadd.f32 %v17629_v61, %v13992_v39  ;;  %v6791_v52 = vadd.f32 %v6567_v24, %v6565_v60  ;;  %v6125_v63 = vmul.f32 %v5258_v38, %v3102_v20  ;;  %v6127_v16 = vmul.f32 %v5707_v34, %v3551_v28  ;;  %v17635_v20 = vld [vmem:[#allocation74_spill] sm:$0xff]  ;;  %v17638_v60 = vld [vmem:[#allocation325_spill] sm:$0xff] }
 0x601   : > { %6980 = vrot.lane.b32.xlu0 %v14461_v0, %s9305_s20  ;;  %v14475_v15 = vadd.f32 %v17630_v26, %v13976_v12  ;;  %v6568_v6 = vadd.f32 %v6124_v49, %v17631_v44  ;;  %v6570_v56 = vadd.f32 %v6126_v54, %v17632_v32  ;;  %v14481_v10 = vadd.f32 %v17633_v58, %v13982_v43  ;;  %v5262_v40 = vpop.f32.mrb[186].mxu1  ;;  %v5711_v50 = vpop.f32.mrb[218].mxu0  ;;  %v17639_v54 = vld [vmem:[#allocation326_spill] sm:$0xff]  ;;  %v17643_v44 = vld [vmem:[#allocation328_spill] sm:$0xff]  ;;  %v17644_v32 = vld [vmem:[#allocation329_spill] sm:$0xff] }
 0x602   : > { %v14485_v23 = vadd.f32 %v17634_v17, %v13984_v62  ;;  %v6569_v28 = vadd.f32 %v6125_v63, %v17635_v20  ;;  %v6571_v9 = vadd.f32 %v6127_v16, %v17636_v18  ;;  %v14489_v8 = vadd.f32 %v6791_v52, %v6790_v25  ;;  %v5264_v53 = vpop.f32.mrb[187].mxu1  ;;  %v5713_v49 = vpop.f32.mrb[219].mxu0  ;;  %v17640_v25 = vld [vmem:[#allocation327_spill] sm:$0xff]  ;;  %v17641_v16 = vld [vmem:[#allocation76_spill] sm:$0xff] }
 0x603   : > { %v14493_v51 = vadd.f32 %v17638_v60, %v13992_v39  ;;  %v6792_v24 = vadd.f32 %v6570_v56, %v6568_v6  ;;  %v6132_v21 = vmul.f32 %v5262_v40, %v14417_v29  ;;  %v6134_v22 = vmul.f32 %v5711_v50, %v3555_v2  ;;  %v17642_v29 = vld [vmem:[#allocation77_spill] sm:$0xff]  ;;  %v17646_v58 = vld [vmem:[#allocation79_spill] sm:$0xff] }
 0x604   : > { %17637 = vst [vmem:[#allocation229_spill] sm:$0xff] %v14489_v8  ;;  %v14498_v38 = vadd.f32 %v17639_v54, %v13976_v12  ;;  %v6793_v34 = vadd.f32 %v6571_v9, %v6569_v28  ;;  %v6133_v61 = vmul.f32 %v5264_v53, %v3108_v1  ;;  %v6135_v63 = vmul.f32 %v5713_v49, %v3557_v5  ;;  %v17645_v1 = vld [vmem:[#allocation78_spill] sm:$0xff]  ;;  %v17649_v49 = vld [vmem:[#allocation331_spill] sm:$0xff] }
 0x605   : > { %6982 = vrot.lane.b32.xlu1 %v14489_v8, %s9305_s20  ;;  %v14504_v52 = vadd.f32 %v17640_v25, %v13982_v43  ;;  %v6572_v26 = vadd.f32 %v6132_v21, %v17641_v16  ;;  %v6574_v2 = vadd.f32 %v6134_v22, %v17642_v29  ;;  %v14510_v6 = vadd.f32 %v17643_v44, %v13984_v62  ;;  %v5268_v20 = vpop.f32.mrb[188].mxu1  ;;  %v5717_v28 = vpop.f32.mrb[220].mxu0  ;;  %v17648_v9 = vld [vmem:[#allocation330_spill] sm:$0xff]  ;;  %v17653_v29 = vld [vmem:[#allocation333_spill] sm:$0xff]  ;;  %v17729_v8 = vld [vmem:[#allocation372_spill] sm:$0xff] }
 0x606   : > { %v14514_v56 = vadd.f32 %v17644_v32, %v13992_v39  ;;  %v6573_v5 = vadd.f32 %v6133_v61, %v17645_v1  ;;  %v6575_v17 = vadd.f32 %v6135_v63, %v17646_v58  ;;  %v14518_v18 = vadd.f32 %v6793_v34, %v6792_v24  ;;  %v5270_v22 = vpop.f32.mrb[189].mxu1  ;;  %v5719_v53 = vpop.f32.mrb[221].mxu0  ;;  %v17650_v34 = vld [vmem:[#allocation332_spill] sm:$0xff]  ;;  %v17654_v44 = vld [vmem:[#allocation334_spill] sm:$0xff]  ;;  %v17656_v1 = vld [vmem:[#allocation83_spill] sm:$0xff] }
 0x607   : > { %v14522_v40 = vadd.f32 %v17648_v9, %v13976_v12  ;;  %v6794_v50 = vadd.f32 %v6574_v2, %v6572_v26  ;;  %v6140_v60 = vmul.f32 %v5268_v20, %v14431_v19  ;;  %v6142_v21 = vmul.f32 %v5717_v28, %v14439_v27  ;;  %v17651_v19 = vld [vmem:[#allocation80_spill] sm:$0xff]  ;;  %v17652_v27 = vld [vmem:[#allocation81_spill] sm:$0xff]  ;;  %v17658_v28 = vld [vmem:[#allocation335_spill] sm:$0xff] }
 0x608   : > { %17647 = vst [vmem:[#allocation230_spill] sm:$0xff] %v14518_v18  ;;  %v14528_v54 = vadd.f32 %v17649_v49, %v13982_v43  ;;  %v6795_v61 = vadd.f32 %v6575_v17, %v6573_v5  ;;  %v6141_v63 = vmul.f32 %v5270_v22, %v14443_v3  ;;  %v6143_v24 = vmul.f32 %v5719_v53, %v3563_v35  ;;  %v17655_v3 = vld [vmem:[#allocation82_spill] sm:$0xff]  ;;  %v17739_v0 = vld [vmem:[#allocation379_spill] sm:$0xff] }
 0x609   : > { %6984 = vrot.lane.b32.xlu0 %v14518_v18, %s9305_s20  ;;  %v14535_v25 = vadd.f32 %v17650_v34, %v13984_v62  ;;  %v6576_v16 = vadd.f32 %v6140_v60, %v17651_v19  ;;  %v6578_v26 = vadd.f32 %v6142_v21, %v17652_v27  ;;  %v14541_v2 = vadd.f32 %v17653_v29, %v13992_v39  ;;  %v5274_v58 = vpop.f32.mrb[190].mxu1  ;;  %v5723_v17 = vpop.f32.mrb[222].mxu0  ;;  %v17659_v34 = vld [vmem:[#allocation336_spill] sm:$0xff]  ;;  %v17662_v27 = vld [vmem:[#allocation85_spill] sm:$0xff]  ;;  %v17663_v29 = vld [vmem:[#allocation338_spill] sm:$0xff] }
 0x60a   : > { %v14545_v32 = vadd.f32 %v17654_v44, %v13976_v12  ;;  %v6577_v35 = vadd.f32 %v6141_v63, %v17655_v3  ;;  %v6579_v5 = vadd.f32 %v6143_v24, %v17656_v1  ;;  %v14549_v20 = vadd.f32 %v6795_v61, %v6794_v50  ;;  %v5276_v53 = vpop.f32.mrb[191].mxu1  ;;  %v5725_v49 = vpop.f32.mrb[223].mxu0  ;;  %v17660_v61 = vld [vmem:[#allocation337_spill] sm:$0xff]  ;;  %v17664_v3 = vld [vmem:[#allocation339_spill] sm:$0xff]  ;;  %v17719_v18 = vld [vmem:[#allocation368_spill] sm:$0xff] }
 0x60b   : > { %v14553_v9 = vadd.f32 %v17658_v28, %v13982_v43  ;;  %v6796_v60 = vadd.f32 %v6578_v26, %v6576_v16  ;;  %v6148_v21 = vmul.f32 %v5274_v58, %v14453_v46  ;;  %v6150_v22 = vmul.f32 %v5723_v17, %v14457_v59  ;;  %v17661_v46 = vld [vmem:[#allocation84_spill] sm:$0xff]  ;;  %v17666_v1 = vld [vmem:[#allocation87_spill] sm:$0xff] }
 0x60c   : > { %17657 = vst [vmem:[#allocation501_spill] sm:$0xff] %v14549_v20  ;;  %v14559_v63 = vadd.f32 %v17659_v34, %v13984_v62  ;;  %v6797_v24 = vadd.f32 %v6579_v5, %v6577_v35  ;;  %v6149_v19 = vmul.f32 %v5276_v53, %v14465_v30  ;;  %v6151_v50 = vmul.f32 %v5725_v49, %v14469_v45  ;;  %v17665_v45 = vld [vmem:[#allocation86_spill] sm:$0xff] }
 0x60d   : > { %6986 = vrot.lane.b32.xlu0 %v14549_v20, %s9305_s20  ;;  %v14567_v16 = vadd.f32 %v17660_v61, %v13992_v39  ;;  %v6580_v59 = vadd.f32 %v6148_v21, %v17661_v46  ;;  %v6582_v26 = vadd.f32 %v6150_v22, %v17662_v27  ;;  %v14573_v44 = vadd.f32 %v17663_v29, %v13976_v12  ;;  %v5280_v58 = vpop.f32.mrb[192].mxu1  ;;  %v5729_v17 = vpop.f32.mrb[224].mxu0  ;;  %v17668_v21 = vld [vmem:[#allocation340_spill] sm:$0xff]  ;;  %v17669_v27 = vld [vmem:[#allocation341_spill] sm:$0xff] }
 0x60e   : > { %v14577_v30 = vadd.f32 %v17664_v3, %v13982_v43  ;;  %v6581_v35 = vadd.f32 %v6149_v19, %v17665_v45  ;;  %v6583_v5 = vadd.f32 %v6151_v50, %v17666_v1  ;;  %v14581_v28 = vadd.f32 %v6797_v24, %v6796_v60  ;;  %v5282_v61 = vpop.f32.mrb[193].mxu1  ;;  %v5731_v46 = vpop.f32.mrb[225].mxu0  ;;  %v17670_v24 = vld [vmem:[#allocation342_spill] sm:$0xff]  ;;  %v17673_v45 = vld [vmem:[#allocation343_spill] sm:$0xff]  ;;  %v17709_v20 = vld [vmem:[#allocation361_spill] sm:$0xff] }
 0x60f   : > { %v14585_v53 = vadd.f32 %v17668_v21, %v13984_v62  ;;  %v6798_v22 = vadd.f32 %v6582_v26, %v6580_v59  ;;  %v6156_v49 = vmul.f32 %v5280_v58, %v14475_v15  ;;  %v6158_v34 = vmul.f32 %v5729_v17, %v14481_v10  ;;  %v17671_v15 = vld [vmem:[#allocation88_spill] sm:$0xff]  ;;  %v17672_v26 = vld [vmem:[#allocation89_spill] sm:$0xff] }
 0x610   : > { %17667 = vst [vmem:[#allocation231_spill] sm:$0xff] %v14581_v28  ;;  %v14591_v19 = vadd.f32 %v17669_v27, %v13992_v39  ;;  %v6799_v50 = vadd.f32 %v6583_v5, %v6581_v35  ;;  %v6157_v29 = vmul.f32 %v5282_v61, %v14485_v23  ;;  %v6159_v60 = vmul.f32 %v5731_v46, %v14493_v51  ;;  %v17674_v35 = vld [vmem:[#allocation344_spill] sm:$0xff]  ;;  %v17675_v51 = vld [vmem:[#allocation90_spill] sm:$0xff]  ;;  %v17676_v58 = vld [vmem:[#allocation541_spill] sm:$0xff] }
 0x611   : > { %6988 = vrot.lane.b32.xlu0 %v14581_v28, %s9305_s20  ;;  %v14599_v59 = vadd.f32 %v17670_v24, %v13976_v12  ;;  %v6584_v10 = vadd.f32 %v6156_v49, %v17671_v15  ;;  %v6586_v3 = vadd.f32 %v6158_v34, %v17672_v26  ;;  %v14605_v1 = vadd.f32 %v17673_v45, %v13982_v43  ;;  %v5286_v21 = vpop.f32.mrb[194].mxu1  ;;  %v5735_v61 = vpop.f32.mrb[226].mxu0  ;;  %v17678_v49 = vld [vmem:[#allocation345_spill] sm:$0xff]  ;;  %v17699_v28 = vld [vmem:[#allocation356_spill] sm:$0xff] }
 0x612   : > { %v14609_v23 = vadd.f32 %v17674_v35, %v13984_v62  ;;  %v6585_v5 = vadd.f32 %v6157_v29, %v17675_v51  ;;  %v6587_v17 = vadd.f32 %v6159_v60, %v17676_v58  ;;  %v14613_v46 = vadd.f32 %v6799_v50, %v6798_v22  ;;  %v5288_v26 = vpop.f32.mrb[195].mxu1  ;;  %v5737_v45 = vpop.f32.mrb[227].mxu0  ;;  %v17679_v35 = vld [vmem:[#allocation346_spill] sm:$0xff]  ;;  %v17680_v50 = vld [vmem:[#allocation347_spill] sm:$0xff] }
 0x613   : > { %v14617_v27 = vadd.f32 %v17678_v49, %v13992_v39  ;;  %v6800_v34 = vadd.f32 %v6586_v3, %v6584_v10  ;;  %v6164_v24 = vmul.f32 %v5286_v21, %v14498_v38  ;;  %v6166_v15 = vmul.f32 %v5735_v61, %v14504_v52  ;;  %v17681_v38 = vld [vmem:[#allocation91_spill] sm:$0xff]  ;;  %v17682_v3 = vld [vmem:[#allocation92_spill] sm:$0xff]  ;;  %v17686_v49 = vld [vmem:[#allocation542_spill] sm:$0xff] }
 0x614   : > { %17677 = vst [vmem:[#allocation232_spill] sm:$0xff] %v14613_v46  ;;  %v14623_v29 = vadd.f32 %v17679_v35, %v13976_v12  ;;  %v6801_v60 = vadd.f32 %v6587_v17, %v6585_v5  ;;  %v6165_v51 = vmul.f32 %v5288_v26, %v14510_v6  ;;  %v6167_v22 = vmul.f32 %v5737_v45, %v14514_v56  ;;  %v17683_v21 = vld [vmem:[#allocation348_spill] sm:$0xff]  ;;  %v17684_v5 = vld [vmem:[#allocation349_spill] sm:$0xff] }
 0x615   : > { %6990 = vrot.lane.b32.xlu1 %v14613_v46, %s9305_s20  ;;  %v14631_v10 = vadd.f32 %v17680_v50, %v13982_v43  ;;  %v6588_v52 = vadd.f32 %v6164_v24, %v17681_v38  ;;  %v6590_v58 = vadd.f32 %v6166_v15, %v17682_v3  ;;  %v14637_v61 = vadd.f32 %v17683_v21, %v13984_v62  ;;  %v17685_v56 = vld [vmem:[#allocation93_spill] sm:$0xff]  ;;  %v5292_v45 = vpop.f32.mrb[196].mxu1  ;;  %v5741_v35 = vpop.f32.mrb[228].mxu0  ;;  %v17688_v24 = vld [vmem:[#allocation350_spill] sm:$0xff]  ;;  %v17689_v46 = vld [vmem:[#allocation351_spill] sm:$0xff] }
 0x616   : > { %v14641_v6 = vadd.f32 %v17684_v5, %v13992_v39  ;;  %v6589_v17 = vadd.f32 %v6165_v51, %v17685_v56  ;;  %v6591_v26 = vadd.f32 %v6167_v22, %v17686_v49  ;;  %v14645_v50 = vadd.f32 %v6801_v60, %v6800_v34  ;;  %v5294_v13 = vpop.f32.mrb[197].mxu1  ;;  %v5743_v5 = vpop.f32.mrb[229].mxu0  ;;  %v17690_v60 = vld [vmem:[#allocation352_spill] sm:$0xff] }
 0x617   : > { %v14649_v38 = vadd.f32 %v17688_v24, %v13976_v12  ;;  %v6802_v15 = vadd.f32 %v6590_v58, %v6588_v52  ;;  %v6172_v3 = vmul.f32 %v5292_v45, %v14522_v40  ;;  %v6174_v21 = vmul.f32 %v5741_v35, %v14528_v54  ;;  %v17691_v40 = vld [vmem:[#allocation94_spill] sm:$0xff]  ;;  %v17692_v58 = vld [vmem:[#allocation95_spill] sm:$0xff]  ;;  %v17693_v45 = vld [vmem:[#allocation353_spill] sm:$0xff] }
 0x618   : > { %17687 = vst [vmem:[#allocation233_spill] sm:$0xff] %v14645_v50  ;;  %v14655_v51 = vadd.f32 %v17689_v46, %v13982_v43  ;;  %v6803_v22 = vadd.f32 %v6591_v26, %v6589_v17  ;;  %v6173_v56 = vmul.f32 %v5294_v13, %v14535_v25  ;;  %v6175_v34 = vmul.f32 %v5743_v5, %v14541_v2  ;;  %v17694_v17 = vld [vmem:[#allocation354_spill] sm:$0xff]  ;;  %v17695_v25 = vld [vmem:[#allocation96_spill] sm:$0xff]  ;;  %v17696_v26 = vld [vmem:[#allocation543_spill] sm:$0xff] }
 0x619   : > { %6992 = vrot.lane.b32.xlu0 %v14645_v50, %s9305_s20  ;;  %v14663_v52 = vadd.f32 %v17690_v60, %v13984_v62  ;;  %v6592_v54 = vadd.f32 %v6172_v3, %v17691_v40  ;;  %v6594_v49 = vadd.f32 %v6174_v21, %v17692_v58  ;;  %v14669_v46 = vadd.f32 %v17693_v45, %v13992_v39  ;;  %v5298_v24 = vpop.f32.mrb[198].mxu1  ;;  %v5747_v5 = vpop.f32.mrb[230].mxu0  ;;  %v17698_v3 = vld [vmem:[#allocation355_spill] sm:$0xff] }
 0x61a   : > { %v14673_v13 = vadd.f32 %v17694_v17, %v13976_v12  ;;  %v6593_v2 = vadd.f32 %v6173_v56, %v17695_v25  ;;  %v6595_v35 = vadd.f32 %v6175_v34, %v17696_v26  ;;  %v14677_v60 = vadd.f32 %v6803_v22, %v6802_v15  ;;  %v5300_v50 = vpop.f32.mrb[199].mxu1  ;;  %v5749_v17 = vpop.f32.mrb[231].mxu0  ;;  %v17700_v22 = vld [vmem:[#allocation357_spill] sm:$0xff] }
 0x61b   : > { %v14681_v40 = vadd.f32 %v17698_v3, %v13982_v43  ;;  %v6804_v21 = vadd.f32 %v6594_v49, %v6592_v54  ;;  %v6180_v58 = vmul.f32 %v5298_v24, %v14545_v32  ;;  %v6182_v45 = vmul.f32 %v5747_v5, %v14553_v9  ;;  %v17701_v32 = vld [vmem:[#allocation97_spill] sm:$0xff]  ;;  %v17702_v49 = vld [vmem:[#allocation98_spill] sm:$0xff] }
 0x61c   : > { %17697 = vst [vmem:[#allocation234_spill] sm:$0xff] %v14677_v60  ;;  %v14687_v56 = vadd.f32 %v17699_v28, %v13984_v62  ;;  %v6805_v34 = vadd.f32 %v6595_v35, %v6593_v2  ;;  %v6181_v25 = vmul.f32 %v5300_v50, %v14559_v63  ;;  %v6183_v15 = vmul.f32 %v5749_v17, %v14567_v16  ;;  %v17703_v24 = vld [vmem:[#allocation358_spill] sm:$0xff]  ;;  %v17704_v2 = vld [vmem:[#allocation359_spill] sm:$0xff]  ;;  %v17706_v35 = vld [vmem:[#allocation544_spill] sm:$0xff] }
 0x61d   : > { %6994 = vrot.lane.b32.xlu1 %v14677_v60, %s9305_s20  ;;  %v14695_v54 = vadd.f32 %v17700_v22, %v13992_v39  ;;  %v6596_v9 = vadd.f32 %v6180_v58, %v17701_v32  ;;  %v6598_v26 = vadd.f32 %v6182_v45, %v17702_v49  ;;  %v14701_v28 = vadd.f32 %v17703_v24, %v13976_v12  ;;  %v17705_v16 = vld [vmem:[#allocation99_spill] sm:$0xff]  ;;  %v5304_v3 = vpop.f32.mrb[200].mxu1  ;;  %v5753_v17 = vpop.f32.mrb[232].mxu0  ;;  %v17708_v58 = vld [vmem:[#allocation360_spill] sm:$0xff] }
 0x61e   : > { %v14705_v63 = vadd.f32 %v17704_v2, %v13982_v43  ;;  %v6597_v50 = vadd.f32 %v6181_v25, %v17705_v16  ;;  %v6599_v5 = vadd.f32 %v6183_v15, %v17706_v35  ;;  %v14709_v22 = vadd.f32 %v6805_v34, %v6804_v21  ;;  %v5306_v60 = vpop.f32.mrb[201].mxu1  ;;  %v5755_v2 = vpop.f32.mrb[233].mxu0  ;;  %v17710_v34 = vld [vmem:[#allocation362_spill] sm:$0xff] }
 0x61f   : > { %v14713_v32 = vadd.f32 %v17708_v58, %v13984_v62  ;;  %v6806_v45 = vadd.f32 %v6598_v26, %v6596_v9  ;;  %v6188_v49 = vmul.f32 %v5304_v3, %v14573_v44  ;;  %v6190_v24 = vmul.f32 %v5753_v17, %v14577_v30  ;;  %v17711_v44 = vld [vmem:[#allocation100_spill] sm:$0xff]  ;;  %v17712_v26 = vld [vmem:[#allocation101_spill] sm:$0xff]  ;;  %v17713_v3 = vld [vmem:[#allocation363_spill] sm:$0xff] }
 0x620   : > { %17707 = vst [vmem:[#allocation506_spill] sm:$0xff] %v14709_v22  ;;  %v14719_v25 = vadd.f32 %v17709_v20, %v13992_v39  ;;  %v6807_v15 = vadd.f32 %v6599_v5, %v6597_v50  ;;  %v6189_v16 = vmul.f32 %v5306_v60, %v14585_v53  ;;  %v6191_v21 = vmul.f32 %v5755_v2, %v14591_v19  ;;  %v17714_v50 = vld [vmem:[#allocation364_spill] sm:$0xff]  ;;  %v17715_v19 = vld [vmem:[#allocation102_spill] sm:$0xff]  ;;  %v17716_v5 = vld [vmem:[#allocation103_spill] sm:$0xff] }
 0x621   : > { %6996 = vrot.lane.b32.xlu0 %v14709_v22, %s9305_s20  ;;  %v14727_v9 = vadd.f32 %v17710_v34, %v13976_v12  ;;  %v6600_v30 = vadd.f32 %v6188_v49, %v17711_v44  ;;  %v6602_v35 = vadd.f32 %v6190_v24, %v17712_v26  ;;  %v14733_v20 = vadd.f32 %v17713_v3, %v13982_v43  ;;  %v5310_v58 = vpop.f32.mrb[202].mxu1  ;;  %v5759_v2 = vpop.f32.mrb[234].mxu0  ;;  %v17718_v49 = vld [vmem:[#allocation365_spill] sm:$0xff] }
 0x622   : > { %v14737_v53 = vadd.f32 %v17714_v50, %v13984_v62  ;;  %v6601_v60 = vadd.f32 %v6189_v16, %v17715_v19  ;;  %v6603_v17 = vadd.f32 %v6191_v21, %v17716_v5  ;;  %v14741_v34 = vadd.f32 %v6807_v15, %v6806_v45  ;;  %v5312_v22 = vpop.f32.mrb[203].mxu1  ;;  %v5761_v50 = vpop.f32.mrb[235].mxu0  ;;  %v17720_v15 = vld [vmem:[#allocation367_spill] sm:$0xff] }
 0x623   : > { %v14745_v44 = vadd.f32 %v17718_v49, %v13992_v39  ;;  %v6808_v24 = vadd.f32 %v6602_v35, %v6600_v30  ;;  %v6196_v26 = vmul.f32 %v5310_v58, %v14599_v59  ;;  %v6198_v3 = vmul.f32 %v5759_v2, %v14605_v1  ;;  %v17721_v59 = vld [vmem:[#allocation104_spill] sm:$0xff]  ;;  %v17722_v35 = vld [vmem:[#allocation105_spill] sm:$0xff] }
 0x624   : > { %17717 = vst [vmem:[#allocation235_spill] sm:$0xff] %v14741_v34  ;;  %v14751_v16 = vadd.f32 %v17719_v18, %v13982_v43  ;;  %v6809_v21 = vadd.f32 %v6603_v17, %v6601_v60  ;;  %v6197_v19 = vmul.f32 %v5312_v22, %v14609_v23  ;;  %v6199_v45 = vmul.f32 %v5761_v50, %v14617_v27  ;;  %v17723_v58 = vld [vmem:[#allocation369_spill] sm:$0xff]  ;;  %v17724_v60 = vld [vmem:[#allocation370_spill] sm:$0xff]  ;;  %v17726_v17 = vld [vmem:[#allocation107_spill] sm:$0xff] }
 0x625   : > { %6998 = vrot.lane.b32.xlu1 %v14741_v34, %s9305_s20  ;;  %v14759_v30 = vadd.f32 %v17720_v15, %v13976_v12  ;;  %v6604_v1 = vadd.f32 %v6196_v26, %v17721_v59  ;;  %v6606_v5 = vadd.f32 %v6198_v3, %v17722_v35  ;;  %v14765_v18 = vadd.f32 %v17723_v58, %v13984_v62  ;;  %v17725_v27 = vld [vmem:[#allocation106_spill] sm:$0xff]  ;;  %v5316_v49 = vpop.f32.mrb[204].mxu1  ;;  %v5765_v50 = vpop.f32.mrb[236].mxu0  ;;  %v17728_v26 = vld [vmem:[#allocation373_spill] sm:$0xff] }
 0x626   : > { %v14769_v23 = vadd.f32 %v17724_v60, %v13992_v39  ;;  %v6605_v22 = vadd.f32 %v6197_v19, %v17725_v27  ;;  %v6607_v2 = vadd.f32 %v6199_v45, %v17726_v17  ;;  %v14773_v15 = vadd.f32 %v6809_v21, %v6808_v24  ;;  %v5318_v34 = vpop.f32.mrb[205].mxu1  ;;  %v5767_v60 = vpop.f32.mrb[237].mxu0  ;;  %v17730_v21 = vld [vmem:[#allocation374_spill] sm:$0xff] }
 0x627   : > { %v14777_v59 = vadd.f32 %v17728_v26, %v13982_v43  ;;  %v6810_v3 = vadd.f32 %v6606_v5, %v6604_v1  ;;  %v6204_v35 = vmul.f32 %v5316_v49, %v14623_v29  ;;  %v6206_v58 = vmul.f32 %v5765_v50, %v14631_v10  ;;  %v17731_v29 = vld [vmem:[#allocation9_spill] sm:$0xff]  ;;  %v17732_v5 = vld [vmem:[#allocation108_spill] sm:$0xff]  ;;  %v17733_v49 = vld [vmem:[#allocation375_spill] sm:$0xff] }
 0x628   : > { %17727 = vst [vmem:[#allocation236_spill] sm:$0xff] %v14773_v15  ;;  %v14783_v19 = vadd.f32 %v17729_v8, %v13976_v12  ;;  %v6811_v45 = vadd.f32 %v6607_v2, %v6605_v22  ;;  %v6205_v27 = vmul.f32 %v5318_v34, %v14637_v61  ;;  %v6207_v24 = vmul.f32 %v5767_v60, %v14641_v6  ;;  %v17734_v22 = vld [vmem:[#allocation378_spill] sm:$0xff]  ;;  %v17735_v6 = vld [vmem:[#allocation109_spill] sm:$0xff] }
 0x629   : > { %7000 = vrot.lane.b32.xlu0 %v14773_v15, %s9305_s20  ;;  %v14791_v1 = vadd.f32 %v17730_v21, %v13984_v62  ;;  %v6608_v10 = vadd.f32 %v6204_v35, %v17731_v29  ;;  %v6610_v17 = vadd.f32 %v6206_v58, %v17732_v5  ;;  %v14797_v8 = vadd.f32 %v17733_v49, %v13992_v39  ;;  %v17736_v2 = vld [vmem:[#allocation110_spill] sm:$0xff]  ;;  %v5322_v26 = vpop.f32.mrb[206].mxu1  ;;  %v5771_v60 = vpop.f32.mrb[238].mxu0  ;;  %v17738_v35 = vld [vmem:[#allocation377_spill] sm:$0xff] }
 0x62a   : > { %v14801_v61 = vadd.f32 %v17734_v22, %v13982_v43  ;;  %v6609_v34 = vadd.f32 %v6205_v27, %v17735_v6  ;;  %v6611_v50 = vadd.f32 %v6207_v24, %v17736_v2  ;;  %v14805_v21 = vadd.f32 %v6811_v45, %v6810_v3  ;;  %v5324_v15 = vpop.f32.mrb[207].mxu1  ;;  %v5773_v22 = vpop.f32.mrb[239].mxu0  ;;  %v17740_v45 = vld [vmem:[#allocation380_spill] sm:$0xff] }
 0x62b   : > { %v14809_v29 = vadd.f32 %v17738_v35, %v13976_v12  ;;  %v6812_v58 = vadd.f32 %v6610_v17, %v6608_v10  ;;  %v6212_v5 = vmul.f32 %v5322_v26, %v14649_v38  ;;  %v6214_v49 = vmul.f32 %v5771_v60, %v14655_v51  ;;  %v17741_v38 = vld [vmem:[#allocation10_spill] sm:$0xff]  ;;  %v17742_v17 = vld [vmem:[#allocation111_spill] sm:$0xff] }
 0x62c   : > { %17737 = vst [vmem:[#allocation237_spill] sm:$0xff] %v14805_v21  ;;  %v14815_v27 = vadd.f32 %v17739_v0, %v13984_v62  ;;  %v6813_v24 = vadd.f32 %v6611_v50, %v6609_v34  ;;  %v6213_v6 = vmul.f32 %v5324_v15, %v14663_v52  ;;  %v6215_v3 = vmul.f32 %v5773_v22, %v14669_v46  ;;  %v17743_v26 = vld [vmem:[#allocation383_spill] sm:$0xff]  ;;  %v17744_v34 = vld [vmem:[#allocation382_spill] sm:$0xff]  ;;  %v17745_v46 = vld [vmem:[#allocation112_spill] sm:$0xff] }
 0x62d   : > { %7002 = vrot.lane.b32.xlu1 %v14805_v21, %s9305_s20  ;;  %v14823_v10 = vadd.f32 %v17740_v45, %v13992_v39  ;;  %v6612_v51 = vadd.f32 %v6212_v5, %v17741_v38  ;;  %v6614_v2 = vadd.f32 %v6214_v49, %v17742_v17  ;;  %v14829_v0 = vadd.f32 %v17743_v26, %v13982_v43  ;;  %v17746_v50 = vld [vmem:[#allocation113_spill] sm:$0xff]  ;;  %v5328_v35 = vpop.f32.mrb[208].mxu1  ;;  %v5777_v22 = vpop.f32.mrb[240].mxu0  ;;  %v17748_v5 = vld [vmem:[#allocation384_spill] sm:$0xff] }
 0x62e   : > { %v14833_v52 = vadd.f32 %v17744_v34, %v13976_v12  ;;  %v6613_v15 = vadd.f32 %v6213_v6, %v17745_v46  ;;  %v6615_v60 = vadd.f32 %v6215_v3, %v17746_v50  ;;  %v14837_v45 = vadd.f32 %v6813_v24, %v6812_v58  ;;  %v5330_v21 = vpop.f32.mrb[209].mxu1  ;;  %v5779_v34 = vpop.f32.mrb[241].mxu0  ;;  %v17750_v24 = vld [vmem:[#allocation388_spill] sm:$0xff] }
 0x62f   : > { %v14841_v38 = vadd.f32 %v17748_v5, %v13984_v62  ;;  %v6814_v49 = vadd.f32 %v6614_v2, %v6612_v51  ;;  %v6220_v17 = vmul.f32 %v5328_v35, %v14673_v13  ;;  %v6222_v26 = vmul.f32 %v5777_v22, %v14681_v40  ;;  %v17751_v13 = vld [vmem:[#allocation11_spill] sm:$0xff]  ;;  %v17752_v2 = vld [vmem:[#allocation114_spill] sm:$0xff] }
 0x630   : > { %17747 = vst [vmem:[#allocation238_spill] sm:$0xff] %v14837_v45  ;;  %v14847_v6 = vadd.f32 %v17749_v4, %v13992_v39  ;;  %v6815_v3 = vadd.f32 %v6615_v60, %v6613_v15  ;;  %v6221_v46 = vmul.f32 %v5330_v21, %v14687_v56  ;;  %v6223_v58 = vmul.f32 %v5779_v34, %v14695_v54  ;;  %v17753_v35 = vld [vmem:[#allocation387_spill] sm:$0xff]  ;;  %v17754_v15 = vld [vmem:[#allocation389_spill] sm:$0xff]  ;;  %v17756_v60 = vld [vmem:[#allocation116_spill] sm:$0xff] }
 0x631   : > { %7004 = vrot.lane.b32.xlu0 %v14837_v45, %s9305_s20  ;;  %v14855_v51 = vadd.f32 %v17750_v24, %v13982_v43  ;;  %v6616_v40 = vadd.f32 %v6220_v17, %v17751_v13  ;;  %v6618_v50 = vadd.f32 %v6222_v26, %v17752_v2  ;;  %v14861_v4 = vadd.f32 %v17753_v35, %v13976_v12  ;;  %v17755_v54 = vld [vmem:[#allocation115_spill] sm:$0xff]  ;;  %v5334_v5 = vpop.f32.mrb[210].mxu1  ;;  %v5783_v34 = vpop.f32.mrb[242].mxu0  ;;  %v17758_v17 = vld [vmem:[#allocation390_spill] sm:$0xff] }
 0x632   : > { %v14865_v56 = vadd.f32 %v17754_v15, %v13984_v62  ;;  %v6617_v21 = vadd.f32 %v6221_v46, %v17755_v54  ;;  %v6619_v22 = vadd.f32 %v6223_v58, %v17756_v60  ;;  %v14869_v24 = vadd.f32 %v6815_v3, %v6814_v49  ;;  %v5336_v45 = vpop.f32.mrb[211].mxu1  ;;  %v5785_v15 = vpop.f32.mrb[243].mxu0  ;;  %v17760_v3 = vld [vmem:[#allocation392_spill] sm:$0xff] }
 0x633   : > { %v14873_v13 = vadd.f32 %v17758_v17, %v13992_v39  ;;  %v6816_v26 = vadd.f32 %v6618_v50, %v6616_v40  ;;  %v6228_v2 = vmul.f32 %v5334_v5, %v14701_v28  ;;  %v6230_v35 = vmul.f32 %v5783_v34, %v14705_v63  ;;  %v17761_v28 = vld [vmem:[#allocation12_spill] sm:$0xff]  ;;  %v17762_v50 = vld [vmem:[#allocation117_spill] sm:$0xff]  ;;  %v17763_v5 = vld [vmem:[#allocation394_spill] sm:$0xff] }
 0x634   : > { %17757 = vst [vmem:[#allocation511_spill] sm:$0xff] %v14869_v24  ;;  %v14879_v46 = vadd.f32 %v17759_v42, %v13982_v43  ;;  %v6817_v58 = vadd.f32 %v6619_v22, %v6617_v21  ;;  %v6229_v54 = vmul.f32 %v5336_v45, %v14713_v32  ;;  %v6231_v49 = vmul.f32 %v5785_v15, %v14719_v25  ;;  %v17764_v21 = vld [vmem:[#allocation395_spill] sm:$0xff]  ;;  %v17765_v25 = vld [vmem:[#allocation118_spill] sm:$0xff] }
 0x635   : > { %7006 = vrot.lane.b32.xlu1 %v14869_v24, %s9305_s20  ;;  %v14887_v40 = vadd.f32 %v17760_v3, %v13976_v12  ;;  %v6620_v63 = vadd.f32 %v6228_v2, %v17761_v28  ;;  %v6622_v60 = vadd.f32 %v6230_v35, %v17762_v50  ;;  %v14893_v42 = vadd.f32 %v17763_v5, %v13984_v62  ;;  %v17766_v22 = vld [vmem:[#allocation119_spill] sm:$0xff]  ;;  %v5340_v17 = vpop.f32.mrb[212].mxu1  ;;  %v5789_v15 = vpop.f32.mrb[244].mxu0  ;;  %v17768_v2 = vld [vmem:[#allocation398_spill] sm:$0xff] }
 0x636   : > { %v14897_v32 = vadd.f32 %v17764_v21, %v13992_v39  ;;  %v6621_v45 = vadd.f32 %v6229_v54, %v17765_v25  ;;  %v6623_v34 = vadd.f32 %v6231_v49, %v17766_v22  ;;  %v14901_v3 = vadd.f32 %v6817_v58, %v6816_v26  ;;  %v5342_v24 = vpop.f32.mrb[213].mxu1  ;;  %v5791_v21 = vpop.f32.mrb[245].mxu0  ;;  %v17770_v58 = vld [vmem:[#allocation399_spill] sm:$0xff] }
 0x637   : > { %v14905_v28 = vadd.f32 %v17768_v2, %v13982_v43  ;;  %v6818_v35 = vadd.f32 %v6622_v60, %v6620_v63  ;;  %v6236_v50 = vmul.f32 %v5340_v17, %v14727_v9  ;;  %v6238_v5 = vmul.f32 %v5789_v15, %v14733_v20  ;;  %v17771_v9 = vld [vmem:[#allocation13_spill] sm:$0xff]  ;;  %v17772_v60 = vld [vmem:[#allocation120_spill] sm:$0xff] }
 0x638   : > { %17767 = vst [vmem:[#allocation517_spill] sm:$0xff] %v14901_v3  ;;  %v14911_v54 = vadd.f32 %v17769_v48, %v13976_v12  ;;  %v6819_v49 = vadd.f32 %v6623_v34, %v6621_v45  ;;  %v6237_v25 = vmul.f32 %v5342_v24, %v14737_v53  ;;  %v6239_v26 = vmul.f32 %v5791_v21, %v14745_v44  ;;  %v17773_v17 = vld [vmem:[#allocation400_spill] sm:$0xff]  ;;  %v17774_v45 = vld [vmem:[#allocation403_spill] sm:$0xff]  ;;  %v17775_v44 = vld [vmem:[#allocation121_spill] sm:$0xff] }
 0x639   : > { %7008 = vrot.lane.b32.xlu0 %v14901_v3, %s9305_s20  ;;  %v14919_v63 = vadd.f32 %v17770_v58, %v13984_v62  ;;  %v6624_v20 = vadd.f32 %v6236_v50, %v17771_v9  ;;  %v6626_v22 = vadd.f32 %v6238_v5, %v17772_v60  ;;  %v14925_v48 = vadd.f32 %v17773_v17, %v13992_v39  ;;  %v17776_v34 = vld [vmem:[#allocation122_spill] sm:$0xff]  ;;  %v5795_v2 = vpop.f32.mrb[246].mxu0 }
 0x63a   : > { %v14929_v53 = vadd.f32 %v17774_v45, %v13982_v43  ;;  %v6625_v24 = vadd.f32 %v6237_v25, %v17775_v44  ;;  %v6627_v15 = vadd.f32 %v6239_v26, %v17776_v34  ;;  %v14933_v58 = vadd.f32 %v6819_v49, %v6818_v35  ;;  %v17778_v50 = vld [vmem:[#allocation402_spill] sm:$0xff]  ;;  %v5346_v45 = vpop.f32.mrb[214].mxu1  ;;  %v5797_v3 = vpop.f32.mrb[247].mxu0  ;;  %v17780_v25 = vld [vmem:[#allocation404_spill] sm:$0xff] }
 0x63b   : > { %v6953_v21 = vpop.permute.xlu1 %6952  ;;  %v14937_v9 = vadd.f32 %v17778_v50, %v13976_v12  ;;  %v6820_v5 = vadd.f32 %v6626_v22, %v6624_v20  ;;  %v6246_v60 = vmul.f32 %v5795_v2, %v14751_v16  ;;  %v14945_v44 = vadd.f32 %v17780_v25, %v13984_v62  ;;  %v5348_v49 = vpop.f32.mrb[215].mxu1  ;;  %v17781_v16 = vld [vmem:[#allocation405_spill] sm:$0xff] }
 0x63c   : > { %17777 = vst [vmem:[#allocation239_spill] sm:$0xff] %v14933_v58  ;;  %v14941_v17 = vadd.f32 %v6953_v21, %v14124_v14  ;;  %v6821_v26 = vadd.f32 %v6627_v15, %v6625_v24  ;;  %v6244_v35 = vmul.f32 %v5346_v45, %v14759_v30  ;;  %v6247_v34 = vmul.f32 %v5797_v3, %v14769_v23  ;;  %v17782_v14 = vld [vmem:[#allocation123_spill] sm:$0xff]  ;;  %v17783_v30 = vld [vmem:[#allocation408_spill] sm:$0xff]  ;;  %v17785_v15 = vld [vmem:[#allocation14_spill] sm:$0xff] }
 0x63d   : > { %7010 = vrot.lane.b32.xlu1 %v14933_v58, %s9305_s20  ;;  %v14953_v20 = vadd.f32 %v17781_v16, %v13992_v39  ;;  %v6630_v22 = vadd.f32 %v6246_v60, %v17782_v14  ;;  %v6245_v2 = vmul.f32 %v5348_v49, %v14765_v18  ;;  %v14961_v24 = vadd.f32 %v17783_v30, %v13982_v43  ;;  %v17784_v23 = vld [vmem:[#allocation407_spill] sm:$0xff]  ;;  %v17786_v50 = vld [vmem:[#allocation125_spill] sm:$0xff]  ;;  %v5801_v25 = vpop.f32.mrb[248].mxu0  ;;  %v17789_v14 = vld [vmem:[#allocation124_spill] sm:$0xff] }
 0x63e   : > { %17779 = vst [vmem:[#allocation240_spill] sm:$0xff] %v14941_v17  ;;  %7144 = vrot.lane.b32.xlu0 %v14941_v17, %s9306_s21  ;;  %v14965_v3 = vadd.f32 %v17784_v23, %v13976_v12  ;;  %v6628_v21 = vadd.f32 %v6244_v35, %v17785_v15  ;;  %v6631_v45 = vadd.f32 %v6247_v34, %v17786_v50  ;;  %v17788_v18 = vld [vmem:[#allocation409_spill] sm:$0xff]  ;;  %v5352_v23 = vpop.f32.mrb[216].mxu1  ;;  %v5803_v11 = vpop.f32.mrb[249].mxu0  ;;  %v17791_v35 = vld [vmem:[#allocation410_spill] sm:$0xff] }
 0x63f   : > { %v6955_v60 = vpop.permute.xlu1 %6954  ;;  %v14969_v16 = vadd.f32 %v6821_v26, %v6820_v5  ;;  %v14973_v49 = vadd.f32 %v17788_v18, %v13984_v62  ;;  %v6629_v17 = vadd.f32 %v6245_v2, %v17789_v14  ;;  %v6254_v30 = vmul.f32 %v5801_v25, %v14777_v59  ;;  %v5354_v26 = vpop.f32.mrb[217].mxu1  ;;  %v17792_v18 = vld [vmem:[#allocation413_spill] sm:$0xff]  ;;  %v17793_v25 = vld [vmem:[#allocation15_spill] sm:$0xff] }
 0x640   : > { %v14978_v58 = vadd.f32 %v6955_v60, %v14150_v47  ;;  %v14982_v34 = vadd.f32 %v17791_v35, %v13992_v39  ;;  %v6822_v15 = vadd.f32 %v6630_v22, %v6628_v21  ;;  %v6252_v5 = vmul.f32 %v5352_v23, %v14783_v19  ;;  %v17794_v22 = vld [vmem:[#allocation366_spill] sm:$0xff]  ;;  %v17795_v21 = vld [vmem:[#allocation127_spill] sm:$0xff]  ;;  %v17796_v23 = vld [vmem:[#allocation412_spill] sm:$0xff] }
 0x641   : > { %17787 = vst [vmem:[#allocation241_spill] sm:$0xff] %v14969_v16  ;;  %v6255_v50 = vmul.f32 %v5803_v11, %v14797_v8  ;;  %v14988_v2 = vadd.f32 %v17792_v18, %v13982_v43  ;;  %v6823_v59 = vadd.f32 %v6631_v45, %v6629_v17  ;;  %v6634_v47 = vadd.f32 %v6254_v30, %v17793_v25  ;;  %v5807_v11 = vpop.f32.mrb[250].mxu0  ;;  %v17797_v17 = vld [vmem:[#allocation414_spill] sm:$0xff] }
 0x642   : > { %17790 = vst [vmem:[#allocation242_spill] sm:$0xff] %v14978_v58  ;;  %v6253_v60 = vmul.f32 %v5354_v26, %v14791_v1  ;;  %7146 = vrot.lane.b32.xlu1 %v14978_v58, %s9306_s21  ;;  %7012 = vrot.lane.b32.xlu0 %v14969_v16, %s9305_s20  ;;  %v6632_v19 = vadd.f32 %v6252_v5, %v17794_v22  ;;  %v6957_v8 = vpop.permute.xlu0 %6956  ;;  %v17798_v1 = vld [vmem:[#allocation126_spill] sm:$0xff]  ;;  %v5358_v5 = vpop.f32.mrb[218].mxu1 }
 0x643   : > { %v6635_v14 = vadd.f32 %v6255_v50, %v17795_v21  ;;  %v15000_v35 = vadd.f32 %v17796_v23, %v13976_v12  ;;  %v15004_v45 = vadd.f32 %v17797_v17, %v13984_v62  ;;  %v6262_v26 = vmul.f32 %v5807_v11, %v14801_v61  ;;  %v5809_v25 = vpop.f32.mrb[251].mxu0  ;;  %v5360_v23 = vpop.f32.mrb[219].mxu1  ;;  %v17800_v17 = vld [vmem:[#allocation415_spill] sm:$0xff]  ;;  %v17804_v11 = vld [vmem:[#allocation418_spill] sm:$0xff] }
 0x644   : > { %v6633_v30 = vadd.f32 %v6253_v60, %v17798_v1  ;;  %v15009_v18 = vadd.f32 %v6957_v8, %v14180_v31  ;;  %v15011_v50 = vadd.f32 %v6823_v59, %v6822_v15  ;;  %v6824_v22 = vadd.f32 %v6634_v47, %v6632_v19  ;;  %v17801_v1 = vld [vmem:[#allocation371_spill] sm:$0xff]  ;;  %v17802_v15 = vld [vmem:[#allocation128_spill] sm:$0xff]  ;;  %v17803_v59 = vld [vmem:[#allocation129_spill] sm:$0xff] }
 0x645   : > { %v6260_v21 = vmul.f32 %v5358_v5, %v14809_v29  ;;  %v6263_v58 = vmul.f32 %v5809_v25, %v14823_v10  ;;  %v15017_v16 = vadd.f32 %v17800_v17, %v13992_v39  ;;  %v6638_v61 = vadd.f32 %v6262_v26, %v17801_v1  ;;  %v5813_v10 = vpop.f32.mrb[252].mxu0 }
 0x646   : > { %17799 = vst [vmem:[#allocation516_spill] sm:$0xff] %v15009_v18  ;;  %v6825_v60 = vadd.f32 %v6635_v14, %v6633_v30  ;;  %v6261_v31 = vmul.f32 %v5360_v23, %v14815_v27  ;;  %7148 = vrot.lane.b32.xlu0 %v15009_v18, %s9306_s21  ;;  %7014 = vrot.lane.b32.xlu1 %v15011_v50, %s9305_s20  ;;  %v6959_v19 = vpop.permute.xlu1 %6958  ;;  %v17805_v14 = vld [vmem:[#allocation417_spill] sm:$0xff]  ;;  %v17806_v27 = vld [vmem:[#allocation16_spill] sm:$0xff]  ;;  %v5815_v23 = vpop.f32.mrb[253].mxu0 }
 0x647   : > { %v6636_v29 = vadd.f32 %v6260_v21, %v17802_v15  ;;  %v6639_v47 = vadd.f32 %v6263_v58, %v17803_v59  ;;  %v15029_v8 = vadd.f32 %v17804_v11, %v13982_v43  ;;  %v15033_v30 = vadd.f32 %v17805_v14, %v13976_v12  ;;  %v5364_v21 = vpop.f32.mrb[220].mxu1  ;;  %v17808_v11 = vld [vmem:[#allocation419_spill] sm:$0xff] }
 0x648   : > { %v6637_v26 = vadd.f32 %v6261_v31, %v17806_v27  ;;  %v6270_v5 = vmul.f32 %v5813_v10, %v14829_v0  ;;  %v15038_v25 = vadd.f32 %v6959_v19, %v14210_v33  ;;  %v15040_v58 = vadd.f32 %v6825_v60, %v6824_v22  ;;  %v5366_v15 = vpop.f32.mrb[221].mxu1  ;;  %v17809_v27 = vld [vmem:[#allocation131_spill] sm:$0xff]  ;;  %v17810_v22 = vld [vmem:[#allocation130_spill] sm:$0xff]  ;;  %v17811_v60 = vld [vmem:[#allocation132_spill] sm:$0xff] }
 0x649   : > { %v6826_v17 = vadd.f32 %v6638_v61, %v6636_v29  ;;  %v6268_v1 = vmul.f32 %v5364_v21, %v14833_v52  ;;  %v6271_v59 = vmul.f32 %v5815_v23, %v14847_v6  ;;  %v15046_v14 = vadd.f32 %v17808_v11, %v13984_v62  ;;  %v5819_v6 = vpop.f32.mrb[254].mxu0  ;;  %v17812_v10 = vld [vmem:[#allocation420_spill] sm:$0xff] }
 0x64a   : > { %17807 = vst [vmem:[#allocation18_spill] sm:$0xff] %v15038_v25  ;;  %v6827_v31 = vadd.f32 %v6639_v47, %v6637_v26  ;;  %v6642_v0 = vadd.f32 %v6270_v5, %v17809_v27  ;;  %v6269_v33 = vmul.f32 %v5366_v15, %v14841_v38  ;;  %7150 = vrot.lane.b32.xlu1 %v15038_v25, %s9306_s21  ;;  %v6961_v29 = vpop.permute.xlu0 %6960  ;;  %v17813_v47 = vld [vmem:[#allocation423_spill] sm:$0xff]  ;;  %v17814_v38 = vld [vmem:[#allocation376_spill] sm:$0xff]  ;;  %v5821_v15 = vpop.f32.mrb[255].mxu0 }
 0x64b   : > { %7016 = vrot.lane.b32.xlu0 %v15040_v58, %s9305_s20  ;;  %v6640_v52 = vadd.f32 %v6268_v1, %v17810_v22  ;;  %v6643_v61 = vadd.f32 %v6271_v59, %v17811_v60  ;;  %v15058_v19 = vadd.f32 %v17812_v10, %v13992_v39  ;;  %v15062_v26 = vadd.f32 %v17813_v47, %v13982_v43  ;;  %v5370_v1 = vpop.f32.mrb[222].mxu1  ;;  %v17816_v10 = vld [vmem:[#allocation422_spill] sm:$0xff] }
 0x64c   : > { %v6641_v5 = vadd.f32 %v6269_v33, %v17814_v38  ;;  %v6278_v21 = vmul.f32 %v5819_v6, %v14855_v51  ;;  %v15067_v23 = vadd.f32 %v6961_v29, %v14240_v7  ;;  %v15069_v59 = vadd.f32 %v6827_v31, %v6826_v17  ;;  %v5372_v22 = vpop.f32.mrb[223].mxu1  ;;  %v17817_v38 = vld [vmem:[#allocation134_spill] sm:$0xff]  ;;  %v17818_v17 = vld [vmem:[#allocation133_spill] sm:$0xff]  ;;  %v17820_v6 = vld [vmem:[#allocation424_spill] sm:$0xff] }
 0x64d   : > { %v6828_v11 = vadd.f32 %v6642_v0, %v6640_v52  ;;  %v6276_v27 = vmul.f32 %v5370_v1, %v14861_v4  ;;  %v6279_v60 = vmul.f32 %v5821_v15, %v14873_v13  ;;  %v15075_v47 = vadd.f32 %v17816_v10, %v13976_v12  ;;  %v17819_v31 = vld [vmem:[#allocation381_spill] sm:$0xff]  ;;  %v5825_v13 = vpop.f32.mrb[0].mxu0 }
 0x64e   : > { %17815 = vst [vmem:[#allocation243_spill] sm:$0xff] %v15067_v23  ;;  %v6829_v33 = vadd.f32 %v6643_v61, %v6641_v5  ;;  %v6646_v51 = vadd.f32 %v6278_v21, %v17817_v38  ;;  %v6277_v7 = vmul.f32 %v5372_v22, %v14865_v56  ;;  %7018 = vrot.lane.b32.xlu1 %v15069_v59, %s9305_s20  ;;  %v6963_v52 = vpop.permute.xlu1 %6962  ;;  %v17821_v61 = vld [vmem:[#allocation425_spill] sm:$0xff]  ;;  %v17822_v56 = vld [vmem:[#allocation135_spill] sm:$0xff]  ;;  %v5827_v22 = vpop.f32.mrb[1].mxu0 }
 0x64f   : > { %7152 = vrot.lane.b32.xlu0 %v15067_v23, %s9306_s21  ;;  %v6644_v4 = vadd.f32 %v6276_v27, %v17818_v17  ;;  %v6647_v0 = vadd.f32 %v6279_v60, %v17819_v31  ;;  %v15087_v29 = vadd.f32 %v17820_v6, %v13984_v62  ;;  %v15091_v5 = vadd.f32 %v17821_v61, %v13992_v39  ;;  %v5376_v27 = vpop.f32.mrb[224].mxu1  ;;  %v17824_v6 = vld [vmem:[#allocation428_spill] sm:$0xff] }
 0x650   : > { %v6645_v21 = vadd.f32 %v6277_v7, %v17822_v56  ;;  %v6286_v1 = vmul.f32 %v5825_v13, %v14879_v46  ;;  %v15096_v15 = vadd.f32 %v6963_v52, %v14266_v37  ;;  %v15098_v60 = vadd.f32 %v6829_v33, %v6828_v11  ;;  %v5378_v17 = vpop.f32.mrb[225].mxu1  ;;  %v17825_v56 = vld [vmem:[#allocation136_spill] sm:$0xff]  ;;  %v17826_v11 = vld [vmem:[#allocation17_spill] sm:$0xff]  ;;  %v17827_v33 = vld [vmem:[#allocation138_spill] sm:$0xff] }
 0x651   : > { %v6830_v10 = vadd.f32 %v6646_v51, %v6644_v4  ;;  %v6284_v38 = vmul.f32 %v5376_v27, %v14887_v40  ;;  %v6287_v31 = vmul.f32 %v5827_v22, %v14897_v32  ;;  %v15104_v61 = vadd.f32 %v17824_v6, %v13982_v43  ;;  %v5831_v32 = vpop.f32.mrb[2].mxu0  ;;  %v17828_v13 = vld [vmem:[#allocation427_spill] sm:$0xff] }
 0x652   : > { %17823 = vst [vmem:[#allocation244_spill] sm:$0xff] %v15096_v15  ;;  %v6831_v7 = vadd.f32 %v6647_v0, %v6645_v21  ;;  %v6650_v46 = vadd.f32 %v6286_v1, %v17825_v56  ;;  %v6285_v37 = vmul.f32 %v5378_v17, %v14893_v42  ;;  %7154 = vrot.lane.b32.xlu1 %v15096_v15, %s9306_s21  ;;  %v6965_v4 = vpop.permute.xlu0 %6964  ;;  %v17829_v0 = vld [vmem:[#allocation429_spill] sm:$0xff]  ;;  %v5833_v17 = vpop.f32.mrb[3].mxu0 }
 0x653   : > { %7020 = vrot.lane.b32.xlu0 %v15098_v60, %s9305_s20  ;;  %v6648_v40 = vadd.f32 %v6284_v38, %v17826_v11  ;;  %v6651_v51 = vadd.f32 %v6287_v31, %v17827_v33  ;;  %v15116_v52 = vadd.f32 %v17828_v13, %v13976_v12  ;;  %v15120_v21 = vadd.f32 %v17829_v0, %v13984_v62  ;;  %v17830_v42 = vld [vmem:[#allocation137_spill] sm:$0xff]  ;;  %v5382_v38 = vpop.f32.mrb[226].mxu1  ;;  %v17831_v13 = vld [vmem:[#allocation430_spill] sm:$0xff] }
 0x654   : > { %v6649_v1 = vadd.f32 %v6285_v37, %v17830_v42  ;;  %v6294_v27 = vmul.f32 %v5831_v32, %v14905_v28  ;;  %v15125_v22 = vadd.f32 %v6965_v4, %v14292_v36  ;;  %v15127_v31 = vadd.f32 %v6831_v7, %v6830_v10  ;;  %v5384_v11 = vpop.f32.mrb[227].mxu1  ;;  %v17832_v42 = vld [vmem:[#allocation139_spill] sm:$0xff]  ;;  %v17833_v10 = vld [vmem:[#allocation386_spill] sm:$0xff]  ;;  %v17834_v7 = vld [vmem:[#allocation141_spill] sm:$0xff] }
 0x655   : > { %v6832_v6 = vadd.f32 %v6650_v46, %v6648_v40  ;;  %v6292_v56 = vmul.f32 %v5382_v38, %v14911_v54  ;;  %v6295_v33 = vmul.f32 %v5833_v17, %v14925_v48  ;;  %v15133_v0 = vadd.f32 %v17831_v13, %v13992_v39  ;;  %v5837_v48 = vpop.f32.mrb[4].mxu0  ;;  %v17835_v32 = vld [vmem:[#allocation433_spill] sm:$0xff] }
 0x656   : > { %v6833_v37 = vadd.f32 %v6651_v51, %v6649_v1  ;;  %v6654_v28 = vadd.f32 %v6294_v27, %v17832_v42  ;;  %v6293_v36 = vmul.f32 %v5384_v11, %v14919_v63  ;;  %7022 = vrot.lane.b32.xlu1 %v15127_v31, %s9305_s20  ;;  %v6967_v40 = vpop.permute.xlu1 %6966  ;;  %v15145_v4 = vadd.f32 %v17835_v32, %v13982_v43  ;;  %v17836_v51 = vld [vmem:[#allocation432_spill] sm:$0xff]  ;;  %v5839_v11 = vpop.f32.mrb[5].mxu0  ;;  %v17838_v32 = vld [vmem:[#allocation434_spill] sm:$0xff] }
 0x657   : > { %7156 = vrot.lane.b32.xlu0 %v15125_v22, %s9306_s21  ;;  %v6652_v54 = vadd.f32 %v6292_v56, %v17833_v10  ;;  %v6655_v46 = vadd.f32 %v6295_v33, %v17834_v7  ;;  %v15149_v1 = vadd.f32 %v17836_v51, %v13976_v12  ;;  %v17837_v63 = vld [vmem:[#allocation140_spill] sm:$0xff]  ;;  %v6302_v38 = vmul.f32 %v5837_v48, %v14929_v53  ;;  %v5388_v56 = vpop.f32.mrb[228].mxu1  ;;  %v17842_v48 = vld [vmem:[#allocation435_spill] sm:$0xff] }
 0x658   : > { %v6653_v27 = vadd.f32 %v6293_v36, %v17837_v63  ;;  %v15154_v17 = vadd.f32 %v6967_v40, %v14316_v41  ;;  %v15156_v33 = vadd.f32 %v6833_v37, %v6832_v6  ;;  %v6300_v42 = vmul.f32 %v5388_v56, %v14937_v9  ;;  %v5390_v10 = vpop.f32.mrb[229].mxu1  ;;  %v17839_v63 = vld [vmem:[#allocation391_spill] sm:$0xff]  ;;  %v17840_v6 = vld [vmem:[#allocation142_spill] sm:$0xff]  ;;  %v17841_v37 = vld [vmem:[#allocation144_spill] sm:$0xff] }
 0x659   : > { %v6834_v13 = vadd.f32 %v6654_v28, %v6652_v54  ;;  %v6303_v7 = vmul.f32 %v5839_v11, %v14953_v20  ;;  %v15162_v51 = vadd.f32 %v17838_v32, %v13984_v62  ;;  %v6658_v53 = vadd.f32 %v6302_v38, %v17839_v63  ;;  %v5843_v20 = vpop.f32.mrb[6].mxu0 }
 0x65a   : > { %v6835_v36 = vadd.f32 %v6655_v46, %v6653_v27  ;;  %v6301_v41 = vmul.f32 %v5390_v10, %v14945_v44  ;;  %7158 = vrot.lane.b32.xlu1 %v15154_v17, %s9306_s21  ;;  %v6656_v9 = vadd.f32 %v6300_v42, %v17840_v6  ;;  %v6969_v54 = vpop.permute.xlu0 %6968  ;;  %v15174_v40 = vadd.f32 %v17842_v48, %v13992_v39  ;;  %v17843_v46 = vld [vmem:[#allocation438_spill] sm:$0xff]  ;;  %v17844_v44 = vld [vmem:[#allocation143_spill] sm:$0xff]  ;;  %v5394_v42 = vpop.f32.mrb[230].mxu1  ;;  %v17845_v48 = vld [vmem:[#allocation437_spill] sm:$0xff] }
 0x65b   : > { %7024 = vrot.lane.b32.xlu0 %v15156_v33, %s9305_s20  ;;  %v6659_v28 = vadd.f32 %v6303_v7, %v17841_v37  ;;  %v15178_v27 = vadd.f32 %v17843_v46, %v13982_v43  ;;  %v6310_v56 = vmul.f32 %v5843_v20, %v14961_v24  ;;  %v15183_v11 = vadd.f32 %v6969_v54, %v14338_v57  ;;  %v5845_v10 = vpop.f32.mrb[7].mxu0  ;;  %v5396_v6 = vpop.f32.mrb[231].mxu1  ;;  %v17849_v20 = vld [vmem:[#allocation439_spill] sm:$0xff] }
 0x65c   : > { %v6657_v38 = vadd.f32 %v6301_v41, %v17844_v44  ;;  %v15185_v7 = vadd.f32 %v6835_v36, %v6834_v13  ;;  %v6836_v32 = vadd.f32 %v6658_v53, %v6656_v9  ;;  %v6308_v63 = vmul.f32 %v5394_v42, %v14965_v3  ;;  %v17846_v44 = vld [vmem:[#allocation146_spill] sm:$0xff]  ;;  %v17847_v13 = vld [vmem:[#allocation145_spill] sm:$0xff]  ;;  %v17848_v36 = vld [vmem:[#allocation147_spill] sm:$0xff] }
 0x65d   : > { %v6311_v37 = vmul.f32 %v5845_v10, %v14982_v34  ;;  %v15191_v46 = vadd.f32 %v17845_v48, %v13976_v12  ;;  %v6662_v24 = vadd.f32 %v6310_v56, %v17846_v44  ;;  %v6309_v57 = vmul.f32 %v5396_v6, %v14973_v49  ;;  %v5849_v34 = vpop.f32.mrb[8].mxu0  ;;  %v17851_v49 = vld [vmem:[#allocation396_spill] sm:$0xff] }
 0x65e   : > { %v6837_v41 = vadd.f32 %v6659_v28, %v6657_v38  ;;  %7026 = vrot.lane.b32.xlu1 %v15185_v7, %s9305_s20  ;;  %v6660_v3 = vadd.f32 %v6308_v63, %v17847_v13  ;;  %v6971_v9 = vpop.permute.xlu1 %6970  ;;  %v15203_v54 = vadd.f32 %v17849_v20, %v13984_v62  ;;  %v17850_v28 = vld [vmem:[#allocation440_spill] sm:$0xff]  ;;  %v6318_v42 = vmul.f32 %v5849_v34, %v14988_v2  ;;  %v5400_v63 = vpop.f32.mrb[232].mxu1  ;;  %v17852_v20 = vld [vmem:[#allocation443_spill] sm:$0xff]  ;;  %v17856_v34 = vld [vmem:[#allocation442_spill] sm:$0xff] }
 0x65f   : > { %7160 = vrot.lane.b32.xlu0 %v15183_v11, %s9306_s21  ;;  %v6663_v53 = vadd.f32 %v6311_v37, %v17848_v36  ;;  %v15207_v38 = vadd.f32 %v17850_v28, %v13992_v39  ;;  %v6661_v56 = vadd.f32 %v6309_v57, %v17851_v49  ;;  %v15212_v10 = vadd.f32 %v6971_v9, %v14359_v55  ;;  %v5851_v6 = vpop.f32.mrb[9].mxu0  ;;  %v5402_v13 = vpop.f32.mrb[233].mxu1  ;;  %v17853_v49 = vld [vmem:[#allocation149_spill] sm:$0xff] }
 0x660   : > { %v15214_v37 = vadd.f32 %v6837_v41, %v6836_v32  ;;  %v6838_v48 = vadd.f32 %v6662_v24, %v6660_v3  ;;  %v6316_v44 = vmul.f32 %v5400_v63, %v15000_v35  ;;  %v6319_v36 = vmul.f32 %v5851_v6, %v15017_v16  ;;  %v17854_v32 = vld [vmem:[#allocation148_spill] sm:$0xff]  ;;  %v17855_v41 = vld [vmem:[#allocation401_spill] sm:$0xff] }
 0x661   : > { %v15220_v28 = vadd.f32 %v17852_v20, %v13982_v43  ;;  %v6839_v57 = vadd.f32 %v6663_v53, %v6661_v56  ;;  %v6666_v2 = vadd.f32 %v6318_v42, %v17853_v49  ;;  %v6317_v55 = vmul.f32 %v5402_v13, %v15004_v45  ;;  %v5855_v16 = vpop.f32.mrb[10].mxu0  ;;  %v17857_v53 = vld [vmem:[#allocation444_spill] sm:$0xff]  ;;  %v17858_v45 = vld [vmem:[#allocation150_spill] sm:$0xff]  ;;  %v17859_v6 = vld [vmem:[#allocation225_spill] sm:$0xff] }
 0x662   : > { %7162 = vrot.lane.b32.xlu1 %v15212_v10, %s9306_s21  ;;  %v6664_v35 = vadd.f32 %v6316_v44, %v17854_v32  ;;  %v6667_v24 = vadd.f32 %v6319_v36, %v17855_v41  ;;  %v15232_v9 = vadd.f32 %v17856_v34, %v13976_v12  ;;  %v15236_v56 = vadd.f32 %v17857_v53, %v13984_v62  ;;  %v5406_v44 = vpop.f32.mrb[234].mxu1  ;;  %v5857_v20 = vpop.f32.mrb[11].mxu0  ;;  %v17860_v53 = vld [vmem:[#allocation445_spill] sm:$0xff] }
 0x663   : > { %7028 = vrot.lane.b32.xlu0 %v15214_v37, %s9305_s20  ;;  %v6973_v3 = vpop.permute.xlu0 %6972  ;;  %v6665_v42 = vadd.f32 %v6317_v55, %v17858_v45  ;;  %v6326_v63 = vmul.f32 %v5855_v16, %v15029_v8  ;;  %v15243_v36 = vadd.f32 %v6839_v57, %v6838_v48  ;;  %v6324_v32 = vmul.f32 %v5406_v44, %v15033_v30  ;;  %v5408_v41 = vpop.f32.mrb[235].mxu1  ;;  %v17861_v45 = vld [vmem:[#allocation152_spill] sm:$0xff]  ;;  %v17862_v48 = vld [vmem:[#allocation151_spill] sm:$0xff]  ;;  %v17863_v57 = vld [vmem:[#allocation154_spill] sm:$0xff] }
 0x664   : > { %v15241_v13 = vadd.f32 %v6973_v3, %v17859_v6  ;;  %v6840_v49 = vadd.f32 %v6666_v2, %v6664_v35  ;;  %v6327_v34 = vmul.f32 %v5857_v20, %v15058_v19  ;;  %v15249_v23 = vadd.f32 %v17860_v53, %v13992_v39  ;;  %v17864_v3 = vld [vmem:[#allocation448_spill] sm:$0xff]  ;;  %v17867_v20 = vld [vmem:[#allocation226_spill] sm:$0xff] }
 0x665   : > { %v6841_v55 = vadd.f32 %v6667_v24, %v6665_v42  ;;  %v6670_v8 = vadd.f32 %v6326_v63, %v17861_v45  ;;  %v6325_v16 = vmul.f32 %v5408_v41, %v15046_v14  ;;  %v6668_v30 = vadd.f32 %v6324_v32, %v17862_v48  ;;  %v5861_v19 = vpop.f32.mrb[12].mxu0  ;;  %v17865_v24 = vld [vmem:[#allocation447_spill] sm:$0xff]  ;;  %v17866_v14 = vld [vmem:[#allocation153_spill] sm:$0xff]  ;;  %v5412_v32 = vpop.f32.mrb[236].mxu1 }
 0x666   : > { %7030 = vrot.lane.b32.xlu1 %v15243_v36, %s9305_s20  ;;  %v6671_v2 = vadd.f32 %v6327_v34, %v17863_v57  ;;  %v15261_v6 = vadd.f32 %v17864_v3, %v13982_v43  ;;  %v15265_v42 = vadd.f32 %v17865_v24, %v13976_v12  ;;  %v6334_v44 = vmul.f32 %v5861_v19, %v15062_v26  ;;  %v5863_v53 = vpop.f32.mrb[13].mxu0  ;;  %v5414_v57 = vpop.f32.mrb[237].mxu1  ;;  %v17868_v24 = vld [vmem:[#allocation449_spill] sm:$0xff] }
 0x667   : > { %7164 = vrot.lane.b32.xlu0 %v15241_v13, %s9306_s21  ;;  %v6975_v35 = vpop.permute.xlu1 %6974  ;;  %v6669_v63 = vadd.f32 %v6325_v16, %v17866_v14  ;;  %v15272_v34 = vadd.f32 %v6841_v55, %v6840_v49  ;;  %v6842_v45 = vadd.f32 %v6670_v8, %v6668_v30  ;;  %v6332_v48 = vmul.f32 %v5412_v32, %v15075_v47  ;;  %v17869_v14 = vld [vmem:[#allocation155_spill] sm:$0xff]  ;;  %v17870_v49 = vld [vmem:[#allocation406_spill] sm:$0xff]  ;;  %v17871_v55 = vld [vmem:[#allocation157_spill] sm:$0xff] }
 0x668   : > { %v15270_v41 = vadd.f32 %v6975_v35, %v17867_v20  ;;  %v6335_v3 = vmul.f32 %v5863_v53, %v15091_v5  ;;  %v15278_v15 = vadd.f32 %v17868_v24, %v13984_v62  ;;  %v6674_v26 = vadd.f32 %v6334_v44, %v17869_v14  ;;  %v17872_v35 = vld [vmem:[#allocation450_spill] sm:$0xff]  ;;  %v17875_v53 = vld [vmem:[#allocation496_spill] sm:$0xff] }
 0x669   : > { %v6843_v16 = vadd.f32 %v6671_v2, %v6669_v63  ;;  %v6333_v19 = vmul.f32 %v5414_v57, %v15087_v29  ;;  %v6672_v47 = vadd.f32 %v6332_v48, %v17870_v49  ;;  %v5867_v5 = vpop.f32.mrb[14].mxu0  ;;  %v15290_v20 = vadd.f32 %v17872_v35, %v13992_v39  ;;  %v17873_v2 = vld [vmem:[#allocation453_spill] sm:$0xff]  ;;  %v17874_v29 = vld [vmem:[#allocation156_spill] sm:$0xff]  ;;  %v5418_v48 = vpop.f32.mrb[238].mxu1 }
 0x66a   : > { %7166 = vrot.lane.b32.xlu1 %v15270_v41, %s9306_s21  ;;  %v6675_v8 = vadd.f32 %v6335_v3, %v17871_v55  ;;  %v15294_v63 = vadd.f32 %v17873_v2, %v13982_v43  ;;  %v6342_v32 = vmul.f32 %v5867_v5, %v15104_v61  ;;  %v5869_v24 = vpop.f32.mrb[15].mxu0  ;;  %v6340_v49 = vmul.f32 %v5418_v48, %v15116_v52  ;;  %v5420_v55 = vpop.f32.mrb[239].mxu1  ;;  %v17876_v2 = vld [vmem:[#allocation452_spill] sm:$0xff] }
 0x66b   : > { %7032 = vrot.lane.b32.xlu0 %v15272_v34, %s9305_s20  ;;  %v6977_v30 = vpop.permute.xlu0 %6976  ;;  %v6673_v44 = vadd.f32 %v6333_v19, %v17874_v29  ;;  %v15301_v3 = vadd.f32 %v6843_v16, %v6842_v45  ;;  %v6844_v14 = vadd.f32 %v6674_v26, %v6672_v47  ;;  %v6343_v35 = vmul.f32 %v5869_v24, %v15133_v0  ;;  %v17877_v29 = vld [vmem:[#allocation411_spill] sm:$0xff]  ;;  %v17878_v45 = vld [vmem:[#allocation158_spill] sm:$0xff]  ;;  %v17879_v16 = vld [vmem:[#allocation160_spill] sm:$0xff] }
 0x66c   : > { %v15299_v57 = vadd.f32 %v6977_v30, %v17875_v53  ;;  %v15307_v18 = vadd.f32 %v17876_v2, %v13976_v12  ;;  %v6678_v61 = vadd.f32 %v6342_v32, %v17877_v29  ;;  %v6341_v5 = vmul.f32 %v5420_v55, %v15120_v21  ;;  %v17880_v30 = vld [vmem:[#allocation454_spill] sm:$0xff]  ;;  %v17882_v21 = vld [vmem:[#allocation159_spill] sm:$0xff] }
 0x66d   : > { %v6845_v19 = vadd.f32 %v6675_v8, %v6673_v44  ;;  %v6676_v52 = vadd.f32 %v6340_v49, %v17878_v45  ;;  %v6679_v26 = vadd.f32 %v6343_v35, %v17879_v16  ;;  %v5873_v0 = vpop.f32.mrb[16].mxu0  ;;  %v15319_v53 = vadd.f32 %v17880_v30, %v13984_v62  ;;  %v17881_v8 = vld [vmem:[#allocation455_spill] sm:$0xff]  ;;  %v5424_v49 = vpop.f32.mrb[240].mxu1 }
 0x66e   : > { %7034 = vrot.lane.b32.xlu1 %v15301_v3, %s9305_s20  ;;  %v15323_v44 = vadd.f32 %v17881_v8, %v13992_v39  ;;  %v6677_v32 = vadd.f32 %v6341_v5, %v17882_v21  ;;  %v6350_v48 = vmul.f32 %v5873_v0, %v15145_v4  ;;  %v17883_v24 = vld [vmem:[#allocation227_spill] sm:$0xff]  ;;  %v5875_v2 = vpop.f32.mrb[17].mxu0  ;;  %v6348_v45 = vmul.f32 %v5424_v49, %v15149_v1  ;;  %v5426_v16 = vpop.f32.mrb[241].mxu1  ;;  %v17885_v8 = vld [vmem:[#allocation458_spill] sm:$0xff] }
 0x66f   : > { %7168 = vrot.lane.b32.xlu0 %v15299_v57, %s9306_s21  ;;  %v6979_v47 = vpop.permute.xlu1 %6978  ;;  %v15330_v35 = vadd.f32 %v6845_v19, %v6844_v14  ;;  %v6846_v29 = vadd.f32 %v6678_v61, %v6676_v52  ;;  %v6351_v30 = vmul.f32 %v5875_v2, %v15174_v40  ;;  %v15336_v25 = vadd.f32 %v17885_v8, %v13982_v43  ;;  %v17886_v21 = vld [vmem:[#allocation162_spill] sm:$0xff]  ;;  %v17887_v14 = vld [vmem:[#allocation161_spill] sm:$0xff]  ;;  %v17888_v19 = vld [vmem:[#allocation163_spill] sm:$0xff] }
 0x670   : > { %v15328_v55 = vadd.f32 %v6979_v47, %v17883_v24  ;;  %v6847_v5 = vadd.f32 %v6679_v26, %v6677_v32  ;;  %v6682_v4 = vadd.f32 %v6350_v48, %v17886_v21  ;;  %v6349_v0 = vmul.f32 %v5426_v16, %v15162_v51  ;;  %v17889_v47 = vld [vmem:[#allocation457_spill] sm:$0xff]  ;;  %v17890_v26 = vld [vmem:[#allocation459_spill] sm:$0xff]  ;;  %v17891_v51 = vld [vmem:[#allocation416_spill] sm:$0xff] }
 0x671   : > { %17884 = vst [vmem:[#allocation245_spill] sm:$0xff] %v15330_v35  ;;  %v6680_v1 = vadd.f32 %v6348_v45, %v17887_v14  ;;  %v6683_v61 = vadd.f32 %v6351_v30, %v17888_v19  ;;  %v5879_v40 = vpop.f32.mrb[18].mxu0  ;;  %v15348_v24 = vadd.f32 %v17889_v47, %v13976_v12  ;;  %v15352_v32 = vadd.f32 %v17890_v26, %v13984_v62  ;;  %v17892_v2 = vld [vmem:[#allocation228_spill] sm:$0xff]  ;;  %v5430_v45 = vpop.f32.mrb[242].mxu1 }
 0x672   : > { %7170 = vrot.lane.b32.xlu1 %v15328_v55, %s9306_s21  ;;  %v6681_v48 = vadd.f32 %v6349_v0, %v17891_v51  ;;  %v6358_v49 = vmul.f32 %v5879_v40, %v15178_v27  ;;  %v5881_v8 = vpop.f32.mrb[19].mxu0  ;;  %v15359_v30 = vadd.f32 %v6847_v5, %v6846_v29  ;;  %v6356_v14 = vmul.f32 %v5430_v45, %v15191_v46  ;;  %v5432_v19 = vpop.f32.mrb[243].mxu1  ;;  %v17894_v26 = vld [vmem:[#allocation460_spill] sm:$0xff]  ;;  %v17895_v51 = vld [vmem:[#allocation165_spill] sm:$0xff] }
 0x673   : > { %7036 = vrot.lane.b32.xlu0 %v15330_v35, %s9305_s20  ;;  %v6981_v52 = vpop.permute.xlu0 %6980  ;;  %v6848_v21 = vadd.f32 %v6682_v4, %v6680_v1  ;;  %v6359_v47 = vmul.f32 %v5881_v8, %v15207_v38  ;;  %v15365_v35 = vadd.f32 %v17894_v26, %v13992_v39  ;;  %v6357_v40 = vmul.f32 %v5432_v19, %v15203_v54  ;;  %v17896_v29 = vld [vmem:[#allocation164_spill] sm:$0xff]  ;;  %v17897_v5 = vld [vmem:[#allocation421_spill] sm:$0xff]  ;;  %v17900_v54 = vld [vmem:[#allocation166_spill] sm:$0xff] }
 0x674   : > { %v15357_v16 = vadd.f32 %v6981_v52, %v17892_v2  ;;  %v6849_v0 = vadd.f32 %v6683_v61, %v6681_v48  ;;  %v6686_v27 = vadd.f32 %v6358_v49, %v17895_v51  ;;  %v6684_v46 = vadd.f32 %v6356_v14, %v17896_v29  ;;  %v17898_v52 = vld [vmem:[#allocation463_spill] sm:$0xff]  ;;  %v17899_v61 = vld [vmem:[#allocation462_spill] sm:$0xff]  ;;  %v17901_v8 = vld [vmem:[#allocation229_spill] sm:$0xff] }
 0x675   : > { %v6687_v4 = vadd.f32 %v6359_v47, %v17897_v5  ;;  %v5885_v38 = vpop.f32.mrb[20].mxu0  ;;  %v15377_v2 = vadd.f32 %v17898_v52, %v13982_v43  ;;  %v15381_v48 = vadd.f32 %v17899_v61, %v13976_v12  ;;  %v6685_v49 = vadd.f32 %v6357_v40, %v17900_v54  ;;  %v5436_v14 = vpop.f32.mrb[244].mxu1  ;;  %v17903_v61 = vld [vmem:[#allocation464_spill] sm:$0xff] }
 0x676   : > { %17893 = vst [vmem:[#allocation19_spill] sm:$0xff] %v15357_v16  ;;  %7038 = vrot.lane.b32.xlu1 %v15359_v30, %s9305_s20  ;;  %v6366_v45 = vmul.f32 %v5885_v38, %v15220_v28  ;;  %v5887_v26 = vpop.f32.mrb[21].mxu0  ;;  %v15388_v47 = vadd.f32 %v6849_v0, %v6848_v21  ;;  %v6850_v51 = vadd.f32 %v6686_v27, %v6684_v46  ;;  %v5438_v5 = vpop.f32.mrb[245].mxu1  ;;  %v17904_v54 = vld [vmem:[#allocation168_spill] sm:$0xff]  ;;  %v17905_v21 = vld [vmem:[#allocation167_spill] sm:$0xff]  ;;  %v17906_v0 = vld [vmem:[#allocation170_spill] sm:$0xff] }
 0x677   : > { %7172 = vrot.lane.b32.xlu0 %v15357_v16, %s9306_s21  ;;  %v6983_v1 = vpop.permute.xlu1 %6982  ;;  %v6364_v29 = vmul.f32 %v5436_v14, %v15232_v9  ;;  %v6367_v52 = vmul.f32 %v5887_v26, %v15249_v23  ;;  %v15394_v16 = vadd.f32 %v17903_v61, %v13984_v62  ;;  %v6851_v40 = vadd.f32 %v6687_v4, %v6685_v49  ;;  %v17908_v4 = vld [vmem:[#allocation468_spill] sm:$0xff]  ;;  %v17910_v26 = vld [vmem:[#allocation230_spill] sm:$0xff] }
 0x678   : > { %v15386_v19 = vadd.f32 %v6983_v1, %v17901_v8  ;;  %17902 = vst [vmem:[#allocation522_spill] sm:$0xff] %v15388_v47  ;;  %v6690_v28 = vadd.f32 %v6366_v45, %v17904_v54  ;;  %v6365_v38 = vmul.f32 %v5438_v5, %v15236_v56  ;;  %v17907_v1 = vld [vmem:[#allocation465_spill] sm:$0xff]  ;;  %v15410_v49 = vadd.f32 %v17908_v4, %v13982_v43  ;;  %v17912_v4 = vld [vmem:[#allocation467_spill] sm:$0xff] }
 0x679   : > { %v6688_v9 = vadd.f32 %v6364_v29, %v17905_v21  ;;  %v6691_v27 = vadd.f32 %v6367_v52, %v17906_v0  ;;  %v5891_v23 = vpop.f32.mrb[22].mxu0  ;;  %v15406_v8 = vadd.f32 %v17907_v1, %v13992_v39  ;;  %v17909_v56 = vld [vmem:[#allocation169_spill] sm:$0xff]  ;;  %v5442_v29 = vpop.f32.mrb[246].mxu1  ;;  %v15417_v52 = vadd.f32 %v6851_v40, %v6850_v51  ;;  %v17914_v51 = vld [vmem:[#allocation426_spill] sm:$0xff] }
 0x67a   : > { %7174 = vrot.lane.b32.xlu1 %v15386_v19, %s9306_s21  ;;  %v6689_v45 = vadd.f32 %v6365_v38, %v17909_v56  ;;  %v6374_v14 = vmul.f32 %v5891_v23, %v15261_v6  ;;  %v5893_v61 = vpop.f32.mrb[23].mxu0  ;;  %v6372_v21 = vmul.f32 %v5442_v29, %v15265_v42  ;;  %v5444_v0 = vpop.f32.mrb[247].mxu1  ;;  %v17913_v56 = vld [vmem:[#allocation171_spill] sm:$0xff]  ;;  %v17915_v40 = vld [vmem:[#allocation173_spill] sm:$0xff] }
 0x67b   : > { %7040 = vrot.lane.b32.xlu0 %v15388_v47, %s9305_s20  ;;  %v6985_v46 = vpop.permute.xlu0 %6984  ;;  %v6852_v54 = vadd.f32 %v6690_v28, %v6688_v9  ;;  %v6375_v1 = vmul.f32 %v5893_v61, %v15290_v20  ;;  %v15423_v47 = vadd.f32 %v17912_v4, %v13976_v12  ;;  %v6373_v23 = vmul.f32 %v5444_v0, %v15278_v15  ;;  %v17918_v15 = vld [vmem:[#allocation172_spill] sm:$0xff]  ;;  %v17919_v61 = vld [vmem:[#allocation501_spill] sm:$0xff] }
 0x67c   : > { %v15415_v5 = vadd.f32 %v6985_v46, %v17910_v26  ;;  %v6853_v38 = vadd.f32 %v6691_v27, %v6689_v45  ;;  %v6694_v6 = vadd.f32 %v6374_v14, %v17913_v56  ;;  %v6692_v42 = vadd.f32 %v6372_v21, %v17914_v51  ;;  %v17916_v46 = vld [vmem:[#allocation469_spill] sm:$0xff]  ;;  %v17917_v27 = vld [vmem:[#allocation470_spill] sm:$0xff] }
 0x67d   : > { %v6695_v28 = vadd.f32 %v6375_v1, %v17915_v40  ;;  %v5897_v20 = vpop.f32.mrb[24].mxu0  ;;  %v15435_v26 = vadd.f32 %v17916_v46, %v13984_v62  ;;  %v15439_v45 = vadd.f32 %v17917_v27, %v13992_v39  ;;  %v6693_v14 = vadd.f32 %v6373_v23, %v17918_v15  ;;  %v5448_v21 = vpop.f32.mrb[248].mxu1  ;;  %v17921_v27 = vld [vmem:[#allocation473_spill] sm:$0xff]  ;;  %v17922_v15 = vld [vmem:[#allocation431_spill] sm:$0xff] }
 0x67e   : > { %17911 = vst [vmem:[#allocation246_spill] sm:$0xff] %v15415_v5  ;;  %7042 = vrot.lane.b32.xlu1 %v15417_v52, %s9305_s20  ;;  %v6382_v29 = vmul.f32 %v5897_v20, %v15294_v63  ;;  %v5899_v4 = vpop.f32.mrb[25].mxu0  ;;  %v15446_v1 = vadd.f32 %v6853_v38, %v6852_v54  ;;  %v6854_v56 = vadd.f32 %v6694_v6, %v6692_v42  ;;  %v5450_v40 = vpop.f32.mrb[249].mxu1  ;;  %v17923_v54 = vld [vmem:[#allocation174_spill] sm:$0xff]  ;;  %v17924_v38 = vld [vmem:[#allocation176_spill] sm:$0xff] }
 0x67f   : > { %7176 = vrot.lane.b32.xlu0 %v15415_v5, %s9306_s21  ;;  %v6987_v9 = vpop.permute.xlu0 %6986  ;;  %v6380_v51 = vmul.f32 %v5448_v21, %v15307_v18  ;;  %v6383_v46 = vmul.f32 %v5899_v4, %v15323_v44  ;;  %v15452_v5 = vadd.f32 %v17921_v27, %v13982_v43  ;;  %v6855_v23 = vadd.f32 %v6695_v28, %v6693_v14  ;;  %v17926_v28 = vld [vmem:[#allocation474_spill] sm:$0xff]  ;;  %v17928_v4 = vld [vmem:[#allocation231_spill] sm:$0xff] }
 0x680   : > { %v15444_v0 = vadd.f32 %v6987_v9, %v17919_v61  ;;  %17920 = vst [vmem:[#allocation247_spill] sm:$0xff] %v15446_v1  ;;  %v6698_v63 = vadd.f32 %v6382_v29, %v17922_v15  ;;  %v6381_v20 = vmul.f32 %v5450_v40, %v15319_v53  ;;  %v17925_v9 = vld [vmem:[#allocation472_spill] sm:$0xff]  ;;  %v15468_v14 = vadd.f32 %v17926_v28, %v13984_v62  ;;  %v17927_v53 = vld [vmem:[#allocation175_spill] sm:$0xff] }
 0x681   : > { %v6696_v18 = vadd.f32 %v6380_v51, %v17923_v54  ;;  %v6699_v6 = vadd.f32 %v6383_v46, %v17924_v38  ;;  %v5903_v44 = vpop.f32.mrb[26].mxu0  ;;  %v15464_v61 = vadd.f32 %v17925_v9, %v13976_v12  ;;  %v5454_v51 = vpop.f32.mrb[250].mxu1  ;;  %v15475_v46 = vadd.f32 %v6855_v23, %v6854_v56  ;;  %v17930_v28 = vld [vmem:[#allocation475_spill] sm:$0xff]  ;;  %v17932_v56 = vld [vmem:[#allocation177_spill] sm:$0xff] }
 0x682   : > { %7178 = vrot.lane.b32.xlu1 %v15444_v0, %s9306_s21  ;;  %v6697_v29 = vadd.f32 %v6381_v20, %v17927_v53  ;;  %v6390_v21 = vmul.f32 %v5903_v44, %v15336_v25  ;;  %v5905_v27 = vpop.f32.mrb[27].mxu0  ;;  %v6388_v54 = vmul.f32 %v5454_v51, %v15348_v24  ;;  %v5456_v38 = vpop.f32.mrb[251].mxu1  ;;  %v17931_v53 = vld [vmem:[#allocation178_spill] sm:$0xff]  ;;  %v17933_v23 = vld [vmem:[#allocation179_spill] sm:$0xff] }
 0x683   : > { %7044 = vrot.lane.b32.xlu0 %v15446_v1, %s9305_s20  ;;  %v6989_v42 = vpop.permute.xlu0 %6988  ;;  %17929 = vst [vmem:[#allocation248_spill] sm:$0xff] %v15475_v46  ;;  %v6856_v15 = vadd.f32 %v6698_v63, %v6696_v18  ;;  %v6391_v9 = vmul.f32 %v5905_v27, %v15365_v35  ;;  %v15481_v1 = vadd.f32 %v17930_v28, %v13992_v39  ;;  %v17937_v27 = vld [vmem:[#allocation232_spill] sm:$0xff] }
 0x684   : > { %v15473_v40 = vadd.f32 %v6989_v42, %v17928_v4  ;;  %v6857_v20 = vadd.f32 %v6699_v6, %v6697_v29  ;;  %v6702_v25 = vadd.f32 %v6390_v21, %v17931_v53  ;;  %v6389_v44 = vmul.f32 %v5456_v38, %v15352_v32  ;;  %v17934_v42 = vld [vmem:[#allocation478_spill] sm:$0xff]  ;;  %v17935_v6 = vld [vmem:[#allocation477_spill] sm:$0xff]  ;;  %v17936_v32 = vld [vmem:[#allocation436_spill] sm:$0xff] }
 0x685   : > { %v6700_v24 = vadd.f32 %v6388_v54, %v17932_v56  ;;  %v6703_v63 = vadd.f32 %v6391_v9, %v17933_v23  ;;  %v5909_v35 = vpop.f32.mrb[28].mxu0  ;;  %v15493_v4 = vadd.f32 %v17934_v42, %v13982_v43  ;;  %v15497_v29 = vadd.f32 %v17935_v6, %v13976_v12  ;;  %v5460_v54 = vpop.f32.mrb[252].mxu1  ;;  %v17939_v6 = vld [vmem:[#allocation479_spill] sm:$0xff] }
 0x686   : > { %7046 = vrot.lane.b32.xlu1 %v15475_v46, %s9305_s20  ;;  %v6701_v21 = vadd.f32 %v6389_v44, %v17936_v32  ;;  %v6398_v51 = vmul.f32 %v5909_v35, %v15377_v2  ;;  %v5911_v28 = vpop.f32.mrb[29].mxu0  ;;  %v15504_v9 = vadd.f32 %v6857_v20, %v6856_v15  ;;  %v6396_v56 = vmul.f32 %v5460_v54, %v15381_v48  ;;  %v5462_v23 = vpop.f32.mrb[253].mxu1  ;;  %v17940_v32 = vld [vmem:[#allocation181_spill] sm:$0xff]  ;;  %v17941_v15 = vld [vmem:[#allocation180_spill] sm:$0xff] }
 0x687   : > { %7180 = vrot.lane.b32.xlu0 %v15473_v40, %s9306_s21  ;;  %v6991_v18 = vpop.permute.xlu1 %6990  ;;  %v6858_v53 = vadd.f32 %v6702_v25, %v6700_v24  ;;  %v6399_v42 = vmul.f32 %v5911_v28, %v15406_v8  ;;  %v15510_v46 = vadd.f32 %v17939_v6, %v13984_v62  ;;  %v6397_v35 = vmul.f32 %v5462_v23, %v15394_v16  ;;  %v17942_v20 = vld [vmem:[#allocation441_spill] sm:$0xff]  ;;  %v17945_v16 = vld [vmem:[#allocation182_spill] sm:$0xff] }
 0x688   : > { %v15502_v38 = vadd.f32 %v6991_v18, %v17937_v27  ;;  %17938 = vst [vmem:[#allocation249_spill] sm:$0xff] %v15504_v9  ;;  %v6859_v44 = vadd.f32 %v6703_v63, %v6701_v21  ;;  %v6706_v2 = vadd.f32 %v6398_v51, %v17940_v32  ;;  %v6704_v48 = vadd.f32 %v6396_v56, %v17941_v15  ;;  %v17943_v18 = vld [vmem:[#allocation480_spill] sm:$0xff]  ;;  %v17944_v63 = vld [vmem:[#allocation483_spill] sm:$0xff]  ;;  %v17946_v28 = vld [vmem:[#allocation233_spill] sm:$0xff] }
 0x689   : > { %v6707_v25 = vadd.f32 %v6399_v42, %v17942_v20  ;;  %v5915_v8 = vpop.f32.mrb[30].mxu0  ;;  %v3773_v27 = vadd.f32 %v17943_v18, %v13992_v39  ;;  %v15524_v21 = vadd.f32 %v17944_v63, %v13982_v43  ;;  %v6705_v51 = vadd.f32 %v6397_v35, %v17945_v16  ;;  %v5466_v6 = vpop.f32.mrb[254].mxu1  ;;  %v17949_v63 = vld [vmem:[#allocation482_spill] sm:$0xff]  ;;  %v17950_v16 = vld [vmem:[#allocation184_spill] sm:$0xff] }
 0x68a   : > { %7182 = vrot.lane.b32.xlu1 %v15502_v38, %s9306_s21  ;;  %v6406_v54 = vmul.f32 %v5915_v8, %v15410_v49  ;;  %v5917_v56 = vpop.f32.mrb[31].mxu0  ;;  %v15531_v32 = vadd.f32 %v6859_v44, %v6858_v53  ;;  %v6860_v42 = vadd.f32 %v6706_v2, %v6704_v48  ;;  %v6404_v15 = vmul.f32 %v5466_v6, %v15423_v47  ;;  %v5468_v20 = vpop.f32.mrb[255].mxu1  ;;  %v17951_v53 = vld [vmem:[#allocation183_spill] sm:$0xff]  ;;  %v17952_v44 = vld [vmem:[#allocation186_spill] sm:$0xff] }
 0x68b   : > { %7048 = vrot.lane.b32.xlu0 %v15504_v9, %s9305_s20  ;;  %v6993_v24 = vpop.permute.xlu0 %6992  ;;  %v6407_v18 = vmul.f32 %v5917_v56, %v15439_v45  ;;  %v15537_v9 = vadd.f32 %v17949_v63, %v13976_v12  ;;  %v6861_v35 = vadd.f32 %v6707_v25, %v6705_v51  ;;  %v6405_v8 = vmul.f32 %v5468_v20, %v15435_v26  ;;  %v17954_v25 = vld [vmem:[#allocation485_spill] sm:$0xff]  ;;  %v17956_v56 = vld [vmem:[#allocation234_spill] sm:$0xff] }
 0x68c   : > { %v15529_v23 = vadd.f32 %v6993_v24, %v17946_v28  ;;  %17948 = vst [vmem:[#allocation251_spill] sm:$0xff] %v15531_v32  ;;  %v6710_v49 = vadd.f32 %v6406_v54, %v17950_v16  ;;  %v6708_v47 = vadd.f32 %v6404_v15, %v17951_v53  ;;  %v17953_v24 = vld [vmem:[#allocation484_spill] sm:$0xff]  ;;  %v3779_v51 = vadd.f32 %v17954_v25, %v13992_v39  ;;  %v17955_v54 = vld [vmem:[#allocation185_spill] sm:$0xff] }
 0x68d   : > { %v6711_v2 = vadd.f32 %v6407_v18, %v17952_v44  ;;  %v3330_v28 = vadd.f32 %v17953_v24, %v13984_v62  ;;  %v6709_v26 = vadd.f32 %v6405_v8, %v17955_v54  ;;  %v5472_v63 = vpop.f32.mrb[0].mxu1  ;;  %v15556_v15 = vadd.f32 %v6861_v35, %v6860_v42  ;;  %v17960_v8 = vld [vmem:[#allocation187_spill] sm:$0xff]  ;;  %v17961_v42 = vld [vmem:[#allocation446_spill] sm:$0xff] }
 0x68e   : > { %17947 = vst [vmem:[#allocation250_spill] sm:$0xff] %v15529_v23  ;;  %7050 = vrot.lane.b32.xlu1 %v15531_v32, %s9305_s20  ;;  %v5921_v45 = vpop.f32.mrb[32].mxu0  ;;  %v6862_v18 = vadd.f32 %v6710_v49, %v6708_v47  ;;  %v6412_v53 = vmul.f32 %v5472_v63, %v15464_v61  ;;  %v5474_v44 = vpop.f32.mrb[1].mxu1  ;;  %v17962_v61 = vld [vmem:[#allocation189_spill] sm:$0xff] }
 0x68f   : > { %7184 = vrot.lane.b32.xlu0 %v15529_v23, %s9306_s21  ;;  %v6995_v48 = vpop.permute.xlu1 %6994  ;;  %v6414_v6 = vmul.f32 %v5921_v45, %v15452_v5  ;;  %v5923_v16 = vpop.f32.mrb[33].mxu0  ;;  %17958 = vst [vmem:[#allocation253_spill] sm:$0xff] %v15556_v15  ;;  %v17959_v23 = vld [vmem:[#allocation488_spill] sm:$0xff]  ;;  %v6863_v32 = vadd.f32 %v6711_v2, %v6709_v26  ;;  %v6413_v5 = vmul.f32 %v5474_v44, %v15468_v14  ;;  %v17963_v45 = vld [vmem:[#allocation487_spill] sm:$0xff]  ;;  %v17964_v2 = vld [vmem:[#allocation489_spill] sm:$0xff] }
 0x690   : > { %v15554_v20 = vadd.f32 %v6995_v48, %v17956_v56  ;;  %v6415_v24 = vmul.f32 %v5923_v16, %v15481_v1  ;;  %v3783_v25 = vadd.f32 %v17959_v23, %v13982_v43  ;;  %v6712_v35 = vadd.f32 %v6412_v53, %v17961_v42  ;;  %v17965_v26 = vld [vmem:[#allocation188_spill] sm:$0xff]  ;;  %v17966_v56 = vld [vmem:[#allocation506_spill] sm:$0xff] }
 0x691   : > { %v6714_v54 = vadd.f32 %v6414_v6, %v17960_v8  ;;  %v3334_v23 = vadd.f32 %v17963_v45, %v13976_v12  ;;  %v3336_v48 = vadd.f32 %v17964_v2, %v13984_v62  ;;  %v6713_v14 = vadd.f32 %v6413_v5, %v17965_v26  ;;  %v17969_v45 = vld [vmem:[#allocation490_spill] sm:$0xff]  ;;  %v17975_v26 = vld [vmem:[#allocation191_spill] sm:$0xff] }
 0x692   : > { %17957 = vst [vmem:[#allocation252_spill] sm:$0xff] %v15554_v20  ;;  %7186 = vrot.lane.b32.xlu1 %v15554_v20, %s9306_s21  ;;  %v6715_v49 = vadd.f32 %v6415_v24, %v17962_v61  ;;  %v5927_v47 = vpop.f32.mrb[34].mxu0  ;;  %v5478_v16 = vpop.f32.mrb[2].mxu1  ;;  %v15579_v53 = vadd.f32 %v6863_v32, %v6862_v18  ;;  %v17970_v20 = vld [vmem:[#allocation451_spill] sm:$0xff]  ;;  %v17971_v32 = vld [vmem:[#allocation190_spill] sm:$0xff] }
 0x693   : > { %7052 = vrot.lane.b32.xlu0 %v15556_v15, %s9305_s20  ;;  %v6997_v1 = vpop.permute.xlu0 %6996  ;;  %v6422_v6 = vmul.f32 %v5927_v47, %v15493_v4  ;;  %v5929_v44 = vpop.f32.mrb[35].mxu0  ;;  %v6864_v24 = vadd.f32 %v6714_v54, %v6712_v35  ;;  %v6420_v8 = vmul.f32 %v5478_v16, %v15497_v29  ;;  %v3785_v15 = vadd.f32 %v17969_v45, %v13992_v39  ;;  %v17972_v54 = vld [vmem:[#allocation192_spill] sm:$0xff]  ;;  %v17973_v47 = vld [vmem:[#allocation493_spill] sm:$0xff] }
 0x694   : > { %v15577_v63 = vadd.f32 %v6997_v1, %v17966_v56  ;;  %17968 = vst [vmem:[#allocation255_spill] sm:$0xff] %v15579_v53  ;;  %v5480_v42 = vpop.f32.mrb[3].mxu1  ;;  %v6423_v61 = vmul.f32 %v5929_v44, %v3773_v27  ;;  %v6865_v2 = vadd.f32 %v6715_v49, %v6713_v14  ;;  %v3789_v1 = vadd.f32 %v17973_v47, %v13982_v43  ;;  %v17974_v49 = vld [vmem:[#allocation492_spill] sm:$0xff] }
 0x695   : > { %v6718_v5 = vadd.f32 %v6422_v6, %v17970_v20  ;;  %v6421_v4 = vmul.f32 %v5480_v42, %v15510_v46  ;;  %v6716_v18 = vadd.f32 %v6420_v8, %v17971_v32  ;;  %v3340_v20 = vadd.f32 %v17974_v49, %v13976_v12  ;;  %v17976_v6 = vld [vmem:[#allocation235_spill] sm:$0xff] }
 0x696   : > { %17967 = vst [vmem:[#allocation254_spill] sm:$0xff] %v15577_v63  ;;  %7054 = vrot.lane.b32.xlu1 %v15579_v53, %s9305_s20  ;;  %v6719_v29 = vadd.f32 %v6423_v61, %v17972_v54  ;;  %v5933_v35 = vpop.f32.mrb[36].mxu0  ;;  %v5484_v16 = vpop.f32.mrb[4].mxu1  ;;  %v15601_v8 = vadd.f32 %v6865_v2, %v6864_v24  ;;  %v17979_v54 = vld [vmem:[#allocation494_spill] sm:$0xff]  ;;  %v17982_v2 = vld [vmem:[#allocation195_spill] sm:$0xff] }
 0x697   : > { %7188 = vrot.lane.b32.xlu0 %v15577_v63, %s9306_s21  ;;  %v6999_v27 = vpop.permute.xlu1 %6998  ;;  %v6717_v46 = vadd.f32 %v6421_v4, %v17975_v26  ;;  %v6430_v14 = vmul.f32 %v5933_v35, %v15524_v21  ;;  %v5935_v44 = vpop.f32.mrb[37].mxu0  ;;  %v6866_v42 = vadd.f32 %v6718_v5, %v6716_v18  ;;  %v6428_v61 = vmul.f32 %v5484_v16, %v15537_v9  ;;  %v17980_v63 = vld [vmem:[#allocation194_spill] sm:$0xff]  ;;  %v17981_v21 = vld [vmem:[#allocation193_spill] sm:$0xff] }
 0x698   : > { %v15599_v56 = vadd.f32 %v6999_v27, %v17976_v6  ;;  %17978 = vst [vmem:[#allocation256_spill] sm:$0xff] %v15601_v8  ;;  %v5486_v45 = vpop.f32.mrb[5].mxu1  ;;  %v6431_v32 = vmul.f32 %v5935_v44, %v3779_v51  ;;  %v3342_v47 = vadd.f32 %v17979_v54, %v13984_v62  ;;  %v17983_v51 = vld [vmem:[#allocation495_spill] sm:$0xff] }
 0x699   : > { %v6867_v49 = vadd.f32 %v6719_v29, %v6717_v46  ;;  %v6722_v4 = vadd.f32 %v6430_v14, %v17980_v63  ;;  %v6429_v26 = vmul.f32 %v5486_v45, %v3330_v28  ;;  %v6720_v24 = vadd.f32 %v6428_v61, %v17981_v21  ;;  %v17984_v29 = vld [vmem:[#allocation498_spill] sm:$0xff]  ;;  %v17985_v63 = vld [vmem:[#allocation456_spill] sm:$0xff] }
 0x69a   : > { %17977 = vst [vmem:[#allocation527_spill] sm:$0xff] %v15599_v56  ;;  %7190 = vrot.lane.b32.xlu1 %v15599_v56, %s9306_s21  ;;  %v6723_v5 = vadd.f32 %v6431_v32, %v17982_v2  ;;  %v3791_v35 = vadd.f32 %v17983_v51, %v13992_v39  ;;  %v3795_v27 = vadd.f32 %v17984_v29, %v13982_v43  ;;  %v17986_v14 = vld [vmem:[#allocation236_spill] sm:$0xff]  ;;  %v5490_v16 = vpop.f32.mrb[6].mxu1  ;;  %v17988_v2 = vld [vmem:[#allocation497_spill] sm:$0xff] }
 0x69b   : > { %7056 = vrot.lane.b32.xlu0 %v15601_v8, %s9305_s20  ;;  %v5939_v9 = vpop.f32.mrb[38].mxu0  ;;  %v7001_v18 = vpop.permute.xlu0 %7000  ;;  %v6721_v28 = vadd.f32 %v6429_v26, %v17985_v63  ;;  %v15621_v45 = vadd.f32 %v6867_v49, %v6866_v42  ;;  %v6868_v61 = vadd.f32 %v6722_v4, %v6720_v24  ;;  %v6436_v32 = vmul.f32 %v5490_v16, %v3334_v23  ;;  %v17989_v56 = vld [vmem:[#allocation197_spill] sm:$0xff] }
 0x69c   : > { %v6438_v46 = vmul.f32 %v5939_v9, %v3783_v25  ;;  %v15619_v6 = vadd.f32 %v7001_v18, %v17986_v14  ;;  %v5941_v44 = vpop.f32.mrb[39].mxu0  ;;  %v5492_v54 = vpop.f32.mrb[7].mxu1  ;;  %v3346_v51 = vadd.f32 %v17988_v2, %v13976_v12  ;;  %v17990_v25 = vld [vmem:[#allocation196_spill] sm:$0xff]  ;;  %v17991_v49 = vld [vmem:[#allocation461_spill] sm:$0xff]  ;;  %v17997_v2 = vld [vmem:[#allocation503_spill] sm:$0xff] }
 0x69d   : > { %v6439_v21 = vmul.f32 %v5941_v44, %v3785_v15  ;;  %v6869_v8 = vadd.f32 %v6723_v5, %v6721_v28  ;;  %v6437_v53 = vmul.f32 %v5492_v54, %v3336_v48  ;;  %v6724_v42 = vadd.f32 %v6436_v32, %v17990_v25  ;;  %v17992_v15 = vld [vmem:[#allocation499_spill] sm:$0xff]  ;;  %v17993_v5 = vld [vmem:[#allocation500_spill] sm:$0xff]  ;;  %v17995_v63 = vld [vmem:[#allocation237_spill] sm:$0xff] }
 0x69e   : > { %17987 = vst [vmem:[#allocation257_spill] sm:$0xff] %v15619_v6  ;;  %v6726_v29 = vadd.f32 %v6438_v46, %v17989_v56  ;;  %7058 = vrot.lane.b32.xlu1 %v15621_v45, %s9305_s20  ;;  %v3348_v24 = vadd.f32 %v17992_v15, %v13984_v62  ;;  %v3797_v9 = vadd.f32 %v17993_v5, %v13992_v39  ;;  %v17994_v56 = vld [vmem:[#allocation198_spill] sm:$0xff]  ;;  %v5496_v46 = vpop.f32.mrb[8].mxu1  ;;  %v17998_v15 = vld [vmem:[#allocation200_spill] sm:$0xff] }
 0x69f   : > { %7192 = vrot.lane.b32.xlu0 %v15619_v6, %s9306_s21  ;;  %v6727_v4 = vadd.f32 %v6439_v21, %v17991_v49  ;;  %v5945_v23 = vpop.f32.mrb[40].mxu0  ;;  %v7003_v26 = vpop.permute.xlu1 %7002  ;;  %v6725_v48 = vadd.f32 %v6437_v53, %v17994_v56  ;;  %v15640_v16 = vadd.f32 %v6869_v8, %v6868_v61  ;;  %v6444_v32 = vmul.f32 %v5496_v46, %v3340_v20  ;;  %v17999_v53 = vld [vmem:[#allocation199_spill] sm:$0xff]  ;;  %v18000_v8 = vld [vmem:[#allocation202_spill] sm:$0xff] }
 0x6a0   : > { %v6446_v18 = vmul.f32 %v5945_v23, %v3789_v1  ;;  %v15638_v28 = vadd.f32 %v7003_v26, %v17995_v63  ;;  %v5947_v14 = vpop.f32.mrb[41].mxu0  ;;  %v6870_v44 = vadd.f32 %v6726_v29, %v6724_v42  ;;  %v5498_v54 = vpop.f32.mrb[9].mxu1  ;;  %v3801_v25 = vadd.f32 %v17997_v2, %v13982_v43  ;;  %v18003_v26 = vld [vmem:[#allocation201_spill] sm:$0xff] }
 0x6a1   : > { %17996 = vst [vmem:[#allocation258_spill] sm:$0xff] %v15640_v16  ;;  %v6447_v21 = vmul.f32 %v5947_v14, %v3791_v35  ;;  %v6871_v49 = vadd.f32 %v6727_v4, %v6725_v48  ;;  %v6445_v6 = vmul.f32 %v5498_v54, %v3342_v47  ;;  %v6728_v1 = vadd.f32 %v6444_v32, %v17999_v53  ;;  %v18001_v35 = vld [vmem:[#allocation502_spill] sm:$0xff]  ;;  %v18002_v4 = vld [vmem:[#allocation504_spill] sm:$0xff] }
 0x6a2   : > { %v6730_v5 = vadd.f32 %v6446_v18, %v17998_v15  ;;  %7194 = vrot.lane.b32.xlu1 %v15638_v28, %s9306_s21  ;;  %v3352_v42 = vadd.f32 %v18001_v35, %v13976_v12  ;;  %v3354_v23 = vadd.f32 %v18002_v4, %v13984_v62  ;;  %v18004_v48 = vld [vmem:[#allocation238_spill] sm:$0xff]  ;;  %v5502_v63 = vpop.f32.mrb[10].mxu1  ;;  %v18006_v15 = vld [vmem:[#allocation505_spill] sm:$0xff]  ;;  %v18007_v35 = vld [vmem:[#allocation203_spill] sm:$0xff] }
 0x6a3   : > { %7060 = vrot.lane.b32.xlu0 %v15640_v16, %s9305_s20  ;;  %v6731_v61 = vadd.f32 %v6447_v21, %v18000_v8  ;;  %v5951_v20 = vpop.f32.mrb[42].mxu0  ;;  %v7005_v29 = vpop.permute.xlu0 %7004  ;;  %v6729_v47 = vadd.f32 %v6445_v6, %v18003_v26  ;;  %v15659_v14 = vadd.f32 %v6871_v49, %v6870_v44  ;;  %v6452_v54 = vmul.f32 %v5502_v63, %v3346_v51  ;;  %v18009_v44 = vld [vmem:[#allocation205_spill] sm:$0xff] }
 0x6a4   : > { %v6454_v56 = vmul.f32 %v5951_v20, %v3795_v27  ;;  %v15657_v18 = vadd.f32 %v7005_v29, %v18004_v48  ;;  %v5953_v46 = vpop.f32.mrb[43].mxu0  ;;  %v6872_v32 = vadd.f32 %v6730_v5, %v6728_v1  ;;  %v5504_v21 = vpop.f32.mrb[11].mxu1  ;;  %v3803_v53 = vadd.f32 %v18006_v15, %v13992_v39  ;;  %v18008_v27 = vld [vmem:[#allocation466_spill] sm:$0xff]  ;;  %v18012_v29 = vld [vmem:[#allocation204_spill] sm:$0xff] }
 0x6a5   : > { %v6455_v2 = vmul.f32 %v5953_v46, %v3797_v9  ;;  %v6873_v8 = vadd.f32 %v6731_v61, %v6729_v47  ;;  %v6453_v16 = vmul.f32 %v5504_v21, %v3348_v24  ;;  %v6732_v6 = vadd.f32 %v6452_v54, %v18008_v27  ;;  %v18010_v9 = vld [vmem:[#allocation508_spill] sm:$0xff]  ;;  %v18011_v61 = vld [vmem:[#allocation507_spill] sm:$0xff] }
 0x6a6   : > { %18005 = vst [vmem:[#allocation259_spill] sm:$0xff] %v15657_v18  ;;  %v6734_v4 = vadd.f32 %v6454_v56, %v18007_v35  ;;  %7062 = vrot.lane.b32.xlu1 %v15659_v14, %s9305_s20  ;;  %v3807_v1 = vadd.f32 %v18010_v9, %v13982_v43  ;;  %v3358_v20 = vadd.f32 %v18011_v61, %v13976_v12  ;;  %v18013_v47 = vld [vmem:[#allocation511_spill] sm:$0xff]  ;;  %v5508_v48 = vpop.f32.mrb[12].mxu1  ;;  %v18015_v35 = vld [vmem:[#allocation509_spill] sm:$0xff] }
 0x6a7   : > { %7196 = vrot.lane.b32.xlu0 %v15657_v18, %s9306_s21  ;;  %v6735_v49 = vadd.f32 %v6455_v2, %v18009_v44  ;;  %v5957_v51 = vpop.f32.mrb[44].mxu0  ;;  %v7007_v5 = vpop.permute.xlu1 %7006  ;;  %v6733_v24 = vadd.f32 %v6453_v16, %v18012_v29  ;;  %v15678_v46 = vadd.f32 %v6873_v8, %v6872_v32  ;;  %v6460_v21 = vmul.f32 %v5508_v48, %v3352_v42  ;;  %v18016_v9 = vld [vmem:[#allocation471_spill] sm:$0xff]  ;;  %v18017_v16 = vld [vmem:[#allocation206_spill] sm:$0xff]  ;;  %v18018_v32 = vld [vmem:[#allocation208_spill] sm:$0xff] }
 0x6a8   : > { %v6462_v26 = vmul.f32 %v5957_v51, %v3801_v25  ;;  %v15676_v56 = vadd.f32 %v7007_v5, %v18013_v47  ;;  %v5959_v63 = vpop.f32.mrb[45].mxu0  ;;  %v6874_v54 = vadd.f32 %v6734_v4, %v6732_v6  ;;  %v5510_v2 = vpop.f32.mrb[13].mxu1  ;;  %v3360_v27 = vadd.f32 %v18015_v35, %v13984_v62  ;;  %v18021_v5 = vld [vmem:[#allocation207_spill] sm:$0xff] }
 0x6a9   : > { %18014 = vst [vmem:[#allocation260_spill] sm:$0xff] %v15678_v46  ;;  %v6463_v15 = vmul.f32 %v5959_v63, %v3803_v53  ;;  %v6875_v44 = vadd.f32 %v6735_v49, %v6733_v24  ;;  %v6461_v18 = vmul.f32 %v5510_v2, %v3354_v23  ;;  %v6736_v25 = vadd.f32 %v6460_v21, %v18017_v16  ;;  %v18019_v53 = vld [vmem:[#allocation510_spill] sm:$0xff]  ;;  %v18020_v49 = vld [vmem:[#allocation513_spill] sm:$0xff] }
 0x6aa   : > { %v6738_v61 = vadd.f32 %v6462_v26, %v18016_v9  ;;  %7198 = vrot.lane.b32.xlu1 %v15676_v56, %s9306_s21  ;;  %v3809_v6 = vadd.f32 %v18019_v53, %v13992_v39  ;;  %v3813_v51 = vadd.f32 %v18020_v49, %v13982_v43  ;;  %v18022_v24 = vld [vmem:[#allocation517_spill] sm:$0xff]  ;;  %v5514_v47 = vpop.f32.mrb[14].mxu1  ;;  %v18024_v9 = vld [vmem:[#allocation512_spill] sm:$0xff]  ;;  %v18025_v53 = vld [vmem:[#allocation210_spill] sm:$0xff] }
 0x6ab   : > { %7064 = vrot.lane.b32.xlu0 %v15678_v46, %s9305_s20  ;;  %v6739_v8 = vadd.f32 %v6463_v15, %v18018_v32  ;;  %v5963_v42 = vpop.f32.mrb[46].mxu0  ;;  %v7009_v4 = vpop.permute.xlu0 %7008  ;;  %v6737_v23 = vadd.f32 %v6461_v18, %v18021_v5  ;;  %v15697_v63 = vadd.f32 %v6875_v44, %v6874_v54  ;;  %v6468_v2 = vmul.f32 %v5514_v47, %v3358_v20  ;;  %v18026_v18 = vld [vmem:[#allocation209_spill] sm:$0xff]  ;;  %v18027_v54 = vld [vmem:[#allocation211_spill] sm:$0xff] }
 0x6ac   : > { %v6470_v29 = vmul.f32 %v5963_v42, %v3807_v1  ;;  %v15695_v26 = vadd.f32 %v7009_v4, %v18022_v24  ;;  %v5965_v48 = vpop.f32.mrb[47].mxu0  ;;  %v6876_v21 = vadd.f32 %v6738_v61, %v6736_v25  ;;  %v5516_v15 = vpop.f32.mrb[15].mxu1  ;;  %v3364_v16 = vadd.f32 %v18024_v9, %v13976_v12  ;;  %v18028_v25 = vld [vmem:[#allocation515_spill] sm:$0xff] }
 0x6ad   : > { %v6471_v35 = vmul.f32 %v5965_v48, %v3809_v6  ;;  %v6877_v32 = vadd.f32 %v6739_v8, %v6737_v23  ;;  %v6469_v46 = vmul.f32 %v5516_v15, %v3360_v27  ;;  %v6740_v1 = vadd.f32 %v6468_v2, %v18026_v18  ;;  %v18029_v8 = vld [vmem:[#allocation514_spill] sm:$0xff]  ;;  %v18030_v6 = vld [vmem:[#allocation476_spill] sm:$0xff]  ;;  %v18031_v23 = vld [vmem:[#allocation239_spill] sm:$0xff] }
 0x6ae   : > { %18023 = vst [vmem:[#allocation261_spill] sm:$0xff] %v15695_v26  ;;  %v6742_v49 = vadd.f32 %v6470_v29, %v18025_v53  ;;  %7066 = vrot.lane.b32.xlu1 %v15697_v63, %s9305_s20  ;;  %v3815_v42 = vadd.f32 %v18028_v25, %v13992_v39  ;;  %v3366_v4 = vadd.f32 %v18029_v8, %v13984_v62  ;;  %v5520_v24 = vpop.f32.mrb[16].mxu1  ;;  %v18034_v18 = vld [vmem:[#allocation518_spill] sm:$0xff]  ;;  %v18035_v8 = vld [vmem:[#allocation213_spill] sm:$0xff] }
 0x6af   : > { %7200 = vrot.lane.b32.xlu0 %v15695_v26, %s9306_s21  ;;  %v6743_v44 = vadd.f32 %v6471_v35, %v18027_v54  ;;  %v5969_v20 = vpop.f32.mrb[48].mxu0  ;;  %v7011_v61 = vpop.permute.xlu1 %7010  ;;  %v6741_v27 = vadd.f32 %v6469_v46, %v18030_v6  ;;  %v15716_v48 = vadd.f32 %v6877_v32, %v6876_v21  ;;  %v6476_v15 = vmul.f32 %v5520_v24, %v3364_v16  ;;  %v18037_v32 = vld [vmem:[#allocation212_spill] sm:$0xff]  ;;  %v18038_v16 = vld [vmem:[#allocation481_spill] sm:$0xff]  ;;  %v18044_v26 = vld [vmem:[#allocation215_spill] sm:$0xff] }
 0x6b0   : > { %v6478_v5 = vmul.f32 %v5969_v20, %v3813_v51  ;;  %v15714_v29 = vadd.f32 %v7011_v61, %v18031_v23  ;;  %v5971_v47 = vpop.f32.mrb[49].mxu0  ;;  %v6878_v2 = vadd.f32 %v6742_v49, %v6740_v1  ;;  %v15718_v9 = vpop.permute.xlu0 %7144  ;;  %v3370_v54 = vadd.f32 %v18034_v18, %v13976_v12  ;;  %v18036_v20 = vld [vmem:[#allocation519_spill] sm:$0xff] }
 0x6b1   : > { %18033 = vst [vmem:[#allocation263_spill] sm:$0xff] %v15716_v48  ;;  %v6479_v35 = vmul.f32 %v5971_v47, %v3815_v42  ;;  %v5522_v53 = vpop.f32.mrb[17].mxu1  ;;  %v6879_v25 = vadd.f32 %v6743_v44, %v6741_v27  ;;  %v3819_v21 = vadd.f32 %v18036_v20, %v13982_v43  ;;  %v6744_v49 = vadd.f32 %v6476_v15, %v18037_v32  ;;  %v18039_v44 = vld [vmem:[#allocation521_spill] sm:$0xff] }
 0x6b2   : > { %18032 = vst [vmem:[#allocation262_spill] sm:$0xff] %v15714_v29  ;;  %v6746_v46 = vadd.f32 %v6478_v5, %v18035_v8  ;;  %v6477_v51 = vmul.f32 %v5522_v53, %v3366_v4  ;;  %7202 = vrot.lane.b32.xlu1 %v15714_v29, %s9306_s21  ;;  %v5526_v61 = vpop.f32.mrb[18].mxu1  ;;  %v3821_v6 = vadd.f32 %v18039_v44, %v13992_v39  ;;  %v18040_v4 = vld [vmem:[#allocation520_spill] sm:$0xff]  ;;  %v18041_v5 = vld [vmem:[#allocation214_spill] sm:$0xff]  ;;  %v18043_v44 = vld [vmem:[#allocation523_spill] sm:$0xff] }
 0x6b3   : > { %v6747_v1 = vadd.f32 %v6479_v35, %v18038_v16  ;;  %7068 = vrot.lane.b32.xlu0 %v15716_v48, %s9305_s20  ;;  %v5975_v42 = vpop.f32.mrb[50].mxu0  ;;  %v3372_v27 = vadd.f32 %v18040_v4, %v13984_v62  ;;  %v6484_v24 = vmul.f32 %v5526_v61, %v3370_v54  ;;  %v15738_v15 = vadd.f32 %v6879_v25, %v6878_v2  ;;  %v5528_v32 = vpop.f32.mrb[19].mxu1  ;;  %v18042_v16 = vld [vmem:[#allocation524_spill] sm:$0xff]  ;;  %v18046_v61 = vld [vmem:[#allocation241_spill] sm:$0xff]  ;;  %v18047_v2 = vld [vmem:[#allocation218_spill] sm:$0xff] }
 0x6b4   : > { %v6745_v23 = vadd.f32 %v6477_v51, %v18041_v5  ;;  %v6486_v47 = vmul.f32 %v5975_v42, %v3819_v21  ;;  %v5977_v53 = vpop.f32.mrb[51].mxu0  ;;  %v15736_v18 = vpop.permute.xlu1 %7146  ;;  %v6880_v35 = vadd.f32 %v6746_v46, %v6744_v49  ;;  %v3825_v48 = vadd.f32 %v18042_v16, %v13982_v43  ;;  %v18045_v54 = vld [vmem:[#allocation216_spill] sm:$0xff]  ;;  %v18048_v5 = vld [vmem:[#allocation526_spill] sm:$0xff] }
 0x6b5   : > { %v6487_v8 = vmul.f32 %v5977_v53, %v3821_v6  ;;  %v7013_v20 = vpop.permute.xlu0 %7012  ;;  %v3376_v29 = vadd.f32 %v18043_v44, %v13976_v12  ;;  %v6748_v51 = vadd.f32 %v6484_v24, %v18044_v26  ;;  %v6485_v46 = vmul.f32 %v5528_v32, %v3372_v27 }
 0x6b6   : > { %v6881_v4 = vadd.f32 %v6747_v1, %v6745_v23  ;;  %v6750_v21 = vadd.f32 %v6486_v47, %v18045_v54  ;;  %v15747_v42 = vadd.f32 %v7013_v20, %v18046_v61  ;;  %7070 = vrot.lane.b32.xlu1 %v15738_v15, %s9305_s20  ;;  %v5532_v6 = vpop.f32.mrb[20].mxu1  ;;  %v3827_v53 = vadd.f32 %v18048_v5, %v13992_v39  ;;  %v18049_v1 = vld [vmem:[#allocation525_spill] sm:$0xff]  ;;  %v18053_v5 = vld [vmem:[#allocation486_spill] sm:$0xff] }
 0x6b7   : > { %v6751_v25 = vadd.f32 %v6487_v8, %v18047_v2  ;;  %v5981_v49 = vpop.f32.mrb[52].mxu0  ;;  %v3378_v23 = vadd.f32 %v18049_v1, %v13984_v62  ;;  %v6492_v47 = vmul.f32 %v5532_v6, %v3376_v29  ;;  %v18050_v8 = vld [vmem:[#allocation217_spill] sm:$0xff]  ;;  %v5534_v2 = vpop.f32.mrb[21].mxu1 }
 0x6b8   : > { %v6882_v26 = vadd.f32 %v6750_v21, %v6748_v51  ;;  %v6494_v24 = vmul.f32 %v5981_v49, %v3825_v48  ;;  %7204 = vrot.lane.b32.xlu0 %v15747_v42, %s9306_s21  ;;  %v5983_v20 = vpop.f32.mrb[53].mxu0  ;;  %v7015_v16 = vpop.permute.xlu1 %7014  ;;  %v15758_v44 = vadd.f32 %v6881_v4, %v6880_v35  ;;  %v6749_v27 = vadd.f32 %v6485_v46, %v18050_v8  ;;  %v18051_v51 = vld [vmem:[#allocation529_spill] sm:$0xff]  ;;  %v18052_v21 = vld [vmem:[#allocation219_spill] sm:$0xff]  ;;  %v18054_v35 = vld [vmem:[#allocation528_spill] sm:$0xff] }
 0x6b9   : > { %v6495_v32 = vmul.f32 %v5983_v20, %v3827_v53  ;;  %v15761_v54 = vpop.permute.xlu0 %7148  ;;  %v15764_v61 = vadd.f32 %v7015_v16, %v15011_v50  ;;  %v3831_v48 = vadd.f32 %v18051_v51, %v13982_v43  ;;  %v6752_v29 = vadd.f32 %v6492_v47, %v18053_v5  ;;  %v18055_v46 = vld [vmem:[#allocation221_spill] sm:$0xff]  ;;  %v18056_v16 = vld [vmem:[#allocation531_spill] sm:$0xff]  ;;  %v18057_v51 = vld [vmem:[#allocation220_spill] sm:$0xff] }
 0x6ba   : > { %v6754_v49 = vadd.f32 %v6494_v24, %v18052_v21  ;;  %v6493_v6 = vmul.f32 %v5534_v2, %v3378_v23  ;;  %v3382_v4 = vadd.f32 %v18054_v35, %v13976_v12  ;;  %v6883_v1 = vadd.f32 %v6751_v25, %v6749_v27  ;;  %v5538_v50 = vpop.f32.mrb[22].mxu1 }
 0x6bb   : > { %v6755_v53 = vadd.f32 %v6495_v32, %v18055_v46  ;;  %v5987_v20 = vpop.f32.mrb[54].mxu0  ;;  %7206 = vrot.lane.b32.xlu1 %v15764_v61, %s9306_s21  ;;  %v3833_v8 = vadd.f32 %v18056_v16, %v13992_v39  ;;  %v18058_v32 = vld [vmem:[#allocation530_spill] sm:$0xff]  ;;  %v5540_v5 = vpop.f32.mrb[23].mxu1  ;;  %v18061_v46 = vld [vmem:[#allocation224_spill] sm:$0xff] }
 0x6bc   : > { %v6884_v43 = vadd.f32 %v6754_v49, %v6752_v29  ;;  %v6753_v24 = vadd.f32 %v6493_v6, %v18057_v51  ;;  %v6502_v21 = vmul.f32 %v5987_v20, %v3831_v48  ;;  %7072 = vrot.lane.b32.xlu0 %v15758_v44, %s9305_s20  ;;  %v6500_v23 = vmul.f32 %v5538_v50, %v3382_v4  ;;  %v5989_v12 = vpop.f32.mrb[55].mxu0  ;;  %v15780_v25 = vpop.permute.xlu1 %7150  ;;  %v18059_v49 = vld [vmem:[#allocation491_spill] sm:$0xff]  ;;  %v18060_v6 = vld [vmem:[#allocation222_spill] sm:$0xff] }
 0x6bd   : > { %v6503_v47 = vmul.f32 %v5989_v12, %v3833_v8  ;;  %v7017_v27 = vpop.permute.xlu0 %7016  ;;  %v3384_v2 = vadd.f32 %v18058_v32, %v13984_v62  ;;  %v15784_v35 = vadd.f32 %v6883_v1, %v6882_v26  ;;  %v18062_v51 = vld [vmem:[#allocation223_spill] sm:$0xff] }
 0x6be   : > { %v6885_v39 = vadd.f32 %v6755_v53, %v6753_v24  ;;  %v6758_v29 = vadd.f32 %v6502_v21, %v18059_v49  ;;  %v6756_v48 = vadd.f32 %v6500_v23, %v18060_v6  ;;  %v15799_v1 = vadd.f32 %v7017_v27, %v15040_v58 }
 0x6bf   : > { %v6759_v20 = vadd.f32 %v6503_v47, %v18061_v46  ;;  %v6501_v16 = vmul.f32 %v5540_v5, %v3384_v2  ;;  %7074 = vrot.lane.b32.xlu1 %v15784_v35, %s9305_s20 }
 0x6c0   : > { %v6886_v4 = vadd.f32 %v6758_v29, %v6756_v48  ;;  %v7019_v50 = vpop.permute.xlu1 %7018  ;;  %v15791_v8 = vadd.f32 %v6885_v39, %v6884_v43 }
 0x6c1   : > { %v6757_v62 = vadd.f32 %v6501_v16, %v18062_v51  ;;  %v15794_v12 = vpop.permute.xlu0 %7152  ;;  %v15813_v47 = vadd.f32 %v7019_v50, %v15069_v59 }
 0x6c2   : > { %7076 = vrot.lane.b32.xlu0 %v15791_v8, %s9305_s20 }
 0x6c3   : > { %v6887_v26 = vadd.f32 %v6759_v20, %v6757_v62 }
 0x6c4   : > { %v15801_v53 = vpop.permute.xlu1 %7154 }
 0x6c5   : > { %v7021_v24 = vpop.permute.xlu0 %7020  ;;  %v15803_v21 = vadd.f32 %v6887_v26, %v6886_v4 }
 0x6c6   : > { %7208 = vrot.lane.b32.xlu0 %v15799_v1, %s9306_s21  ;;  %v15810_v43 = vadd.f32 %v7021_v24, %v15098_v60 }
 0x6c7   : > { %7078 = vrot.lane.b32.xlu1 %v15803_v21, %s9305_s20 }
 0x6c8   : > { %v7023_v23 = vpop.permute.xlu1 %7022 }
 0x6c9   : > { %v7157_v58 = vpop.permute.xlu0 %7156  ;;  %v15823_v2 = vadd.f32 %v7023_v23, %v15127_v31  ;;  %v18063_v23 = vld [vmem:[#allocation245_spill] sm:$0xff] }
 0x6ca   : > { %7212 = vrot.lane.b32.xlu0 %v15810_v43, %s9306_s21  ;;  %v15820_v32 = vadd.f32 %v7157_v58, %v15125_v22 }
 0x6cb   : > { %7210 = vrot.lane.b32.xlu1 %v15813_v47, %s9306_s21 }
 0x6cc   : > { %v7159_v27 = vpop.permute.xlu1 %7158 }
 0x6cd   : > { %v15826_v60 = vadd.f32 %v7159_v27, %v15154_v17  ;;  %v7025_v5 = vpop.permute.xlu0 %7024 }
 0x6ce   : > { %v15829_v59 = vadd.f32 %v7025_v5, %v15156_v33 }
 0x6cf   : > { %v9122_v39 = vpack.c.bf16 %v15826_v60, %v15820_v32  ;;  %7214 = vrot.lane.b32.xlu1 %v15823_v2, %s9306_s21  ;;  %v18084_v60 = vld [vmem:[#allocation259_spill] sm:$0xff] }
 0x6d0   : > { %7216 = vrot.lane.b32.xlu0 %v15829_v59, %s9306_s21  ;;  %v7027_v22 = vpop.permute.xlu1 %7026 }
 0x6d1   : > { %v7161_v49 = vpop.permute.xlu0 %7160  ;;  %v15838_v31 = vadd.f32 %v7027_v22, %v15185_v7 }
 0x6d2   : > { %v15843_v33 = vadd.f32 %v7161_v49, %v15183_v11 }
 0x6d3   : > { %7218 = vrot.lane.b32.xlu1 %v15838_v31, %s9306_s21 }
 0x6d4   : > { %v7163_v17 = vpop.permute.xlu1 %7162 }
 0x6d5   : > { %v15846_v29 = vadd.f32 %v7163_v17, %v15212_v10  ;;  %v7029_v6 = vpop.permute.xlu0 %7028 }
 0x6d6   : > { %v15849_v48 = vadd.f32 %v7029_v6, %v15214_v37 }
 0x6d7   : > { %v9126_v46 = vpack.c.bf16 %v15846_v29, %v15843_v33  ;;  %v18086_v29 = vld [vmem:[#allocation261_spill] sm:$0xff] }
 0x6d8   : > { %7220 = vrot.lane.b32.xlu0 %v15849_v48, %s9306_s21  ;;  %v7031_v7 = vpop.permute.xlu1 %7030 }
 0x6d9   : > { %v7165_v20 = vpop.permute.xlu0 %7164  ;;  %v15856_v16 = vadd.f32 %v7031_v7, %v15243_v36  ;;  %v18065_v7 = vld [vmem:[#allocation522_spill] sm:$0xff] }
 0x6da   : > { %v15861_v10 = vadd.f32 %v7165_v20, %v15241_v13 }
 0x6db   : > { %7222 = vrot.lane.b32.xlu1 %v15856_v16, %s9306_s21 }
 0x6dc   : > { %v7167_v11 = vpop.permute.xlu1 %7166 }
 0x6dd   : > { %v15864_v37 = vadd.f32 %v7167_v11, %v15270_v41  ;;  %v7033_v4 = vpop.permute.xlu0 %7032 }
 0x6de   : > { %v15867_v50 = vadd.f32 %v7033_v4, %v15272_v34 }
 0x6df   : > { %v9130_v51 = vpack.c.bf16 %v15864_v37, %v15861_v10 }
 0x6e0   : > { %7224 = vrot.lane.b32.xlu0 %v15867_v50, %s9306_s21  ;;  %v7035_v36 = vpop.permute.xlu1 %7034 }
 0x6e1   : > { %v7169_v62 = vpop.permute.xlu0 %7168  ;;  %v15874_v26 = vadd.f32 %v7035_v36, %v15301_v3 }
 0x6e2   : > { %v15879_v41 = vadd.f32 %v7169_v62, %v15299_v57 }
 0x6e3   : > { %7226 = vrot.lane.b32.xlu1 %v15874_v26, %s9306_s21 }
 0x6e4   : > { %v7171_v13 = vpop.permute.xlu1 %7170 }
 0x6e5   : > { %v15882_v34 = vadd.f32 %v7171_v13, %v15328_v55  ;;  %v7037_v24 = vpop.permute.xlu0 %7036  ;;  %v18064_v55 = vld [vmem:[#allocation19_spill] sm:$0xff] }
 0x6e6   : > { %v15885_v58 = vadd.f32 %v7037_v24, %v18063_v23  ;;  %v18067_v24 = vld [vmem:[#allocation246_spill] sm:$0xff] }
 0x6e7   : > { %v9134_v27 = vpack.c.bf16 %v15882_v34, %v15879_v41  ;;  %v7338_v41 = vld [vmem:[%s16223_s4 + $0x10] sm:$0x33] }
 0x6e8   : > { %7228 = vrot.lane.b32.xlu0 %v15885_v58, %s9306_s21  ;;  %v7039_v3 = vpop.permute.xlu1 %7038 }
 0x6e9   : > { %v7173_v5 = vpop.permute.xlu0 %7172  ;;  %v15892_v22 = vadd.f32 %v7039_v3, %v15359_v30 }
 0x6ea   : > { %v15897_v49 = vadd.f32 %v7173_v5, %v18064_v55 }
 0x6eb   : > { %7230 = vrot.lane.b32.xlu1 %v15892_v22, %s9306_s21 }
 0x6ec   : > { %v7175_v57 = vpop.permute.xlu1 %7174 }
 0x6ed   : > { %v15900_v17 = vadd.f32 %v7175_v57, %v15386_v19  ;;  %v7041_v6 = vpop.permute.xlu0 %7040  ;;  %v18066_v19 = vld [vmem:[#allocation242_spill] sm:$0xff]  ;;  %v18068_v57 = vld [vmem:[#allocation240_spill] sm:$0xff] }
 0x6ee   : > { %v15903_v20 = vadd.f32 %v7041_v6, %v18065_v7  ;;  %v7273_v62 = vadd.f32 %v15736_v18, %v18066_v19  ;;  %v7272_v55 = vadd.f32 %v15718_v9, %v18068_v57  ;;  %v15927_v18 = vld [vmem:[%s16223_s4] sm:$0xff]  ;;  %v18071_v57 = vld [vmem:[#allocation249_spill] sm:$0xff] }
 0x6f0   : > { %7232 = vrot.lane.b32.xlu0 %v15903_v20, %s9306_s21  ;;  %v7043_v30 = vpop.permute.xlu1 %7042  ;;  %v9110_v7 = vpack.c.bf16 %v7273_v62, %v7272_v55 }
 0x6f1   : > { %v7177_v4 = vpop.permute.xlu0 %7176  ;;  %v15910_v36 = vadd.f32 %v7043_v30, %v15417_v52 }
 0x6f2   : > { %v7288_v23 = vadd.f32 %v7177_v4, %v18067_v24  ;;  %v7341_v4 = vunpack.c.h.bf16 %v15927_v18 }
 0x6f3   : > { %7234 = vrot.lane.b32.xlu1 %v15910_v36, %s9306_s21 }
 0x6f4   : > { %v7179_v13 = vpop.permute.xlu1 %7178  ;;  %7414 = vmatprep.mubr.f32.mxu1 %v7341_v4 }
 0x6f5   : > { %v7289_v3 = vadd.f32 %v7179_v13, %v15444_v0  ;;  %v15918_v5 = vpop.permute.xlu0 %7044  ;;  %v18069_v0 = vld [vmem:[#allocation18_spill] sm:$0xff] }
 0x6f6   : > { %v7275_v19 = vadd.f32 %v15780_v25, %v18069_v0  ;;  %v18072_v0 = vld [vmem:[#allocation251_spill] sm:$0xff] }
 0x6f7   : > { %v9108_v6 = vpack.c.bf16 %v7289_v3, %v7288_v23  ;;  %v18070_v23 = vld [vmem:[#allocation516_spill] sm:$0xff] }
 0x6f8   : > { %v15922_v52 = vpop.permute.xlu1 %7046  ;;  %v7274_v3 = vadd.f32 %v15761_v54, %v18070_v23 }
 0x6f9   : > { %v7181_v30 = vpop.permute.xlu0 %7180  ;;  %9109 = vmatprep.subr.bf16.mxu1 %v9108_v6 }
 0x6fa   : > { %9111 = vmatpush3.bf16.msra.mxu1 %v9110_v7  ;;  %v7290_v9 = vadd.f32 %v7181_v30, %v15473_v40  ;;  %v9114_v7 = vpack.c.bf16 %v7275_v19, %v7274_v3  ;;  %v18073_v40 = vld [vmem:[#allocation244_spill] sm:$0xff]  ;;  %v18074_v30 = vld [vmem:[#allocation250_spill] sm:$0xff]  ;;  %v18077_v3 = vld [vmem:[#allocation253_spill] sm:$0xff] }
 0x6fb   : > { %v18075_v19 = vld [vmem:[#allocation252_spill] sm:$0xff] }
 0x6fc   : > { %v7183_v13 = vpop.permute.xlu1 %7182 }
 0x6fd   : > { %v7291_v62 = vadd.f32 %v7183_v13, %v15502_v38  ;;  %v7049_v24 = vpop.permute.xlu0 %7048  ;;  %v7277_v38 = vadd.f32 %v15801_v53, %v18073_v40  ;;  %v18078_v53 = vld [vmem:[#allocation255_spill] sm:$0xff] }
 0x6fe   : > { %v15937_v55 = vadd.f32 %v7049_v24, %v18071_v57  ;;  %v18076_v24 = vld [vmem:[#allocation243_spill] sm:$0xff] }
 0x6ff   : > { %v9112_v6 = vpack.c.bf16 %v7291_v62, %v7290_v9  ;;  %v7276_v23 = vadd.f32 %v15794_v12, %v18076_v24  ;;  %v18079_v12 = vld [vmem:[#allocation254_spill] sm:$0xff] }
 0x700   : > { %7240 = vrot.lane.b32.xlu0 %v15937_v55, %s9306_s21  ;;  %v7051_v11 = vpop.permute.xlu1 %7050 }
 0x701   : > { %v7185_v25 = vpop.permute.xlu0 %7184  ;;  %v15942_v4 = vadd.f32 %v7051_v11, %v18072_v0  ;;  %9113 = vmatprep.subr.bf16.mxu1 %v9112_v6  ;;  %v9118_v6 = vpack.c.bf16 %v7277_v38, %v7276_v23  ;;  %v18081_v38 = vld [vmem:[#allocation256_spill] sm:$0xff] }
 0x702   : > { %9115 = vmatpush3.bf16.msra.mxu1 %v9114_v7  ;;  %v7292_v13 = vadd.f32 %v7185_v25, %v18074_v30  ;;  %v18080_v30 = vld [vmem:[#allocation527_spill] sm:$0xff] }
 0x703   : > { %7242 = vrot.lane.b32.xlu1 %v15942_v4, %s9306_s21 }
 0x704   : > { %v7187_v54 = vpop.permute.xlu1 %7186 }
 0x705   : > { %v7293_v9 = vadd.f32 %v7187_v54, %v18075_v19  ;;  %v7053_v62 = vpop.permute.xlu0 %7052 }
 0x706   : > { %v15953_v11 = vadd.f32 %v7053_v62, %v18077_v3 }
 0x707   : > { %v9116_v57 = vpack.c.bf16 %v7293_v9, %v7292_v13 }
 0x708   : > { %7244 = vrot.lane.b32.xlu0 %v15953_v11, %s9306_s21  ;;  %v7055_v7 = vpop.permute.xlu1 %7054 }
 0x709   : > { %v7189_v0 = vpop.permute.xlu0 %7188  ;;  %v15958_v40 = vadd.f32 %v7055_v7, %v18078_v53  ;;  %9117 = vmatprep.subr.bf16.mxu1 %v9116_v57 }
 0x70a   : > { %9119 = vmatpush3.bf16.msra.mxu1 %v9118_v6  ;;  %v7294_v54 = vadd.f32 %v7189_v0, %v18079_v12  ;;  %v18082_v6 = vld [vmem:[#allocation257_spill] sm:$0xff] }
 0x70b   : > { %7246 = vrot.lane.b32.xlu1 %v15958_v40, %s9306_s21 }
 0x70c   : > { %v7191_v25 = vpop.permute.xlu1 %7190 }
 0x70d   : > { %v7295_v19 = vadd.f32 %v7191_v25, %v18080_v30  ;;  %v7057_v13 = vpop.permute.xlu0 %7056  ;;  %v18083_v25 = vld [vmem:[#allocation258_spill] sm:$0xff] }
 0x70e   : > { %v15965_v9 = vadd.f32 %v7057_v13, %v18081_v38  ;;  %v18085_v38 = vld [vmem:[#allocation260_spill] sm:$0xff] }
 0x70f   : > { %v9120_v62 = vpack.c.bf16 %v7295_v19, %v7294_v54 }
 0x710   : > { %7248 = vrot.lane.b32.xlu0 %v15965_v9, %s9306_s21  ;;  %v7059_v24 = vpop.permute.xlu1 %7058 }
 0x711   : > { %v7193_v23 = vpop.permute.xlu0 %7192  ;;  %v15970_v3 = vadd.f32 %v7059_v24, %v15621_v45  ;;  %9121 = vmatprep.subr.bf16.mxu1 %v9120_v62 }
 0x712   : > { %9123 = vmatpush3.bf16.msra.mxu1 %v9122_v39  ;;  %v7296_v7 = vadd.f32 %v7193_v23, %v18082_v6 }
 0x713   : > { %7250 = vrot.lane.b32.xlu1 %v15970_v3, %s9306_s21 }
 0x714   : > { %v7195_v57 = vpop.permute.xlu1 %7194 }
 0x715   : > { %v7297_v0 = vadd.f32 %v7195_v57, %v15638_v28  ;;  %v7061_v53 = vpop.permute.xlu0 %7060  ;;  %v18087_v57 = vld [vmem:[#allocation262_spill] sm:$0xff] }
 0x716   : > { %v15980_v12 = vadd.f32 %v7061_v53, %v18083_v25 }
 0x717   : > { %v9124_v54 = vpack.c.bf16 %v7297_v0, %v7296_v7  ;;  %v18088_v0 = vld [vmem:[#allocation263_spill] sm:$0xff] }
 0x718   : > { %7252 = vrot.lane.b32.xlu0 %v15980_v12, %s9306_s21  ;;  %v7063_v45 = vpop.permute.xlu1 %7062 }
 0x719   : > { %v7197_v30 = vpop.permute.xlu0 %7196  ;;  %v15985_v32 = vadd.f32 %v7063_v45, %v15659_v14  ;;  %9125 = vmatprep.subr.bf16.mxu1 %v9124_v54 }
 0x71a   : > { %9127 = vmatpush3.bf16.msra.mxu1 %v9126_v46  ;;  %v7298_v39 = vadd.f32 %v7197_v30, %v18084_v60 }
 0x71b   : > { %7254 = vrot.lane.b32.xlu1 %v15985_v32, %s9306_s21 }
 0x71c   : > { %v7199_v28 = vpop.permute.xlu1 %7198 }
 0x71d   : > { %v7299_v19 = vadd.f32 %v7199_v28, %v15676_v56  ;;  %v7065_v13 = vpop.permute.xlu0 %7064 }
 0x71e   : > { %v15995_v62 = vadd.f32 %v7065_v13, %v18085_v38  ;;  %v18091_v38 = vld [vmem:[#allocation248_spill] sm:$0xff] }
 0x71f   : > { %v9128_v24 = vpack.c.bf16 %v7299_v19, %v7298_v39  ;;  %v7344_v19 = vunpack.c.l.bf16 %v7338_v41 }
 0x720   : > { %7256 = vrot.lane.b32.xlu0 %v15995_v62, %s9306_s21  ;;  %v7067_v14 = vpop.permute.xlu1 %7066 }
 0x721   : > { %v7201_v23 = vpop.permute.xlu0 %7200  ;;  %v16000_v33 = vadd.f32 %v7067_v14, %v15697_v63  ;;  %9129 = vmatprep.subr.bf16.mxu1 %v9128_v24  ;;  %v16065_v24 = vadd.f32 %v15922_v52, %v18091_v38 }
 0x722   : > { %9131 = vmatpush3.bf16.msra.mxu1 %v9130_v51  ;;  %v7300_v46 = vadd.f32 %v7201_v23, %v18086_v29 }
 0x723   : > { %7258 = vrot.lane.b32.xlu1 %v16000_v33, %s9306_s21 }
 0x724   : > { %v7203_v56 = vpop.permute.xlu1 %7202 }
 0x725   : > { %v7301_v6 = vadd.f32 %v7203_v56, %v18087_v57  ;;  %v7069_v7 = vpop.permute.xlu0 %7068 }
 0x726   : > { %v16010_v53 = vadd.f32 %v7069_v7, %v18088_v0 }
 0x727   : > { %v9132_v25 = vpack.c.bf16 %v7301_v6, %v7300_v46 }
 0x728   : > { %7260 = vrot.lane.b32.xlu0 %v16010_v53, %s9306_s21  ;;  %v7071_v63 = vpop.permute.xlu1 %7070 }
 0x729   : > { %v16015_v10 = vadd.f32 %v7071_v63, %v15738_v15  ;;  %9133 = vmatprep.subr.bf16.mxu1 %v9132_v25 }
 0x72a   : > { %v7205_v37 = vpop.permute.xlu0 %7204  ;;  %9135 = vmatpush3.bf16.msra.mxu1 %v9134_v27 }
 0x72b   : > { %7262 = vrot.lane.b32.xlu1 %v16015_v10, %s9306_s21  ;;  %v7302_v54 = vadd.f32 %v7205_v37, %v15747_v42  ;;  %v7340_v42 = vunpack.c.l.bf16 %v15927_v18 }
 0x72d   : > { %v7207_v51 = vpop.permute.xlu1 %7206 }
 0x72e   : > { %v7303_v45 = vadd.f32 %v7207_v51, %v15764_v61  ;;  %v7073_v30 = vpop.permute.xlu0 %7072  ;;  %v18089_v61 = vpack.c.bf16 %v15900_v17, %v15897_v49  ;;  %v18090_v17 = vld [vmem:[#allocation247_spill] sm:$0xff] }
 0x72f   : > { %v16025_v28 = vadd.f32 %v7073_v30, %v15758_v44  ;;  %v7345_v44 = vunpack.c.h.bf16 %v7338_v41  ;;  %v16054_v18 = vadd.f32 %v15918_v5, %v18090_v17 }
 0x730   : > { %v9136_v15 = vpack.c.bf16 %v7303_v45, %v7302_v54 }
 0x731   : > { %7264 = vrot.lane.b32.xlu0 %v16025_v28, %s9306_s21  ;;  %v7075_v60 = vpop.permute.xlu1 %7074 }
 0x732   : > { %v16033_v34 = vadd.f32 %v7075_v60, %v15784_v35  ;;  %9137 = vmatprep.subr.bf16.mxu1 %v9136_v15  ;;  %v16047_v35 = vld [vmem:[%s16223_s4 + $0x8] sm:$0xff] }
 0x733   : > { %9139 = vmatpush3.bf16.msra.mxu1 %v18089_v61  ;;  %v7343_v49 = vunpack.c.h.bf16 %v16047_v35 }
 0x734   : > { %v7077_v27 = vpop.permute.xlu0 %7076  ;;  %7266 = vrot.lane.b32.xlu1 %v16033_v34, %s9306_s21 }
 0x735   : > { %v16042_v39 = vadd.f32 %v7077_v27, %v15791_v8 }
 0x736   : > { %7415 = vmatmul.mubr.f32.vlgmr.msra.gmra.mrb[24].mxu1 %v7340_v42 }
 0x737   : > { %7268 = vrot.lane.b32.xlu0 %v16042_v39, %s9306_s21  ;;  %7419 = vmatprep.mubr.f32.mxu1 %v7345_v44 }
 0x738   : > { %v7209_v5 = vpop.permute.xlu0 %7208 }
 0x739   : > { %v7079_v13 = vpop.permute.xlu1 %7078  ;;  %v7304_v15 = vadd.f32 %v7209_v5, %v15799_v1 }
 0x73a   : > { %v16057_v8 = vadd.f32 %v7079_v13, %v15803_v21  ;;  %7420 = vmatmul.mubr.f32.gmra.mrb[26].mxu1 %v7344_v19 }
 0x73b   : > { %7236 = vrot.lane.b32.xlu0 %v16054_v18, %s9306_s21  ;;  %7489 = vmatprep.mubr.f32.mxu1 %v7343_v49 }
 0x73c   : > { %7270 = vrot.lane.b32.xlu1 %v16057_v8, %s9306_s21  ;;  %v7213_v23 = vpop.permute.xlu0 %7212 }
 0x73d   : > { %v7211_v14 = vpop.permute.xlu1 %7210 }
 0x73e   : > { %v7305_v51 = vadd.f32 %v7211_v14, %v15813_v47  ;;  %v7306_v47 = vadd.f32 %v7213_v23, %v15810_v43 }
 0x740   : > { %7238 = vrot.lane.b32.xlu1 %v16065_v24, %s9306_s21  ;;  %v9142_v41 = vpack.c.bf16 %v7305_v51, %v7304_v15 }
 0x741   : > { %v7215_v21 = vpop.permute.xlu1 %7214 }
 0x742   : > { %v7217_v56 = vpop.permute.xlu0 %7216  ;;  %v7307_v61 = vadd.f32 %v7215_v21, %v15823_v2 }
 0x743   : > { %v7308_v2 = vadd.f32 %v7217_v56, %v15829_v59 }
 0x745   : > { %v7219_v29 = vpop.permute.xlu1 %7218 }
 0x746   : > { %v7309_v1 = vadd.f32 %v7219_v29, %v15838_v31 }
 0x74a   : > { %v7221_v46 = vpop.permute.xlu0 %7220 }
 0x74b   : > { %v7310_v31 = vadd.f32 %v7221_v46, %v15849_v48 }
 0x74d   : > { %v7223_v57 = vpop.permute.xlu1 %7222 }
 0x74e   : > { %v7311_v43 = vadd.f32 %v7223_v57, %v15856_v16 }
 0x752   : > { %v7225_v6 = vpop.permute.xlu0 %7224 }
 0x753   : > { %v7312_v16 = vadd.f32 %v7225_v6, %v15867_v50 }
 0x755   : > { %v7227_v7 = vpop.permute.xlu1 %7226 }
 0x756   : > { %v7313_v59 = vadd.f32 %v7227_v7, %v15874_v26 }
 0x75a   : > { %v7229_v0 = vpop.permute.xlu0 %7228 }
 0x75b   : > { %v7314_v26 = vadd.f32 %v7229_v0, %v15885_v58 }
 0x75d   : > { %v7231_v25 = vpop.permute.xlu1 %7230 }
 0x75e   : > { %v7315_v48 = vadd.f32 %v7231_v25, %v15892_v22 }
 0x762   : > { %v16069_v63 = vpop.permute.xlu0 %7232 }
 0x763   : > { %v7316_v22 = vadd.f32 %v16069_v63, %v15903_v20  ;;  %v7516_v20 = vld [vmem:[%s16230_s11 + $0x8] sm:$0xff] }
 0x765   : > { %v7235_v37 = vpop.permute.xlu1 %7234 }
 0x766   : > { %v7317_v50 = vadd.f32 %v7235_v37, %v15910_v36 }
 0x768   : > { %v9166_v25 = vpack.c.bf16 %v7317_v50, %v7316_v22 }
 0x772   : > { %v7241_v52 = vpop.permute.xlu0 %7240 }
 0x773   : > { %v7320_v45 = vadd.f32 %v7241_v52, %v15937_v55  ;;  %v9146_v55 = vpack.c.bf16 %v7307_v61, %v7306_v47  ;;  %v7517_v61 = vld [vmem:[%s16230_s11 + $0x10] sm:$0xff] }
 0x774   : > { %v7509_v47 = vld [vmem:[#allocation2] sm:$0xff] }
 0x775   : > { %v7243_v54 = vpop.permute.xlu1 %7242 }
 0x776   : > { %v7321_v30 = vadd.f32 %v7243_v54, %v15942_v4 }
 0x778   : > { %v9140_v60 = vpack.c.bf16 %v7321_v30, %v7320_v45 }
 0x77a   : > { %9141 = vmatprep.subr.bf16.mxu1 %v9140_v60  ;;  %v7245_v42 = vpop.permute.xlu0 %7244 }
 0x77b   : > { %9143 = vmatpush3.bf16.msra.mxu1 %v9142_v41  ;;  %v7322_v27 = vadd.f32 %v7245_v42, %v15953_v11  ;;  %v9150_v11 = vpack.c.bf16 %v7309_v1, %v7308_v2  ;;  %v7613_v2 = vld [vmem:[%s16232_s13] sm:$0xff] }
 0x77d   : > { %v7247_v44 = vpop.permute.xlu1 %7246 }
 0x77e   : > { %v7323_v19 = vadd.f32 %v7247_v44, %v15958_v40  ;;  %v7518_v44 = vld [vmem:[%s16230_s11 + $0x18] sm:$0xff] }
 0x780   : > { %v9144_v49 = vpack.c.bf16 %v7323_v19, %v7322_v27  ;;  %v7342_v27 = vunpack.c.l.bf16 %v16047_v35 }
 0x782   : > { %9145 = vmatprep.subr.bf16.mxu1 %v9144_v49  ;;  %v7249_v4 = vpop.permute.xlu0 %7248  ;;  %v7510_v49 = vld [vmem:[#allocation2 + $0x8] sm:$0xf] }
 0x783   : > { %9147 = vmatpush3.bf16.msra.mxu1 %v9146_v55  ;;  %v7324_v13 = vadd.f32 %v7249_v4, %v15965_v9  ;;  %v9154_v9 = vpack.c.bf16 %v7311_v43, %v7310_v31  ;;  %v7616_v43 = vld [vmem:[%s16232_s13 + $0x18] sm:$0xff] }
 0x785   : > { %v7251_v17 = vpop.permute.xlu1 %7250 }
 0x786   : > { %v7325_v38 = vadd.f32 %v7251_v17, %v15970_v3 }
 0x788   : > { %v9148_v5 = vpack.c.bf16 %v7325_v38, %v7324_v13  ;;  %v18092_v38 = vmov 0.0  }
 0x789   : > { %705 = vst.msk [vmem:[#allocation4 + $0x8] sm:$0xf] %vm704_vm10, %v18092_v38 }
 0x78a   : > { %9149 = vmatprep.subr.bf16.mxu1 %v9148_v5  ;;  %v7253_v40 = vpop.permute.xlu0 %7252  ;;  %v7614_v5 = vld [vmem:[%s16232_s13 + $0x8] sm:$0xff] }
 0x78b   : > { %9151 = vmatpush3.bf16.msra.mxu1 %v9150_v11  ;;  %v7326_v23 = vadd.f32 %v7253_v40, %v15980_v12  ;;  %v9158_v12 = vpack.c.bf16 %v7313_v59, %v7312_v16  ;;  %v9180_v11 = vpack.c.bf16 %v7614_v5, %v7613_v2  ;;  %v7615_v40 = vld [vmem:[%s16232_s13 + $0x10] sm:$0xff] }
 0x78c   : > { %v7348_v59 = vld [vmem:[#allocation4] sm:$0xff] }
 0x78d   : > { %v7255_v14 = vpop.permute.xlu1 %7254 }
 0x78e   : > { %v7327_v21 = vadd.f32 %v7255_v14, %v15985_v32  ;;  %v9184_v14 = vpack.c.bf16 %v7616_v43, %v7615_v40 }
 0x790   : > { %v9152_v29 = vpack.c.bf16 %v7327_v21, %v7326_v23  ;;  %v7705_v23 = vld [vmem:[%s16233_s14] sm:$0xff]  ;;  %v7706_v21 = vld [vmem:[%s16233_s14 + $0x8] sm:$0xff] }
 0x791   : > { %v9188_v31 = vpack.c.bf16 %v7706_v21, %v7705_v23 }
 0x792   : > { %9153 = vmatprep.subr.bf16.mxu1 %v9152_v29  ;;  %v7257_v3 = vpop.permute.xlu0 %7256 }
 0x793   : > { %9155 = vmatpush3.bf16.msra.mxu1 %v9154_v9  ;;  %v7328_v52 = vadd.f32 %v7257_v3, %v15995_v62  ;;  %v9162_v62 = vpack.c.bf16 %v7315_v48, %v7314_v26 }
 0x795   : > { %v7259_v56 = vpop.permute.xlu1 %7258 }
 0x796   : > { %v7329_v51 = vadd.f32 %v7259_v56, %v16000_v33 }
 0x798   : > { %v9156_v57 = vpack.c.bf16 %v7329_v51, %v7328_v52 }
 0x79a   : > { %9157 = vmatprep.subr.bf16.mxu1 %v9156_v57  ;;  %v7261_v32 = vpop.permute.xlu0 %7260 }
 0x79b   : > { %9159 = vmatpush3.bf16.msra.mxu1 %v9158_v12  ;;  %v7330_v54 = vadd.f32 %v7261_v32, %v16010_v53  ;;  %v7349_v12 = vld [vmem:[#allocation4 + $0x8] sm:$0xf] }
 0x79d   : > { %v7263_v46 = vpop.permute.xlu1 %7262 }
 0x79e   : > { %v7331_v45 = vadd.f32 %v7263_v46, %v16015_v10 }
 0x7a0   : > { %v9160_v7 = vpack.c.bf16 %v7331_v45, %v7330_v54  ;;  %v8565_v45 = vld [vmem:[%s16231_s12] ss:$0 sm:$0xff] }
 0x7a2   : > { %9161 = vmatprep.subr.bf16.mxu1 %v9160_v7 }
 0x7a3   : > { %9163 = vmatpush3.bf16.msra.mxu1 %v9162_v62  ;;  %v7265_v33 = vpop.permute.xlu0 %7264 }
 0x7a4   : > { %v7332_v30 = vadd.f32 %v7265_v33, %v16025_v28  ;;  %v7515_v28 = vld [vmem:[%s16230_s11] sm:$0xff] }
 0x7a6   : > { %v7267_v6 = vpop.permute.xlu1 %7266 }
 0x7a7   : > { %v7333_v15 = vadd.f32 %v7267_v6, %v16033_v34 }
 0x7a9   : > { %v9164_v53 = vpack.c.bf16 %v7333_v15, %v7332_v30  ;;  %v7269_v10 = vpop.permute.xlu0 %7268  ;;  %v7707_v30 = vld [vmem:[%s16233_s14 + $0x10] sm:$0xff]  ;;  %v7708_v15 = vld [vmem:[%s16233_s14 + $0x18] sm:$0xff] }
 0x7aa   : > { %v7334_v0 = vadd.f32 %v7269_v10, %v16042_v39  ;;  %v7339_v39 = vld [vmem:[%s16223_s4 + $0x18] sm:$0x33]  ;;  %v7511_v10 = vld [vmem:[#allocation3] sm:$0xff] }
 0x7ab   : > { %9165 = vmatprep.subr.bf16.mxu1 %v9164_v53  ;;  %v7346_v19 = vunpack.c.l.bf16 %v7339_v39 }
 0x7ac   : > { %9167 = vmatpush3.bf16.msra.mxu1 %v9166_v25  ;;  %v9192_v25 = vpack.c.bf16 %v7708_v15, %v7707_v30 }
 0x7ad   : > { %v7237_v41 = vpop.permute.xlu0 %7236 }
 0x7ae   : > { %v7271_v58 = vpop.permute.xlu1 %7270  ;;  %v7318_v63 = vadd.f32 %v7237_v41, %v16054_v18  ;;  %v7347_v18 = vunpack.c.h.bf16 %v7339_v39  ;;  %v8569_v41 = vld [vmem:[%s16235_s16] ss:$0 sm:$0xff] }
 0x7af   : > { %v7335_v60 = vadd.f32 %v7271_v58, %v16057_v8  ;;  %v9172_v8 = vpack.c.bf16 %v7516_v20, %v7515_v28  ;;  %v7512_v58 = vld [vmem:[#allocation3 + $0x8] sm:$0xf] }
 0x7b1   : > { %v9168_v36 = vpack.c.bf16 %v7335_v60, %v7334_v0 }
 0x7b2   : > { %v7239_v34 = vpop.permute.xlu1 %7238 }
 0x7b3   : > { %v7319_v37 = vadd.f32 %v7239_v34, %v16065_v24  ;;  %9169 = vmatprep.subr.bf16.mxu1 %v9168_v36  ;;  %v9176_v24 = vpack.c.bf16 %v7518_v44, %v7517_v61 }
 0x7b5   : > { %v9170_v42 = vpack.c.bf16 %v7319_v37, %v7318_v63  ;;  %v8566_v63 = vld [vmem:[%s16234_s15] ss:$0 sm:$0xff] }
 0x7b7   : > { %9171 = vmatpush3.bf16.msra.mxu1 %v9170_v42 }
 0x7b8   : > { %9173 = vmatprep.subr.bf16.mxu1 %v9172_v8 }
 0x7ba   : > { %7490 = vmatmul.mubr.f32.vlgmr.msra.gmra.mrb[28].mxu1 %v7342_v27 }
 0x7bb   : > { %7494 = vmatprep.mubr.f32.mxu1 %v7347_v18  ;;  %9175 = vmatpush3.bf16.msra.mxu1 %v9172_v8 }
 0x7bc   : > { %9177 = vmatprep.subr.bf16.mxu1 %v9176_v24 }
 0x7be   : > { %7495 = vmatmul.mubr.f32.gmra.mrb[30].mxu1 %v7346_v19 }
 0x7bf   : > { %9179 = vmatpush3.bf16.msra.mxu1 %v9176_v24  ;;  %9011 = vmatprep.mubr.msk.f32.mxu1 %vm702_vm3, %v7509_v47 }
 0x7c0   : > { %9181 = vmatprep.subr.bf16.mxu1 %v9180_v11 }
 0x7c2   : > { %9012 = vmatmul.mubr.msk.f32.vlgmr.msra.gmra.mrb[32].mxu1 %vm702_vm3, %v7510_v49 }
 0x7c3   : > { %9183 = vmatpush3.bf16.msra.mxu1 %v9180_v11 }
 0x7c4   : > { %9185 = vmatprep.subr.bf16.mxu1 %v9184_v14 }
 0x7c7   : > { %9187 = vmatpush3.bf16.msra.mxu1 %v9184_v14 }
 0x7c8   : > { %9189 = vmatprep.subr.bf16.mxu1 %v9188_v31 }
 0x809   : > { %v8838_v55 = vpop.f32.mrb[24].mxu1 }
 0x80a   : > { %v8839_v4 = vpop.f32.mrb[25].mxu1 }
 0x80b   : > { %v8840_v35 = vadd.f32 %v8839_v4, %v8838_v55 }
 0x80d   : > { %v8841_v1 = vpop.f32.mrb[26].mxu1 }
 0x80e   : > { %v8842_v17 = vpop.f32.mrb[27].mxu1 }
 0x80f   : > { %v8843_v13 = vadd.f32 %v8842_v17, %v8841_v1 }
 0x88d   : > { %v8876_v29 = vpop.f32.mrb[28].mxu1 }
 0x88e   : > { %v8877_v9 = vpop.f32.mrb[29].mxu1 }
 0x88f   : > { %v8878_v3 = vadd.f32 %v8877_v9, %v8876_v29 }
 0x891   : > { %v7492_v56 = vadd.f32 %v8878_v3, %v8840_v35  ;;  %v8879_v52 = vpop.f32.mrb[30].mxu1 }
 0x892   : > { %v8880_v51 = vpop.f32.mrb[31].mxu1 }
 0x893   : > { %v7500_v16 = vadd.f32 %v7492_v56, %v7348_v59  ;;  %v8881_v57 = vadd.f32 %v8880_v51, %v8879_v52 }
 0x895   : > { %7503 = vst.msk [vmem:[#allocation4] sm:$0xff] %vm702_vm3, %v7500_v16  ;;  %v7497_v32 = vadd.f32 %v8881_v57, %v8843_v13  ;;  %v9013_v48 = vpop.f32.mrb[32].mxu1 }
 0x896   : > { %v7591_v46 = vpop.f32.mrb[33].mxu1 }
 0x897   : > { %v7501_v54 = vadd.f32 %v7497_v32, %v7349_v12 }
 0x899   : > { %7505 = vst.msk [vmem:[#allocation4 + $0x8] sm:$0xf] %vm704_vm10, %v7501_v54 }
 0x89c   : > { %v7513_v26 = vld [vmem:[#allocation4] sm:$0xff] }
 0x89d   : > { %v7600_v7 = vadd.f32 %v7591_v46, %v7513_v26 }
 0x89f   : > { %v7609_v62 = vadd.f32 %v8565_v45, %v7600_v7 }
 0x8a0   : > { %v7514_v33 = vld [vmem:[#allocation4 + $0x8] sm:$0xf] }
 0x8a1   : > { %v7601_v50 = vadd.f32 %v9013_v48, %v7514_v33  ;;  %v7611_v6 = vmax.f32 %v7609_v62, 0.0 }
 0x8a3   : > { %v7610_v22 = vadd.f32 %v8565_v45, %v7601_v50  ;;  %9022 = vmatprep.mubr.msk.f32.mxu1 %vm702_vm3, %v7611_v6 }
 0x8a5   : > { %v7612_v53 = vmax.f32 %v7610_v22, 0.0 }
 0x8a7   : > { %9023 = vmatmul.mubr.msk.f32.vlgmr.msra.gmra.mrb[34].mxu1 %vm702_vm3, %v7612_v53 }
 0x8a8   : > { %9191 = vmatpush3.bf16.msra.mxu1 %v9188_v31  ;;  %9033 = vmatprep.mubr.msk.f32.mxu1 %vm702_vm3, %v7511_v10 }
 0x8a9   : > { %9193 = vmatprep.subr.bf16.mxu1 %v9192_v25 }
 0x8ac   : > { %9195 = vmatpush3.bf16.msra.mxu1 %v9192_v25 }
 0x8af   : > { %9034 = vmatmul.mubr.msk.f32.vlgmr.msra.gmra.mrb[36].mxu1 %vm702_vm3, %v7512_v58 }
 0x97a   : > { %v9024_v0 = vpop.f32.mrb[34].mxu1 }
 0x97b   : > { %v7696_v60 = vpop.f32.mrb[35].mxu1  ;;  %v7702_v37 = vadd.f32 %v9024_v0, %v8566_v63 }
 0x97c   : > { %v7697_v39 = vadd.f32 %v8566_v63, %v7696_v60 }
 0x982   : > { %v9035_v36 = vpop.f32.mrb[36].mxu1 }
 0x983   : > { %v7794_v28 = vadd.f32 %v9035_v36, %v8569_v41  ;;  %v7788_v20 = vpop.f32.mrb[37].mxu1 }
 0x984   : > { %v7789_v34 = vadd.f32 %v8569_v41, %v7788_v20 }
 0x985   : > { %7815 = vrot.lane.b32.xlu1 %v7794_v28, %s9305_s20  ;;  %v7798_v8 = vadd.f32 %v7794_v28, %v7702_v37 }
 0x986   : > { %7813 = vrot.lane.b32.xlu0 %v7789_v34, %s9305_s20  ;;  %v7797_v42 = vadd.f32 %v7789_v34, %v7697_v39 }
 0x987   : > { %v8573_v61 = vmul.f32 -1.442695, %v7798_v8 }
 0x988   : > { %v8572_v44 = vmul.f32 -1.442695, %v7797_v42 }
 0x989   : > { %9236 = vpow2.f32 %v8573_v61 }
 0x98a   : > { %9238 = vpow2.f32 %v8572_v44 }
 0x993   : > { %v9237_v27 = vpop.eup %9236 }
 0x994   : > { %v9239_v18 = vpop.eup %9238  ;;  %v7806_v24 = vadd.f32 1.0, %v9237_v27 }
 0x995   : > { %v7805_v19 = vadd.f32 1.0, %v9239_v18 }
 0x996   : > { %9240 = vrcp.f32 %v7806_v24 }
 0x997   : > { %9242 = vrcp.f32 %v7805_v19 }
 0x9a0   : > { %v9241_v47 = vpop.eup %9240 }
 0x9a1   : > { %v9243_v55 = vpop.eup %9242  ;;  %v7834_v14 = vsub.f32 1.0, %v9241_v47 }
 0x9a2   : > { %v7833_v23 = vsub.f32 1.0, %v9243_v55 }
 0x9f7   : > { %v7816_v49 = vpop.permute.xlu1 %7815 }
 0x9f8   : > { %v7820_v4 = vmul.f32 %v9241_v47, %v7816_v49  ;;  %v7814_v35 = vpop.permute.xlu0 %7813 }
 0x9f9   : > { %v7819_v1 = vmul.f32 %v9243_v55, %v7814_v35 }
 0x9fa   : > { %7825 = vrot.lane.b32.xlu1 %v7820_v4, %s9305_s20 }
 0x9fb   : > { %7823 = vrot.lane.b32.xlu0 %v7819_v1, %s9305_s20  ;;  %s9308_s20 = smov [#allocation6]  }
 0x9fc   : > { %s7875_s24 = sshll.u32 %s9308_s20, 4  ;;  %s16175_s24 = int_to_ptr.vmem [resolvable:$true] %s7875_s24 }
 0x9fd   : > { %s9249_s0 = scalar_lea.vmem %s16175_s24, 256  ;;  %p9256_p9 = scmp.lt.s32.totalorder %s16175_s24, %s16175_s24 }
 0x9fe   : > { %p9250_p6 = scmp.ne.s32.totalorder %s16175_s24, %s9249_s0  ;;  %p9257_p10 = scmp.lt.s32.totalorder %s9249_s0, %s9249_s0 }
 0xa00   : > { %p9251_p7 = pnand %p9250_p6, %p16171_p5  ;;  %p9258_p11 = por %p9257_p10, %p9256_p9 }
 0xa02   : > { %p9252_p8 = pneg %p9251_p7 }
 0xa04   : > { %p9259_p12 = pnand %p9258_p11, %p9252_p8 }
 0xa6c   : > { %v7826_v17 = vpop.permute.xlu1 %7825 }
 0xa6d   : > { %v7830_v13 = vadd.f32 %v7826_v17, %v7702_v37  ;;  %v7824_v38 = vpop.permute.xlu0 %7823 }
 0xa6e   : > { %v7829_v2 = vadd.f32 %v7824_v38, %v7697_v39 }
 0xa6f   : > { %9244 = vtanh.f32 %v7830_v13 }
 0xa70   : > { %9246 = vtanh.f32 %v7829_v2 }
 0xa79   : > { %v9245_v5 = vpop.eup %9244 }
 0xa7a   : > { %v9247_v11 = vpop.eup %9246  ;;  %7839 = vrot.lane.b32.xlu1 %v9245_v5, %s9307_s23 }
 0xa7b   : > { %7837 = vrot.lane.b32.xlu0 %v9247_v11, %s9307_s23 }
 0xa7e   : > { %7847 = vrot.lane.b32.xlu1 %v7512_v58, %s9306_s21 }
 0xa7f   : > { %7845 = vrot.lane.b32.xlu0 %v7511_v10, %s9306_s21 }
 0xaec   : > { %v7840_v40 = vpop.permute.xlu1 %7839 }
 0xaed   : > { %v7838_v43 = vpop.permute.xlu0 %7837  ;;  %v7844_v31 = vmul.f32 %v7840_v40, %v7834_v14 }
 0xaee   : > { %v7843_v3 = vmul.f32 %v7838_v43, %v7833_v23 }
 0xaf0   : > { %v7848_v21 = vpop.permute.xlu1 %7847 }
 0xaf1   : > { %v7852_v29 = vmul.f32 %v9241_v47, %v7848_v21  ;;  %v7846_v9 = vpop.permute.xlu0 %7845 }
 0xaf2   : > { %v7851_v59 = vmul.f32 %v9243_v55, %v7846_v9 }
 0xaf3   : > { %v7854_v56 = vadd.f32 %v7852_v29, %v7844_v31 }
 0xaf4   : > { %v7853_v52 = vadd.f32 %v7851_v59, %v7843_v3 }
 0xaf5   : > { %7859 = vrot.lane.b32.xlu1 %v7854_v56, %s9307_s23 }
 0xaf6   : > { %7857 = vrot.lane.b32.xlu0 %v7853_v52, %s9307_s23 }
 0xb67   : > { %v7860_v51 = vpop.permute.xlu1 %7859 }
 0xb68   : > { %7864 = vst.msk [vmem:[#allocation3 + $0x8] sm:$0xf] %vm704_vm10, %v7860_v51  ;;  %7866 = vst.msk [vmem:[#allocation2 + $0x8] sm:$0xf] %vm704_vm10, %v7860_v51  ;;  %v7858_v16 = vpop.permute.xlu0 %7857 }
 0xb69   : > { %7868 = vst.msk [vmem:[#allocation6 + $0x8] sm:$0xf] %vm704_vm10, %v7860_v51 }
 0xb6a   : > { %7863 = vst.msk [vmem:[#allocation3] sm:$0xff] %vm702_vm3, %v7858_v16  ;;  %7865 = vst.msk [vmem:[#allocation2] sm:$0xff] %vm702_vm3, %v7858_v16 }
 0xb6b   : > { %7867 = vst.msk [vmem:[#allocation6] sm:$0xff] %vm702_vm3, %v7858_v16 }
 0xb6c   : > { %9262 = shalt.err (!%p9259_p12)
}
 0xb6d   : > { %s9263_s19 = scalar_lea.hbm %s16236_s17, 256 }
 0xb6e   : > { %p9264_p13 = scmp.ne.s32.totalorder %s16236_s17, %s9263_s19  ;;  %p9269_p2 = scmp.lt.u32.totalorder %s9263_s19, %s16236_s17 }
 0xb70   : > { %p9265_p0 = pnand %p9264_p13, %p16171_p5 }
 0xb72   : > { %p9266_p1 = pneg %p9265_p0 }
 0xb74   : > { %p9271_p3 = pnand %p9269_p2, %p9266_p1 }
 0xb76   : > { %9274 = shalt.err (!%p9271_p3)
}
 0xb77   : > { %s9309_s29 = smov 128   ;;  %s9310_s0 = smov 8  }
 0xb78   : > { %9199 = dma.vmem_to_hbm [thread:$0]  (%p16171_p5), %s16175_s24, 256, %s16236_s17, [#allocation7], %s9309_s29, %s9309_s29, %s9310_s0  }
 0xb79   : > { %9288 = dma.done.wait (%p16171_p5), [#allocation7], 256  }
 0xb7a   : > { %9290 = vsyncadd (%p16171_p5), [#allocation7], 4294967040 }
 0xb7b PF: > { %s28_s26 = sadd.s32 1, %s9301_s26   ;;  %s18095_s24 = smov %s9297_s25 }
 0xb7c   : > { %p25_p4 = scmp.ge.s32.totalorder %s28_s26, 5   ;;  %s18096_s25 = smov %s18098_s28 }
 0xb7e   :  { %27 = sbr.rel (!%p25_p4) target bundleno = 5 (0x5), region = 133 }
 0xb85   :  { %7891 = vsyncpa [#allocation7], 1 }
 0xb86   :  { %7893 = vsyncpa [#allocation7 + $0x1], 1 }

</bundles_post_ra>
